<compile_context>
chip_gen: v7x
topology: tpu7x:2x2x1
jax: 0.10.0
libtpu: 0.0.40
codegen_flags: <defaults>
</compile_context>

<pallas_src>
import jax
import jax.numpy as jnp
from jax import lax
from jax.experimental import pallas as pl
from jax.experimental.pallas import tpu as pltpu

LEAKY_SLOPE = 0.2
BN_EPS = 1e-5


def _make_block_kernel(layer_dims):
    """Builds the fused kernel for a list of (N, H, W, Cin, Cout) layer dims."""
    n_layers = len(layer_dims)

    def kernel(*refs):
        x_ref = refs[0]
        p_refs = refs[1:1 + 3 * n_layers]      # (weight, gamma, beta) per layer
        o_ref = refs[1 + 3 * n_layers]
        s_refs = refs[2 + 3 * n_layers:]       # (pad_buf, hpool_buf) per layer

        fm = x_ref[...]                                      # (N, H, W, Cin) f32
        for i, (N, H, W, Cin, Cout) in enumerate(layer_dims):
            w_ref, g_ref, b_ref = p_refs[3 * i:3 * i + 3]
            pad_ref, hp_ref = s_refs[2 * i:2 * i + 2]

            # ---- ReflectionPad2d(1), built directly in VMEM.
            pad_ref[:, 1:H + 1, 1:W + 1, :] = fm
            pad_ref[:, 0:1, 1:W + 1, :] = fm[:, 1:2, :, :]
            pad_ref[:, H + 1:H + 2, 1:W + 1, :] = fm[:, H - 2:H - 1, :, :]
            pad_ref[:, :, 0:1, :] = pad_ref[:, :, 2:3, :]
            pad_ref[:, :, W + 1:W + 2, :] = pad_ref[:, :, W - 1:W, :]

            # ---- 3x3 conv: 9 shifted full-batch (N*H*W, Cin) @ (Cin, Cout)
            # MXU matmuls accumulated in f32.  No bias: it is exactly cancelled
            # by the BatchNorm mean subtraction below.
            acc = None
            for ky in range(3):
                for kx in range(3):
                    patch = pad_ref[:, ky:ky + H, kx:kx + W, :]   # (N,H,W,Cin)
                    part = jnp.dot(patch.reshape(N * H * W, Cin),
                                   w_ref[ky, kx, :, :],
                                   preferred_element_type=jnp.float32)
                    acc = part if acc is None else acc + part
            y = acc                                               # (N*H*W, Cout)

            # ---- BatchNorm2d, training-mode batch stats, single pass over y.
            inv_m = 1.0 / float(N * H * W)
            s1 = jnp.sum(y, axis=0, keepdims=True)
            s2 = jnp.sum(y * y, axis=0, keepdims=True)
            mean = s1 * inv_m
            var = s2 * inv_m - mean * mean
            scale = g_ref[...] * lax.rsqrt(var + BN_EPS)
            shift = b_ref[...] - mean * scale
            y = y * scale + shift

            # ---- LeakyReLU(0.2)
            y = jnp.where(y > 0, y, LEAKY_SLOPE * y)

            # ---- MaxPool2d(2, 2).  H direction: pure leading-dim regroup in
            # registers.  W direction: even/odd sublane-strided loads from a
            # small VMEM scratch (stays on-chip).
            y = y.reshape(N, H // 2, 2, W, Cout)
            hp_ref[...] = jnp.maximum(y[:, :, 0], y[:, :, 1])     # (N,H/2,W,Cout)
            even = hp_ref[:, :, pl.ds(0, W // 2, 2), :]
            odd = hp_ref[:, :, pl.ds(1, W // 2, 2), :]
            fm = jnp.maximum(even, odd)                           # (N,H/2,W/2,Cout)

        o_ref[...] = fm

    return kernel


def rescale_block_forward(x_nchw, layers):
    """RescaleBlock.forward with defaults (scale=0.5, no skip, no all_scales),
    fused into a single Pallas kernel (all intermediates stay in VMEM)."""
    # TODO(synk): scale>1 nearest-upsample branch, `skip`/pyramid residual add
    # and return_all_scales bookkeeping are not exercised by the defaults.
    # TODO(synk): for large feature maps (esp. v7x 64 MiB VMEM / 2 TCs) grid
    # over H row-strips with a two-phase BatchNorm instead of whole-map-in-VMEM.
    fm0 = jnp.transpose(x_nchw, (0, 2, 3, 1)).astype(jnp.float32)  # NCHW->NHWC
    N, H, W, C = fm0.shape

    layer_dims, params, scratch = [], [], []
    h, w, cin = H, W, C
    for (w_hwio, _bias, gamma, beta) in layers:   # bias dropped (BN cancels it)
        cout = int(w_hwio.shape[-1])
        assert int(w_hwio.shape[2]) == cin, (w_hwio.shape, cin)
        assert h % 2 == 0 and w % 8 == 0, "kernel assumes even H and W % 8 == 0"
        layer_dims.append((N, h, w, cin, cout))
        params += [w_hwio.astype(jnp.float32),                    # (3,3,Cin,Cout)
                   gamma.reshape(1, cout).astype(jnp.float32),
                   beta.reshape(1, cout).astype(jnp.float32)]
        scratch += [pltpu.VMEM((N, h + 2, w + 2, cin), jnp.float32),  # reflect pad
                    pltpu.VMEM((N, h // 2, w, cout), jnp.float32)]    # H-pooled
        h, w, cin = h // 2, w // 2, cout

    vmem = pl.BlockSpec(memory_space=pltpu.MemorySpace.VMEM)
    out = pl.pallas_call(
        _make_block_kernel(layer_dims),
        out_shape=jax.ShapeDtypeStruct((N, h, w, cin), jnp.float32),
        in_specs=[vmem] * (1 + len(params)),
        out_specs=vmem,
        scratch_shapes=scratch,
    )(fm0, *params)
    return jnp.transpose(out, (0, 3, 1, 2)), None                 # back to NCHW


def make_params(key, n_layers=2, base_channels=8):
    """Deterministic synthetic parameters. Spectral norm is applied at setup
    time via power iteration (parameter-setup glue, matches weight / sigma)."""
    layers = []
    for i in range(n_layers):
        cin = base_channels * 2 ** i          # in_channel_power = 0 (scale < 1)
        cout = base_channels * 2 ** (i + 1)   # out_channel_power = 1
        key, kw, kb, ku = jax.random.split(key, 4)
        w = 0.2 * jax.random.normal(kw, (cout, cin, 3, 3), jnp.float32)  # OIHW
        b = 0.05 * jax.random.normal(kb, (cout,), jnp.float32)
        wmat = w.reshape(cout, -1)
        u = jax.random.normal(ku, (cout,), jnp.float32)
        u = u / (jnp.linalg.norm(u) + 1e-12)
        for _ in range(5):
            v = wmat.T @ u
            v = v / (jnp.linalg.norm(v) + 1e-12)
            u = wmat @ v
            u = u / (jnp.linalg.norm(u) + 1e-12)
        sigma = u @ (wmat @ v)
        w_sn = w / sigma
        gamma = jnp.ones((cout,), jnp.float32)
        beta = jnp.zeros((cout,), jnp.float32)
        w_hwio = jnp.transpose(w_sn, (2, 3, 1, 0))               # -> (3,3,Cin,Cout)
        layers.append((w_hwio, b, gamma, beta))
    return layers


def reference_forward(x_nchw, layers):
    """Pure-JAX reference mirroring the PyTorch forward (NCHW), WITH bias."""
    fm = x_nchw
    for (w_hwio, b, g, bt) in layers:
        w_oihw = jnp.transpose(w_hwio, (3, 2, 0, 1))
        xp = jnp.pad(fm, ((0, 0), (0, 0), (1, 1), (1, 1)), mode="reflect")
        y = lax.conv_general_dilated(xp, w_oihw, (1, 1), "VALID",
                                     dimension_numbers=("NCHW", "OIHW", "NCHW"))
        y = y + b[None, :, None, None]
        mean = jnp.mean(y, axis=(0, 2, 3), keepdims=True)
        var = jnp.mean(jnp.square(y - mean), axis=(0, 2, 3), keepdims=True)
        y = (y - mean) / jnp.sqrt(var + BN_EPS)
        y = y * g[None, :, None, None] + bt[None, :, None, None]
        y = jnp.where(y > 0, y, LEAKY_SLOPE * y)
        n, c, h, w = y.shape
        fm = y.reshape(n, c, h // 2, 2, w // 2, 2).max(axis=(3, 5))
    return fm


if __name__ == "__main__":
    key = jax.random.PRNGKey(0)
    kx, kp = jax.random.split(key)

    N, base_channels, H, W = 2, 8, 16, 16
    n_layers = 2

    # RescaleBlock input: NCHW with base_channels input channels.
    x = jax.random.normal(kx, (N, base_channels, H, W), jnp.float32)
    layers = make_params(kp, n_layers=n_layers, base_channels=base_channels)

    out, _ = rescale_block_forward(x, layers)
    out = jax.block_until_ready(out)

    expected_shape = (N, base_channels * 2 ** n_layers,
                      H // 2 ** n_layers, W // 2 ** n_layers)
    assert out.shape == expected_shape, (out.shape, expected_shape)

    ref = reference_forward(x, layers)
    err = float(jnp.max(jnp.abs(out - ref)))
    assert err < 5e-3, f"mismatch vs pure-JAX reference: max abs err = {err}"

    print("KERNEL_OK")
</pallas_src>

<mosaic_0001>
module attributes {stable_mosaic.version = 11 : i64} {
  func.func @kernel(%arg0: memref<2x16x16x8xf32, #tpu.memory_space<vmem>>, %arg1: memref<3x3x8x16xf32, #tpu.memory_space<vmem>>, %arg2: memref<1x16xf32, #tpu.memory_space<vmem>>, %arg3: memref<1x16xf32, #tpu.memory_space<vmem>>, %arg4: memref<3x3x16x32xf32, #tpu.memory_space<vmem>>, %arg5: memref<1x32xf32, #tpu.memory_space<vmem>>, %arg6: memref<1x32xf32, #tpu.memory_space<vmem>>, %arg7: memref<2x4x4x32xf32, #tpu.memory_space<vmem>>, %arg8: memref<2x18x18x8xf32, #tpu.memory_space<vmem>>, %arg9: memref<2x8x16x16xf32, #tpu.memory_space<vmem>>, %arg10: memref<2x10x10x16xf32, #tpu.memory_space<vmem>>, %arg11: memref<2x4x8x32xf32, #tpu.memory_space<vmem>>) attributes {dimension_semantics = [], scalar_prefetch = 0 : i64, scratch_operands = 4 : i64, tpu.core_type = #tpu.core_type<tc>} {
    %c0 = arith.constant 0 : index
    %c0_0 = arith.constant 0 : index
    %c0_1 = arith.constant 0 : index
    %c0_2 = arith.constant 0 : index
    %0 = vector.load %arg0[%c0, %c0_0, %c0_1, %c0_2] : memref<2x16x16x8xf32, #tpu.memory_space<vmem>>, vector<2x16x16x8xf32>
    %c0_3 = arith.constant 0 : index
    %c1 = arith.constant 1 : index
    %c1_4 = arith.constant 1 : index
    %c0_5 = arith.constant 0 : index
    %1 = vector.load %arg8[%c0_3, %c1, %c1_4, %c0_5] : memref<2x18x18x8xf32, #tpu.memory_space<vmem>>, vector<2x16x16x8xf32>
    tpu.vector_store %arg8[%c0_3, %c1, %c1_4, %c0_5], %0 {strides = array<i32>} : memref<2x18x18x8xf32, #tpu.memory_space<vmem>>, vector<2x16x16x8xf32>,
    %2 = vector.extract_strided_slice %0 {offsets = [0, 1, 0, 0], sizes = [2, 1, 16, 8], strides = [1, 1, 1, 1]} : vector<2x16x16x8xf32> to vector<2x1x16x8xf32>
    %c0_6 = arith.constant 0 : index
    %c0_7 = arith.constant 0 : index
    %c1_8 = arith.constant 1 : index
    %c0_9 = arith.constant 0 : index
    %3 = vector.load %arg8[%c0_6, %c0_7, %c1_8, %c0_9] : memref<2x18x18x8xf32, #tpu.memory_space<vmem>>, vector<2x1x16x8xf32>
    tpu.vector_store %arg8[%c0_6, %c0_7, %c1_8, %c0_9], %2 {strides = array<i32>} : memref<2x18x18x8xf32, #tpu.memory_space<vmem>>, vector<2x1x16x8xf32>,
    %4 = vector.extract_strided_slice %0 {offsets = [0, 14, 0, 0], sizes = [2, 1, 16, 8], strides = [1, 1, 1, 1]} : vector<2x16x16x8xf32> to vector<2x1x16x8xf32>
    %c0_10 = arith.constant 0 : index
    %c17 = arith.constant 17 : index
    %c1_11 = arith.constant 1 : index
    %c0_12 = arith.constant 0 : index
    %5 = vector.load %arg8[%c0_10, %c17, %c1_11, %c0_12] : memref<2x18x18x8xf32, #tpu.memory_space<vmem>>, vector<2x1x16x8xf32>
    tpu.vector_store %arg8[%c0_10, %c17, %c1_11, %c0_12], %4 {strides = array<i32>} : memref<2x18x18x8xf32, #tpu.memory_space<vmem>>, vector<2x1x16x8xf32>,
    %c0_13 = arith.constant 0 : index
    %c0_14 = arith.constant 0 : index
    %c2 = arith.constant 2 : index
    %c0_15 = arith.constant 0 : index
    %6 = vector.load %arg8[%c0_13, %c0_14, %c2, %c0_15] : memref<2x18x18x8xf32, #tpu.memory_space<vmem>>, vector<2x18x1x8xf32>
    %c0_16 = arith.constant 0 : index
    %c0_17 = arith.constant 0 : index
    %c0_18 = arith.constant 0 : index
    %c0_19 = arith.constant 0 : index
    %7 = vector.load %arg8[%c0_16, %c0_17, %c0_18, %c0_19] : memref<2x18x18x8xf32, #tpu.memory_space<vmem>>, vector<2x18x1x8xf32>
    tpu.vector_store %arg8[%c0_16, %c0_17, %c0_18, %c0_19], %6 {strides = array<i32>} : memref<2x18x18x8xf32, #tpu.memory_space<vmem>>, vector<2x18x1x8xf32>,
    %c0_20 = arith.constant 0 : index
    %c0_21 = arith.constant 0 : index
    %c15 = arith.constant 15 : index
    %c0_22 = arith.constant 0 : index
    %8 = vector.load %arg8[%c0_20, %c0_21, %c15, %c0_22] : memref<2x18x18x8xf32, #tpu.memory_space<vmem>>, vector<2x18x1x8xf32>
    %c0_23 = arith.constant 0 : index
    %c0_24 = arith.constant 0 : index
    %c17_25 = arith.constant 17 : index
    %c0_26 = arith.constant 0 : index
    %9 = vector.load %arg8[%c0_23, %c0_24, %c17_25, %c0_26] : memref<2x18x18x8xf32, #tpu.memory_space<vmem>>, vector<2x18x1x8xf32>
    tpu.vector_store %arg8[%c0_23, %c0_24, %c17_25, %c0_26], %8 {strides = array<i32>} : memref<2x18x18x8xf32, #tpu.memory_space<vmem>>, vector<2x18x1x8xf32>,
    %c0_27 = arith.constant 0 : index
    %c0_28 = arith.constant 0 : index
    %c0_29 = arith.constant 0 : index
    %c0_30 = arith.constant 0 : index
    %10 = vector.load %arg8[%c0_27, %c0_28, %c0_29, %c0_30] : memref<2x18x18x8xf32, #tpu.memory_space<vmem>>, vector<2x16x16x8xf32>
    %11 = vector.shape_cast %10 : vector<2x16x16x8xf32> to vector<512x8xf32>
    %c0_31 = arith.constant 0 : index
    %c0_32 = arith.constant 0 : index
    %c0_33 = arith.constant 0 : index
    %c0_34 = arith.constant 0 : index
    %12 = vector.load %arg1[%c0_31, %c0_32, %c0_33, %c0_34] : memref<3x3x8x16xf32, #tpu.memory_space<vmem>>, vector<1x1x8x16xf32>
    %13 = vector.shape_cast %12 : vector<1x1x8x16xf32> to vector<8x16xf32>
    %cst = arith.constant dense<0.000000e+00> : vector<512x16xf32>
    %14 = tpu.matmul %11, %13, %cst {dimension_numbers = #tpu.dot_dimension_numbers<[1], [0], [0], [1], [0, 0, 1, 1], [], []>} : vector<512x8xf32>, vector<8x16xf32>, vector<512x16xf32> -> vector<512x16xf32>
    %c0_35 = arith.constant 0 : index
    %c0_36 = arith.constant 0 : index
    %c1_37 = arith.constant 1 : index
    %c0_38 = arith.constant 0 : index
    %15 = vector.load %arg8[%c0_35, %c0_36, %c1_37, %c0_38] : memref<2x18x18x8xf32, #tpu.memory_space<vmem>>, vector<2x16x16x8xf32>
    %16 = vector.shape_cast %15 : vector<2x16x16x8xf32> to vector<512x8xf32>
    %c0_39 = arith.constant 0 : index
    %c1_40 = arith.constant 1 : index
    %c0_41 = arith.constant 0 : index
    %c0_42 = arith.constant 0 : index
    %17 = vector.load %arg1[%c0_39, %c1_40, %c0_41, %c0_42] : memref<3x3x8x16xf32, #tpu.memory_space<vmem>>, vector<1x1x8x16xf32>
    %18 = vector.shape_cast %17 : vector<1x1x8x16xf32> to vector<8x16xf32>
    %cst_43 = arith.constant dense<0.000000e+00> : vector<512x16xf32>
    %19 = tpu.matmul %16, %18, %cst_43 {dimension_numbers = #tpu.dot_dimension_numbers<[1], [0], [0], [1], [0, 0, 1, 1], [], []>} : vector<512x8xf32>, vector<8x16xf32>, vector<512x16xf32> -> vector<512x16xf32>
    %20 = arith.addf %14, %19 : vector<512x16xf32>
    %c0_44 = arith.constant 0 : index
    %c0_45 = arith.constant 0 : index
    %c2_46 = arith.constant 2 : index
    %c0_47 = arith.constant 0 : index
    %21 = vector.load %arg8[%c0_44, %c0_45, %c2_46, %c0_47] : memref<2x18x18x8xf32, #tpu.memory_space<vmem>>, vector<2x16x16x8xf32>
    %22 = vector.shape_cast %21 : vector<2x16x16x8xf32> to vector<512x8xf32>
    %c0_48 = arith.constant 0 : index
    %c2_49 = arith.constant 2 : index
    %c0_50 = arith.constant 0 : index
    %c0_51 = arith.constant 0 : index
    %23 = vector.load %arg1[%c0_48, %c2_49, %c0_50, %c0_51] : memref<3x3x8x16xf32, #tpu.memory_space<vmem>>, vector<1x1x8x16xf32>
    %24 = vector.shape_cast %23 : vector<1x1x8x16xf32> to vector<8x16xf32>
    %cst_52 = arith.constant dense<0.000000e+00> : vector<512x16xf32>
    %25 = tpu.matmul %22, %24, %cst_52 {dimension_numbers = #tpu.dot_dimension_numbers<[1], [0], [0], [1], [0, 0, 1, 1], [], []>} : vector<512x8xf32>, vector<8x16xf32>, vector<512x16xf32> -> vector<512x16xf32>
    %26 = arith.addf %20, %25 : vector<512x16xf32>
    %c0_53 = arith.constant 0 : index
    %c1_54 = arith.constant 1 : index
    %c0_55 = arith.constant 0 : index
    %c0_56 = arith.constant 0 : index
    %27 = vector.load %arg8[%c0_53, %c1_54, %c0_55, %c0_56] : memref<2x18x18x8xf32, #tpu.memory_space<vmem>>, vector<2x16x16x8xf32>
    %28 = vector.shape_cast %27 : vector<2x16x16x8xf32> to vector<512x8xf32>
    %c1_57 = arith.constant 1 : index
    %c0_58 = arith.constant 0 : index
    %c0_59 = arith.constant 0 : index
    %c0_60 = arith.constant 0 : index
    %29 = vector.load %arg1[%c1_57, %c0_58, %c0_59, %c0_60] : memref<3x3x8x16xf32, #tpu.memory_space<vmem>>, vector<1x1x8x16xf32>
    %30 = vector.shape_cast %29 : vector<1x1x8x16xf32> to vector<8x16xf32>
    %cst_61 = arith.constant dense<0.000000e+00> : vector<512x16xf32>
    %31 = tpu.matmul %28, %30, %cst_61 {dimension_numbers = #tpu.dot_dimension_numbers<[1], [0], [0], [1], [0, 0, 1, 1], [], []>} : vector<512x8xf32>, vector<8x16xf32>, vector<512x16xf32> -> vector<512x16xf32>
    %32 = arith.addf %26, %31 : vector<512x16xf32>
    %c0_62 = arith.constant 0 : index
    %c1_63 = arith.constant 1 : index
    %c1_64 = arith.constant 1 : index
    %c0_65 = arith.constant 0 : index
    %33 = vector.load %arg8[%c0_62, %c1_63, %c1_64, %c0_65] : memref<2x18x18x8xf32, #tpu.memory_space<vmem>>, vector<2x16x16x8xf32>
    %34 = vector.shape_cast %33 : vector<2x16x16x8xf32> to vector<512x8xf32>
    %c1_66 = arith.constant 1 : index
    %c1_67 = arith.constant 1 : index
    %c0_68 = arith.constant 0 : index
    %c0_69 = arith.constant 0 : index
    %35 = vector.load %arg1[%c1_66, %c1_67, %c0_68, %c0_69] : memref<3x3x8x16xf32, #tpu.memory_space<vmem>>, vector<1x1x8x16xf32>
    %36 = vector.shape_cast %35 : vector<1x1x8x16xf32> to vector<8x16xf32>
    %cst_70 = arith.constant dense<0.000000e+00> : vector<512x16xf32>
    %37 = tpu.matmul %34, %36, %cst_70 {dimension_numbers = #tpu.dot_dimension_numbers<[1], [0], [0], [1], [0, 0, 1, 1], [], []>} : vector<512x8xf32>, vector<8x16xf32>, vector<512x16xf32> -> vector<512x16xf32>
    %38 = arith.addf %32, %37 : vector<512x16xf32>
    %c0_71 = arith.constant 0 : index
    %c1_72 = arith.constant 1 : index
    %c2_73 = arith.constant 2 : index
    %c0_74 = arith.constant 0 : index
    %39 = vector.load %arg8[%c0_71, %c1_72, %c2_73, %c0_74] : memref<2x18x18x8xf32, #tpu.memory_space<vmem>>, vector<2x16x16x8xf32>
    %40 = vector.shape_cast %39 : vector<2x16x16x8xf32> to vector<512x8xf32>
    %c1_75 = arith.constant 1 : index
    %c2_76 = arith.constant 2 : index
    %c0_77 = arith.constant 0 : index
    %c0_78 = arith.constant 0 : index
    %41 = vector.load %arg1[%c1_75, %c2_76, %c0_77, %c0_78] : memref<3x3x8x16xf32, #tpu.memory_space<vmem>>, vector<1x1x8x16xf32>
    %42 = vector.shape_cast %41 : vector<1x1x8x16xf32> to vector<8x16xf32>
    %cst_79 = arith.constant dense<0.000000e+00> : vector<512x16xf32>
    %43 = tpu.matmul %40, %42, %cst_79 {dimension_numbers = #tpu.dot_dimension_numbers<[1], [0], [0], [1], [0, 0, 1, 1], [], []>} : vector<512x8xf32>, vector<8x16xf32>, vector<512x16xf32> -> vector<512x16xf32>
    %44 = arith.addf %38, %43 : vector<512x16xf32>
    %c0_80 = arith.constant 0 : index
    %c2_81 = arith.constant 2 : index
    %c0_82 = arith.constant 0 : index
    %c0_83 = arith.constant 0 : index
    %45 = vector.load %arg8[%c0_80, %c2_81, %c0_82, %c0_83] : memref<2x18x18x8xf32, #tpu.memory_space<vmem>>, vector<2x16x16x8xf32>
    %46 = vector.shape_cast %45 : vector<2x16x16x8xf32> to vector<512x8xf32>
    %c2_84 = arith.constant 2 : index
    %c0_85 = arith.constant 0 : index
    %c0_86 = arith.constant 0 : index
    %c0_87 = arith.constant 0 : index
    %47 = vector.load %arg1[%c2_84, %c0_85, %c0_86, %c0_87] : memref<3x3x8x16xf32, #tpu.memory_space<vmem>>, vector<1x1x8x16xf32>
    %48 = vector.shape_cast %47 : vector<1x1x8x16xf32> to vector<8x16xf32>
    %cst_88 = arith.constant dense<0.000000e+00> : vector<512x16xf32>
    %49 = tpu.matmul %46, %48, %cst_88 {dimension_numbers = #tpu.dot_dimension_numbers<[1], [0], [0], [1], [0, 0, 1, 1], [], []>} : vector<512x8xf32>, vector<8x16xf32>, vector<512x16xf32> -> vector<512x16xf32>
    %50 = arith.addf %44, %49 : vector<512x16xf32>
    %c0_89 = arith.constant 0 : index
    %c2_90 = arith.constant 2 : index
    %c1_91 = arith.constant 1 : index
    %c0_92 = arith.constant 0 : index
    %51 = vector.load %arg8[%c0_89, %c2_90, %c1_91, %c0_92] : memref<2x18x18x8xf32, #tpu.memory_space<vmem>>, vector<2x16x16x8xf32>
    %52 = vector.shape_cast %51 : vector<2x16x16x8xf32> to vector<512x8xf32>
    %c2_93 = arith.constant 2 : index
    %c1_94 = arith.constant 1 : index
    %c0_95 = arith.constant 0 : index
    %c0_96 = arith.constant 0 : index
    %53 = vector.load %arg1[%c2_93, %c1_94, %c0_95, %c0_96] : memref<3x3x8x16xf32, #tpu.memory_space<vmem>>, vector<1x1x8x16xf32>
    %54 = vector.shape_cast %53 : vector<1x1x8x16xf32> to vector<8x16xf32>
    %cst_97 = arith.constant dense<0.000000e+00> : vector<512x16xf32>
    %55 = tpu.matmul %52, %54, %cst_97 {dimension_numbers = #tpu.dot_dimension_numbers<[1], [0], [0], [1], [0, 0, 1, 1], [], []>} : vector<512x8xf32>, vector<8x16xf32>, vector<512x16xf32> -> vector<512x16xf32>
    %56 = arith.addf %50, %55 : vector<512x16xf32>
    %c0_98 = arith.constant 0 : index
    %c2_99 = arith.constant 2 : index
    %c2_100 = arith.constant 2 : index
    %c0_101 = arith.constant 0 : index
    %57 = vector.load %arg8[%c0_98, %c2_99, %c2_100, %c0_101] : memref<2x18x18x8xf32, #tpu.memory_space<vmem>>, vector<2x16x16x8xf32>
    %58 = vector.shape_cast %57 : vector<2x16x16x8xf32> to vector<512x8xf32>
    %c2_102 = arith.constant 2 : index
    %c2_103 = arith.constant 2 : index
    %c0_104 = arith.constant 0 : index
    %c0_105 = arith.constant 0 : index
    %59 = vector.load %arg1[%c2_102, %c2_103, %c0_104, %c0_105] : memref<3x3x8x16xf32, #tpu.memory_space<vmem>>, vector<1x1x8x16xf32>
    %60 = vector.shape_cast %59 : vector<1x1x8x16xf32> to vector<8x16xf32>
    %cst_106 = arith.constant dense<0.000000e+00> : vector<512x16xf32>
    %61 = tpu.matmul %58, %60, %cst_106 {dimension_numbers = #tpu.dot_dimension_numbers<[1], [0], [0], [1], [0, 0, 1, 1], [], []>} : vector<512x8xf32>, vector<8x16xf32>, vector<512x16xf32> -> vector<512x16xf32>
    %62 = arith.addf %56, %61 : vector<512x16xf32>
    %cst_107 = arith.constant dense<0.000000e+00> : vector<16xf32>
    %63 = vector.multi_reduction <add>, %62, %cst_107 [0] : vector<512x16xf32> to vector<16xf32>
    %64 = vector.shape_cast %63 : vector<16xf32> to vector<1x16xf32>
    %65 = arith.mulf %62, %62 : vector<512x16xf32>
    %cst_108 = arith.constant dense<0.000000e+00> : vector<16xf32>
    %66 = vector.multi_reduction <add>, %65, %cst_108 [0] : vector<512x16xf32> to vector<16xf32>
    %67 = vector.shape_cast %66 : vector<16xf32> to vector<1x16xf32>
    %cst_109 = arith.constant 0.001953125 : f32
    %68 = vector.broadcast %cst_109 : f32 to vector<1x16xf32>
    %69 = arith.mulf %64, %68 : vector<1x16xf32>
    %cst_110 = arith.constant 0.001953125 : f32
    %70 = vector.broadcast %cst_110 : f32 to vector<1x16xf32>
    %71 = arith.mulf %67, %70 : vector<1x16xf32>
    %72 = arith.mulf %69, %69 : vector<1x16xf32>
    %73 = arith.subf %71, %72 : vector<1x16xf32>
    %c0_111 = arith.constant 0 : index
    %c0_112 = arith.constant 0 : index
    %74 = vector.load %arg2[%c0_111, %c0_112] : memref<1x16xf32, #tpu.memory_space<vmem>>, vector<1x16xf32>
    %cst_113 = arith.constant 9.99999974E-6 : f32
    %75 = vector.broadcast %cst_113 : f32 to vector<1x16xf32>
    %76 = arith.addf %73, %75 : vector<1x16xf32>
    %77 = math.rsqrt %76 : vector<1x16xf32>
    %78 = arith.mulf %74, %77 : vector<1x16xf32>
    %c0_114 = arith.constant 0 : index
    %c0_115 = arith.constant 0 : index
    %79 = vector.load %arg3[%c0_114, %c0_115] : memref<1x16xf32, #tpu.memory_space<vmem>>, vector<1x16xf32>
    %80 = arith.mulf %69, %78 : vector<1x16xf32>
    %81 = arith.subf %79, %80 : vector<1x16xf32>
    %82 = vector.broadcast %78 : vector<1x16xf32> to vector<512x16xf32>
    %83 = arith.mulf %62, %82 : vector<512x16xf32>
    %84 = vector.broadcast %81 : vector<1x16xf32> to vector<512x16xf32>
    %85 = arith.addf %83, %84 : vector<512x16xf32>
    %cst_116 = arith.constant 0.000000e+00 : f32
    %86 = vector.broadcast %cst_116 : f32 to vector<512x16xf32>
    %87 = arith.cmpf ogt, %85, %86 : vector<512x16xf32>
    %cst_117 = arith.constant 2.000000e-01 : f32
    %88 = vector.broadcast %cst_117 : f32 to vector<512x16xf32>
    %89 = arith.mulf %88, %85 : vector<512x16xf32>
    %90 = arith.select %87, %85, %89 : vector<512x16xi1>, vector<512x16xf32>
    %91 = vector.shape_cast %90 : vector<512x16xf32> to vector<2x8x2x16x16xf32>
    %92 = vector.extract_strided_slice %91 {offsets = [0, 0, 0, 0, 0], sizes = [2, 8, 1, 16, 16], strides = [1, 1, 1, 1, 1]} : vector<2x8x2x16x16xf32> to vector<2x8x1x16x16xf32>
    %93 = vector.shape_cast %92 : vector<2x8x1x16x16xf32> to vector<2x8x16x16xf32>
    %94 = vector.extract_strided_slice %91 {offsets = [0, 0, 1, 0, 0], sizes = [2, 8, 1, 16, 16], strides = [1, 1, 1, 1, 1]} : vector<2x8x2x16x16xf32> to vector<2x8x1x16x16xf32>
    %95 = vector.shape_cast %94 : vector<2x8x1x16x16xf32> to vector<2x8x16x16xf32>
    %96 = arith.maximumf %93, %95 : vector<2x8x16x16xf32>
    %c0_118 = arith.constant 0 : index
    %c0_119 = arith.constant 0 : index
    %c0_120 = arith.constant 0 : index
    %c0_121 = arith.constant 0 : index
    %97 = vector.load %arg9[%c0_118, %c0_119, %c0_120, %c0_121] : memref<2x8x16x16xf32, #tpu.memory_space<vmem>>, vector<2x8x16x16xf32>
    tpu.vector_store %arg9[%c0_118, %c0_119, %c0_120, %c0_121], %96 {strides = array<i32>} : memref<2x8x16x16xf32, #tpu.memory_space<vmem>>, vector<2x8x16x16xf32>,
    %c0_122 = arith.constant 0 : index
    %c0_123 = arith.constant 0 : index
    %c0_124 = arith.constant 0 : index
    %c0_125 = arith.constant 0 : index
    %98 = tpu.strided_load %arg9[%c0_122, %c0_123, %c0_124, %c0_125] {strides = array<i32: 1, 1, 2, 1>} : memref<2x8x16x16xf32, #tpu.memory_space<vmem>>, vector<2x8x8x16xf32>
    %c0_126 = arith.constant 0 : index
    %c0_127 = arith.constant 0 : index
    %c1_128 = arith.constant 1 : index
    %c0_129 = arith.constant 0 : index
    %99 = tpu.strided_load %arg9[%c0_126, %c0_127, %c1_128, %c0_129] {strides = array<i32: 1, 1, 2, 1>} : memref<2x8x16x16xf32, #tpu.memory_space<vmem>>, vector<2x8x8x16xf32>
    %100 = arith.maximumf %98, %99 : vector<2x8x8x16xf32>
    %c0_130 = arith.constant 0 : index
    %c1_131 = arith.constant 1 : index
    %c1_132 = arith.constant 1 : index
    %c0_133 = arith.constant 0 : index
    %101 = vector.load %arg10[%c0_130, %c1_131, %c1_132, %c0_133] : memref<2x10x10x16xf32, #tpu.memory_space<vmem>>, vector<2x8x8x16xf32>
    tpu.vector_store %arg10[%c0_130, %c1_131, %c1_132, %c0_133], %100 {strides = array<i32>} : memref<2x10x10x16xf32, #tpu.memory_space<vmem>>, vector<2x8x8x16xf32>,
    %102 = vector.extract_strided_slice %100 {offsets = [0, 1, 0, 0], sizes = [2, 1, 8, 16], strides = [1, 1, 1, 1]} : vector<2x8x8x16xf32> to vector<2x1x8x16xf32>
    %c0_134 = arith.constant 0 : index
    %c0_135 = arith.constant 0 : index
    %c1_136 = arith.constant 1 : index
    %c0_137 = arith.constant 0 : index
    %103 = vector.load %arg10[%c0_134, %c0_135, %c1_136, %c0_137] : memref<2x10x10x16xf32, #tpu.memory_space<vmem>>, vector<2x1x8x16xf32>
    tpu.vector_store %arg10[%c0_134, %c0_135, %c1_136, %c0_137], %102 {strides = array<i32>} : memref<2x10x10x16xf32, #tpu.memory_space<vmem>>, vector<2x1x8x16xf32>,
    %104 = vector.extract_strided_slice %100 {offsets = [0, 6, 0, 0], sizes = [2, 1, 8, 16], strides = [1, 1, 1, 1]} : vector<2x8x8x16xf32> to vector<2x1x8x16xf32>
    %c0_138 = arith.constant 0 : index
    %c9 = arith.constant 9 : index
    %c1_139 = arith.constant 1 : index
    %c0_140 = arith.constant 0 : index
    %105 = vector.load %arg10[%c0_138, %c9, %c1_139, %c0_140] : memref<2x10x10x16xf32, #tpu.memory_space<vmem>>, vector<2x1x8x16xf32>
    tpu.vector_store %arg10[%c0_138, %c9, %c1_139, %c0_140], %104 {strides = array<i32>} : memref<2x10x10x16xf32, #tpu.memory_space<vmem>>, vector<2x1x8x16xf32>,
    %c0_141 = arith.constant 0 : index
    %c0_142 = arith.constant 0 : index
    %c2_143 = arith.constant 2 : index
    %c0_144 = arith.constant 0 : index
    %106 = vector.load %arg10[%c0_141, %c0_142, %c2_143, %c0_144] : memref<2x10x10x16xf32, #tpu.memory_space<vmem>>, vector<2x10x1x16xf32>
    %c0_145 = arith.constant 0 : index
    %c0_146 = arith.constant 0 : index
    %c0_147 = arith.constant 0 : index
    %c0_148 = arith.constant 0 : index
    %107 = vector.load %arg10[%c0_145, %c0_146, %c0_147, %c0_148] : memref<2x10x10x16xf32, #tpu.memory_space<vmem>>, vector<2x10x1x16xf32>
    tpu.vector_store %arg10[%c0_145, %c0_146, %c0_147, %c0_148], %106 {strides = array<i32>} : memref<2x10x10x16xf32, #tpu.memory_space<vmem>>, vector<2x10x1x16xf32>,
    %c0_149 = arith.constant 0 : index
    %c0_150 = arith.constant 0 : index
    %c7 = arith.constant 7 : index
    %c0_151 = arith.constant 0 : index
    %108 = vector.load %arg10[%c0_149, %c0_150, %c7, %c0_151] : memref<2x10x10x16xf32, #tpu.memory_space<vmem>>, vector<2x10x1x16xf32>
    %c0_152 = arith.constant 0 : index
    %c0_153 = arith.constant 0 : index
    %c9_154 = arith.constant 9 : index
    %c0_155 = arith.constant 0 : index
    %109 = vector.load %arg10[%c0_152, %c0_153, %c9_154, %c0_155] : memref<2x10x10x16xf32, #tpu.memory_space<vmem>>, vector<2x10x1x16xf32>
    tpu.vector_store %arg10[%c0_152, %c0_153, %c9_154, %c0_155], %108 {strides = array<i32>} : memref<2x10x10x16xf32, #tpu.memory_space<vmem>>, vector<2x10x1x16xf32>,
    %c0_156 = arith.constant 0 : index
    %c0_157 = arith.constant 0 : index
    %c0_158 = arith.constant 0 : index
    %c0_159 = arith.constant 0 : index
    %110 = vector.load %arg10[%c0_156, %c0_157, %c0_158, %c0_159] : memref<2x10x10x16xf32, #tpu.memory_space<vmem>>, vector<2x8x8x16xf32>
    %111 = vector.shape_cast %110 : vector<2x8x8x16xf32> to vector<128x16xf32>
    %c0_160 = arith.constant 0 : index
    %c0_161 = arith.constant 0 : index
    %c0_162 = arith.constant 0 : index
    %c0_163 = arith.constant 0 : index
    %112 = vector.load %arg4[%c0_160, %c0_161, %c0_162, %c0_163] : memref<3x3x16x32xf32, #tpu.memory_space<vmem>>, vector<1x1x16x32xf32>
    %113 = vector.shape_cast %112 : vector<1x1x16x32xf32> to vector<16x32xf32>
    %cst_164 = arith.constant dense<0.000000e+00> : vector<128x32xf32>
    %114 = tpu.matmul %111, %113, %cst_164 {dimension_numbers = #tpu.dot_dimension_numbers<[1], [0], [0], [1], [0, 0, 1, 1], [], []>} : vector<128x16xf32>, vector<16x32xf32>, vector<128x32xf32> -> vector<128x32xf32>
    %c0_165 = arith.constant 0 : index
    %c0_166 = arith.constant 0 : index
    %c1_167 = arith.constant 1 : index
    %c0_168 = arith.constant 0 : index
    %115 = vector.load %arg10[%c0_165, %c0_166, %c1_167, %c0_168] : memref<2x10x10x16xf32, #tpu.memory_space<vmem>>, vector<2x8x8x16xf32>
    %116 = vector.shape_cast %115 : vector<2x8x8x16xf32> to vector<128x16xf32>
    %c0_169 = arith.constant 0 : index
    %c1_170 = arith.constant 1 : index
    %c0_171 = arith.constant 0 : index
    %c0_172 = arith.constant 0 : index
    %117 = vector.load %arg4[%c0_169, %c1_170, %c0_171, %c0_172] : memref<3x3x16x32xf32, #tpu.memory_space<vmem>>, vector<1x1x16x32xf32>
    %118 = vector.shape_cast %117 : vector<1x1x16x32xf32> to vector<16x32xf32>
    %cst_173 = arith.constant dense<0.000000e+00> : vector<128x32xf32>
    %119 = tpu.matmul %116, %118, %cst_173 {dimension_numbers = #tpu.dot_dimension_numbers<[1], [0], [0], [1], [0, 0, 1, 1], [], []>} : vector<128x16xf32>, vector<16x32xf32>, vector<128x32xf32> -> vector<128x32xf32>
    %120 = arith.addf %114, %119 : vector<128x32xf32>
    %c0_174 = arith.constant 0 : index
    %c0_175 = arith.constant 0 : index
    %c2_176 = arith.constant 2 : index
    %c0_177 = arith.constant 0 : index
    %121 = vector.load %arg10[%c0_174, %c0_175, %c2_176, %c0_177] : memref<2x10x10x16xf32, #tpu.memory_space<vmem>>, vector<2x8x8x16xf32>
    %122 = vector.shape_cast %121 : vector<2x8x8x16xf32> to vector<128x16xf32>
    %c0_178 = arith.constant 0 : index
    %c2_179 = arith.constant 2 : index
    %c0_180 = arith.constant 0 : index
    %c0_181 = arith.constant 0 : index
    %123 = vector.load %arg4[%c0_178, %c2_179, %c0_180, %c0_181] : memref<3x3x16x32xf32, #tpu.memory_space<vmem>>, vector<1x1x16x32xf32>
    %124 = vector.shape_cast %123 : vector<1x1x16x32xf32> to vector<16x32xf32>
    %cst_182 = arith.constant dense<0.000000e+00> : vector<128x32xf32>
    %125 = tpu.matmul %122, %124, %cst_182 {dimension_numbers = #tpu.dot_dimension_numbers<[1], [0], [0], [1], [0, 0, 1, 1], [], []>} : vector<128x16xf32>, vector<16x32xf32>, vector<128x32xf32> -> vector<128x32xf32>
    %126 = arith.addf %120, %125 : vector<128x32xf32>
    %c0_183 = arith.constant 0 : index
    %c1_184 = arith.constant 1 : index
    %c0_185 = arith.constant 0 : index
    %c0_186 = arith.constant 0 : index
    %127 = vector.load %arg10[%c0_183, %c1_184, %c0_185, %c0_186] : memref<2x10x10x16xf32, #tpu.memory_space<vmem>>, vector<2x8x8x16xf32>
    %128 = vector.shape_cast %127 : vector<2x8x8x16xf32> to vector<128x16xf32>
    %c1_187 = arith.constant 1 : index
    %c0_188 = arith.constant 0 : index
    %c0_189 = arith.constant 0 : index
    %c0_190 = arith.constant 0 : index
    %129 = vector.load %arg4[%c1_187, %c0_188, %c0_189, %c0_190] : memref<3x3x16x32xf32, #tpu.memory_space<vmem>>, vector<1x1x16x32xf32>
    %130 = vector.shape_cast %129 : vector<1x1x16x32xf32> to vector<16x32xf32>
    %cst_191 = arith.constant dense<0.000000e+00> : vector<128x32xf32>
    %131 = tpu.matmul %128, %130, %cst_191 {dimension_numbers = #tpu.dot_dimension_numbers<[1], [0], [0], [1], [0, 0, 1, 1], [], []>} : vector<128x16xf32>, vector<16x32xf32>, vector<128x32xf32> -> vector<128x32xf32>
    %132 = arith.addf %126, %131 : vector<128x32xf32>
    %c0_192 = arith.constant 0 : index
    %c1_193 = arith.constant 1 : index
    %c1_194 = arith.constant 1 : index
    %c0_195 = arith.constant 0 : index
    %133 = vector.load %arg10[%c0_192, %c1_193, %c1_194, %c0_195] : memref<2x10x10x16xf32, #tpu.memory_space<vmem>>, vector<2x8x8x16xf32>
    %134 = vector.shape_cast %133 : vector<2x8x8x16xf32> to vector<128x16xf32>
    %c1_196 = arith.constant 1 : index
    %c1_197 = arith.constant 1 : index
    %c0_198 = arith.constant 0 : index
    %c0_199 = arith.constant 0 : index
    %135 = vector.load %arg4[%c1_196, %c1_197, %c0_198, %c0_199] : memref<3x3x16x32xf32, #tpu.memory_space<vmem>>, vector<1x1x16x32xf32>
    %136 = vector.shape_cast %135 : vector<1x1x16x32xf32> to vector<16x32xf32>
    %cst_200 = arith.constant dense<0.000000e+00> : vector<128x32xf32>
    %137 = tpu.matmul %134, %136, %cst_200 {dimension_numbers = #tpu.dot_dimension_numbers<[1], [0], [0], [1], [0, 0, 1, 1], [], []>} : vector<128x16xf32>, vector<16x32xf32>, vector<128x32xf32> -> vector<128x32xf32>
    %138 = arith.addf %132, %137 : vector<128x32xf32>
    %c0_201 = arith.constant 0 : index
    %c1_202 = arith.constant 1 : index
    %c2_203 = arith.constant 2 : index
    %c0_204 = arith.constant 0 : index
    %139 = vector.load %arg10[%c0_201, %c1_202, %c2_203, %c0_204] : memref<2x10x10x16xf32, #tpu.memory_space<vmem>>, vector<2x8x8x16xf32>
    %140 = vector.shape_cast %139 : vector<2x8x8x16xf32> to vector<128x16xf32>
    %c1_205 = arith.constant 1 : index
    %c2_206 = arith.constant 2 : index
    %c0_207 = arith.constant 0 : index
    %c0_208 = arith.constant 0 : index
    %141 = vector.load %arg4[%c1_205, %c2_206, %c0_207, %c0_208] : memref<3x3x16x32xf32, #tpu.memory_space<vmem>>, vector<1x1x16x32xf32>
    %142 = vector.shape_cast %141 : vector<1x1x16x32xf32> to vector<16x32xf32>
    %cst_209 = arith.constant dense<0.000000e+00> : vector<128x32xf32>
    %143 = tpu.matmul %140, %142, %cst_209 {dimension_numbers = #tpu.dot_dimension_numbers<[1], [0], [0], [1], [0, 0, 1, 1], [], []>} : vector<128x16xf32>, vector<16x32xf32>, vector<128x32xf32> -> vector<128x32xf32>
    %144 = arith.addf %138, %143 : vector<128x32xf32>
    %c0_210 = arith.constant 0 : index
    %c2_211 = arith.constant 2 : index
    %c0_212 = arith.constant 0 : index
    %c0_213 = arith.constant 0 : index
    %145 = vector.load %arg10[%c0_210, %c2_211, %c0_212, %c0_213] : memref<2x10x10x16xf32, #tpu.memory_space<vmem>>, vector<2x8x8x16xf32>
    %146 = vector.shape_cast %145 : vector<2x8x8x16xf32> to vector<128x16xf32>
    %c2_214 = arith.constant 2 : index
    %c0_215 = arith.constant 0 : index
    %c0_216 = arith.constant 0 : index
    %c0_217 = arith.constant 0 : index
    %147 = vector.load %arg4[%c2_214, %c0_215, %c0_216, %c0_217] : memref<3x3x16x32xf32, #tpu.memory_space<vmem>>, vector<1x1x16x32xf32>
    %148 = vector.shape_cast %147 : vector<1x1x16x32xf32> to vector<16x32xf32>
    %cst_218 = arith.constant dense<0.000000e+00> : vector<128x32xf32>
    %149 = tpu.matmul %146, %148, %cst_218 {dimension_numbers = #tpu.dot_dimension_numbers<[1], [0], [0], [1], [0, 0, 1, 1], [], []>} : vector<128x16xf32>, vector<16x32xf32>, vector<128x32xf32> -> vector<128x32xf32>
    %150 = arith.addf %144, %149 : vector<128x32xf32>
    %c0_219 = arith.constant 0 : index
    %c2_220 = arith.constant 2 : index
    %c1_221 = arith.constant 1 : index
    %c0_222 = arith.constant 0 : index
    %151 = vector.load %arg10[%c0_219, %c2_220, %c1_221, %c0_222] : memref<2x10x10x16xf32, #tpu.memory_space<vmem>>, vector<2x8x8x16xf32>
    %152 = vector.shape_cast %151 : vector<2x8x8x16xf32> to vector<128x16xf32>
    %c2_223 = arith.constant 2 : index
    %c1_224 = arith.constant 1 : index
    %c0_225 = arith.constant 0 : index
    %c0_226 = arith.constant 0 : index
    %153 = vector.load %arg4[%c2_223, %c1_224, %c0_225, %c0_226] : memref<3x3x16x32xf32, #tpu.memory_space<vmem>>, vector<1x1x16x32xf32>
    %154 = vector.shape_cast %153 : vector<1x1x16x32xf32> to vector<16x32xf32>
    %cst_227 = arith.constant dense<0.000000e+00> : vector<128x32xf32>
    %155 = tpu.matmul %152, %154, %cst_227 {dimension_numbers = #tpu.dot_dimension_numbers<[1], [0], [0], [1], [0, 0, 1, 1], [], []>} : vector<128x16xf32>, vector<16x32xf32>, vector<128x32xf32> -> vector<128x32xf32>
    %156 = arith.addf %150, %155 : vector<128x32xf32>
    %c0_228 = arith.constant 0 : index
    %c2_229 = arith.constant 2 : index
    %c2_230 = arith.constant 2 : index
    %c0_231 = arith.constant 0 : index
    %157 = vector.load %arg10[%c0_228, %c2_229, %c2_230, %c0_231] : memref<2x10x10x16xf32, #tpu.memory_space<vmem>>, vector<2x8x8x16xf32>
    %158 = vector.shape_cast %157 : vector<2x8x8x16xf32> to vector<128x16xf32>
    %c2_232 = arith.constant 2 : index
    %c2_233 = arith.constant 2 : index
    %c0_234 = arith.constant 0 : index
    %c0_235 = arith.constant 0 : index
    %159 = vector.load %arg4[%c2_232, %c2_233, %c0_234, %c0_235] : memref<3x3x16x32xf32, #tpu.memory_space<vmem>>, vector<1x1x16x32xf32>
    %160 = vector.shape_cast %159 : vector<1x1x16x32xf32> to vector<16x32xf32>
    %cst_236 = arith.constant dense<0.000000e+00> : vector<128x32xf32>
    %161 = tpu.matmul %158, %160, %cst_236 {dimension_numbers = #tpu.dot_dimension_numbers<[1], [0], [0], [1], [0, 0, 1, 1], [], []>} : vector<128x16xf32>, vector<16x32xf32>, vector<128x32xf32> -> vector<128x32xf32>
    %162 = arith.addf %156, %161 : vector<128x32xf32>
    %cst_237 = arith.constant dense<0.000000e+00> : vector<32xf32>
    %163 = vector.multi_reduction <add>, %162, %cst_237 [0] : vector<128x32xf32> to vector<32xf32>
    %164 = vector.shape_cast %163 : vector<32xf32> to vector<1x32xf32>
    %165 = arith.mulf %162, %162 : vector<128x32xf32>
    %cst_238 = arith.constant dense<0.000000e+00> : vector<32xf32>
    %166 = vector.multi_reduction <add>, %165, %cst_238 [0] : vector<128x32xf32> to vector<32xf32>
    %167 = vector.shape_cast %166 : vector<32xf32> to vector<1x32xf32>
    %cst_239 = arith.constant 7.812500e-03 : f32
    %168 = vector.broadcast %cst_239 : f32 to vector<1x32xf32>
    %169 = arith.mulf %164, %168 : vector<1x32xf32>
    %cst_240 = arith.constant 7.812500e-03 : f32
    %170 = vector.broadcast %cst_240 : f32 to vector<1x32xf32>
    %171 = arith.mulf %167, %170 : vector<1x32xf32>
    %172 = arith.mulf %169, %169 : vector<1x32xf32>
    %173 = arith.subf %171, %172 : vector<1x32xf32>
    %c0_241 = arith.constant 0 : index
    %c0_242 = arith.constant 0 : index
    %174 = vector.load %arg5[%c0_241, %c0_242] : memref<1x32xf32, #tpu.memory_space<vmem>>, vector<1x32xf32>
    %cst_243 = arith.constant 9.99999974E-6 : f32
    %175 = vector.broadcast %cst_243 : f32 to vector<1x32xf32>
    %176 = arith.addf %173, %175 : vector<1x32xf32>
    %177 = math.rsqrt %176 : vector<1x32xf32>
    %178 = arith.mulf %174, %177 : vector<1x32xf32>
    %c0_244 = arith.constant 0 : index
    %c0_245 = arith.constant 0 : index
    %179 = vector.load %arg6[%c0_244, %c0_245] : memref<1x32xf32, #tpu.memory_space<vmem>>, vector<1x32xf32>
    %180 = arith.mulf %169, %178 : vector<1x32xf32>
    %181 = arith.subf %179, %180 : vector<1x32xf32>
    %182 = vector.broadcast %178 : vector<1x32xf32> to vector<128x32xf32>
    %183 = arith.mulf %162, %182 : vector<128x32xf32>
    %184 = vector.broadcast %181 : vector<1x32xf32> to vector<128x32xf32>
    %185 = arith.addf %183, %184 : vector<128x32xf32>
    %cst_246 = arith.constant 0.000000e+00 : f32
    %186 = vector.broadcast %cst_246 : f32 to vector<128x32xf32>
    %187 = arith.cmpf ogt, %185, %186 : vector<128x32xf32>
    %cst_247 = arith.constant 2.000000e-01 : f32
    %188 = vector.broadcast %cst_247 : f32 to vector<128x32xf32>
    %189 = arith.mulf %188, %185 : vector<128x32xf32>
    %190 = arith.select %187, %185, %189 : vector<128x32xi1>, vector<128x32xf32>
    %191 = vector.shape_cast %190 : vector<128x32xf32> to vector<2x4x2x8x32xf32>
    %192 = vector.extract_strided_slice %191 {offsets = [0, 0, 0, 0, 0], sizes = [2, 4, 1, 8, 32], strides = [1, 1, 1, 1, 1]} : vector<2x4x2x8x32xf32> to vector<2x4x1x8x32xf32>
    %193 = vector.shape_cast %192 : vector<2x4x1x8x32xf32> to vector<2x4x8x32xf32>
    %194 = vector.extract_strided_slice %191 {offsets = [0, 0, 1, 0, 0], sizes = [2, 4, 1, 8, 32], strides = [1, 1, 1, 1, 1]} : vector<2x4x2x8x32xf32> to vector<2x4x1x8x32xf32>
    %195 = vector.shape_cast %194 : vector<2x4x1x8x32xf32> to vector<2x4x8x32xf32>
    %196 = arith.maximumf %193, %195 : vector<2x4x8x32xf32>
    %c0_248 = arith.constant 0 : index
    %c0_249 = arith.constant 0 : index
    %c0_250 = arith.constant 0 : index
    %c0_251 = arith.constant 0 : index
    %197 = vector.load %arg11[%c0_248, %c0_249, %c0_250, %c0_251] : memref<2x4x8x32xf32, #tpu.memory_space<vmem>>, vector<2x4x8x32xf32>
    tpu.vector_store %arg11[%c0_248, %c0_249, %c0_250, %c0_251], %196 {strides = array<i32>} : memref<2x4x8x32xf32, #tpu.memory_space<vmem>>, vector<2x4x8x32xf32>,
    %c0_252 = arith.constant 0 : index
    %c0_253 = arith.constant 0 : index
    %c0_254 = arith.constant 0 : index
    %c0_255 = arith.constant 0 : index
    %198 = tpu.strided_load %arg11[%c0_252, %c0_253, %c0_254, %c0_255] {strides = array<i32: 1, 1, 2, 1>} : memref<2x4x8x32xf32, #tpu.memory_space<vmem>>, vector<2x4x4x32xf32>
    %c0_256 = arith.constant 0 : index
    %c0_257 = arith.constant 0 : index
    %c1_258 = arith.constant 1 : index
    %c0_259 = arith.constant 0 : index
    %199 = tpu.strided_load %arg11[%c0_256, %c0_257, %c1_258, %c0_259] {strides = array<i32: 1, 1, 2, 1>} : memref<2x4x8x32xf32, #tpu.memory_space<vmem>>, vector<2x4x4x32xf32>
    %200 = arith.maximumf %198, %199 : vector<2x4x4x32xf32>
    %c0_260 = arith.constant 0 : index
    %c0_261 = arith.constant 0 : index
    %c0_262 = arith.constant 0 : index
    %c0_263 = arith.constant 0 : index
    %201 = vector.load %arg7[%c0_260, %c0_261, %c0_262, %c0_263] : memref<2x4x4x32xf32, #tpu.memory_space<vmem>>, vector<2x4x4x32xf32>
    tpu.vector_store %arg7[%c0_260, %c0_261, %c0_262, %c0_263], %200 {strides = array<i32>} : memref<2x4x4x32xf32, #tpu.memory_space<vmem>>, vector<2x4x4x32xf32>,
    return
  }
}

</mosaic_0001>

<bundles_post_ra>
// kernel: tpu_custom_call.1
= control target key start
LH: loop header
LB: loop body
LE: loop exit
PB: predicated region body
PF: predicated region fallthrough
CT: control target
= control target key end

     0   :  { %vm92_vm0 = vcmask 64512   ;;  %vm202_vm1 = vcmask 57344   ;;  %s17191_s0 = inlined_call_operand.vmem [shape: f32[2,16,16,8], index: 0, kind: input, shape index: {}]   ;;  %s17192_s1 = inlined_call_operand.vmem [shape: f32[3,3,8,16], index: 1, kind: input, shape index: {}]   ;;  %s17193_s2 = inlined_call_operand.vmem [shape: f32[1,16], index: 2, kind: input, shape index: {}]   ;;  %s17194_s3 = inlined_call_operand.vmem [shape: f32[1,16], index: 3, kind: input, shape index: {}]   ;;  %s17195_s4 = inlined_call_operand.vmem [shape: f32[3,3,16,32], index: 4, kind: input, shape index: {}]   ;;  %s17196_s5 = inlined_call_operand.vmem [shape: f32[1,32], index: 5, kind: input, shape index: {}]   ;;  %s17197_s6 = inlined_call_operand.vmem [shape: f32[1,32], index: 6, kind: input, shape index: {}]   ;;  %s17198_s7 = inlined_call_operand.hbm [shape: f32[2,4,4,32], index: 7, kind: output, shape index: {}]  }
   0x1   :  { %v9760_v0 = vld [vmem:[%s17192_s1 + $0x8] sm:$0xff]  ;;  %v29_v1 = vld [vmem:[%s17191_s0 + $0x10] sm:$0xff]  ;;  %v30_v2 = vld [vmem:[%s17191_s0 + $0x18] sm:$0xff] }
   0x2   :  { %11251 = vmatprep.subr.mxu1 %v9760_v0  ;;  %95 = vst.msk [vmem:[#allocation2 + $0x31] sm:$0xff] %vm92_vm0, %v29_v1  ;;  %157 = vst.msk [vmem:[#allocation2 + $0x1] sm:$0xff] %vm92_vm0, %v29_v1  ;;  %v27_v3 = vld [vmem:[%s17191_s0] sm:$0xff]  ;;  %v28_v4 = vld [vmem:[%s17191_s0 + $0x8] sm:$0xff] }
   0x3   :  { %158 = vst.msk [vmem:[#allocation2 + $0x9] sm:$0xff] %vm92_vm0, %v30_v2  ;;  %96 = vst.msk [vmem:[#allocation2 + $0x39] sm:$0xff] %vm92_vm0, %v30_v2  ;;  %v13160_v5 = vld [vmem:[%s17192_s1 + $0x18] sm:$0xff]  ;;  %11252 = vmatpush3.msra.mxu1 %v9760_v0  ;;  %v13168_v6 = vld [vmem:[%s17192_s1 + $0x20] sm:$0xff] }
   0x4   :  { %93 = vst.msk [vmem:[#allocation2 + $0x19] sm:$0xff] %vm92_vm0, %v27_v3  ;;  %94 = vst.msk [vmem:[#allocation2 + $0x21] sm:$0xff] %vm92_vm0, %v28_v4  ;;  %11545 = vmatprep.subr.mxu0 %v13160_v5  ;;  %v31_v7 = vld [vmem:[%s17191_s0 + $0x20] sm:$0xff]  ;;  %v32_v8 = vld [vmem:[%s17191_s0 + $0x28] sm:$0xff] }
   0x5   :  { %11546 = vmatpush3.msra.mxu0 %v13160_v5  ;;  %97 = vst.msk [vmem:[#allocation2 + $0x49] sm:$0xff] %vm92_vm0, %v31_v7  ;;  %98 = vst.msk [vmem:[#allocation2 + $0x51] sm:$0xff] %vm92_vm0, %v32_v8  ;;  %v33_v9 = vld [vmem:[%s17191_s0 + $0x30] sm:$0xff]  ;;  %v34_v10 = vld [vmem:[%s17191_s0 + $0x38] sm:$0xff] }
   0x6   :  { %v35_v11 = vld [vmem:[%s17191_s0 + $0x40] sm:$0xff]  ;;  %11643 = vmatprep.subr.mxu0 %v13168_v6  ;;  %99 = vst.msk [vmem:[#allocation2 + $0x61] sm:$0xff] %vm92_vm0, %v33_v9  ;;  %100 = vst.msk [vmem:[#allocation2 + $0x69] sm:$0xff] %vm92_vm0, %v34_v10  ;;  %v36_v12 = vld [vmem:[%s17191_s0 + $0x48] sm:$0xff] }
   0x7   :  { %101 = vst.msk [vmem:[#allocation2 + $0x79] sm:$0xff] %vm92_vm0, %v35_v11  ;;  %v37_v13 = vld [vmem:[%s17191_s0 + $0x50] sm:$0xff]  ;;  %v38_v14 = vld [vmem:[%s17191_s0 + $0x58] sm:$0xff]  ;;  %102 = vst.msk [vmem:[#allocation2 + $0x81] sm:$0xff] %vm92_vm0, %v36_v12 }
   0x8   :  { %103 = vst.msk [vmem:[#allocation2 + $0x91] sm:$0xff] %vm92_vm0, %v37_v13  ;;  %104 = vst.msk [vmem:[#allocation2 + $0x99] sm:$0xff] %vm92_vm0, %v38_v14  ;;  %v39_v15 = vld [vmem:[%s17191_s0 + $0x60] sm:$0xff]  ;;  %v40_v16 = vld [vmem:[%s17191_s0 + $0x68] sm:$0xff] }
   0x9   :  { %v41_v17 = vld [vmem:[%s17191_s0 + $0x70] sm:$0xff]  ;;  %105 = vst.msk [vmem:[#allocation2 + $0xa9] sm:$0xff] %vm92_vm0, %v39_v15  ;;  %106 = vst.msk [vmem:[#allocation2 + $0xb1] sm:$0xff] %vm92_vm0, %v40_v16  ;;  %v42_v18 = vld [vmem:[%s17191_s0 + $0x78] sm:$0xff] }
   0xa   :  { %107 = vst.msk [vmem:[#allocation2 + $0xc1] sm:$0xff] %vm92_vm0, %v41_v17  ;;  %v43_v19 = vld [vmem:[%s17191_s0 + $0x80] sm:$0xff]  ;;  %v44_v20 = vld [vmem:[%s17191_s0 + $0x88] sm:$0xff]  ;;  %108 = vst.msk [vmem:[#allocation2 + $0xc9] sm:$0xff] %vm92_vm0, %v42_v18 }
   0xb   :  { %109 = vst.msk [vmem:[#allocation2 + $0xd9] sm:$0xff] %vm92_vm0, %v43_v19  ;;  %110 = vst.msk [vmem:[#allocation2 + $0xe1] sm:$0xff] %vm92_vm0, %v44_v20  ;;  %v45_v21 = vld [vmem:[%s17191_s0 + $0x90] sm:$0xff]  ;;  %v46_v22 = vld [vmem:[%s17191_s0 + $0x98] sm:$0xff] }
   0xc   :  { %v47_v23 = vld [vmem:[%s17191_s0 + $0xa0] sm:$0xff]  ;;  %v377_v25 = vld [vmem:[#allocation2 + $0x9] sm:$0xff]  ;;  %111 = vst.msk [vmem:[#allocation2 + $0xf1] sm:$0xff] %vm92_vm0, %v45_v21  ;;  %112 = vst.msk [vmem:[#allocation2 + $0xf9] sm:$0xff] %vm92_vm0, %v46_v22 }
   0xd   :  { %v376_v24 = vld [vmem:[#allocation2 + $0x1] sm:$0xff]  ;;  %113 = vst.msk [vmem:[#allocation2 + $0x109] sm:$0xff] %vm92_vm0, %v47_v23  ;;  %v13241_v26 = vld [vmem:[#allocation2 + $0x19] sm:$0xff]  ;;  %v168_v29 = vld [vmem:[#allocation2 + $0x32] sm:$0x1] }
   0xe   :  { %11253 = vmatprep.mubr.msk.f32.mxu1 %vm92_vm0, %v376_v24  ;;  %v167_v27 = vld [vmem:[#allocation2 + $0x1a] sm:$0x1]  ;;  %v13247_v28 = vld [vmem:[#allocation2 + $0x21] sm:$0xff]  ;;  %v13249_v30 = vld [vmem:[#allocation2 + $0x31] sm:$0xff]  ;;  %205 = vst.msk [vmem:[#allocation2 + $0x30] sm:$0x1] %vm202_vm1, %v168_v29 }
   0xf   :  { %11254 = vmatmul.mubr.msk.f32.vlgmr.msra.gmra.mrb[0].mxu1 %vm92_vm0, %v377_v25  ;;  %204 = vst.msk [vmem:[#allocation2 + $0x18] sm:$0x1] %vm202_vm1, %v167_v27  ;;  %v169_v31 = vld [vmem:[#allocation2 + $0x4a] sm:$0x1]  ;;  %v170_v32 = vld [vmem:[#allocation2 + $0x62] sm:$0x1] }
  0x10   :  { %11256 = vmatprep.mubr.msk.f32.mxu1 %vm92_vm0, %v13241_v26  ;;  %206 = vst.msk [vmem:[#allocation2 + $0x48] sm:$0x1] %vm202_vm1, %v169_v31  ;;  %207 = vst.msk [vmem:[#allocation2 + $0x60] sm:$0x1] %vm202_vm1, %v170_v32  ;;  %v13258_v33 = vld [vmem:[#allocation2 + $0x39] sm:$0xff]  ;;  %v13262_v36 = vld [vmem:[#allocation2 + $0x49] sm:$0xff] }
  0x11   :  { %v171_v34 = vld [vmem:[#allocation2 + $0x7a] sm:$0x1]  ;;  %v13260_v35 = vld [vmem:[#allocation2 + $0x20] sm:$0xff]  ;;  %v172_v37 = vld [vmem:[#allocation2 + $0x92] sm:$0x1] }
  0x12   :  { %208 = vst.msk [vmem:[#allocation2 + $0x78] sm:$0x1] %vm202_vm1, %v171_v34  ;;  %209 = vst.msk [vmem:[#allocation2 + $0x90] sm:$0x1] %vm202_vm1, %v172_v37  ;;  %v173_v39 = vld [vmem:[#allocation2 + $0xaa] sm:$0x1] }
  0x13   :  { %11257 = vmatmul.mubr.msk.f32.gmra.mrb[2].mxu1 %vm92_vm0, %v13247_v28  ;;  %v13278_v41 = vld [vmem:[#allocation2 + $0x51] sm:$0xff]  ;;  %210 = vst.msk [vmem:[#allocation2 + $0xa8] sm:$0x1] %vm202_vm1, %v173_v39  ;;  %v174_v42 = vld [vmem:[#allocation2 + $0xc2] sm:$0x1]  ;;  %v13293_v47 = vld [vmem:[#allocation2 + $0x69] sm:$0xff] }
  0x14   :  { %11259 = vmatprep.mubr.msk.f32.mxu1 %vm92_vm0, %v13249_v30  ;;  %v13284_v43 = vld [vmem:[#allocation2 + $0x38] sm:$0xff]  ;;  %v13286_v44 = vld [vmem:[#allocation2 + $0x61] sm:$0xff]  ;;  %211 = vst.msk [vmem:[#allocation2 + $0xc0] sm:$0x1] %vm202_vm1, %v174_v42  ;;  %v13300_v48 = vld [vmem:[#allocation2 + $0x50] sm:$0xff] }
  0x15   :  { %v13276_v40 = vld [vmem:[#allocation2 + $0x30] sm:$0xff]  ;;  %v175_v46 = vld [vmem:[#allocation2 + $0xda] sm:$0x1]  ;;  %v48_v50 = vld [vmem:[%s17191_s0 + $0xa8] sm:$0xff] }
  0x16   :  { %v13265_v38 = vld [vmem:[#allocation2 + $0x18] sm:$0xff]  ;;  %212 = vst.msk [vmem:[#allocation2 + $0xd8] sm:$0x1] %vm202_vm1, %v175_v46  ;;  %v176_v49 = vld [vmem:[#allocation2 + $0xf2] sm:$0x1]  ;;  %v13316_v54 = vld [vmem:[#allocation2 + $0x81] sm:$0xff] }
  0x17   :  { %11547 = vmatprep.mubr.msk.f32.mxu0 %vm92_vm0, %v13265_v38  ;;  %11260 = vmatmul.mubr.msk.f32.gmra.mrb[4].mxu1 %vm92_vm0, %v13258_v33  ;;  %v13289_v45 = vld [vmem:[#allocation2 + $0x48] sm:$0xff]  ;;  %v13307_v51 = vld [vmem:[#allocation2 + $0x79] sm:$0xff]  ;;  %213 = vst.msk [vmem:[#allocation2 + $0xf0] sm:$0x1] %vm202_vm1, %v176_v49  ;;  %v49_v53 = vld [vmem:[%s17191_s0 + $0xb0] sm:$0xff] }
  0x18   :  { %11548 = vmatmul.mubr.msk.f32.vlgmr.msra.gmra.mrb[0].mxu0 %vm92_vm0, %v13260_v35  ;;  %11262 = vmatprep.mubr.msk.f32.mxu1 %vm92_vm0, %v13262_v36  ;;  %v13309_v52 = vld [vmem:[#allocation2 + $0x60] sm:$0xff]  ;;  %114 = vst.msk [vmem:[#allocation2 + $0x111] sm:$0xff] %vm92_vm0, %v48_v50  ;;  %115 = vst.msk [vmem:[#allocation2 + $0x121] sm:$0xff] %vm92_vm0, %v49_v53  ;;  %v177_v55 = vld [vmem:[#allocation2 + $0x10a] sm:$0x1] }
  0x19   :  { %11644 = vmatpush3.msra.mxu0 %v13168_v6  ;;  %11550 = vmatprep.mubr.msk.f32.mxu0 %vm92_vm0, %v13276_v40  ;;  %v50_v56 = vld [vmem:[%s17191_s0 + $0xb8] sm:$0xff]  ;;  %v51_v57 = vld [vmem:[%s17191_s0 + $0xc0] sm:$0xff]  ;;  %v13327_v58 = vld [vmem:[#allocation2 + $0x68] sm:$0xff]  ;;  %214 = vst.msk [vmem:[#allocation2 + $0x108] sm:$0x1] %vm202_vm1, %v177_v55 }
  0x1a   :  { %116 = vst.msk [vmem:[#allocation2 + $0x129] sm:$0xff] %vm92_vm0, %v50_v56  ;;  %117 = vst.msk [vmem:[#allocation2 + $0x139] sm:$0xff] %vm92_vm0, %v51_v57  ;;  %v52_v59 = vld [vmem:[%s17191_s0 + $0xc8] sm:$0xff]  ;;  %v53_v60 = vld [vmem:[%s17191_s0 + $0xd0] sm:$0xff] }
  0x1b   :  { %11263 = vmatmul.mubr.msk.f32.gmra.mrb[6].mxu1 %vm92_vm0, %v13278_v41  ;;  %v13342_v61 = vld [vmem:[#allocation2 + $0x91] sm:$0xff]  ;;  %118 = vst.msk [vmem:[#allocation2 + $0x141] sm:$0xff] %vm92_vm0, %v52_v59  ;;  %119 = vst.msk [vmem:[#allocation2 + $0x151] sm:$0xff] %vm92_vm0, %v53_v60  ;;  %v55_v63 = vld [vmem:[%s17191_s0 + $0xe0] sm:$0xff] }
  0x1c   :  { %11551 = vmatmul.mubr.msk.f32.gmra.mrb[2].mxu0 %vm92_vm0, %v13284_v43  ;;  %11265 = vmatprep.mubr.msk.f32.mxu1 %vm92_vm0, %v13286_v44  ;;  %v54_v62 = vld [vmem:[%s17191_s0 + $0xd8] sm:$0xff]  ;;  %121 = vst.msk [vmem:[#allocation2 + $0x169] sm:$0xff] %vm92_vm0, %v55_v63  ;;  %162 = vst.msk [vmem:[#allocation2 + $0x199] sm:$0xff] %vm92_vm0, %v55_v63  ;;  %v56_v0 = vld [vmem:[%s17191_s0 + $0xe8] sm:$0xff] }
  0x1d   :  { %11553 = vmatprep.mubr.msk.f32.mxu0 %vm92_vm0, %v13289_v45  ;;  %120 = vst.msk [vmem:[#allocation2 + $0x159] sm:$0xff] %vm92_vm0, %v54_v62  ;;  %v61_v1 = vld [vmem:[%s17191_s0 + $0x110] sm:$0xff]  ;;  %v62_v2 = vld [vmem:[%s17191_s0 + $0x118] sm:$0xff]  ;;  %122 = vst.msk [vmem:[#allocation2 + $0x171] sm:$0xff] %vm92_vm0, %v56_v0 }
  0x1e   :  { %v13366_v3 = vld [vmem:[#allocation2 + $0x78] sm:$0xff]  ;;  %163 = vst.msk [vmem:[#allocation2 + $0x1a1] sm:$0xff] %vm92_vm0, %v56_v0  ;;  %159 = vst.msk [vmem:[#allocation2 + $0x1b1] sm:$0xff] %vm92_vm0, %v61_v1  ;;  %v59_v4 = vld [vmem:[%s17191_s0 + $0x100] sm:$0xff] }
  0x1f   :  { %11266 = vmatmul.mubr.msk.f32.gmra.mrb[8].mxu1 %vm92_vm0, %v13293_v47  ;;  %127 = vst.msk [vmem:[#allocation2 + $0x1e1] sm:$0xff] %vm92_vm0, %v61_v1  ;;  %160 = vst.msk [vmem:[#allocation2 + $0x1b9] sm:$0xff] %vm92_vm0, %v62_v2  ;;  %v57_v6 = vld [vmem:[%s17191_s0 + $0xf0] sm:$0xff]  ;;  %v60_v7 = vld [vmem:[%s17191_s0 + $0x108] sm:$0xff] }
  0x20   :  { %11554 = vmatmul.mubr.msk.f32.gmra.mrb[4].mxu0 %vm92_vm0, %v13300_v48  ;;  %11268 = vmatprep.mubr.msk.f32.mxu1 %vm92_vm0, %v13307_v51  ;;  %128 = vst.msk [vmem:[#allocation2 + $0x1e9] sm:$0xff] %vm92_vm0, %v62_v2  ;;  %125 = vst.msk [vmem:[#allocation2 + $0x1c9] sm:$0xff] %vm92_vm0, %v59_v4  ;;  %v58_v8 = vld [vmem:[%s17191_s0 + $0xf8] sm:$0xff]  ;;  %v63_v9 = vld [vmem:[%s17191_s0 + $0x120] sm:$0xff] }
  0x21   :  { %11556 = vmatprep.mubr.msk.f32.mxu0 %vm92_vm0, %v13309_v52  ;;  %123 = vst.msk [vmem:[#allocation2 + $0x181] sm:$0xff] %vm92_vm0, %v57_v6  ;;  %v13397_v10 = vld [vmem:[#allocation2 + $0x99] sm:$0xff]  ;;  %126 = vst.msk [vmem:[#allocation2 + $0x1d1] sm:$0xff] %vm92_vm0, %v60_v7  ;;  %v13406_v12 = vld [vmem:[#allocation2 + $0xa9] sm:$0xff] }
  0x22   :  { %v13399_v11 = vld [vmem:[#allocation2 + $0x80] sm:$0xff]  ;;  %124 = vst.msk [vmem:[#allocation2 + $0x189] sm:$0xff] %vm92_vm0, %v58_v8  ;;  %129 = vst.msk [vmem:[#allocation2 + $0x1f9] sm:$0xff] %vm92_vm0, %v63_v9  ;;  %v64_v14 = vld [vmem:[%s17191_s0 + $0x128] sm:$0xff] }
  0x23   :  { %11269 = vmatmul.mubr.msk.f32.gmra.mrb[10].mxu1 %vm92_vm0, %v13316_v54  ;;  %v178_v13 = vld [vmem:[#allocation2 + $0x122] sm:$0x1]  ;;  %v13411_v15 = vld [vmem:[#allocation2 + $0x90] sm:$0xff]  ;;  %130 = vst.msk [vmem:[#allocation2 + $0x201] sm:$0xff] %vm92_vm0, %v64_v14  ;;  %v179_v17 = vld [vmem:[#allocation2 + $0x13a] sm:$0x1] }
  0x24   :  { %11557 = vmatmul.mubr.msk.f32.gmra.mrb[6].mxu0 %vm92_vm0, %v13327_v58  ;;  %11271 = vmatprep.mubr.msk.f32.mxu1 %vm92_vm0, %v13342_v61  ;;  %215 = vst.msk [vmem:[#allocation2 + $0x120] sm:$0x1] %vm202_vm1, %v178_v13  ;;  %v13421_v16 = vld [vmem:[#allocation2 + $0xb1] sm:$0xff]  ;;  %v13427_v19 = vld [vmem:[#allocation2 + $0xc1] sm:$0xff]  ;;  %216 = vst.msk [vmem:[#allocation2 + $0x138] sm:$0x1] %vm202_vm1, %v179_v17 }
  0x25   :  { %11559 = vmatprep.mubr.msk.f32.mxu0 %vm92_vm0, %v13366_v3  ;;  %v13425_v18 = vld [vmem:[#allocation2 + $0x98] sm:$0xff]  ;;  %v180_v20 = vld [vmem:[#allocation2 + $0x152] sm:$0x1]  ;;  %v13430_v21 = vld [vmem:[#allocation2 + $0xa8] sm:$0xff] }
  0x26   :  { %217 = vst.msk [vmem:[#allocation2 + $0x150] sm:$0x1] %vm202_vm1, %v180_v20  ;;  %v181_v22 = vld [vmem:[#allocation2 + $0x16a] sm:$0x1]  ;;  %v13444_v25 = vld [vmem:[#allocation2 + $0xb0] sm:$0xff]  ;;  %v13446_v27 = vld [vmem:[#allocation2 + $0xd9] sm:$0xff] }
  0x27   :  { %11272 = vmatmul.mubr.msk.f32.gmra.mrb[12].mxu1 %vm92_vm0, %v13397_v10  ;;  %218 = vst.msk [vmem:[#allocation2 + $0x168] sm:$0x1] %vm202_vm1, %v181_v22  ;;  %v13440_v23 = vld [vmem:[#allocation2 + $0xc9] sm:$0xff]  ;;  %v13449_v31 = vld [vmem:[#allocation2 + $0xc0] sm:$0xff]  ;;  %v13468_v46 = vld [vmem:[#allocation2 + $0xf1] sm:$0xff] }
  0x28   :  { %11560 = vmatmul.mubr.msk.f32.gmra.mrb[8].mxu0 %vm92_vm0, %v13399_v11  ;;  %11274 = vmatprep.mubr.msk.f32.mxu1 %vm92_vm0, %v13406_v12  ;;  %v182_v24 = vld [vmem:[#allocation2 + $0x182] sm:$0x1]  ;;  %v185_v29 = vld [vmem:[#allocation2 + $0x1ca] sm:$0x1]  ;;  %v65_v37 = vld [vmem:[%s17191_s0 + $0x130] sm:$0xff] }
  0x29   :  { %11562 = vmatprep.mubr.msk.f32.mxu0 %vm92_vm0, %v13411_v15  ;;  %219 = vst.msk [vmem:[#allocation2 + $0x180] sm:$0x1] %vm202_vm1, %v182_v24  ;;  %222 = vst.msk [vmem:[#allocation2 + $0x1c8] sm:$0x1] %vm202_vm1, %v185_v29  ;;  %v186_v32 = vld [vmem:[#allocation2 + $0x1e2] sm:$0x1] }
  0x2a   :  { %v13458_v34 = vld [vmem:[#allocation2 + $0xe1] sm:$0xff]  ;;  %223 = vst.msk [vmem:[#allocation2 + $0x1e0] sm:$0x1] %vm202_vm1, %v186_v32  ;;  %v187_v39 = vld [vmem:[#allocation2 + $0x1fa] sm:$0x1]  ;;  %v69_v59 = vld [vmem:[%s17191_s0 + $0x150] sm:$0xff] }
  0x2b   :  { %11275 = vmatmul.mubr.msk.f32.gmra.mrb[14].mxu1 %vm92_vm0, %v13421_v16  ;;  %v13466_v42 = vld [vmem:[#allocation2 + $0xc8] sm:$0xff]  ;;  %131 = vst.msk [vmem:[#allocation2 + $0x211] sm:$0xff] %vm92_vm0, %v65_v37  ;;  %v66_v49 = vld [vmem:[%s17191_s0 + $0x138] sm:$0xff]  ;;  %v67_v55 = vld [vmem:[%s17191_s0 + $0x140] sm:$0xff] }
  0x2c   :  { %11563 = vmatmul.mubr.msk.f32.gmra.mrb[10].mxu0 %vm92_vm0, %v13425_v18  ;;  %11277 = vmatprep.mubr.msk.f32.mxu1 %vm92_vm0, %v13427_v19  ;;  %224 = vst.msk [vmem:[#allocation2 + $0x1f8] sm:$0x1] %vm202_vm1, %v187_v39  ;;  %v13475_v50 = vld [vmem:[#allocation2 + $0xd8] sm:$0xff]  ;;  %v68_v56 = vld [vmem:[%s17191_s0 + $0x148] sm:$0xff]  ;;  %v13488_v57 = vld [vmem:[#allocation2 + $0xe0] sm:$0xff] }
  0x2d   :  { %11565 = vmatprep.mubr.msk.f32.mxu0 %vm92_vm0, %v13430_v21  ;;  %v13477_v53 = vld [vmem:[#allocation2 + $0xf9] sm:$0xff]  ;;  %132 = vst.msk [vmem:[#allocation2 + $0x219] sm:$0xff] %vm92_vm0, %v66_v49  ;;  %17287 = vst [vmem:[#allocation9_spill] sm:$0xff] %v13488_v57  ;;  %v13498_v60 = vld [vmem:[%s17192_s1 + $0x28] sm:$0xff] }
  0x2e   :  { %133 = vst.msk [vmem:[#allocation2 + $0x229] sm:$0xff] %vm92_vm0, %v67_v55  ;;  %134 = vst.msk [vmem:[#allocation2 + $0x231] sm:$0xff] %vm92_vm0, %v68_v56  ;;  %v70_v62 = vld [vmem:[%s17191_s0 + $0x158] sm:$0xff]  ;;  %v13507_v63 = vld [vmem:[#allocation2 + $0x109] sm:$0xff]  ;;  %11741 = vmatprep.subr.mxu0 %v13498_v60 }
  0x2f   :  { %11278 = vmatmul.mubr.msk.f32.gmra.mrb[16].mxu1 %vm92_vm0, %v13440_v23  ;;  %135 = vst.msk [vmem:[#allocation2 + $0x241] sm:$0xff] %vm92_vm0, %v69_v59  ;;  %136 = vst.msk [vmem:[#allocation2 + $0x249] sm:$0xff] %vm92_vm0, %v70_v62  ;;  %v71_v0 = vld [vmem:[%s17191_s0 + $0x160] sm:$0xff]  ;;  %v72_v1 = vld [vmem:[%s17191_s0 + $0x168] sm:$0xff] }
  0x30   :  { %11566 = vmatmul.mubr.msk.f32.gmra.mrb[12].mxu0 %vm92_vm0, %v13444_v25  ;;  %11280 = vmatprep.mubr.msk.f32.mxu1 %vm92_vm0, %v13446_v27  ;;  %v13519_v2 = vld [vmem:[#allocation2 + $0xf0] sm:$0xff]  ;;  %137 = vst.msk [vmem:[#allocation2 + $0x259] sm:$0xff] %vm92_vm0, %v71_v0  ;;  %138 = vst.msk [vmem:[#allocation2 + $0x261] sm:$0xff] %vm92_vm0, %v72_v1  ;;  %v74_v6 = vld [vmem:[%s17191_s0 + $0x178] sm:$0xff] }
  0x31   :  { %11568 = vmatprep.mubr.msk.f32.mxu0 %vm92_vm0, %v13449_v31  ;;  %17288 = vst [vmem:[#allocation10_spill] sm:$0xff] %v13519_v2  ;;  %v73_v4 = vld [vmem:[%s17191_s0 + $0x170] sm:$0xff]  ;;  %140 = vst.msk [vmem:[#allocation2 + $0x279] sm:$0xff] %vm92_vm0, %v74_v6  ;;  %v75_v7 = vld [vmem:[%s17191_s0 + $0x180] sm:$0xff] }
  0x32   :  { %139 = vst.msk [vmem:[#allocation2 + $0x271] sm:$0xff] %vm92_vm0, %v73_v4  ;;  %v76_v8 = vld [vmem:[%s17191_s0 + $0x188] sm:$0xff]  ;;  %v77_v9 = vld [vmem:[%s17191_s0 + $0x190] sm:$0xff]  ;;  %141 = vst.msk [vmem:[#allocation2 + $0x289] sm:$0xff] %vm92_vm0, %v75_v7 }
  0x33   :  { %11281 = vmatmul.mubr.msk.f32.gmra.mrb[18].mxu1 %vm92_vm0, %v13458_v34  ;;  %142 = vst.msk [vmem:[#allocation2 + $0x291] sm:$0xff] %vm92_vm0, %v76_v8  ;;  %143 = vst.msk [vmem:[#allocation2 + $0x2a1] sm:$0xff] %vm92_vm0, %v77_v9  ;;  %v78_v13 = vld [vmem:[%s17191_s0 + $0x198] sm:$0xff]  ;;  %v79_v14 = vld [vmem:[%s17191_s0 + $0x1a0] sm:$0xff] }
  0x34   :  { %11569 = vmatmul.mubr.msk.f32.gmra.mrb[14].mxu0 %vm92_vm0, %v13466_v42  ;;  %11283 = vmatprep.mubr.msk.f32.mxu1 %vm92_vm0, %v13468_v46  ;;  %v13556_v17 = vld [vmem:[#allocation2 + $0x111] sm:$0xff]  ;;  %144 = vst.msk [vmem:[#allocation2 + $0x2a9] sm:$0xff] %vm92_vm0, %v78_v13  ;;  %145 = vst.msk [vmem:[#allocation2 + $0x2b9] sm:$0xff] %vm92_vm0, %v79_v14  ;;  %v13564_v24 = vld [vmem:[#allocation2 + $0x121] sm:$0xff] }
  0x35   :  { %11571 = vmatprep.mubr.msk.f32.mxu0 %vm92_vm0, %v13475_v50  ;;  %v188_v20 = vld [vmem:[#allocation2 + $0x212] sm:$0x1]  ;;  %v13562_v22 = vld [vmem:[#allocation2 + $0xf8] sm:$0xff]  ;;  %v80_v29 = vld [vmem:[%s17191_s0 + $0x1a8] sm:$0xff] }
  0x36   :  { %17289 = vst [vmem:[#allocation11_spill] sm:$0xff] %v13562_v22  ;;  %225 = vst.msk [vmem:[#allocation2 + $0x210] sm:$0x1] %vm202_vm1, %v188_v20  ;;  %v13570_v32 = vld [vmem:[#allocation2 + $0x108] sm:$0xff]  ;;  %v81_v37 = vld [vmem:[%s17191_s0 + $0x1b0] sm:$0xff] }
  0x37   :  { %11284 = vmatmul.mubr.msk.f32.gmra.mrb[20].mxu1 %vm92_vm0, %v13477_v53  ;;  %17290 = vst [vmem:[#allocation12_spill] sm:$0xff] %v13570_v32  ;;  %146 = vst.msk [vmem:[#allocation2 + $0x2c1] sm:$0xff] %vm92_vm0, %v80_v29  ;;  %v82_v39 = vld [vmem:[%s17191_s0 + $0x1b8] sm:$0xff]  ;;  %v13586_v49 = vld [vmem:[#allocation2 + $0x129] sm:$0xff] }
  0x38   :  { %11572 = vmatmul.mubr.msk.f32.gmra.mrb[16].mxu0 %vm92_vm0, %v13488_v57  ;;  %11286 = vmatprep.mubr.msk.f32.mxu1 %vm92_vm0, %v13507_v63  ;;  %147 = vst.msk [vmem:[#allocation2 + $0x2d1] sm:$0xff] %vm92_vm0, %v81_v37  ;;  %148 = vst.msk [vmem:[#allocation2 + $0x2d9] sm:$0xff] %vm92_vm0, %v82_v39  ;;  %v83_v55 = vld [vmem:[%s17191_s0 + $0x1c0] sm:$0xff]  ;;  %v13594_v56 = vld [vmem:[#allocation2 + $0x110] sm:$0xff] }
  0x39   :  { %11574 = vmatprep.mubr.msk.f32.mxu0 %vm92_vm0, %v13519_v2  ;;  %17291 = vst [vmem:[#allocation13_spill] sm:$0xff] %v13594_v56  ;;  %v13596_v59 = vld [vmem:[#allocation2 + $0x139] sm:$0xff]  ;;  %149 = vst.msk [vmem:[#allocation2 + $0x2e9] sm:$0xff] %vm92_vm0, %v83_v55  ;;  %v84_v62 = vld [vmem:[%s17191_s0 + $0x1c8] sm:$0xff] }
  0x3a   :  { %v13602_v0 = vld [vmem:[#allocation2 + $0x120] sm:$0xff]  ;;  %150 = vst.msk [vmem:[#allocation2 + $0x2f1] sm:$0xff] %vm92_vm0, %v84_v62  ;;  %v85_v4 = vld [vmem:[%s17191_s0 + $0x1d0] sm:$0xff]  ;;  %v13616_v6 = vld [vmem:[#allocation2 + $0x128] sm:$0xff] }
  0x3b   :  { %11287 = vmatmul.mubr.msk.f32.gmra.mrb[22].mxu1 %vm92_vm0, %v13556_v17  ;;  %17292 = vst [vmem:[#allocation14_spill] sm:$0xff] %v13602_v0  ;;  %v13607_v1 = vld [vmem:[#allocation2 + $0x141] sm:$0xff]  ;;  %17293 = vst [vmem:[#allocation15_spill] sm:$0xff] %v13616_v6  ;;  %v86_v7 = vld [vmem:[%s17191_s0 + $0x1d8] sm:$0xff] }
  0x3c   :  { %11575 = vmatmul.mubr.msk.f32.gmra.mrb[18].mxu0 %vm92_vm0, %v13562_v22  ;;  %11289 = vmatprep.mubr.msk.f32.mxu1 %vm92_vm0, %v13564_v24  ;;  %151 = vst.msk [vmem:[#allocation2 + $0x301] sm:$0xff] %vm92_vm0, %v85_v4  ;;  %v87_v8 = vld [vmem:[%s17191_s0 + $0x1e0] sm:$0xff]  ;;  %v13627_v9 = vld [vmem:[#allocation2 + $0x151] sm:$0xff]  ;;  %152 = vst.msk [vmem:[#allocation2 + $0x309] sm:$0xff] %vm92_vm0, %v86_v7 }
  0x3d   :  { %11577 = vmatprep.mubr.msk.f32.mxu0 %vm92_vm0, %v13570_v32  ;;  %153 = vst.msk [vmem:[#allocation2 + $0x319] sm:$0xff] %vm92_vm0, %v87_v8  ;;  %164 = vst.msk [vmem:[#allocation2 + $0x349] sm:$0xff] %vm92_vm0, %v87_v8  ;;  %v88_v13 = vld [vmem:[%s17191_s0 + $0x1e8] sm:$0xff]  ;;  %v375_v14 = vld [vmem:[%s17192_s1] sm:$0xff] }
  0x3e   :  { %v13638_v20 = vld [vmem:[#allocation2 + $0x138] sm:$0xff]  ;;  %154 = vst.msk [vmem:[#allocation2 + $0x321] sm:$0xff] %vm92_vm0, %v88_v13  ;;  %165 = vst.msk [vmem:[#allocation2 + $0x351] sm:$0xff] %vm92_vm0, %v88_v13  ;;  %11349 = vmatprep.subr.mxu1 %v375_v14  ;;  %v166_v29 = vld [vmem:[#allocation2 + $0x2] sm:$0x1] }
  0x3f   :  { %11290 = vmatmul.mubr.msk.f32.gmra.mrb[24].mxu1 %vm92_vm0, %v13586_v49  ;;  %17294 = vst [vmem:[#allocation16_spill] sm:$0xff] %v13638_v20  ;;  %203 = vst.msk [vmem:[#allocation2] sm:$0x1] %vm202_vm1, %v166_v29  ;;  %v13649_v37 = vld [vmem:[#allocation2 + $0x159] sm:$0xff] }
  0x40   :  { %11578 = vmatmul.mubr.msk.f32.gmra.mrb[20].mxu0 %vm92_vm0, %v13594_v56  ;;  %11292 = vmatprep.mubr.msk.f32.mxu1 %vm92_vm0, %v13596_v59 }
  0x41   :  { %11580 = vmatprep.mubr.msk.f32.mxu0 %vm92_vm0, %v13602_v0 }
  0x43   :  { %11293 = vmatmul.mubr.msk.f32.gmra.mrb[26].mxu1 %vm92_vm0, %v13607_v1 }
  0x44   :  { %11581 = vmatmul.mubr.msk.f32.gmra.mrb[22].mxu0 %vm92_vm0, %v13616_v6  ;;  %11295 = vmatprep.mubr.msk.f32.mxu1 %vm92_vm0, %v13627_v9 }
  0x45   :  { %12 = vsyncpa [#allocation7], 0  ;;  %11583 = vmatprep.mubr.msk.f32.mxu0 %vm92_vm0, %v13638_v20  ;;  %v13653_v39 = vld [vmem:[#allocation2 + $0x140] sm:$0xff]  ;;  %v13655_v55 = vld [vmem:[#allocation2 + $0x169] sm:$0xff]  ;;  %11350 = vmatpush3.msra.mxu1 %v375_v14  ;;  %vm17261_vm2 = vcmask 130048  }
  0x46   :  { %17295 = vst [vmem:[#allocation17_spill] sm:$0xff] %v13653_v39  ;;  %v13657_v62 = vld [vmem:[#allocation2 + $0x150] sm:$0xff]  ;;  %v13670_v8 = vld [vmem:[#allocation2 + $0x158] sm:$0xff]  ;;  %v13672_v14 = vld [vmem:[#allocation2 + $0x168] sm:$0xff] }
  0x47   :  { %17296 = vst [vmem:[#allocation18_spill] sm:$0xff] %v13657_v62  ;;  %v184_v4 = vld [vmem:[#allocation2 + $0x1b2] sm:$0x1]  ;;  %11296 = vmatmul.mubr.msk.f32.gmra.mrb[28].mxu1 %vm92_vm0, %v13649_v37  ;;  %17297 = vst [vmem:[#allocation19_spill] sm:$0xff] %v13670_v8  ;;  %v409_v29 = vld [vmem:[#allocation2 + $0x1b9] sm:$0xff] }
  0x48   :  { %221 = vst.msk [vmem:[#allocation2 + $0x1b0] sm:$0x1] %vm202_vm1, %v184_v4  ;;  %11584 = vmatmul.mubr.msk.f32.gmra.mrb[24].mxu0 %vm92_vm0, %v13653_v39  ;;  %11298 = vmatprep.mubr.msk.f32.mxu1 %vm92_vm0, %v13655_v55  ;;  %v13666_v7 = vld [vmem:[#allocation2 + $0x171] sm:$0xff]  ;;  %17298 = vst [vmem:[#allocation20_spill] sm:$0xff] %v13672_v14  ;;  %v2333_v39 = vld [vmem:[#allocation2 + $0x180] sm:$0xff] }
  0x49   :  { %11586 = vmatprep.mubr.msk.f32.mxu0 %vm92_vm0, %v13657_v62  ;;  %v408_v13 = vld [vmem:[#allocation2 + $0x1b1] sm:$0xff]  ;;  %v13683_v62 = vld [vmem:[#allocation2 + $0x1c9] sm:$0xff]  ;;  %v13693_v20 = vld [vmem:[#allocation2 + $0x1e1] sm:$0xff] }
  0x4a   :  { %v13681_v4 = vld [vmem:[#allocation2 + $0x170] sm:$0xff]  ;;  %v13710_v6 = vld [vmem:[#allocation2 + $0x1e0] sm:$0xff]  ;;  %v13726_v56 = vld [vmem:[#allocation2 + $0x1f8] sm:$0xff] }
  0x4b   :  { %11299 = vmatmul.mubr.msk.f32.gmra.mrb[30].mxu1 %vm92_vm0, %v13666_v7  ;;  %17299 = vst [vmem:[#allocation21_spill] sm:$0xff] %v13681_v4  ;;  %17302 = vst [vmem:[#allocation24_spill] sm:$0xff] %v13710_v6  ;;  %v13724_v0 = vld [vmem:[#allocation2 + $0x211] sm:$0xff]  ;;  %v189_v32 = vld [vmem:[#allocation2 + $0x22a] sm:$0x1] }
  0x4c   :  { %11587 = vmatmul.mubr.msk.f32.gmra.mrb[26].mxu0 %vm92_vm0, %v13670_v8  ;;  %11301 = vmatprep.mubr.msk.f32.mxu1 %vm92_vm0, %v408_v13  ;;  %v13690_v8 = vld [vmem:[#allocation2 + $0x1d1] sm:$0xff]  ;;  %v2334_v13 = vld [vmem:[#allocation2 + $0x188] sm:$0xff]  ;;  %17304 = vst [vmem:[#allocation26_spill] sm:$0xff] %v13724_v0  ;;  %17305 = vst [vmem:[#allocation27_spill] sm:$0xff] %v13726_v56 }
  0x4d   :  { %11589 = vmatprep.mubr.msk.f32.mxu0 %vm92_vm0, %v13672_v14  ;;  %v13695_v14 = vld [vmem:[#allocation2 + $0x1c8] sm:$0xff]  ;;  %v89_v22 = vld [vmem:[%s17191_s0 + $0x1f0] sm:$0xff]  ;;  %226 = vst.msk [vmem:[#allocation2 + $0x228] sm:$0x1] %vm202_vm1, %v189_v32  ;;  %v13747_v32 = vld [vmem:[#allocation2 + $0x200] sm:$0xff] }
  0x4e   :  { %17300 = vst [vmem:[#allocation22_spill] sm:$0xff] %v13695_v14  ;;  %155 = vst.msk [vmem:[#allocation2 + $0x331] sm:$0xff] %vm92_vm0, %v89_v22  ;;  %v13749_v22 = vld [vmem:[#allocation2 + $0x229] sm:$0xff]  ;;  %v190_v57 = vld [vmem:[#allocation2 + $0x242] sm:$0x1] }
  0x4f   :  { %11302 = vmatmul.mubr.msk.f32.gmra.mrb[32].mxu1 %vm92_vm0, %v409_v29  ;;  %v13702_v29 = vld [vmem:[#allocation2 + $0x1e9] sm:$0xff]  ;;  %17307 = vst [vmem:[#allocation29_spill] sm:$0xff] %v13747_v32  ;;  %227 = vst.msk [vmem:[#allocation2 + $0x240] sm:$0x1] %vm202_vm1, %v190_v57  ;;  %v241_v57 = vld [vmem:[#allocation2 + $0x3f] sm:$0x1] }
  0x50   :  { %11590 = vmatmul.mubr.msk.f32.gmra.mrb[28].mxu0 %vm92_vm0, %v13681_v4  ;;  %11304 = vmatprep.mubr.msk.f32.mxu1 %vm92_vm0, %v13683_v62  ;;  %v13706_v4 = vld [vmem:[#allocation2 + $0x1d0] sm:$0xff]  ;;  %277 = vst.msk [vmem:[#allocation2 + $0x41] sm:$0x1] %vm202_vm1, %v241_v57 }
  0x51   :  { %11592 = vmatprep.mubr.msk.f32.mxu0 %vm92_vm0, %v2333_v39  ;;  %17301 = vst [vmem:[#allocation23_spill] sm:$0xff] %v13706_v4  ;;  %v13708_v39 = vld [vmem:[#allocation2 + $0x1f9] sm:$0xff]  ;;  %v13751_v2 = vld [vmem:[#allocation2 + $0x210] sm:$0xff] }
  0x52   :  { %17308 = vst [vmem:[#allocation30_spill] sm:$0xff] %v13751_v2  ;;  %v13801_v57 = vld [vmem:[#allocation2 + $0x271] sm:$0xff] }
  0x53   :  { %11305 = vmatmul.mubr.msk.f32.gmra.mrb[34].mxu1 %vm92_vm0, %v13690_v8 }
  0x54   :  { %11593 = vmatmul.mubr.msk.f32.gmra.mrb[30].mxu0 %vm92_vm0, %v2334_v13  ;;  %11307 = vmatprep.mubr.msk.f32.mxu1 %vm92_vm0, %v13693_v20  ;;  %v13718_v13 = vld [vmem:[#allocation2 + $0x201] sm:$0xff] }
  0x55   :  { %11595 = vmatprep.mubr.msk.f32.mxu0 %vm92_vm0, %v13695_v14  ;;  %v13722_v14 = vld [vmem:[#allocation2 + $0x1e8] sm:$0xff] }
  0x56   :  { %17303 = vst [vmem:[#allocation25_spill] sm:$0xff] %v13722_v14 }
  0x57   :  { %11308 = vmatmul.mubr.msk.f32.gmra.mrb[36].mxu1 %vm92_vm0, %v13702_v29 }
  0x58   :  { %11596 = vmatmul.mubr.msk.f32.gmra.mrb[32].mxu0 %vm92_vm0, %v13706_v4  ;;  %11310 = vmatprep.mubr.msk.f32.mxu1 %vm92_vm0, %v13708_v39  ;;  %v13742_v4 = vld [vmem:[#allocation2 + $0x219] sm:$0xff] }
  0x59   :  { %11598 = vmatprep.mubr.msk.f32.mxu0 %vm92_vm0, %v13710_v6  ;;  %v90_v6 = vld [vmem:[%s17191_s0 + $0x1f8] sm:$0xff]  ;;  %17306 = vst [vmem:[#allocation28_spill] sm:$0xff] %v13742_v4 }
  0x5a   :  { %156 = vst.msk [vmem:[#allocation2 + $0x339] sm:$0xff] %vm92_vm0, %v90_v6  ;;  %v13760_v6 = vld [vmem:[#allocation2 + $0x231] sm:$0xff] }
  0x5b   :  { %11311 = vmatmul.mubr.msk.f32.gmra.mrb[38].mxu1 %vm92_vm0, %v13718_v13 }
  0x5c   :  { %11599 = vmatmul.mubr.msk.f32.gmra.mrb[34].mxu0 %vm92_vm0, %v13722_v14  ;;  %11313 = vmatprep.mubr.msk.f32.mxu1 %vm92_vm0, %v13724_v0  ;;  %v240_v14 = vld [vmem:[#allocation2 + $0x27] sm:$0x1] }
  0x5d   :  { %11601 = vmatprep.mubr.msk.f32.mxu0 %vm92_vm0, %v13726_v56  ;;  %276 = vst.msk [vmem:[#allocation2 + $0x29] sm:$0x1] %vm202_vm1, %v240_v14  ;;  %v13765_v56 = vld [vmem:[#allocation2 + $0x218] sm:$0xff]  ;;  %v13767_v0 = vld [vmem:[#allocation2 + $0x241] sm:$0xff]  ;;  %v13776_v14 = vld [vmem:[#allocation2 + $0x249] sm:$0xff] }
  0x5e   :  { %17309 = vst [vmem:[#allocation31_spill] sm:$0xff] %v13765_v56 }
  0x5f   :  { %11314 = vmatmul.mubr.msk.f32.gmra.mrb[40].mxu1 %vm92_vm0, %v13742_v4  ;;  %v191_v4 = vld [vmem:[#allocation2 + $0x25a] sm:$0x1] }
  0x60   :  { %11602 = vmatmul.mubr.msk.f32.gmra.mrb[36].mxu0 %vm92_vm0, %v13747_v32  ;;  %11316 = vmatprep.mubr.msk.f32.mxu1 %vm92_vm0, %v13749_v22  ;;  %228 = vst.msk [vmem:[#allocation2 + $0x258] sm:$0x1] %vm202_vm1, %v191_v4  ;;  %v192_v32 = vld [vmem:[#allocation2 + $0x272] sm:$0x1] }
  0x61   :  { %11604 = vmatprep.mubr.msk.f32.mxu0 %vm92_vm0, %v13751_v2  ;;  %v13781_v2 = vld [vmem:[#allocation2 + $0x259] sm:$0xff]  ;;  %v13788_v4 = vld [vmem:[%s17192_s1 + $0x30] sm:$0xff]  ;;  %229 = vst.msk [vmem:[#allocation2 + $0x270] sm:$0x1] %vm202_vm1, %v192_v32  ;;  %v193_v32 = vld [vmem:[#allocation2 + $0x28a] sm:$0x1] }
  0x62   :  { %230 = vst.msk [vmem:[#allocation2 + $0x288] sm:$0x1] %vm202_vm1, %v193_v32  ;;  %v244_v32 = vld [vmem:[#allocation2 + $0x87] sm:$0x1] }
  0x63   :  { %11317 = vmatmul.mubr.msk.f32.gmra.mrb[42].mxu1 %vm92_vm0, %v13760_v6  ;;  %280 = vst.msk [vmem:[#allocation2 + $0x89] sm:$0x1] %vm202_vm1, %v244_v32  ;;  %v196_v32 = vld [vmem:[#allocation2 + $0x2d2] sm:$0x1] }
  0x64   :  { %11605 = vmatmul.mubr.msk.f32.gmra.mrb[38].mxu0 %vm92_vm0, %v13765_v56  ;;  %11319 = vmatprep.mubr.msk.f32.mxu1 %vm92_vm0, %v13767_v0  ;;  %v242_v56 = vld [vmem:[#allocation2 + $0x57] sm:$0x1]  ;;  %233 = vst.msk [vmem:[#allocation2 + $0x2d0] sm:$0x1] %vm202_vm1, %v196_v32  ;;  %v247_v32 = vld [vmem:[#allocation2 + $0xcf] sm:$0x1] }
  0x65   :  { %11645 = vmatprep.mubr.msk.f32.mxu0 %vm92_vm0, %v13241_v26  ;;  %v13795_v26 = vld [vmem:[#allocation2 + $0x261] sm:$0xff]  ;;  %278 = vst.msk [vmem:[#allocation2 + $0x59] sm:$0x1] %vm202_vm1, %v242_v56  ;;  %283 = vst.msk [vmem:[#allocation2 + $0xd1] sm:$0x1] %vm202_vm1, %v247_v32 }
  0x66   :  { %v194_v56 = vld [vmem:[#allocation2 + $0x2a2] sm:$0x1]  ;;  %v199_v32 = vld [vmem:[#allocation2 + $0x31a] sm:$0x1] }
  0x67   :  { %11320 = vmatmul.mubr.msk.f32.gmra.mrb[44].mxu1 %vm92_vm0, %v13776_v14  ;;  %231 = vst.msk [vmem:[#allocation2 + $0x2a0] sm:$0x1] %vm202_vm1, %v194_v56  ;;  %v245_v56 = vld [vmem:[#allocation2 + $0x9f] sm:$0x1]  ;;  %236 = vst.msk [vmem:[#allocation2 + $0x318] sm:$0x1] %vm202_vm1, %v199_v32 }
  0x68   :  { %11646 = vmatmul.mubr.msk.f32.vlgmr.msra.gmra.mrb[0].mxu0 %vm92_vm0, %v13247_v28  ;;  %11322 = vmatprep.mubr.msk.f32.mxu1 %vm92_vm0, %v13781_v2  ;;  %v243_v28 = vld [vmem:[#allocation2 + $0x6f] sm:$0x1]  ;;  %281 = vst.msk [vmem:[#allocation2 + $0xa1] sm:$0x1] %vm202_vm1, %v245_v56  ;;  %v197_v56 = vld [vmem:[#allocation2 + $0x2ea] sm:$0x1] }
  0x69   :  { %11742 = vmatpush3.msra.mxu0 %v13498_v60  ;;  %11648 = vmatprep.mubr.msk.f32.mxu0 %vm92_vm0, %v13249_v30  ;;  %v13811_v60 = vld [vmem:[#allocation2 + $0x279] sm:$0xff]  ;;  %279 = vst.msk [vmem:[#allocation2 + $0x71] sm:$0x1] %vm202_vm1, %v243_v28  ;;  %v13816_v30 = vld [vmem:[#allocation2 + $0x289] sm:$0xff]  ;;  %234 = vst.msk [vmem:[#allocation2 + $0x2e8] sm:$0x1] %vm202_vm1, %v197_v56 }
  0x6a   :  { %11839 = vmatprep.subr.mxu0 %v13788_v4  ;;  %v195_v28 = vld [vmem:[#allocation2 + $0x2ba] sm:$0x1]  ;;  %v248_v56 = vld [vmem:[#allocation2 + $0xe7] sm:$0x1]  ;;  %v250_v32 = vld [vmem:[#allocation2 + $0x117] sm:$0x1] }
  0x6b   :  { %11323 = vmatmul.mubr.msk.f32.gmra.mrb[46].mxu1 %vm92_vm0, %v13795_v26  ;;  %232 = vst.msk [vmem:[#allocation2 + $0x2b8] sm:$0x1] %vm202_vm1, %v195_v28  ;;  %v246_v28 = vld [vmem:[#allocation2 + $0xb7] sm:$0x1]  ;;  %284 = vst.msk [vmem:[#allocation2 + $0xe9] sm:$0x1] %vm202_vm1, %v248_v56 }
  0x6c   :  { %11649 = vmatmul.mubr.msk.f32.gmra.mrb[2].mxu0 %vm92_vm0, %v13258_v33  ;;  %11325 = vmatprep.mubr.msk.f32.mxu1 %vm92_vm0, %v13801_v57  ;;  %v13825_v33 = vld [vmem:[#allocation2 + $0x291] sm:$0xff]  ;;  %282 = vst.msk [vmem:[#allocation2 + $0xb9] sm:$0x1] %vm202_vm1, %v246_v28  ;;  %v198_v28 = vld [vmem:[#allocation2 + $0x302] sm:$0x1] }
  0x6d   :  { %11651 = vmatprep.mubr.msk.f32.mxu0 %vm92_vm0, %v13262_v36  ;;  %v13830_v36 = vld [vmem:[#allocation2 + $0x2a1] sm:$0xff]  ;;  %235 = vst.msk [vmem:[#allocation2 + $0x300] sm:$0x1] %vm202_vm1, %v198_v28  ;;  %v249_v28 = vld [vmem:[#allocation2 + $0xff] sm:$0x1] }
  0x6e   :  { %285 = vst.msk [vmem:[#allocation2 + $0x101] sm:$0x1] %vm202_vm1, %v249_v28  ;;  %v239_v56 = vld [vmem:[#allocation2 + $0xf] sm:$0x1]  ;;  %286 = vst.msk [vmem:[#allocation2 + $0x119] sm:$0x1] %vm202_vm1, %v250_v32 }
  0x6f   :  { %11326 = vmatmul.mubr.msk.f32.gmra.mrb[48].mxu1 %vm92_vm0, %v13811_v60  ;;  %275 = vst.msk [vmem:[#allocation2 + $0x11] sm:$0x1] %vm202_vm1, %v239_v56  ;;  %v251_v28 = vld [vmem:[#allocation2 + $0x12f] sm:$0x1]  ;;  %v9889_v56 = vld [vmem:[%s17192_s1 + $0x10] sm:$0xff] }
  0x70   :  { %11652 = vmatmul.mubr.msk.f32.gmra.mrb[4].mxu0 %vm92_vm0, %v13278_v41  ;;  %11328 = vmatprep.mubr.msk.f32.mxu1 %vm92_vm0, %v13816_v30  ;;  %v13839_v41 = vld [vmem:[#allocation2 + $0x2a9] sm:$0xff]  ;;  %287 = vst.msk [vmem:[#allocation2 + $0x131] sm:$0x1] %vm202_vm1, %v251_v28  ;;  %v14130_v32 = vld [vmem:[#allocation2 + $0x32] sm:$0xff]  ;;  %v14148_v28 = vld [vmem:[#allocation2 + $0x3a] sm:$0xff] }
  0x71   :  { %11654 = vmatprep.mubr.msk.f32.mxu0 %vm92_vm0, %v13286_v44  ;;  %v13844_v44 = vld [vmem:[#allocation2 + $0x2b9] sm:$0xff]  ;;  %11447 = vmatprep.subr.mxu1 %v9889_v56 }
  0x73   :  { %11329 = vmatmul.mubr.msk.f32.gmra.mrb[50].mxu1 %vm92_vm0, %v13825_v33 }
  0x74   :  { %11655 = vmatmul.mubr.msk.f32.gmra.mrb[6].mxu0 %vm92_vm0, %v13293_v47  ;;  %11331 = vmatprep.mubr.msk.f32.mxu1 %vm92_vm0, %v13830_v36  ;;  %v13853_v47 = vld [vmem:[#allocation2 + $0x2c1] sm:$0xff] }
  0x75   :  { %11657 = vmatprep.mubr.msk.f32.mxu0 %vm92_vm0, %v13307_v51  ;;  %v13858_v51 = vld [vmem:[#allocation2 + $0x2d1] sm:$0xff] }
  0x77   :  { %11332 = vmatmul.mubr.msk.f32.gmra.mrb[52].mxu1 %vm92_vm0, %v13839_v41 }
  0x78   :  { %11658 = vmatmul.mubr.msk.f32.gmra.mrb[8].mxu0 %vm92_vm0, %v13316_v54  ;;  %11334 = vmatprep.mubr.msk.f32.mxu1 %vm92_vm0, %v13844_v44  ;;  %v13867_v54 = vld [vmem:[#allocation2 + $0x2d9] sm:$0xff] }
  0x79   :  { %11660 = vmatprep.mubr.msk.f32.mxu0 %vm92_vm0, %v13342_v61  ;;  %v13872_v61 = vld [vmem:[#allocation2 + $0x2e9] sm:$0xff] }
  0x7b   :  { %11335 = vmatmul.mubr.msk.f32.gmra.mrb[54].mxu1 %vm92_vm0, %v13853_v47 }
  0x7c   :  { %11661 = vmatmul.mubr.msk.f32.gmra.mrb[10].mxu0 %vm92_vm0, %v13397_v10  ;;  %11337 = vmatprep.mubr.msk.f32.mxu1 %vm92_vm0, %v13858_v51  ;;  %v13881_v10 = vld [vmem:[#allocation2 + $0x2f1] sm:$0xff] }
  0x7d   :  { %11663 = vmatprep.mubr.msk.f32.mxu0 %vm92_vm0, %v13406_v12  ;;  %v13886_v12 = vld [vmem:[#allocation2 + $0x301] sm:$0xff] }
  0x7f   :  { %11338 = vmatmul.mubr.msk.f32.gmra.mrb[56].mxu1 %vm92_vm0, %v13867_v54 }
  0x80   :  { %11664 = vmatmul.mubr.msk.f32.gmra.mrb[12].mxu0 %vm92_vm0, %v13421_v16  ;;  %11340 = vmatprep.mubr.msk.f32.mxu1 %vm92_vm0, %v13872_v61  ;;  %v13895_v16 = vld [vmem:[#allocation2 + $0x309] sm:$0xff] }
  0x81   :  { %11666 = vmatprep.mubr.msk.f32.mxu0 %vm92_vm0, %v13427_v19  ;;  %v13900_v19 = vld [vmem:[#allocation2 + $0x319] sm:$0xff] }
  0x83   :  { %11341 = vmatmul.mubr.msk.f32.gmra.mrb[58].mxu1 %vm92_vm0, %v13881_v10 }
  0x84   :  { %11667 = vmatmul.mubr.msk.f32.gmra.mrb[14].mxu0 %vm92_vm0, %v13440_v23  ;;  %11343 = vmatprep.mubr.msk.f32.mxu1 %vm92_vm0, %v13886_v12  ;;  %v13908_v23 = vld [vmem:[#allocation2 + $0x321] sm:$0xff] }
  0x85   :  { %11669 = vmatprep.mubr.msk.f32.mxu0 %vm92_vm0, %v13446_v27  ;;  %v311_v27 = vld [vmem:[#allocation2] sm:$0xff] }
  0x87   :  { %11344 = vmatmul.mubr.msk.f32.gmra.mrb[60].mxu1 %vm92_vm0, %v13895_v16 }
  0x88   :  { %11670 = vmatmul.mubr.msk.f32.gmra.mrb[16].mxu0 %vm92_vm0, %v13458_v34  ;;  %11346 = vmatprep.mubr.msk.f32.mxu1 %vm92_vm0, %v13900_v19  ;;  %v312_v34 = vld [vmem:[#allocation2 + $0x8] sm:$0xff] }
  0x89   :  { %11672 = vmatprep.mubr.msk.f32.mxu0 %vm92_vm0, %v13468_v46  ;;  %v252_v46 = vld [vmem:[#allocation2 + $0x147] sm:$0x1] }
  0x8a   :  { %288 = vst.msk [vmem:[#allocation2 + $0x149] sm:$0x1] %vm202_vm1, %v252_v46  ;;  %v14165_v46 = vld [vmem:[#allocation2 + $0x52] sm:$0xff] }
  0x8b   :  { %11347 = vmatmul.mubr.msk.f32.gmra.mrb[62].mxu1 %vm92_vm0, %v13908_v23 }
  0x8c   :  { %11673 = vmatmul.mubr.msk.f32.gmra.mrb[18].mxu0 %vm92_vm0, %v13477_v53  ;;  %11351 = vmatprep.mubr.msk.f32.mxu1 %vm92_vm0, %v311_v27  ;;  %v253_v53 = vld [vmem:[#allocation2 + $0x15f] sm:$0x1]  ;;  %v14143_v27 = vld [vmem:[#allocation2 + $0x260] sm:$0xff] }
  0x8d   :  { %11675 = vmatprep.mubr.msk.f32.mxu0 %vm92_vm0, %v13507_v63  ;;  %289 = vst.msk [vmem:[#allocation2 + $0x161] sm:$0x1] %vm202_vm1, %v253_v53  ;;  %v265_v63 = vld [vmem:[#allocation2 + $0x27f] sm:$0x1]  ;;  %v14167_v53 = vld [vmem:[#allocation2 + $0x288] sm:$0xff] }
  0x8e   :  { %301 = vst.msk [vmem:[#allocation2 + $0x281] sm:$0x1] %vm202_vm1, %v265_v63  ;;  %v14245_v63 = vld [vmem:[#allocation2 + $0xca] sm:$0xff] }
  0x8f   :  { %11352 = vmatmul.mubr.msk.f32.vlgmr.msra.gmra.mrb[0].mxu1 %vm92_vm0, %v312_v34  ;;  %v14150_v34 = vld [vmem:[#allocation2 + $0x270] sm:$0xff] }
  0x90   :  { %11676 = vmatmul.mubr.msk.f32.gmra.mrb[20].mxu0 %vm92_vm0, %v13556_v17  ;;  %11354 = vmatprep.mubr.msk.f32.mxu1 %vm92_vm0, %v13265_v38  ;;  %v254_v38 = vld [vmem:[#allocation2 + $0x177] sm:$0x1]  ;;  %v17317_v17 = vld [vmem:[#allocation14_spill] sm:$0xff] }
  0x91   :  { %11678 = vmatprep.mubr.msk.f32.mxu0 %vm92_vm0, %v13564_v24  ;;  %11448 = vmatpush3.msra.mxu1 %v9889_v56  ;;  %290 = vst.msk [vmem:[#allocation2 + $0x179] sm:$0x1] %vm202_vm1, %v254_v38  ;;  %v17318_v24 = vld [vmem:[#allocation15_spill] sm:$0xff]  ;;  %v14169_v38 = vld [vmem:[#allocation2 + $0x62] sm:$0xff] }
  0x92   :  { %12421 = vmatprep.subr.mxu1 %v13160_v5  ;;  %v255_v5 = vld [vmem:[#allocation2 + $0x18f] sm:$0x1] }
  0x93   :  { %11355 = vmatmul.mubr.msk.f32.gmra.mrb[2].mxu1 %vm92_vm0, %v13260_v35  ;;  %291 = vst.msk [vmem:[#allocation2 + $0x191] sm:$0x1] %vm202_vm1, %v255_v5  ;;  %v3040_v35 = vld [vmem:[#allocation2 + $0x181] sm:$0xff]  ;;  %v14152_v56 = vld [vmem:[#allocation2 + $0x4a] sm:$0xff] }
  0x94   :  { %11679 = vmatmul.mubr.msk.f32.gmra.mrb[22].mxu0 %vm92_vm0, %v13586_v49  ;;  %11357 = vmatprep.mubr.msk.f32.mxu1 %vm92_vm0, %v13276_v40  ;;  %v258_v40 = vld [vmem:[#allocation2 + $0x1d7] sm:$0x1] }
  0x95   :  { %11681 = vmatprep.mubr.msk.f32.mxu0 %vm92_vm0, %v13596_v59  ;;  %294 = vst.msk [vmem:[#allocation2 + $0x1d9] sm:$0x1] %vm202_vm1, %v258_v40  ;;  %v266_v49 = vld [vmem:[#allocation2 + $0x297] sm:$0x1]  ;;  %v17319_v59 = vld [vmem:[#allocation16_spill] sm:$0xff]  ;;  %v14183_v40 = vld [vmem:[#allocation2 + $0x2a0] sm:$0xff] }
  0x96   :  { %302 = vst.msk [vmem:[#allocation2 + $0x299] sm:$0x1] %vm202_vm1, %v266_v49  ;;  %v14177_v5 = vld [vmem:[#allocation2 + $0x290] sm:$0xff]  ;;  %v14257_v49 = vld [vmem:[#allocation2 + $0x308] sm:$0xff] }
  0x97   :  { %11358 = vmatmul.mubr.msk.f32.gmra.mrb[4].mxu1 %vm92_vm0, %v13284_v43  ;;  %v3041_v43 = vld [vmem:[#allocation2 + $0x189] sm:$0xff] }
  0x98   :  { %11682 = vmatmul.mubr.msk.f32.gmra.mrb[24].mxu0 %vm92_vm0, %v13607_v1  ;;  %11360 = vmatprep.mubr.msk.f32.mxu1 %vm92_vm0, %v13289_v45  ;;  %v259_v45 = vld [vmem:[#allocation2 + $0x1ef] sm:$0x1] }
  0x99   :  { %11684 = vmatprep.mubr.msk.f32.mxu0 %vm92_vm0, %v13627_v9  ;;  %295 = vst.msk [vmem:[#allocation2 + $0x1f1] sm:$0x1] %vm202_vm1, %v259_v45  ;;  %v267_v1 = vld [vmem:[#allocation2 + $0x2af] sm:$0x1]  ;;  %v17322_v9 = vld [vmem:[#allocation19_spill] sm:$0xff] }
  0x9a   :  { %303 = vst.msk [vmem:[#allocation2 + $0x2b1] sm:$0x1] %vm202_vm1, %v267_v1  ;;  %v14193_v45 = vld [vmem:[#allocation2 + $0x2a8] sm:$0xff]  ;;  %v14265_v1 = vld [vmem:[#allocation2 + $0xf2] sm:$0xff] }
  0x9b   :  { %11361 = vmatmul.mubr.msk.f32.gmra.mrb[6].mxu1 %vm92_vm0, %v13300_v48  ;;  %v260_v48 = vld [vmem:[#allocation2 + $0x207] sm:$0x1] }
  0x9c   :  { %11685 = vmatmul.mubr.msk.f32.gmra.mrb[26].mxu0 %vm92_vm0, %v13649_v37  ;;  %11363 = vmatprep.mubr.msk.f32.mxu1 %vm92_vm0, %v13309_v52  ;;  %296 = vst.msk [vmem:[#allocation2 + $0x209] sm:$0x1] %vm202_vm1, %v260_v48  ;;  %v261_v52 = vld [vmem:[#allocation2 + $0x21f] sm:$0x1]  ;;  %v268_v37 = vld [vmem:[#allocation2 + $0x2c7] sm:$0x1] }
  0x9d   :  { %11687 = vmatprep.mubr.msk.f32.mxu0 %vm92_vm0, %v13655_v55  ;;  %297 = vst.msk [vmem:[#allocation2 + $0x221] sm:$0x1] %vm202_vm1, %v261_v52  ;;  %v17323_v55 = vld [vmem:[#allocation20_spill] sm:$0xff]  ;;  %304 = vst.msk [vmem:[#allocation2 + $0x2c9] sm:$0x1] %vm202_vm1, %v268_v37  ;;  %v14197_v48 = vld [vmem:[#allocation2 + $0x82] sm:$0xff] }
  0x9e   :  { %v14199_v52 = vld [vmem:[#allocation2 + $0x2b8] sm:$0xff]  ;;  %v14279_v37 = vld [vmem:[#allocation2 + $0x10a] sm:$0xff] }
  0x9f   :  { %11364 = vmatmul.mubr.msk.f32.gmra.mrb[8].mxu1 %vm92_vm0, %v13327_v58  ;;  %v262_v58 = vld [vmem:[#allocation2 + $0x237] sm:$0x1] }
  0xa0   :  { %11688 = vmatmul.mubr.msk.f32.gmra.mrb[28].mxu0 %vm92_vm0, %v13666_v7  ;;  %11366 = vmatprep.mubr.msk.f32.mxu1 %vm92_vm0, %v13366_v3  ;;  %298 = vst.msk [vmem:[#allocation2 + $0x239] sm:$0x1] %vm202_vm1, %v262_v58  ;;  %v17310_v3 = vld [vmem:[#allocation26_spill] sm:$0xff]  ;;  %v17324_v7 = vld [vmem:[#allocation21_spill] sm:$0xff]  ;;  %v14201_v58 = vld [vmem:[#allocation2 + $0x92] sm:$0xff] }
  0xa1   :  { %11690 = vmatprep.mubr.msk.f32.mxu0 %vm92_vm0, %v3040_v35  ;;  %v14181_v35 = vld [vmem:[#allocation2 + $0x6a] sm:$0xff] }
  0xa3   :  { %11367 = vmatmul.mubr.msk.f32.gmra.mrb[10].mxu1 %vm92_vm0, %v13399_v11  ;;  %v17311_v11 = vld [vmem:[#allocation9_spill] sm:$0xff] }
  0xa4   :  { %11691 = vmatmul.mubr.msk.f32.gmra.mrb[30].mxu0 %vm92_vm0, %v3041_v43  ;;  %11369 = vmatprep.mubr.msk.f32.mxu1 %vm92_vm0, %v13411_v15  ;;  %v263_v15 = vld [vmem:[#allocation2 + $0x24f] sm:$0x1]  ;;  %v14185_v43 = vld [vmem:[#allocation2 + $0x7a] sm:$0xff] }
  0xa5   :  { %11693 = vmatprep.mubr.msk.f32.mxu0 %vm92_vm0, %v13683_v62  ;;  %299 = vst.msk [vmem:[#allocation2 + $0x251] sm:$0x1] %vm202_vm1, %v263_v15  ;;  %v343_v62 = vld [vmem:[#allocation2 + $0x1b0] sm:$0xff] }
  0xa6   :  { %v14215_v15 = vld [vmem:[#allocation2 + $0x2d0] sm:$0xff] }
  0xa7   :  { %11370 = vmatmul.mubr.msk.f32.gmra.mrb[12].mxu1 %vm92_vm0, %v13425_v18  ;;  %v17312_v18 = vld [vmem:[#allocation28_spill] sm:$0xff] }
  0xa8   :  { %11694 = vmatmul.mubr.msk.f32.gmra.mrb[32].mxu0 %vm92_vm0, %v13690_v8  ;;  %11372 = vmatprep.mubr.msk.f32.mxu1 %vm92_vm0, %v13430_v21  ;;  %v17313_v21 = vld [vmem:[#allocation10_spill] sm:$0xff]  ;;  %v269_v8 = vld [vmem:[#allocation2 + $0x2df] sm:$0x1] }
  0xa9   :  { %11696 = vmatprep.mubr.msk.f32.mxu0 %vm92_vm0, %v13693_v20  ;;  %v257_v20 = vld [vmem:[#allocation2 + $0x1bf] sm:$0x1]  ;;  %305 = vst.msk [vmem:[#allocation2 + $0x2e1] sm:$0x1] %vm202_vm1, %v269_v8  ;;  %v14299_v8 = vld [vmem:[#allocation2 + $0x12a] sm:$0xff] }
  0xaa   :  { %293 = vst.msk [vmem:[#allocation2 + $0x1c1] sm:$0x1] %vm202_vm1, %v257_v20  ;;  %v1596_v20 = vld [vmem:[#allocation2 + $0x2] sm:$0xff] }
  0xab   :  { %11373 = vmatmul.mubr.msk.f32.gmra.mrb[14].mxu1 %vm92_vm0, %v13444_v25  ;;  %v17314_v25 = vld [vmem:[#allocation11_spill] sm:$0xff] }
  0xac   :  { %11697 = vmatmul.mubr.msk.f32.gmra.mrb[34].mxu0 %vm92_vm0, %v13702_v29  ;;  %11375 = vmatprep.mubr.msk.f32.mxu1 %vm92_vm0, %v13449_v31  ;;  %v264_v31 = vld [vmem:[#allocation2 + $0x267] sm:$0x1]  ;;  %v344_v29 = vld [vmem:[#allocation2 + $0x1b8] sm:$0xff] }
  0xad   :  { %11699 = vmatprep.mubr.msk.f32.mxu0 %vm92_vm0, %v13708_v39  ;;  %300 = vst.msk [vmem:[#allocation2 + $0x269] sm:$0x1] %vm202_vm1, %v264_v31  ;;  %v270_v39 = vld [vmem:[#allocation2 + $0x2f7] sm:$0x1]  ;;  %v14231_v31 = vld [vmem:[#allocation2 + $0x2e8] sm:$0xff] }
  0xae   :  { %306 = vst.msk [vmem:[#allocation2 + $0x2f9] sm:$0x1] %vm202_vm1, %v270_v39  ;;  %v14304_v39 = vld [vmem:[#allocation2 + $0x13a] sm:$0xff] }
  0xaf   :  { %11376 = vmatmul.mubr.msk.f32.gmra.mrb[16].mxu1 %vm92_vm0, %v13466_v42  ;;  %v17315_v42 = vld [vmem:[#allocation12_spill] sm:$0xff] }
  0xb0   :  { %11700 = vmatmul.mubr.msk.f32.gmra.mrb[36].mxu0 %vm92_vm0, %v13718_v13  ;;  %11378 = vmatprep.mubr.msk.f32.mxu1 %vm92_vm0, %v13475_v50  ;;  %v17316_v50 = vld [vmem:[#allocation13_spill] sm:$0xff]  ;;  %v17325_v13 = vld [vmem:[#allocation22_spill] sm:$0xff] }
  0xb1   :  { %11702 = vmatprep.mubr.msk.f32.mxu0 %vm92_vm0, %v17310_v3  ;;  %v14209_v3 = vld [vmem:[#allocation2 + $0x2c0] sm:$0xff] }
  0xb3   :  { %11379 = vmatmul.mubr.msk.f32.gmra.mrb[18].mxu1 %vm92_vm0, %v17311_v11  ;;  %v14213_v11 = vld [vmem:[#allocation2 + $0x9a] sm:$0xff] }
  0xb4   :  { %11703 = vmatmul.mubr.msk.f32.gmra.mrb[38].mxu0 %vm92_vm0, %v17312_v18  ;;  %11381 = vmatprep.mubr.msk.f32.mxu1 %vm92_vm0, %v17313_v21  ;;  %v14217_v18 = vld [vmem:[#allocation2 + $0xaa] sm:$0xff]  ;;  %v14225_v21 = vld [vmem:[#allocation2 + $0x2d8] sm:$0xff] }
  0xb5   :  { %11705 = vmatprep.mubr.msk.f32.mxu0 %vm92_vm0, %v13749_v22  ;;  %v17326_v22 = vld [vmem:[#allocation23_spill] sm:$0xff] }
  0xb7   :  { %11382 = vmatmul.mubr.msk.f32.gmra.mrb[20].mxu1 %vm92_vm0, %v17314_v25  ;;  %v14229_v25 = vld [vmem:[#allocation2 + $0xb2] sm:$0xff] }
  0xb8   :  { %11706 = vmatmul.mubr.msk.f32.gmra.mrb[40].mxu0 %vm92_vm0, %v13760_v6  ;;  %11384 = vmatprep.mubr.msk.f32.mxu1 %vm92_vm0, %v17315_v42  ;;  %v271_v6 = vld [vmem:[#allocation2 + $0x30f] sm:$0x1]  ;;  %v14233_v42 = vld [vmem:[#allocation2 + $0xc2] sm:$0xff] }
  0xb9   :  { %11708 = vmatprep.mubr.msk.f32.mxu0 %vm92_vm0, %v13767_v0  ;;  %v17320_v0 = vld [vmem:[#allocation17_spill] sm:$0xff]  ;;  %307 = vst.msk [vmem:[#allocation2 + $0x311] sm:$0x1] %vm202_vm1, %v271_v6 }
  0xba   :  { %v14326_v6 = vld [vmem:[#allocation2 + $0x15a] sm:$0xff] }
  0xbb   :  { %11385 = vmatmul.mubr.msk.f32.gmra.mrb[22].mxu1 %vm92_vm0, %v17316_v50  ;;  %v14241_v50 = vld [vmem:[#allocation2 + $0x2f0] sm:$0xff] }
  0xbc   :  { %11709 = vmatmul.mubr.msk.f32.gmra.mrb[42].mxu0 %vm92_vm0, %v13776_v14  ;;  %11387 = vmatprep.mubr.msk.f32.mxu1 %vm92_vm0, %v17317_v17  ;;  %v17327_v14 = vld [vmem:[#allocation24_spill] sm:$0xff]  ;;  %v14247_v17 = vld [vmem:[#allocation2 + $0x300] sm:$0xff] }
  0xbd   :  { %11711 = vmatprep.mubr.msk.f32.mxu0 %vm92_vm0, %v13781_v2  ;;  %v17321_v2 = vld [vmem:[#allocation18_spill] sm:$0xff] }
  0xbf   :  { %11388 = vmatmul.mubr.msk.f32.gmra.mrb[24].mxu1 %vm92_vm0, %v17318_v24  ;;  %v14249_v24 = vld [vmem:[#allocation2 + $0xda] sm:$0xff] }
  0xc0   :  { %11712 = vmatmul.mubr.msk.f32.gmra.mrb[44].mxu0 %vm92_vm0, %v13795_v26  ;;  %11390 = vmatprep.mubr.msk.f32.mxu1 %vm92_vm0, %v17319_v59  ;;  %v17328_v26 = vld [vmem:[#allocation25_spill] sm:$0xff] }
  0xc1   :  { %11714 = vmatprep.mubr.msk.f32.mxu0 %vm92_vm0, %v13801_v57  ;;  %v272_v57 = vld [vmem:[#allocation2 + $0x327] sm:$0x1] }
  0xc2   :  { %308 = vst.msk [vmem:[#allocation2 + $0x329] sm:$0x1] %vm202_vm1, %v272_v57  ;;  %v14261_v59 = vld [vmem:[#allocation2 + $0xe2] sm:$0xff]  ;;  %v14339_v57 = vld [vmem:[#allocation2 + $0x172] sm:$0xff] }
  0xc3   :  { %11391 = vmatmul.mubr.msk.f32.gmra.mrb[26].mxu1 %vm92_vm0, %v17320_v0  ;;  %v14263_v0 = vld [vmem:[#allocation2 + $0x318] sm:$0xff] }
  0xc4   :  { %11715 = vmatmul.mubr.msk.f32.gmra.mrb[46].mxu0 %vm92_vm0, %v13811_v60  ;;  %11393 = vmatprep.mubr.msk.f32.mxu1 %vm92_vm0, %v17321_v2  ;;  %v17329_v60 = vld [vmem:[#allocation27_spill] sm:$0xff]  ;;  %v14273_v2 = vld [vmem:[#allocation2 + $0x320] sm:$0xff] }
  0xc5   :  { %11717 = vmatprep.mubr.msk.f32.mxu0 %vm92_vm0, %v13816_v30  ;;  %v17330_v30 = vld [vmem:[#allocation29_spill] sm:$0xff] }
  0xc7   :  { %11394 = vmatmul.mubr.msk.f32.gmra.mrb[28].mxu1 %vm92_vm0, %v17322_v9  ;;  %v14277_v9 = vld [vmem:[#allocation2 + $0xfa] sm:$0xff] }
  0xc8   :  { %11718 = vmatmul.mubr.msk.f32.gmra.mrb[48].mxu0 %vm92_vm0, %v13825_v33  ;;  %11396 = vmatprep.mubr.msk.f32.mxu1 %vm92_vm0, %v17323_v55  ;;  %v273_v33 = vld [vmem:[#allocation2 + $0x33f] sm:$0x1]  ;;  %v1597_v55 = vld [vmem:[#allocation2 + $0xa] sm:$0xff] }
  0xc9   :  { %11720 = vmatprep.mubr.msk.f32.mxu0 %vm92_vm0, %v13830_v36  ;;  %v17331_v36 = vld [vmem:[#allocation30_spill] sm:$0xff]  ;;  %309 = vst.msk [vmem:[#allocation2 + $0x341] sm:$0x1] %vm202_vm1, %v273_v33 }
  0xca   :  { %v14348_v33 = vld [vmem:[#allocation2 + $0x1ca] sm:$0xff] }
  0xcb   :  { %11397 = vmatmul.mubr.msk.f32.gmra.mrb[30].mxu1 %vm92_vm0, %v17324_v7  ;;  %v14290_v7 = vld [vmem:[#allocation2 + $0x122] sm:$0xff] }
  0xcc   :  { %11721 = vmatmul.mubr.msk.f32.gmra.mrb[50].mxu0 %vm92_vm0, %v13839_v41  ;;  %11399 = vmatprep.mubr.msk.f32.mxu1 %vm92_vm0, %v343_v62  ;;  %v14102_v41 = vld [vmem:[#allocation2 + $0x228] sm:$0xff]  ;;  %v14288_v62 = vld [vmem:[#allocation2 + $0x112] sm:$0xff] }
  0xcd   :  { %11723 = vmatprep.mubr.msk.f32.mxu0 %vm92_vm0, %v13844_v44  ;;  %v3072_v44 = vld [vmem:[#allocation2 + $0x331] sm:$0xff] }
  0xcf   :  { %11400 = vmatmul.mubr.msk.f32.gmra.mrb[32].mxu1 %vm92_vm0, %v344_v29  ;;  %v13070_v29 = vld [vmem:[%s17192_s1 + $0x18] sm:$0xff] }
  0xd0   :  { %11724 = vmatmul.mubr.msk.f32.gmra.mrb[52].mxu0 %vm92_vm0, %v13853_v47  ;;  %11402 = vmatprep.mubr.msk.f32.mxu1 %vm92_vm0, %v17325_v13  ;;  %v17332_v47 = vld [vmem:[#allocation31_spill] sm:$0xff]  ;;  %v14314_v13 = vld [vmem:[#allocation2 + $0x142] sm:$0xff] }
  0xd1   :  { %11726 = vmatprep.mubr.msk.f32.mxu0 %vm92_vm0, %v13858_v51  ;;  %v14110_v51 = vld [vmem:[#allocation2 + $0x230] sm:$0xff] }
  0xd3   :  { %11403 = vmatmul.mubr.msk.f32.gmra.mrb[34].mxu1 %vm92_vm0, %v17326_v22  ;;  %v14316_v22 = vld [vmem:[#allocation2 + $0x152] sm:$0xff] }
  0xd4   :  { %11727 = vmatmul.mubr.msk.f32.gmra.mrb[54].mxu0 %vm92_vm0, %v13867_v54  ;;  %11405 = vmatprep.mubr.msk.f32.mxu1 %vm92_vm0, %v17327_v14  ;;  %v3073_v54 = vld [vmem:[#allocation2 + $0x339] sm:$0xff]  ;;  %v14328_v14 = vld [vmem:[#allocation2 + $0x16a] sm:$0xff] }
  0xd5   :  { %11729 = vmatprep.mubr.msk.f32.mxu0 %vm92_vm0, %v13872_v61  ;;  %v14113_v61 = vld [vmem:[#allocation2 + $0x240] sm:$0xff] }
  0xd7   :  { %11406 = vmatmul.mubr.msk.f32.gmra.mrb[36].mxu1 %vm92_vm0, %v17328_v26  ;;  %v183_v26 = vld [vmem:[#allocation2 + $0x19a] sm:$0x1] }
  0xd8   :  { %11730 = vmatmul.mubr.msk.f32.gmra.mrb[56].mxu0 %vm92_vm0, %v13881_v10  ;;  %11408 = vmatprep.mubr.msk.f32.mxu1 %vm92_vm0, %v17329_v60  ;;  %v14115_v10 = vld [vmem:[#allocation2 + $0x1a] sm:$0xff]  ;;  %220 = vst.msk [vmem:[#allocation2 + $0x198] sm:$0x1] %vm202_vm1, %v183_v26  ;;  %v3747_v60 = vld [vmem:[#allocation2 + $0x182] sm:$0xff] }
  0xd9   :  { %11732 = vmatprep.mubr.msk.f32.mxu0 %vm92_vm0, %v13886_v12  ;;  %v14122_v12 = vld [vmem:[#allocation2 + $0x248] sm:$0xff]  ;;  %v4426_v26 = vld [vmem:[#allocation2 + $0x38] sm:$0xff] }
  0xdb   :  { %11409 = vmatmul.mubr.msk.f32.gmra.mrb[38].mxu1 %vm92_vm0, %v17330_v30  ;;  %v3748_v30 = vld [vmem:[#allocation2 + $0x18a] sm:$0xff] }
  0xdc   :  { %11733 = vmatmul.mubr.msk.f32.gmra.mrb[58].mxu0 %vm92_vm0, %v13895_v16  ;;  %11411 = vmatprep.mubr.msk.f32.mxu1 %vm92_vm0, %v17331_v36  ;;  %v14126_v16 = vld [vmem:[#allocation2 + $0x22] sm:$0xff]  ;;  %v14357_v36 = vld [vmem:[#allocation2 + $0x1d2] sm:$0xff] }
  0xdd   :  { %11735 = vmatprep.mubr.msk.f32.mxu0 %vm92_vm0, %v13900_v19  ;;  %v14128_v19 = vld [vmem:[#allocation2 + $0x258] sm:$0xff] }
  0xdf   :  { %11412 = vmatmul.mubr.msk.f32.gmra.mrb[40].mxu1 %vm92_vm0, %v17332_v47  ;;  %v14369_v47 = vld [vmem:[#allocation2 + $0x1ea] sm:$0xff] }
  0xe0   :  { %11736 = vmatmul.mubr.msk.f32.gmra.mrb[60].mxu0 %vm92_vm0, %v13908_v23  ;;  %11414 = vmatprep.mubr.msk.f32.mxu1 %vm92_vm0, %v14102_v41  ;;  %v14137_v23 = vld [vmem:[%s17192_s1 + $0x38] sm:$0xff] }
  0xe1   :  { %11738 = vmatprep.mubr.msk.f32.mxu0 %vm92_vm0, %v3072_v44  ;;  %v14359_v44 = vld [vmem:[#allocation2 + $0x1e2] sm:$0xff] }
  0xe3   :  { %11415 = vmatmul.mubr.msk.f32.gmra.mrb[42].mxu1 %vm92_vm0, %v14110_v51 }
  0xe4   :  { %11739 = vmatmul.mubr.msk.f32.gmra.mrb[62].mxu0 %vm92_vm0, %v3073_v54  ;;  %11417 = vmatprep.mubr.msk.f32.mxu1 %vm92_vm0, %v14113_v61  ;;  %v14371_v54 = vld [vmem:[#allocation2 + $0x1fa] sm:$0xff] }
  0xe5   :  { %11743 = vmatprep.mubr.msk.f32.mxu0 %vm92_vm0, %v14115_v10 }
  0xe7   :  { %11418 = vmatmul.mubr.msk.f32.gmra.mrb[44].mxu1 %vm92_vm0, %v14122_v12 }
  0xe8   :  { %11744 = vmatmul.mubr.msk.f32.vlgmr.msra.gmra.mrb[0].mxu0 %vm92_vm0, %v14126_v16  ;;  %11420 = vmatprep.mubr.msk.f32.mxu1 %vm92_vm0, %v14128_v19 }
  0xe9   :  { %11840 = vmatpush3.msra.mxu0 %v13788_v4  ;;  %11746 = vmatprep.mubr.msk.f32.mxu0 %vm92_vm0, %v14130_v32  ;;  %v14161_v4 = vld [vmem:[#allocation2 + $0x278] sm:$0xff] }
  0xea   :  { %11937 = vmatprep.subr.mxu0 %v14137_v23 }
  0xeb   :  { %11421 = vmatmul.mubr.msk.f32.gmra.mrb[46].mxu1 %vm92_vm0, %v14143_v27 }
  0xec   :  { %11747 = vmatmul.mubr.msk.f32.gmra.mrb[2].mxu0 %vm92_vm0, %v14148_v28  ;;  %11423 = vmatprep.mubr.msk.f32.mxu1 %vm92_vm0, %v14150_v34 }
  0xed   :  { %11749 = vmatprep.mubr.msk.f32.mxu0 %vm92_vm0, %v14152_v56 }
  0xef   :  { %11424 = vmatmul.mubr.msk.f32.gmra.mrb[48].mxu1 %vm92_vm0, %v14161_v4 }
  0xf0   :  { %11750 = vmatmul.mubr.msk.f32.gmra.mrb[4].mxu0 %vm92_vm0, %v14165_v46  ;;  %11426 = vmatprep.mubr.msk.f32.mxu1 %vm92_vm0, %v14167_v53 }
  0xf1   :  { %11752 = vmatprep.mubr.msk.f32.mxu0 %vm92_vm0, %v14169_v38 }
  0xf3   :  { %11427 = vmatmul.mubr.msk.f32.gmra.mrb[50].mxu1 %vm92_vm0, %v14177_v5 }
  0xf4   :  { %11753 = vmatmul.mubr.msk.f32.gmra.mrb[6].mxu0 %vm92_vm0, %v14181_v35  ;;  %11429 = vmatprep.mubr.msk.f32.mxu1 %vm92_vm0, %v14183_v40 }
  0xf5   :  { %11755 = vmatprep.mubr.msk.f32.mxu0 %vm92_vm0, %v14185_v43 }
  0xf7   :  { %11430 = vmatmul.mubr.msk.f32.gmra.mrb[52].mxu1 %vm92_vm0, %v14193_v45 }
  0xf8   :  { %11756 = vmatmul.mubr.msk.f32.gmra.mrb[8].mxu0 %vm92_vm0, %v14197_v48  ;;  %11432 = vmatprep.mubr.msk.f32.mxu1 %vm92_vm0, %v14199_v52 }
  0xf9   :  { %11758 = vmatprep.mubr.msk.f32.mxu0 %vm92_vm0, %v14201_v58 }
  0xfb   :  { %11433 = vmatmul.mubr.msk.f32.gmra.mrb[54].mxu1 %vm92_vm0, %v14209_v3 }
  0xfc   :  { %11759 = vmatmul.mubr.msk.f32.gmra.mrb[10].mxu0 %vm92_vm0, %v14213_v11  ;;  %11435 = vmatprep.mubr.msk.f32.mxu1 %vm92_vm0, %v14215_v15 }
  0xfd   :  { %11761 = vmatprep.mubr.msk.f32.mxu0 %vm92_vm0, %v14217_v18 }
  0xff   :  { %11436 = vmatmul.mubr.msk.f32.gmra.mrb[56].mxu1 %vm92_vm0, %v14225_v21 }
 0x100   :  { %11762 = vmatmul.mubr.msk.f32.gmra.mrb[12].mxu0 %vm92_vm0, %v14229_v25  ;;  %11438 = vmatprep.mubr.msk.f32.mxu1 %vm92_vm0, %v14231_v31 }
 0x101   :  { %11764 = vmatprep.mubr.msk.f32.mxu0 %vm92_vm0, %v14233_v42 }
 0x103   :  { %11439 = vmatmul.mubr.msk.f32.gmra.mrb[58].mxu1 %vm92_vm0, %v14241_v50 }
 0x104   :  { %11765 = vmatmul.mubr.msk.f32.gmra.mrb[14].mxu0 %vm92_vm0, %v14245_v63  ;;  %11441 = vmatprep.mubr.msk.f32.mxu1 %vm92_vm0, %v14247_v17 }
 0x105   :  { %11767 = vmatprep.mubr.msk.f32.mxu0 %vm92_vm0, %v14249_v24 }
 0x107   :  { %11442 = vmatmul.mubr.msk.f32.gmra.mrb[60].mxu1 %vm92_vm0, %v14257_v49 }
 0x108   :  { %11768 = vmatmul.mubr.msk.f32.gmra.mrb[16].mxu0 %vm92_vm0, %v14261_v59  ;;  %11444 = vmatprep.mubr.msk.f32.mxu1 %vm92_vm0, %v14263_v0 }
 0x109   :  { %11770 = vmatprep.mubr.msk.f32.mxu0 %vm92_vm0, %v14265_v1 }
 0x10b   :  { %11445 = vmatmul.mubr.msk.f32.gmra.mrb[62].mxu1 %vm92_vm0, %v14273_v2 }
 0x10c   :  { %11771 = vmatmul.mubr.msk.f32.gmra.mrb[18].mxu0 %vm92_vm0, %v14277_v9  ;;  %11449 = vmatprep.mubr.msk.f32.mxu1 %vm92_vm0, %v1596_v20  ;;  %v14479_v20 = vld [vmem:[#allocation2 + $0x2d2] sm:$0xff] }
 0x10d   :  { %11773 = vmatprep.mubr.msk.f32.mxu0 %vm92_vm0, %v14279_v37 }
 0x10f   :  { %11450 = vmatmul.mubr.msk.f32.vlgmr.msra.gmra.mrb[0].mxu1 %vm92_vm0, %v1597_v55  ;;  %v14490_v55 = vld [vmem:[#allocation2 + $0x2ea] sm:$0xff] }
 0x110   :  { %11774 = vmatmul.mubr.msk.f32.gmra.mrb[20].mxu0 %vm92_vm0, %v14288_v62  ;;  %11452 = vmatprep.mubr.msk.f32.mxu1 %vm92_vm0, %v14115_v10  ;;  %v14381_v10 = vld [vmem:[#allocation2 + $0x202] sm:$0xff] }
 0x111   :  { %11776 = vmatprep.mubr.msk.f32.mxu0 %vm92_vm0, %v14290_v7  ;;  %12422 = vmatpush3.msra.mxu1 %v13070_v29  ;;  %v14514_v29 = vld [vmem:[#allocation2 + $0x31a] sm:$0xff] }
 0x113   :  { %11453 = vmatmul.mubr.msk.f32.gmra.mrb[2].mxu1 %vm92_vm0, %v14126_v16  ;;  %v14383_v16 = vld [vmem:[#allocation2 + $0x212] sm:$0xff] }
 0x114   :  { %11777 = vmatmul.mubr.msk.f32.gmra.mrb[22].mxu0 %vm92_vm0, %v14299_v8  ;;  %11455 = vmatprep.mubr.msk.f32.mxu1 %vm92_vm0, %v14130_v32  ;;  %v14393_v32 = vld [vmem:[#allocation2 + $0x21a] sm:$0xff] }
 0x115   :  { %11779 = vmatprep.mubr.msk.f32.mxu0 %vm92_vm0, %v14304_v39 }
 0x117   :  { %11456 = vmatmul.mubr.msk.f32.gmra.mrb[4].mxu1 %vm92_vm0, %v14148_v28  ;;  %v14395_v28 = vld [vmem:[#allocation2 + $0x22a] sm:$0xff] }
 0x118   :  { %11780 = vmatmul.mubr.msk.f32.gmra.mrb[24].mxu0 %vm92_vm0, %v14314_v13  ;;  %11458 = vmatprep.mubr.msk.f32.mxu1 %vm92_vm0, %v14152_v56  ;;  %v200_v56 = vld [vmem:[#allocation2 + $0x332] sm:$0x1] }
 0x119   :  { %11782 = vmatprep.mubr.msk.f32.mxu0 %vm92_vm0, %v14316_v22  ;;  %237 = vst.msk [vmem:[#allocation2 + $0x330] sm:$0x1] %vm202_vm1, %v200_v56  ;;  %v4439_v56 = vld [vmem:[#allocation2 + $0xd8] sm:$0xff] }
 0x11b   :  { %11459 = vmatmul.mubr.msk.f32.gmra.mrb[6].mxu1 %vm92_vm0, %v14165_v46  ;;  %v14406_v46 = vld [vmem:[#allocation2 + $0x232] sm:$0xff] }
 0x11c   :  { %11783 = vmatmul.mubr.msk.f32.gmra.mrb[26].mxu0 %vm92_vm0, %v14326_v6  ;;  %11461 = vmatprep.mubr.msk.f32.mxu1 %vm92_vm0, %v14169_v38  ;;  %v14408_v38 = vld [vmem:[#allocation2 + $0x242] sm:$0xff] }
 0x11d   :  { %11785 = vmatprep.mubr.msk.f32.mxu0 %vm92_vm0, %v14328_v14 }
 0x11f   :  { %11462 = vmatmul.mubr.msk.f32.gmra.mrb[8].mxu1 %vm92_vm0, %v14181_v35  ;;  %v14418_v35 = vld [vmem:[#allocation2 + $0x24a] sm:$0xff] }
 0x120   :  { %11786 = vmatmul.mubr.msk.f32.gmra.mrb[28].mxu0 %vm92_vm0, %v14339_v57  ;;  %11464 = vmatprep.mubr.msk.f32.mxu1 %vm92_vm0, %v14185_v43  ;;  %v14420_v43 = vld [vmem:[#allocation2 + $0x25a] sm:$0xff] }
 0x121   :  { %11788 = vmatprep.mubr.msk.f32.mxu0 %vm92_vm0, %v3747_v60  ;;  %v14545_v60 = vld [vmem:[%s17192_s1 + $0x40] sm:$0xff] }
 0x123   :  { %11465 = vmatmul.mubr.msk.f32.gmra.mrb[10].mxu1 %vm92_vm0, %v14197_v48  ;;  %v14430_v48 = vld [vmem:[#allocation2 + $0x262] sm:$0xff] }
 0x124   :  { %11789 = vmatmul.mubr.msk.f32.gmra.mrb[30].mxu0 %vm92_vm0, %v3748_v30  ;;  %11467 = vmatprep.mubr.msk.f32.mxu1 %vm92_vm0, %v14201_v58  ;;  %v14432_v58 = vld [vmem:[#allocation2 + $0x272] sm:$0xff] }
 0x125   :  { %11791 = vmatprep.mubr.msk.f32.mxu0 %vm92_vm0, %v14348_v33  ;;  %v4428_v30 = vld [vmem:[#allocation2 + $0x50] sm:$0xff] }
 0x127   :  { %11468 = vmatmul.mubr.msk.f32.gmra.mrb[12].mxu1 %vm92_vm0, %v14213_v11  ;;  %v14442_v11 = vld [vmem:[#allocation2 + $0x27a] sm:$0xff] }
 0x128   :  { %11792 = vmatmul.mubr.msk.f32.gmra.mrb[32].mxu0 %vm92_vm0, %v14357_v36  ;;  %11470 = vmatprep.mubr.msk.f32.mxu1 %vm92_vm0, %v14217_v18  ;;  %v14444_v18 = vld [vmem:[#allocation2 + $0x28a] sm:$0xff] }
 0x129   :  { %11794 = vmatprep.mubr.msk.f32.mxu0 %vm92_vm0, %v14359_v44 }
 0x12b   :  { %11471 = vmatmul.mubr.msk.f32.gmra.mrb[14].mxu1 %vm92_vm0, %v14229_v25  ;;  %v14454_v25 = vld [vmem:[#allocation2 + $0x292] sm:$0xff] }
 0x12c   :  { %11795 = vmatmul.mubr.msk.f32.gmra.mrb[34].mxu0 %vm92_vm0, %v14369_v47  ;;  %11473 = vmatprep.mubr.msk.f32.mxu1 %vm92_vm0, %v14233_v42  ;;  %v14456_v42 = vld [vmem:[#allocation2 + $0x2a2] sm:$0xff] }
 0x12d   :  { %11797 = vmatprep.mubr.msk.f32.mxu0 %vm92_vm0, %v14371_v54 }
 0x12f   :  { %11474 = vmatmul.mubr.msk.f32.gmra.mrb[16].mxu1 %vm92_vm0, %v14245_v63  ;;  %v14466_v63 = vld [vmem:[#allocation2 + $0x2aa] sm:$0xff] }
 0x130   :  { %11798 = vmatmul.mubr.msk.f32.gmra.mrb[36].mxu0 %vm92_vm0, %v14381_v10  ;;  %11476 = vmatprep.mubr.msk.f32.mxu1 %vm92_vm0, %v14249_v24  ;;  %v1628_v24 = vld [vmem:[#allocation2 + $0x1b2] sm:$0xff] }
 0x131   :  { %11800 = vmatprep.mubr.msk.f32.mxu0 %vm92_vm0, %v14383_v16 }
 0x133   :  { %11477 = vmatmul.mubr.msk.f32.gmra.mrb[18].mxu1 %vm92_vm0, %v14261_v59  ;;  %v14468_v59 = vld [vmem:[#allocation2 + $0x2ba] sm:$0xff] }
 0x134   :  { %11801 = vmatmul.mubr.msk.f32.gmra.mrb[38].mxu0 %vm92_vm0, %v14393_v32  ;;  %11479 = vmatprep.mubr.msk.f32.mxu1 %vm92_vm0, %v14265_v1  ;;  %v1629_v1 = vld [vmem:[#allocation2 + $0x1ba] sm:$0xff] }
 0x135   :  { %11803 = vmatprep.mubr.msk.f32.mxu0 %vm92_vm0, %v14395_v28 }
 0x137   :  { %11480 = vmatmul.mubr.msk.f32.gmra.mrb[20].mxu1 %vm92_vm0, %v14277_v9  ;;  %v14477_v9 = vld [vmem:[#allocation2 + $0x2c2] sm:$0xff] }
 0x138   :  { %11804 = vmatmul.mubr.msk.f32.gmra.mrb[40].mxu0 %vm92_vm0, %v14406_v46  ;;  %11482 = vmatprep.mubr.msk.f32.mxu1 %vm92_vm0, %v14279_v37  ;;  %v14488_v37 = vld [vmem:[#allocation2 + $0x2da] sm:$0xff] }
 0x139   :  { %11806 = vmatprep.mubr.msk.f32.mxu0 %vm92_vm0, %v14408_v38 }
 0x13b   :  { %11483 = vmatmul.mubr.msk.f32.gmra.mrb[22].mxu1 %vm92_vm0, %v14288_v62  ;;  %v14500_v62 = vld [vmem:[#allocation2 + $0x2f2] sm:$0xff] }
 0x13c   :  { %11807 = vmatmul.mubr.msk.f32.gmra.mrb[42].mxu0 %vm92_vm0, %v14418_v35  ;;  %11485 = vmatprep.mubr.msk.f32.mxu1 %vm92_vm0, %v14290_v7  ;;  %v14502_v7 = vld [vmem:[#allocation2 + $0x302] sm:$0xff] }
 0x13d   :  { %11809 = vmatprep.mubr.msk.f32.mxu0 %vm92_vm0, %v14420_v43 }
 0x13f   :  { %11486 = vmatmul.mubr.msk.f32.gmra.mrb[24].mxu1 %vm92_vm0, %v14299_v8  ;;  %v14512_v8 = vld [vmem:[#allocation2 + $0x30a] sm:$0xff] }
 0x140   :  { %11810 = vmatmul.mubr.msk.f32.gmra.mrb[44].mxu0 %vm92_vm0, %v14430_v48  ;;  %11488 = vmatprep.mubr.msk.f32.mxu1 %vm92_vm0, %v14304_v39  ;;  %v201_v39 = vld [vmem:[#allocation2 + $0x34a] sm:$0x1] }
 0x141   :  { %11812 = vmatprep.mubr.msk.f32.mxu0 %vm92_vm0, %v14432_v58  ;;  %238 = vst.msk [vmem:[#allocation2 + $0x348] sm:$0x1] %vm202_vm1, %v201_v39  ;;  %v4466_v39 = vld [vmem:[#allocation2 + $0x248] sm:$0xff] }
 0x143   :  { %11489 = vmatmul.mubr.msk.f32.gmra.mrb[26].mxu1 %vm92_vm0, %v14314_v13  ;;  %v14525_v13 = vld [vmem:[#allocation2 + $0x322] sm:$0xff] }
 0x144   :  { %11813 = vmatmul.mubr.msk.f32.gmra.mrb[46].mxu0 %vm92_vm0, %v14442_v11  ;;  %11491 = vmatprep.mubr.msk.f32.mxu1 %vm92_vm0, %v14316_v22  ;;  %v3779_v22 = vld [vmem:[#allocation2 + $0x332] sm:$0xff] }
 0x145   :  { %11815 = vmatprep.mubr.msk.f32.mxu0 %vm92_vm0, %v14444_v18 }
 0x147   :  { %11492 = vmatmul.mubr.msk.f32.gmra.mrb[28].mxu1 %vm92_vm0, %v14326_v6  ;;  %v3780_v6 = vld [vmem:[#allocation2 + $0x33a] sm:$0xff] }
 0x148   :  { %11816 = vmatmul.mubr.msk.f32.gmra.mrb[48].mxu0 %vm92_vm0, %v14454_v25  ;;  %11494 = vmatprep.mubr.msk.f32.mxu1 %vm92_vm0, %v14328_v14  ;;  %v4425_v14 = vld [vmem:[#allocation2 + $0x30] sm:$0xff] }
 0x149   :  { %11818 = vmatprep.mubr.msk.f32.mxu0 %vm92_vm0, %v14456_v42 }
 0x14b   :  { %11495 = vmatmul.mubr.msk.f32.gmra.mrb[30].mxu1 %vm92_vm0, %v14339_v57  ;;  %v4427_v57 = vld [vmem:[#allocation2 + $0x48] sm:$0xff] }
 0x14c   :  { %11819 = vmatmul.mubr.msk.f32.gmra.mrb[50].mxu0 %vm92_vm0, %v14466_v63  ;;  %11497 = vmatprep.mubr.msk.f32.mxu1 %vm92_vm0, %v1628_v24  ;;  %v4455_v24 = vld [vmem:[#allocation2 + $0x198] sm:$0xff] }
 0x14d   :  { %11821 = vmatprep.mubr.msk.f32.mxu0 %vm92_vm0, %v14468_v59 }
 0x14f   :  { %11498 = vmatmul.mubr.msk.f32.gmra.mrb[32].mxu1 %vm92_vm0, %v1629_v1  ;;  %v4457_v1 = vld [vmem:[#allocation2 + $0x1e0] sm:$0xff] }
 0x150   :  { %11822 = vmatmul.mubr.msk.f32.gmra.mrb[52].mxu0 %vm92_vm0, %v14477_v9  ;;  %11500 = vmatprep.mubr.msk.f32.mxu1 %vm92_vm0, %v14348_v33  ;;  %v4429_v33 = vld [vmem:[#allocation2 + $0x60] sm:$0xff] }
 0x151   :  { %11824 = vmatprep.mubr.msk.f32.mxu0 %vm92_vm0, %v14479_v20 }
 0x153   :  { %11501 = vmatmul.mubr.msk.f32.gmra.mrb[34].mxu1 %vm92_vm0, %v14357_v36  ;;  %v4430_v36 = vld [vmem:[#allocation2 + $0x68] sm:$0xff] }
 0x154   :  { %11825 = vmatmul.mubr.msk.f32.gmra.mrb[54].mxu0 %vm92_vm0, %v14488_v37  ;;  %11503 = vmatprep.mubr.msk.f32.mxu1 %vm92_vm0, %v14359_v44  ;;  %v4431_v44 = vld [vmem:[#allocation2 + $0x78] sm:$0xff] }
 0x155   :  { %11827 = vmatprep.mubr.msk.f32.mxu0 %vm92_vm0, %v14490_v55 }
 0x157   :  { %11504 = vmatmul.mubr.msk.f32.gmra.mrb[36].mxu1 %vm92_vm0, %v14369_v47  ;;  %v4433_v47 = vld [vmem:[#allocation2 + $0x90] sm:$0xff] }
 0x158   :  { %11828 = vmatmul.mubr.msk.f32.gmra.mrb[56].mxu0 %vm92_vm0, %v14500_v62  ;;  %11506 = vmatprep.mubr.msk.f32.mxu1 %vm92_vm0, %v14371_v54  ;;  %v4434_v54 = vld [vmem:[#allocation2 + $0x98] sm:$0xff] }
 0x159   :  { %11830 = vmatprep.mubr.msk.f32.mxu0 %vm92_vm0, %v14502_v7 }
 0x15b   :  { %11507 = vmatmul.mubr.msk.f32.gmra.mrb[38].mxu1 %vm92_vm0, %v14381_v10  ;;  %v4435_v10 = vld [vmem:[#allocation2 + $0xa8] sm:$0xff] }
 0x15c   :  { %11831 = vmatmul.mubr.msk.f32.gmra.mrb[58].mxu0 %vm92_vm0, %v14512_v8  ;;  %11509 = vmatprep.mubr.msk.f32.mxu1 %vm92_vm0, %v14383_v16  ;;  %v4436_v16 = vld [vmem:[#allocation2 + $0xb0] sm:$0xff] }
 0x15d   :  { %11833 = vmatprep.mubr.msk.f32.mxu0 %vm92_vm0, %v14514_v29 }
 0x15f   :  { %11510 = vmatmul.mubr.msk.f32.gmra.mrb[40].mxu1 %vm92_vm0, %v14393_v32  ;;  %v4437_v32 = vld [vmem:[#allocation2 + $0xc0] sm:$0xff] }
 0x160   :  { %11834 = vmatmul.mubr.msk.f32.gmra.mrb[60].mxu0 %vm92_vm0, %v14525_v13  ;;  %11512 = vmatprep.mubr.msk.f32.mxu1 %vm92_vm0, %v14395_v28  ;;  %v4438_v28 = vld [vmem:[#allocation2 + $0xc8] sm:$0xff] }
 0x161   :  { %11836 = vmatprep.mubr.msk.f32.mxu0 %vm92_vm0, %v3779_v22  ;;  %v2366_v22 = vld [vmem:[#allocation2 + $0x338] sm:$0xff] }
 0x163   :  { %11513 = vmatmul.mubr.msk.f32.gmra.mrb[42].mxu1 %vm92_vm0, %v14406_v46  ;;  %v4440_v46 = vld [vmem:[#allocation2 + $0xe0] sm:$0xff] }
 0x164   :  { %11837 = vmatmul.mubr.msk.f32.gmra.mrb[62].mxu0 %vm92_vm0, %v3780_v6  ;;  %11515 = vmatprep.mubr.msk.f32.mxu1 %vm92_vm0, %v14408_v38  ;;  %v4441_v38 = vld [vmem:[#allocation2 + $0xf0] sm:$0xff] }
 0x165   :  { %11841 = vmatprep.mubr.msk.f32.mxu0 %vm92_vm0, %v4425_v14  ;;  %v5140_v6 = vld [vmem:[#allocation2 + $0x91] sm:$0xff] }
 0x167   :  { %11516 = vmatmul.mubr.msk.f32.gmra.mrb[44].mxu1 %vm92_vm0, %v14418_v35  ;;  %v4442_v35 = vld [vmem:[#allocation2 + $0xf8] sm:$0xff] }
 0x168   :  { %11842 = vmatmul.mubr.msk.f32.vlgmr.msra.gmra.mrb[0].mxu0 %vm92_vm0, %v4426_v26  ;;  %11518 = vmatprep.mubr.msk.f32.mxu1 %vm92_vm0, %v14420_v43  ;;  %v4443_v43 = vld [vmem:[#allocation2 + $0x108] sm:$0xff] }
 0x169   :  { %11938 = vmatpush3.msra.mxu0 %v14137_v23  ;;  %11844 = vmatprep.mubr.msk.f32.mxu0 %vm92_vm0, %v4427_v57  ;;  %v4432_v23 = vld [vmem:[#allocation2 + $0x80] sm:$0xff] }
 0x16a   :  { %12035 = vmatprep.subr.mxu0 %v14545_v60  ;;  %v5141_v57 = vld [vmem:[#allocation2 + $0x99] sm:$0xff] }
 0x16b   :  { %11519 = vmatmul.mubr.msk.f32.gmra.mrb[46].mxu1 %vm92_vm0, %v14430_v48  ;;  %v4444_v48 = vld [vmem:[#allocation2 + $0x110] sm:$0xff] }
 0x16c   :  { %11845 = vmatmul.mubr.msk.f32.gmra.mrb[2].mxu0 %vm92_vm0, %v4428_v30  ;;  %11521 = vmatprep.mubr.msk.f32.mxu1 %vm92_vm0, %v14432_v58  ;;  %v4445_v58 = vld [vmem:[#allocation2 + $0x120] sm:$0xff] }
 0x16d   :  { %11847 = vmatprep.mubr.msk.f32.mxu0 %vm92_vm0, %v4429_v33 }
 0x16f   :  { %11522 = vmatmul.mubr.msk.f32.gmra.mrb[48].mxu1 %vm92_vm0, %v14442_v11  ;;  %v4446_v11 = vld [vmem:[#allocation2 + $0x128] sm:$0xff] }
 0x170   :  { %11848 = vmatmul.mubr.msk.f32.gmra.mrb[4].mxu0 %vm92_vm0, %v4430_v36  ;;  %11524 = vmatprep.mubr.msk.f32.mxu1 %vm92_vm0, %v14444_v18  ;;  %v4447_v18 = vld [vmem:[#allocation2 + $0x138] sm:$0xff] }
 0x171   :  { %11850 = vmatprep.mubr.msk.f32.mxu0 %vm92_vm0, %v4431_v44  ;;  %v5143_v36 = vld [vmem:[#allocation2 + $0xb1] sm:$0xff]  ;;  %v5144_v44 = vld [vmem:[#allocation2 + $0xc1] sm:$0xff] }
 0x173   :  { %11525 = vmatmul.mubr.msk.f32.gmra.mrb[50].mxu1 %vm92_vm0, %v14454_v25  ;;  %v4448_v25 = vld [vmem:[#allocation2 + $0x140] sm:$0xff] }
 0x174   :  { %11851 = vmatmul.mubr.msk.f32.gmra.mrb[6].mxu0 %vm92_vm0, %v4432_v23  ;;  %11527 = vmatprep.mubr.msk.f32.mxu1 %vm92_vm0, %v14456_v42  ;;  %v4449_v42 = vld [vmem:[#allocation2 + $0x150] sm:$0xff] }
 0x175   :  { %11853 = vmatprep.mubr.msk.f32.mxu0 %vm92_vm0, %v4433_v47 }
 0x177   :  { %11528 = vmatmul.mubr.msk.f32.gmra.mrb[52].mxu1 %vm92_vm0, %v14466_v63  ;;  %v4454_v63 = vld [vmem:[#allocation2 + $0x188] sm:$0xff] }
 0x178   :  { %11854 = vmatmul.mubr.msk.f32.gmra.mrb[8].mxu0 %vm92_vm0, %v4434_v54  ;;  %11530 = vmatprep.mubr.msk.f32.mxu1 %vm92_vm0, %v14468_v59  ;;  %v4456_v59 = vld [vmem:[#allocation2 + $0x1a0] sm:$0xff]  ;;  %v5145_v54 = vld [vmem:[#allocation2 + $0xc9] sm:$0xff] }
 0x179   :  { %11856 = vmatprep.mubr.msk.f32.mxu0 %vm92_vm0, %v4435_v10  ;;  %v5146_v10 = vld [vmem:[#allocation2 + $0xd9] sm:$0xff] }
 0x17b   :  { %11531 = vmatmul.mubr.msk.f32.gmra.mrb[54].mxu1 %vm92_vm0, %v14477_v9  ;;  %v4458_v9 = vld [vmem:[#allocation2 + $0x1e8] sm:$0xff] }
 0x17c   :  { %11857 = vmatmul.mubr.msk.f32.gmra.mrb[10].mxu0 %vm92_vm0, %v4436_v16  ;;  %11533 = vmatprep.mubr.msk.f32.mxu1 %vm92_vm0, %v14479_v20  ;;  %v4459_v20 = vld [vmem:[#allocation2 + $0x1f8] sm:$0xff] }
 0x17d   :  { %11859 = vmatprep.mubr.msk.f32.mxu0 %vm92_vm0, %v4437_v32 }
 0x17f   :  { %11534 = vmatmul.mubr.msk.f32.gmra.mrb[56].mxu1 %vm92_vm0, %v14488_v37  ;;  %v4460_v37 = vld [vmem:[#allocation2 + $0x200] sm:$0xff] }
 0x180   :  { %11860 = vmatmul.mubr.msk.f32.gmra.mrb[12].mxu0 %vm92_vm0, %v4438_v28  ;;  %11536 = vmatprep.mubr.msk.f32.mxu1 %vm92_vm0, %v14490_v55  ;;  %v4461_v55 = vld [vmem:[#allocation2 + $0x210] sm:$0xff]  ;;  %v5147_v28 = vld [vmem:[#allocation2 + $0xe1] sm:$0xff] }
 0x181   :  { %11862 = vmatprep.mubr.msk.f32.mxu0 %vm92_vm0, %v4439_v56  ;;  %v5148_v56 = vld [vmem:[#allocation2 + $0xf1] sm:$0xff] }
 0x183   :  { %11537 = vmatmul.mubr.msk.f32.gmra.mrb[58].mxu1 %vm92_vm0, %v14500_v62  ;;  %v4462_v62 = vld [vmem:[#allocation2 + $0x218] sm:$0xff] }
 0x184   :  { %11863 = vmatmul.mubr.msk.f32.gmra.mrb[14].mxu0 %vm92_vm0, %v4440_v46  ;;  %11539 = vmatprep.mubr.msk.f32.mxu1 %vm92_vm0, %v14502_v7  ;;  %v4463_v7 = vld [vmem:[#allocation2 + $0x228] sm:$0xff] }
 0x185   :  { %11865 = vmatprep.mubr.msk.f32.mxu0 %vm92_vm0, %v4441_v38 }
 0x187   :  { %11540 = vmatmul.mubr.msk.f32.gmra.mrb[60].mxu1 %vm92_vm0, %v14512_v8  ;;  %v4464_v8 = vld [vmem:[#allocation2 + $0x230] sm:$0xff] }
 0x188   :  { %11866 = vmatmul.mubr.msk.f32.gmra.mrb[16].mxu0 %vm92_vm0, %v4442_v35  ;;  %11542 = vmatprep.mubr.msk.f32.mxu1 %vm92_vm0, %v14514_v29  ;;  %v4465_v29 = vld [vmem:[#allocation2 + $0x240] sm:$0xff] }
 0x189   :  { %11868 = vmatprep.mubr.msk.f32.mxu0 %vm92_vm0, %v4443_v43  ;;  %v5149_v35 = vld [vmem:[#allocation2 + $0xf9] sm:$0xff]  ;;  %v5150_v43 = vld [vmem:[#allocation2 + $0x109] sm:$0xff] }
 0x18b   :  { %11543 = vmatmul.mubr.msk.f32.gmra.mrb[62].mxu1 %vm92_vm0, %v14525_v13  ;;  %v2365_v13 = vld [vmem:[#allocation2 + $0x330] sm:$0xff] }
 0x18c   :  { %11869 = vmatmul.mubr.msk.f32.gmra.mrb[18].mxu0 %vm92_vm0, %v4444_v48  ;;  %11607 = vmatprep.mubr.msk.f32.mxu1 %vm92_vm0, %v14102_v41  ;;  %v4450_v41 = vld [vmem:[#allocation2 + $0x158] sm:$0xff] }
 0x18d   :  { %11871 = vmatprep.mubr.msk.f32.mxu0 %vm92_vm0, %v4445_v58 }
 0x18f   :  { %11608 = vmatmul.mubr.msk.f32.vlgmr.msra.gmra.mrb[40].mxu1 %vm92_vm0, %v14110_v51  ;;  %v4451_v51 = vld [vmem:[#allocation2 + $0x168] sm:$0xff] }
 0x190   :  { %11872 = vmatmul.mubr.msk.f32.gmra.mrb[20].mxu0 %vm92_vm0, %v4446_v11  ;;  %11610 = vmatprep.mubr.msk.f32.mxu1 %vm92_vm0, %v14113_v61  ;;  %v4452_v61 = vld [vmem:[#allocation2 + $0x170] sm:$0xff] }
 0x191   :  { %11874 = vmatprep.mubr.msk.f32.mxu0 %vm92_vm0, %v4447_v18  ;;  %v5151_v11 = vld [vmem:[#allocation2 + $0x111] sm:$0xff]  ;;  %v5152_v18 = vld [vmem:[#allocation2 + $0x121] sm:$0xff] }
 0x193   :  { %11611 = vmatmul.mubr.msk.f32.gmra.mrb[42].mxu1 %vm92_vm0, %v14122_v12  ;;  %v4453_v12 = vld [vmem:[#allocation2 + $0x180] sm:$0xff] }
 0x194   :  { %11875 = vmatmul.mubr.msk.f32.gmra.mrb[22].mxu0 %vm92_vm0, %v4448_v25  ;;  %11613 = vmatprep.mubr.msk.f32.mxu1 %vm92_vm0, %v14128_v19 }
 0x195   :  { %11877 = vmatprep.mubr.msk.f32.mxu0 %vm92_vm0, %v4449_v42 }
 0x197   :  { %11614 = vmatmul.mubr.msk.f32.gmra.mrb[44].mxu1 %vm92_vm0, %v14143_v27 }
 0x198   :  { %11878 = vmatmul.mubr.msk.f32.gmra.mrb[24].mxu0 %vm92_vm0, %v4450_v41  ;;  %11616 = vmatprep.mubr.msk.f32.mxu1 %vm92_vm0, %v14150_v34  ;;  %v5153_v41 = vld [vmem:[#allocation2 + $0x129] sm:$0xff] }
 0x199   :  { %11880 = vmatprep.mubr.msk.f32.mxu0 %vm92_vm0, %v4451_v51  ;;  %v5154_v51 = vld [vmem:[#allocation2 + $0x139] sm:$0xff] }
 0x19b   :  { %11617 = vmatmul.mubr.msk.f32.gmra.mrb[46].mxu1 %vm92_vm0, %v14161_v4 }
 0x19c   :  { %11881 = vmatmul.mubr.msk.f32.gmra.mrb[26].mxu0 %vm92_vm0, %v4452_v61  ;;  %11619 = vmatprep.mubr.msk.f32.mxu1 %vm92_vm0, %v14167_v53 }
 0x19d   :  { %11883 = vmatprep.mubr.msk.f32.mxu0 %vm92_vm0, %v4453_v12 }
 0x19f   :  { %11620 = vmatmul.mubr.msk.f32.gmra.mrb[48].mxu1 %vm92_vm0, %v14177_v5 }
 0x1a0   :  { %11884 = vmatmul.mubr.msk.f32.gmra.mrb[28].mxu0 %vm92_vm0, %v4454_v63  ;;  %11622 = vmatprep.mubr.msk.f32.mxu1 %vm92_vm0, %v14183_v40  ;;  %v5155_v63 = vld [vmem:[#allocation2 + $0x141] sm:$0xff] }
 0x1a1   :  { %11886 = vmatprep.mubr.msk.f32.mxu0 %vm92_vm0, %v4455_v24  ;;  %v5156_v24 = vld [vmem:[#allocation2 + $0x151] sm:$0xff] }
 0x1a3   :  { %11623 = vmatmul.mubr.msk.f32.gmra.mrb[50].mxu1 %vm92_vm0, %v14193_v45 }
 0x1a4   :  { %11887 = vmatmul.mubr.msk.f32.gmra.mrb[30].mxu0 %vm92_vm0, %v4456_v59  ;;  %11625 = vmatprep.mubr.msk.f32.mxu1 %vm92_vm0, %v14199_v52 }
 0x1a5   :  { %11889 = vmatprep.mubr.msk.f32.mxu0 %vm92_vm0, %v4457_v1 }
 0x1a7   :  { %11626 = vmatmul.mubr.msk.f32.gmra.mrb[52].mxu1 %vm92_vm0, %v14209_v3 }
 0x1a8   :  { %11890 = vmatmul.mubr.msk.f32.gmra.mrb[32].mxu0 %vm92_vm0, %v4458_v9  ;;  %11628 = vmatprep.mubr.msk.f32.mxu1 %vm92_vm0, %v14215_v15  ;;  %v5157_v9 = vld [vmem:[#allocation2 + $0x159] sm:$0xff] }
 0x1a9   :  { %11892 = vmatprep.mubr.msk.f32.mxu0 %vm92_vm0, %v4459_v20  ;;  %v5158_v20 = vld [vmem:[#allocation2 + $0x169] sm:$0xff] }
 0x1ab   :  { %11629 = vmatmul.mubr.msk.f32.gmra.mrb[54].mxu1 %vm92_vm0, %v14225_v21 }
 0x1ac   :  { %11893 = vmatmul.mubr.msk.f32.gmra.mrb[34].mxu0 %vm92_vm0, %v4460_v37  ;;  %11631 = vmatprep.mubr.msk.f32.mxu1 %vm92_vm0, %v14231_v31 }
 0x1ad   :  { %11895 = vmatprep.mubr.msk.f32.mxu0 %vm92_vm0, %v4461_v55 }
 0x1af   :  { %11632 = vmatmul.mubr.msk.f32.gmra.mrb[56].mxu1 %vm92_vm0, %v14241_v50 }
 0x1b0   :  { %11896 = vmatmul.mubr.msk.f32.gmra.mrb[36].mxu0 %vm92_vm0, %v4462_v62  ;;  %11634 = vmatprep.mubr.msk.f32.mxu1 %vm92_vm0, %v14247_v17  ;;  %v5159_v62 = vld [vmem:[#allocation2 + $0x171] sm:$0xff] }
 0x1b1   :  { %11898 = vmatprep.mubr.msk.f32.mxu0 %vm92_vm0, %v4463_v7  ;;  %v5160_v7 = vld [vmem:[#allocation2 + $0x181] sm:$0xff] }
 0x1b3   :  { %11635 = vmatmul.mubr.msk.f32.gmra.mrb[58].mxu1 %vm92_vm0, %v14257_v49 }
 0x1b4   :  { %11899 = vmatmul.mubr.msk.f32.gmra.mrb[38].mxu0 %vm92_vm0, %v4464_v8  ;;  %11637 = vmatprep.mubr.msk.f32.mxu1 %vm92_vm0, %v14263_v0 }
 0x1b5   :  { %11901 = vmatprep.mubr.msk.f32.mxu0 %vm92_vm0, %v4465_v29 }
 0x1b7   :  { %11638 = vmatmul.mubr.msk.f32.gmra.mrb[60].mxu1 %vm92_vm0, %v14273_v2 }
 0x1b8   :  { %11902 = vmatmul.mubr.msk.f32.gmra.mrb[40].mxu0 %vm92_vm0, %v4466_v39  ;;  %11640 = vmatprep.mubr.msk.f32.mxu1 %vm92_vm0, %v2365_v13  ;;  %v256_v39 = vld [vmem:[#allocation2 + $0x1a7] sm:$0x1] }
 0x1b9   :  { %11904 = vmatprep.mubr.msk.f32.mxu0 %vm92_vm0, %v14128_v19  ;;  %v4487_v19 = vld [vmem:[#allocation2 + $0x348] sm:$0xff]  ;;  %292 = vst.msk [vmem:[#allocation2 + $0x1a9] sm:$0x1] %vm202_vm1, %v256_v39  ;;  %v5184_v39 = vld [vmem:[#allocation2 + $0x2d1] sm:$0xff] }
 0x1bb   :  { %11641 = vmatmul.mubr.msk.f32.gmra.mrb[62].mxu1 %vm92_vm0, %v2366_v22 }
 0x1bc   :  { %11905 = vmatmul.mubr.msk.f32.gmra.mrb[42].mxu0 %vm92_vm0, %v14143_v27  ;;  %v4488_v27 = vld [vmem:[#allocation2 + $0x350] sm:$0xff] }
 0x1bd   :  { %11907 = vmatprep.mubr.msk.f32.mxu0 %vm92_vm0, %v14150_v34  ;;  %v5132_v34 = vld [vmem:[#allocation2 + $0x31] sm:$0xff] }
 0x1c0   :  { %11908 = vmatmul.mubr.msk.f32.gmra.mrb[44].mxu0 %vm92_vm0, %v14161_v4 }
 0x1c1   :  { %11910 = vmatprep.mubr.msk.f32.mxu0 %vm92_vm0, %v14167_v53 }
 0x1c4   :  { %11911 = vmatmul.mubr.msk.f32.gmra.mrb[46].mxu0 %vm92_vm0, %v14177_v5  ;;  %v5133_v5 = vld [vmem:[#allocation2 + $0x39] sm:$0xff] }
 0x1c5   :  { %11913 = vmatprep.mubr.msk.f32.mxu0 %vm92_vm0, %v14183_v40  ;;  %v5134_v40 = vld [vmem:[#allocation2 + $0x49] sm:$0xff] }
 0x1c8   :  { %11914 = vmatmul.mubr.msk.f32.gmra.mrb[48].mxu0 %vm92_vm0, %v14193_v45 }
 0x1c9   :  { %11916 = vmatprep.mubr.msk.f32.mxu0 %vm92_vm0, %v14199_v52 }
 0x1cc   :  { %11917 = vmatmul.mubr.msk.f32.gmra.mrb[50].mxu0 %vm92_vm0, %v14209_v3  ;;  %v5135_v3 = vld [vmem:[#allocation2 + $0x51] sm:$0xff] }
 0x1cd   :  { %11919 = vmatprep.mubr.msk.f32.mxu0 %vm92_vm0, %v14215_v15  ;;  %v5136_v15 = vld [vmem:[#allocation2 + $0x61] sm:$0xff] }
 0x1d0   :  { %11920 = vmatmul.mubr.msk.f32.gmra.mrb[52].mxu0 %vm92_vm0, %v14225_v21 }
 0x1d1   :  { %11922 = vmatprep.mubr.msk.f32.mxu0 %vm92_vm0, %v14231_v31 }
 0x1d4   :  { %11923 = vmatmul.mubr.msk.f32.gmra.mrb[54].mxu0 %vm92_vm0, %v14241_v50  ;;  %v5137_v50 = vld [vmem:[#allocation2 + $0x69] sm:$0xff] }
 0x1d5   :  { %11925 = vmatprep.mubr.msk.f32.mxu0 %vm92_vm0, %v14247_v17  ;;  %v5138_v17 = vld [vmem:[#allocation2 + $0x79] sm:$0xff] }
 0x1d8   :  { %11926 = vmatmul.mubr.msk.f32.gmra.mrb[56].mxu0 %vm92_vm0, %v14257_v49 }
 0x1d9   :  { %11928 = vmatprep.mubr.msk.f32.mxu0 %vm92_vm0, %v14263_v0 }
 0x1dc   :  { %11929 = vmatmul.mubr.msk.f32.gmra.mrb[58].mxu0 %vm92_vm0, %v14273_v2  ;;  %v5139_v2 = vld [vmem:[#allocation2 + $0x81] sm:$0xff] }
 0x1dd   :  { %11931 = vmatprep.mubr.msk.f32.mxu0 %vm92_vm0, %v2365_v13  ;;  %v5161_v13 = vld [vmem:[#allocation2 + $0x189] sm:$0xff] }
 0x1e0   :  { %11932 = vmatmul.mubr.msk.f32.gmra.mrb[60].mxu0 %vm92_vm0, %v2366_v22  ;;  %v5162_v22 = vld [vmem:[#allocation2 + $0x199] sm:$0xff] }
 0x1e1   :  { %11934 = vmatprep.mubr.msk.f32.mxu0 %vm92_vm0, %v4487_v19 }
 0x1e2   :  { %v14711_v4 = vpop.f32.mrb[0].mxu1 }
 0x1e3   :  { %v14713_v53 = vpop.f32.mrb[1].mxu1 }
 0x1e4   :  { %11935 = vmatmul.mubr.msk.f32.gmra.mrb[62].mxu0 %vm92_vm0, %v4488_v27 }
 0x1e5   :  { %11939 = vmatprep.mubr.msk.f32.mxu0 %vm92_vm0, %v5132_v34  ;;  %v5163_v34 = vld [vmem:[#allocation2 + $0x1a1] sm:$0xff] }
 0x1e6   :  { %v14717_v45 = vpop.f32.mrb[2].mxu1 }
 0x1e7   :  { %v14719_v52 = vpop.f32.mrb[3].mxu1 }
 0x1e8   :  { %11940 = vmatmul.mubr.msk.f32.vlgmr.msra.gmra.mrb[0].mxu0 %vm92_vm0, %v5133_v5  ;;  %v5164_v5 = vld [vmem:[#allocation2 + $0x1e1] sm:$0xff] }
 0x1e9   :  { %12036 = vmatpush3.msra.mxu0 %v14545_v60  ;;  %11942 = vmatprep.mubr.msk.f32.mxu0 %vm92_vm0, %v5134_v40  ;;  %v5142_v60 = vld [vmem:[#allocation2 + $0xa9] sm:$0xff] }
 0x1ea   :  { %v14724_v21 = vpop.f32.mrb[4].mxu1 }
 0x1eb   :  { %v14726_v31 = vpop.f32.mrb[5].mxu1 }
 0x1ec   :  { %11943 = vmatmul.mubr.msk.f32.gmra.mrb[2].mxu0 %vm92_vm0, %v5135_v3 }
 0x1ed   :  { %11945 = vmatprep.mubr.msk.f32.mxu0 %vm92_vm0, %v5136_v15  ;;  %v5165_v15 = vld [vmem:[#allocation2 + $0x1e9] sm:$0xff] }
 0x1ee   :  { %v14730_v49 = vpop.f32.mrb[6].mxu1 }
 0x1ef   :  { %v14732_v0 = vpop.f32.mrb[7].mxu1 }
 0x1f0   :  { %11946 = vmatmul.mubr.msk.f32.gmra.mrb[4].mxu0 %vm92_vm0, %v5137_v50  ;;  %v5166_v50 = vld [vmem:[#allocation2 + $0x1f9] sm:$0xff] }
 0x1f1   :  { %11948 = vmatprep.mubr.msk.f32.mxu0 %vm92_vm0, %v5138_v17 }
 0x1f2   :  { %v14736_v14 = vpop.f32.mrb[8].mxu1 }
 0x1f3   :  { %v14738_v26 = vpop.f32.mrb[9].mxu1 }
 0x1f4   :  { %11949 = vmatmul.mubr.msk.f32.gmra.mrb[6].mxu0 %vm92_vm0, %v5139_v2 }
 0x1f5   :  { %11951 = vmatprep.mubr.msk.f32.mxu0 %vm92_vm0, %v5140_v6  ;;  %v5167_v6 = vld [vmem:[#allocation2 + $0x201] sm:$0xff] }
 0x1f6   :  { %v14742_v30 = vpop.f32.mrb[10].mxu1 }
 0x1f7   :  { %v14744_v33 = vpop.f32.mrb[11].mxu1 }
 0x1f8   :  { %11952 = vmatmul.mubr.msk.f32.gmra.mrb[8].mxu0 %vm92_vm0, %v5141_v57  ;;  %v5168_v57 = vld [vmem:[#allocation2 + $0x211] sm:$0xff] }
 0x1f9   :  { %11954 = vmatprep.mubr.msk.f32.mxu0 %vm92_vm0, %v5142_v60 }
 0x1fa   :  { %v14748_v23 = vpop.f32.mrb[12].mxu1 }
 0x1fb   :  { %v14750_v47 = vpop.f32.mrb[13].mxu1 }
 0x1fc   :  { %11955 = vmatmul.mubr.msk.f32.gmra.mrb[10].mxu0 %vm92_vm0, %v5143_v36 }
 0x1fd   :  { %11957 = vmatprep.mubr.msk.f32.mxu0 %vm92_vm0, %v5144_v44  ;;  %v5169_v44 = vld [vmem:[#allocation2 + $0x219] sm:$0xff] }
 0x1fe   :  { %v14754_v16 = vpop.f32.mrb[14].mxu1 }
 0x1ff   :  { %v14756_v32 = vpop.f32.mrb[15].mxu1 }
 0x200   :  { %11958 = vmatmul.mubr.msk.f32.gmra.mrb[12].mxu0 %vm92_vm0, %v5145_v54  ;;  %v5170_v54 = vld [vmem:[#allocation2 + $0x229] sm:$0xff] }
 0x201   :  { %11960 = vmatprep.mubr.msk.f32.mxu0 %vm92_vm0, %v5146_v10 }
 0x202   :  { %v14760_v46 = vpop.f32.mrb[16].mxu1 }
 0x203   :  { %v14762_v38 = vpop.f32.mrb[17].mxu1 }
 0x204   :  { %11961 = vmatmul.mubr.msk.f32.gmra.mrb[14].mxu0 %vm92_vm0, %v5147_v28 }
 0x205   :  { %11963 = vmatprep.mubr.msk.f32.mxu0 %vm92_vm0, %v5148_v56  ;;  %v5171_v56 = vld [vmem:[#allocation2 + $0x231] sm:$0xff] }
 0x206   :  { %v14766_v48 = vpop.f32.mrb[18].mxu1 }
 0x207   :  { %v14768_v58 = vpop.f32.mrb[19].mxu1 }
 0x208   :  { %11964 = vmatmul.mubr.msk.f32.gmra.mrb[16].mxu0 %vm92_vm0, %v5149_v35  ;;  %v5172_v35 = vld [vmem:[#allocation2 + $0x241] sm:$0xff] }
 0x209   :  { %11966 = vmatprep.mubr.msk.f32.mxu0 %vm92_vm0, %v5150_v43  ;;  %v5173_v43 = vld [vmem:[#allocation2 + $0x249] sm:$0xff] }
 0x20a   :  { %v14772_v25 = vpop.f32.mrb[20].mxu1 }
 0x20b   :  { %v14774_v42 = vpop.f32.mrb[21].mxu1 }
 0x20c   :  { %11967 = vmatmul.mubr.msk.f32.gmra.mrb[18].mxu0 %vm92_vm0, %v5151_v11  ;;  %v5174_v11 = vld [vmem:[#allocation2 + $0x259] sm:$0xff] }
 0x20d   :  { %11969 = vmatprep.mubr.msk.f32.mxu0 %vm92_vm0, %v5152_v18  ;;  %v5175_v18 = vld [vmem:[#allocation2 + $0x261] sm:$0xff] }
 0x20e   :  { %v14778_v61 = vpop.f32.mrb[22].mxu1 }
 0x20f   :  { %v14780_v12 = vpop.f32.mrb[23].mxu1 }
 0x210   :  { %11970 = vmatmul.mubr.msk.f32.gmra.mrb[20].mxu0 %vm92_vm0, %v5153_v41  ;;  %v5176_v41 = vld [vmem:[#allocation2 + $0x271] sm:$0xff] }
 0x211   :  { %11972 = vmatprep.mubr.msk.f32.mxu0 %vm92_vm0, %v5154_v51  ;;  %v5177_v51 = vld [vmem:[#allocation2 + $0x279] sm:$0xff] }
 0x212   :  { %v14784_v59 = vpop.f32.mrb[24].mxu1 }
 0x213   :  { %v14786_v1 = vpop.f32.mrb[25].mxu1 }
 0x214   :  { %11973 = vmatmul.mubr.msk.f32.gmra.mrb[22].mxu0 %vm92_vm0, %v5155_v63  ;;  %v5178_v63 = vld [vmem:[#allocation2 + $0x289] sm:$0xff] }
 0x215   :  { %11975 = vmatprep.mubr.msk.f32.mxu0 %vm92_vm0, %v5156_v24  ;;  %v5179_v24 = vld [vmem:[#allocation2 + $0x291] sm:$0xff] }
 0x216   :  { %v14790_v37 = vpop.f32.mrb[26].mxu1 }
 0x217   :  { %v14792_v55 = vpop.f32.mrb[27].mxu1 }
 0x218   :  { %11976 = vmatmul.mubr.msk.f32.gmra.mrb[24].mxu0 %vm92_vm0, %v5157_v9  ;;  %v5180_v9 = vld [vmem:[#allocation2 + $0x2a1] sm:$0xff] }
 0x219   :  { %11978 = vmatprep.mubr.msk.f32.mxu0 %vm92_vm0, %v5158_v20  ;;  %v5181_v20 = vld [vmem:[#allocation2 + $0x2a9] sm:$0xff] }
 0x21a   :  { %v14796_v8 = vpop.f32.mrb[28].mxu1 }
 0x21b   :  { %v14798_v29 = vpop.f32.mrb[29].mxu1 }
 0x21c   :  { %11979 = vmatmul.mubr.msk.f32.gmra.mrb[26].mxu0 %vm92_vm0, %v5159_v62  ;;  %v5182_v62 = vld [vmem:[#allocation2 + $0x2b9] sm:$0xff] }
 0x21d   :  { %11981 = vmatprep.mubr.msk.f32.mxu0 %vm92_vm0, %v5160_v7  ;;  %v5183_v7 = vld [vmem:[#allocation2 + $0x2c1] sm:$0xff] }
 0x21e   :  { %v14803_v19 = vpop.f32.mrb[30].mxu1 }
 0x21f   :  { %v14805_v27 = vpop.f32.mrb[31].mxu1 }
 0x220   :  { %11982 = vmatmul.mubr.msk.f32.gmra.mrb[28].mxu0 %vm92_vm0, %v5161_v13  ;;  %v5185_v13 = vld [vmem:[#allocation2 + $0x2d9] sm:$0xff] }
 0x221   :  { %11984 = vmatprep.mubr.msk.f32.mxu0 %vm92_vm0, %v5162_v22  ;;  %v5186_v22 = vld [vmem:[#allocation2 + $0x2e9] sm:$0xff] }
 0x222   :  { %v14809_v40 = vpop.f32.mrb[32].mxu1 }
 0x223   :  { %v14811_v3 = vpop.f32.mrb[33].mxu1 }
 0x224   :  { %11985 = vmatmul.mubr.msk.f32.gmra.mrb[30].mxu0 %vm92_vm0, %v5163_v34  ;;  %v5187_v34 = vld [vmem:[#allocation2 + $0x2f1] sm:$0xff] }
 0x225   :  { %11987 = vmatprep.mubr.msk.f32.mxu0 %vm92_vm0, %v5164_v5  ;;  %v5188_v5 = vld [vmem:[#allocation2 + $0x301] sm:$0xff] }
 0x226   :  { %v14815_v17 = vpop.f32.mrb[34].mxu1 }
 0x227   :  { %v14817_v2 = vpop.f32.mrb[35].mxu1 }
 0x228   :  { %11988 = vmatmul.mubr.msk.f32.gmra.mrb[32].mxu0 %vm92_vm0, %v5165_v15  ;;  %v5189_v15 = vld [vmem:[#allocation2 + $0x309] sm:$0xff] }
 0x229   :  { %11990 = vmatprep.mubr.msk.f32.mxu0 %vm92_vm0, %v5166_v50  ;;  %v5190_v50 = vld [vmem:[#allocation2 + $0x319] sm:$0xff] }
 0x22a   :  { %v14821_v60 = vpop.f32.mrb[36].mxu1 }
 0x22b   :  { %v14823_v36 = vpop.f32.mrb[37].mxu1 }
 0x22c   :  { %11991 = vmatmul.mubr.msk.f32.gmra.mrb[34].mxu0 %vm92_vm0, %v5167_v6  ;;  %v5191_v6 = vld [vmem:[#allocation2 + $0x321] sm:$0xff] }
 0x22d   :  { %11993 = vmatprep.mubr.msk.f32.mxu0 %vm92_vm0, %v5168_v57  ;;  %v5192_v57 = vld [vmem:[#allocation2 + $0x331] sm:$0xff] }
 0x22e   :  { %v14827_v10 = vpop.f32.mrb[38].mxu1 }
 0x22f   :  { %v14829_v28 = vpop.f32.mrb[39].mxu1 }
 0x230   :  { %11994 = vmatmul.mubr.msk.f32.gmra.mrb[36].mxu0 %vm92_vm0, %v5169_v44  ;;  %v274_v44 = vld [vmem:[#allocation2 + $0x357] sm:$0x1] }
 0x231   :  { %11996 = vmatprep.mubr.msk.f32.mxu0 %vm92_vm0, %v5170_v54  ;;  %310 = vst.msk [vmem:[#allocation2 + $0x359] sm:$0x1] %vm202_vm1, %v274_v44  ;;  %v5193_v54 = vld [vmem:[#allocation2 + $0x339] sm:$0xff] }
 0x234   :  { %11997 = vmatmul.mubr.msk.f32.gmra.mrb[38].mxu0 %vm92_vm0, %v5171_v56  ;;  %v5194_v56 = vld [vmem:[#allocation2 + $0x349] sm:$0xff] }
 0x235   :  { %11999 = vmatprep.mubr.msk.f32.mxu0 %vm92_vm0, %v5172_v35  ;;  %v5195_v35 = vld [vmem:[#allocation2 + $0x351] sm:$0xff] }
 0x238   :  { %12000 = vmatmul.mubr.msk.f32.gmra.mrb[40].mxu0 %vm92_vm0, %v5173_v43 }
 0x239   :  { %12002 = vmatprep.mubr.msk.f32.mxu0 %vm92_vm0, %v5174_v11  ;;  %v5839_v11 = vld [vmem:[#allocation2 + $0x32] sm:$0xff] }
 0x23c   :  { %12003 = vmatmul.mubr.msk.f32.gmra.mrb[42].mxu0 %vm92_vm0, %v5175_v18 }
 0x23d   :  { %12005 = vmatprep.mubr.msk.f32.mxu0 %vm92_vm0, %v5176_v41  ;;  %v5840_v41 = vld [vmem:[#allocation2 + $0x3a] sm:$0xff] }
 0x240   :  { %12006 = vmatmul.mubr.msk.f32.gmra.mrb[44].mxu0 %vm92_vm0, %v5177_v51 }
 0x241   :  { %12008 = vmatprep.mubr.msk.f32.mxu0 %vm92_vm0, %v5178_v63  ;;  %v5841_v63 = vld [vmem:[#allocation2 + $0x4a] sm:$0xff] }
 0x244   :  { %12009 = vmatmul.mubr.msk.f32.gmra.mrb[46].mxu0 %vm92_vm0, %v5179_v24 }
 0x245   :  { %12011 = vmatprep.mubr.msk.f32.mxu0 %vm92_vm0, %v5180_v9  ;;  %v5842_v9 = vld [vmem:[#allocation2 + $0x52] sm:$0xff] }
 0x248   :  { %12012 = vmatmul.mubr.msk.f32.gmra.mrb[48].mxu0 %vm92_vm0, %v5181_v20 }
 0x249   :  { %12014 = vmatprep.mubr.msk.f32.mxu0 %vm92_vm0, %v5182_v62  ;;  %v5843_v62 = vld [vmem:[#allocation2 + $0x62] sm:$0xff] }
 0x24c   :  { %12015 = vmatmul.mubr.msk.f32.gmra.mrb[50].mxu0 %vm92_vm0, %v5183_v7 }
 0x24d   :  { %12017 = vmatprep.mubr.msk.f32.mxu0 %vm92_vm0, %v5184_v39  ;;  %v5844_v39 = vld [vmem:[#allocation2 + $0x6a] sm:$0xff] }
 0x250   :  { %12018 = vmatmul.mubr.msk.f32.gmra.mrb[52].mxu0 %vm92_vm0, %v5185_v13 }
 0x251   :  { %12020 = vmatprep.mubr.msk.f32.mxu0 %vm92_vm0, %v5186_v22  ;;  %v5845_v22 = vld [vmem:[#allocation2 + $0x7a] sm:$0xff] }
 0x254   :  { %12021 = vmatmul.mubr.msk.f32.gmra.mrb[54].mxu0 %vm92_vm0, %v5187_v34 }
 0x255   :  { %12023 = vmatprep.mubr.msk.f32.mxu0 %vm92_vm0, %v5188_v5  ;;  %v5846_v5 = vld [vmem:[#allocation2 + $0x82] sm:$0xff] }
 0x258   :  { %12024 = vmatmul.mubr.msk.f32.gmra.mrb[56].mxu0 %vm92_vm0, %v5189_v15 }
 0x259   :  { %12026 = vmatprep.mubr.msk.f32.mxu0 %vm92_vm0, %v5190_v50  ;;  %v5847_v50 = vld [vmem:[#allocation2 + $0x92] sm:$0xff] }
 0x25c   :  { %12027 = vmatmul.mubr.msk.f32.gmra.mrb[58].mxu0 %vm92_vm0, %v5191_v6 }
 0x25d   :  { %12029 = vmatprep.mubr.msk.f32.mxu0 %vm92_vm0, %v5192_v57  ;;  %v5848_v57 = vld [vmem:[#allocation2 + $0x9a] sm:$0xff] }
 0x260   :  { %12030 = vmatmul.mubr.msk.f32.gmra.mrb[60].mxu0 %vm92_vm0, %v5193_v54  ;;  %v5849_v54 = vld [vmem:[#allocation2 + $0xaa] sm:$0xff] }
 0x261   :  { %12032 = vmatprep.mubr.msk.f32.mxu0 %vm92_vm0, %v5194_v56 }
 0x262   :  { %v14858_v43 = vpop.f32.mrb[40].mxu1 }
 0x263   :  { %v14860_v18 = vpop.f32.mrb[41].mxu1 }
 0x264   :  { %12033 = vmatmul.mubr.msk.f32.gmra.mrb[62].mxu0 %vm92_vm0, %v5195_v35  ;;  %v5850_v35 = vld [vmem:[#allocation2 + $0xb2] sm:$0xff] }
 0x265   :  { %12037 = vmatprep.mubr.msk.f32.mxu0 %vm92_vm0, %v5839_v11 }
 0x266   :  { %v14864_v51 = vpop.f32.mrb[42].mxu1 }
 0x267   :  { %v14866_v24 = vpop.f32.mrb[43].mxu1 }
 0x268   :  { %12038 = vmatmul.mubr.msk.f32.vlgmr.msra.gmra.mrb[0].mxu0 %vm92_vm0, %v5840_v41  ;;  %v5851_v41 = vld [vmem:[#allocation2 + $0xc2] sm:$0xff] }
 0x269   :  { %12040 = vmatprep.mubr.msk.f32.mxu0 %vm92_vm0, %v5841_v63 }
 0x26a   :  { %v14870_v20 = vpop.f32.mrb[44].mxu1 }
 0x26b   :  { %v14872_v7 = vpop.f32.mrb[45].mxu1 }
 0x26c   :  { %12041 = vmatmul.mubr.msk.f32.gmra.mrb[2].mxu0 %vm92_vm0, %v5842_v9  ;;  %v5852_v9 = vld [vmem:[#allocation2 + $0xca] sm:$0xff] }
 0x26d   :  { %12043 = vmatprep.mubr.msk.f32.mxu0 %vm92_vm0, %v5843_v62 }
 0x26e   :  { %v14876_v13 = vpop.f32.mrb[46].mxu1 }
 0x26f   :  { %v14878_v34 = vpop.f32.mrb[47].mxu1 }
 0x270   :  { %12044 = vmatmul.mubr.msk.f32.gmra.mrb[4].mxu0 %vm92_vm0, %v5844_v39  ;;  %v5853_v39 = vld [vmem:[#allocation2 + $0xda] sm:$0xff] }
 0x271   :  { %12046 = vmatprep.mubr.msk.f32.mxu0 %vm92_vm0, %v5845_v22 }
 0x272   :  { %v14882_v15 = vpop.f32.mrb[48].mxu1 }
 0x273   :  { %v14884_v6 = vpop.f32.mrb[49].mxu1 }
 0x274   :  { %17333 = vst [vmem:[#allocation26_spill] sm:$0xff] %v14884_v6  ;;  %12047 = vmatmul.mubr.msk.f32.gmra.mrb[6].mxu0 %vm92_vm0, %v5846_v5  ;;  %v5854_v5 = vld [vmem:[#allocation2 + $0xe2] sm:$0xff] }
 0x275   :  { %12049 = vmatprep.mubr.msk.f32.mxu0 %vm92_vm0, %v5847_v50 }
 0x276   :  { %v14888_v44 = vpop.f32.mrb[50].mxu1 }
 0x277   :  { %17334 = vst [vmem:[#allocation9_spill] sm:$0xff] %v14888_v44  ;;  %v14890_v56 = vpop.f32.mrb[51].mxu1 }
 0x278   :  { %17335 = vst [vmem:[#allocation28_spill] sm:$0xff] %v14890_v56  ;;  %12050 = vmatmul.mubr.msk.f32.gmra.mrb[8].mxu0 %vm92_vm0, %v5848_v57  ;;  %v5855_v57 = vld [vmem:[#allocation2 + $0xf2] sm:$0xff] }
 0x279   :  { %12052 = vmatprep.mubr.msk.f32.mxu0 %vm92_vm0, %v5849_v54 }
 0x27a   :  { %v14894_v11 = vpop.f32.mrb[52].mxu1 }
 0x27b   :  { %17336 = vst [vmem:[#allocation10_spill] sm:$0xff] %v14894_v11  ;;  %v14896_v63 = vpop.f32.mrb[53].mxu1 }
 0x27c   :  { %17337 = vst [vmem:[#allocation11_spill] sm:$0xff] %v14896_v63  ;;  %12053 = vmatmul.mubr.msk.f32.gmra.mrb[10].mxu0 %vm92_vm0, %v5850_v35  ;;  %v5856_v35 = vld [vmem:[#allocation2 + $0xfa] sm:$0xff] }
 0x27d   :  { %12055 = vmatprep.mubr.msk.f32.mxu0 %vm92_vm0, %v5851_v41 }
 0x27e   :  { %v14900_v62 = vpop.f32.mrb[54].mxu1 }
 0x27f   :  { %17338 = vst [vmem:[#allocation12_spill] sm:$0xff] %v14900_v62  ;;  %v14902_v22 = vpop.f32.mrb[55].mxu1  ;;  %v5857_v62 = vld [vmem:[#allocation2 + $0x10a] sm:$0xff] }
 0x280   :  { %17339 = vst [vmem:[#allocation13_spill] sm:$0xff] %v14902_v22  ;;  %12056 = vmatmul.mubr.msk.f32.gmra.mrb[12].mxu0 %vm92_vm0, %v5852_v9  ;;  %v5858_v9 = vld [vmem:[#allocation2 + $0x112] sm:$0xff] }
 0x281   :  { %12058 = vmatprep.mubr.msk.f32.mxu0 %vm92_vm0, %v5853_v39 }
 0x282   :  { %v14906_v50 = vpop.f32.mrb[56].mxu1 }
 0x283   :  { %17340 = vst [vmem:[#allocation14_spill] sm:$0xff] %v14906_v50  ;;  %v14908_v54 = vpop.f32.mrb[57].mxu1  ;;  %v5859_v50 = vld [vmem:[#allocation2 + $0x122] sm:$0xff] }
 0x284   :  { %17341 = vst [vmem:[#allocation15_spill] sm:$0xff] %v14908_v54  ;;  %12059 = vmatmul.mubr.msk.f32.gmra.mrb[14].mxu0 %vm92_vm0, %v5854_v5  ;;  %v5860_v5 = vld [vmem:[#allocation2 + $0x12a] sm:$0xff] }
 0x285   :  { %12061 = vmatprep.mubr.msk.f32.mxu0 %vm92_vm0, %v5855_v57 }
 0x286   :  { %v14912_v41 = vpop.f32.mrb[58].mxu1 }
 0x287   :  { %17342 = vst [vmem:[#allocation16_spill] sm:$0xff] %v14912_v41  ;;  %v14914_v63 = vpop.f32.mrb[59].mxu1  ;;  %v5861_v41 = vld [vmem:[#allocation2 + $0x13a] sm:$0xff] }
 0x288   :  { %17343 = vst [vmem:[#allocation17_spill] sm:$0xff] %v14914_v63  ;;  %12062 = vmatmul.mubr.msk.f32.gmra.mrb[16].mxu0 %vm92_vm0, %v5856_v35  ;;  %v5863_v35 = vld [vmem:[#allocation2 + $0x152] sm:$0xff] }
 0x289   :  { %12064 = vmatprep.mubr.msk.f32.mxu0 %vm92_vm0, %v5857_v62  ;;  %v5862_v62 = vld [vmem:[#allocation2 + $0x142] sm:$0xff] }
 0x28a   :  { %v14918_v39 = vpop.f32.mrb[60].mxu1 }
 0x28b   :  { %17344 = vst [vmem:[#allocation18_spill] sm:$0xff] %v14918_v39  ;;  %v14920_v22 = vpop.f32.mrb[61].mxu1 }
 0x28c   :  { %17345 = vst [vmem:[#allocation19_spill] sm:$0xff] %v14920_v22  ;;  %12065 = vmatmul.mubr.msk.f32.gmra.mrb[18].mxu0 %vm92_vm0, %v5858_v9  ;;  %v5864_v22 = vld [vmem:[#allocation2 + $0x15a] sm:$0xff]  ;;  %v5865_v9 = vld [vmem:[#allocation2 + $0x16a] sm:$0xff] }
 0x28d   :  { %12067 = vmatprep.mubr.msk.f32.mxu0 %vm92_vm0, %v5859_v50  ;;  %v5866_v50 = vld [vmem:[#allocation2 + $0x172] sm:$0xff] }
 0x28e   :  { %v14924_v57 = vpop.f32.mrb[62].mxu1 }
 0x28f   :  { %17346 = vst [vmem:[#allocation20_spill] sm:$0xff] %v14924_v57  ;;  %v14926_v54 = vpop.f32.mrb[63].mxu1  ;;  %v5867_v57 = vld [vmem:[#allocation2 + $0x182] sm:$0xff] }
 0x290   :  { %17347 = vst [vmem:[#allocation21_spill] sm:$0xff] %v14926_v54  ;;  %12068 = vmatmul.mubr.msk.f32.gmra.mrb[20].mxu0 %vm92_vm0, %v5860_v5  ;;  %v5868_v5 = vld [vmem:[#allocation2 + $0x18a] sm:$0xff] }
 0x291   :  { %12070 = vmatprep.mubr.msk.f32.mxu0 %vm92_vm0, %v5861_v41  ;;  %v5869_v41 = vld [vmem:[#allocation2 + $0x19a] sm:$0xff] }
 0x294   :  { %12071 = vmatmul.mubr.msk.f32.gmra.mrb[22].mxu0 %vm92_vm0, %v5862_v62  ;;  %v5870_v62 = vld [vmem:[#allocation2 + $0x1a2] sm:$0xff] }
 0x295   :  { %12073 = vmatprep.mubr.msk.f32.mxu0 %vm92_vm0, %v5863_v35  ;;  %v5871_v35 = vld [vmem:[#allocation2 + $0x1e2] sm:$0xff] }
 0x298   :  { %12074 = vmatmul.mubr.msk.f32.gmra.mrb[24].mxu0 %vm92_vm0, %v5864_v22  ;;  %v5872_v22 = vld [vmem:[#allocation2 + $0x1ea] sm:$0xff] }
 0x299   :  { %12076 = vmatprep.mubr.msk.f32.mxu0 %vm92_vm0, %v5865_v9  ;;  %v5873_v9 = vld [vmem:[#allocation2 + $0x1fa] sm:$0xff] }
 0x29c   :  { %12077 = vmatmul.mubr.msk.f32.gmra.mrb[26].mxu0 %vm92_vm0, %v5866_v50  ;;  %v5874_v50 = vld [vmem:[#allocation2 + $0x202] sm:$0xff] }
 0x29d   :  { %12079 = vmatprep.mubr.msk.f32.mxu0 %vm92_vm0, %v5867_v57  ;;  %v5875_v57 = vld [vmem:[#allocation2 + $0x212] sm:$0xff] }
 0x2a0   :  { %12080 = vmatmul.mubr.msk.f32.gmra.mrb[28].mxu0 %vm92_vm0, %v5868_v5  ;;  %v5876_v5 = vld [vmem:[#allocation2 + $0x21a] sm:$0xff] }
 0x2a1   :  { %12082 = vmatprep.mubr.msk.f32.mxu0 %vm92_vm0, %v5869_v41  ;;  %v5877_v41 = vld [vmem:[#allocation2 + $0x22a] sm:$0xff] }
 0x2a4   :  { %12083 = vmatmul.mubr.msk.f32.gmra.mrb[30].mxu0 %vm92_vm0, %v5870_v62  ;;  %v5878_v62 = vld [vmem:[#allocation2 + $0x232] sm:$0xff] }
 0x2a5   :  { %12085 = vmatprep.mubr.msk.f32.mxu0 %vm92_vm0, %v5871_v35  ;;  %v5879_v35 = vld [vmem:[#allocation2 + $0x242] sm:$0xff] }
 0x2a8   :  { %12086 = vmatmul.mubr.msk.f32.gmra.mrb[32].mxu0 %vm92_vm0, %v5872_v22  ;;  %v5880_v22 = vld [vmem:[#allocation2 + $0x24a] sm:$0xff] }
 0x2a9   :  { %12088 = vmatprep.mubr.msk.f32.mxu0 %vm92_vm0, %v5873_v9  ;;  %v5881_v9 = vld [vmem:[#allocation2 + $0x25a] sm:$0xff] }
 0x2ac   :  { %12089 = vmatmul.mubr.msk.f32.gmra.mrb[34].mxu0 %vm92_vm0, %v5874_v50  ;;  %v5882_v50 = vld [vmem:[#allocation2 + $0x262] sm:$0xff] }
 0x2ad   :  { %12091 = vmatprep.mubr.msk.f32.mxu0 %vm92_vm0, %v5875_v57  ;;  %v5883_v57 = vld [vmem:[#allocation2 + $0x272] sm:$0xff] }
 0x2b0   :  { %12092 = vmatmul.mubr.msk.f32.gmra.mrb[36].mxu0 %vm92_vm0, %v5876_v5  ;;  %v5884_v5 = vld [vmem:[#allocation2 + $0x27a] sm:$0xff] }
 0x2b1   :  { %12094 = vmatprep.mubr.msk.f32.mxu0 %vm92_vm0, %v5877_v41  ;;  %v5885_v41 = vld [vmem:[#allocation2 + $0x28a] sm:$0xff] }
 0x2b4   :  { %12095 = vmatmul.mubr.msk.f32.gmra.mrb[38].mxu0 %vm92_vm0, %v5878_v62  ;;  %v5886_v62 = vld [vmem:[#allocation2 + $0x292] sm:$0xff] }
 0x2b5   :  { %12097 = vmatprep.mubr.msk.f32.mxu0 %vm92_vm0, %v5879_v35  ;;  %v5887_v35 = vld [vmem:[#allocation2 + $0x2a2] sm:$0xff] }
 0x2b8   :  { %12098 = vmatmul.mubr.msk.f32.gmra.mrb[40].mxu0 %vm92_vm0, %v5880_v22  ;;  %v5888_v22 = vld [vmem:[#allocation2 + $0x2aa] sm:$0xff] }
 0x2b9   :  { %12100 = vmatprep.mubr.msk.f32.mxu0 %vm92_vm0, %v5881_v9  ;;  %v5889_v9 = vld [vmem:[#allocation2 + $0x2ba] sm:$0xff] }
 0x2bc   :  { %12101 = vmatmul.mubr.msk.f32.gmra.mrb[42].mxu0 %vm92_vm0, %v5882_v50  ;;  %v5890_v50 = vld [vmem:[#allocation2 + $0x2c2] sm:$0xff] }
 0x2bd   :  { %12103 = vmatprep.mubr.msk.f32.mxu0 %vm92_vm0, %v5883_v57  ;;  %v5891_v57 = vld [vmem:[#allocation2 + $0x2d2] sm:$0xff] }
 0x2c0   :  { %12104 = vmatmul.mubr.msk.f32.gmra.mrb[44].mxu0 %vm92_vm0, %v5884_v5  ;;  %v5892_v5 = vld [vmem:[#allocation2 + $0x2da] sm:$0xff] }
 0x2c1   :  { %12106 = vmatprep.mubr.msk.f32.mxu0 %vm92_vm0, %v5885_v41  ;;  %v5893_v41 = vld [vmem:[#allocation2 + $0x2ea] sm:$0xff] }
 0x2c4   :  { %12107 = vmatmul.mubr.msk.f32.gmra.mrb[46].mxu0 %vm92_vm0, %v5886_v62  ;;  %v5894_v62 = vld [vmem:[#allocation2 + $0x2f2] sm:$0xff] }
 0x2c5   :  { %12109 = vmatprep.mubr.msk.f32.mxu0 %vm92_vm0, %v5887_v35  ;;  %v5895_v35 = vld [vmem:[#allocation2 + $0x302] sm:$0xff] }
 0x2c8   :  { %12110 = vmatmul.mubr.msk.f32.gmra.mrb[48].mxu0 %vm92_vm0, %v5888_v22  ;;  %v5896_v22 = vld [vmem:[#allocation2 + $0x30a] sm:$0xff] }
 0x2c9   :  { %12112 = vmatprep.mubr.msk.f32.mxu0 %vm92_vm0, %v5889_v9  ;;  %v5897_v9 = vld [vmem:[#allocation2 + $0x31a] sm:$0xff] }
 0x2cc   :  { %12113 = vmatmul.mubr.msk.f32.gmra.mrb[50].mxu0 %vm92_vm0, %v5890_v50  ;;  %v5898_v50 = vld [vmem:[#allocation2 + $0x322] sm:$0xff] }
 0x2cd   :  { %12115 = vmatprep.mubr.msk.f32.mxu0 %vm92_vm0, %v5891_v57  ;;  %v5899_v57 = vld [vmem:[#allocation2 + $0x332] sm:$0xff] }
 0x2d0   :  { %12116 = vmatmul.mubr.msk.f32.gmra.mrb[52].mxu0 %vm92_vm0, %v5892_v5  ;;  %v5900_v5 = vld [vmem:[#allocation2 + $0x33a] sm:$0xff] }
 0x2d1   :  { %12118 = vmatprep.mubr.msk.f32.mxu0 %vm92_vm0, %v5893_v41  ;;  %v5901_v41 = vld [vmem:[#allocation2 + $0x34a] sm:$0xff] }
 0x2d4   :  { %12119 = vmatmul.mubr.msk.f32.gmra.mrb[54].mxu0 %vm92_vm0, %v5894_v62  ;;  %v5902_v62 = vld [vmem:[#allocation2 + $0x352] sm:$0xff] }
 0x2d5   :  { %12121 = vmatprep.mubr.msk.f32.mxu0 %vm92_vm0, %v5895_v35 }
 0x2d8   :  { %12122 = vmatmul.mubr.msk.f32.gmra.mrb[56].mxu0 %vm92_vm0, %v5896_v22 }
 0x2d9   :  { %12124 = vmatprep.mubr.msk.f32.mxu0 %vm92_vm0, %v5897_v9 }
 0x2dc   :  { %12125 = vmatmul.mubr.msk.f32.gmra.mrb[58].mxu0 %vm92_vm0, %v5898_v50 }
 0x2dd   :  { %12127 = vmatprep.mubr.msk.f32.mxu0 %vm92_vm0, %v5899_v57 }
 0x2e0   :  { %12128 = vmatmul.mubr.msk.f32.gmra.mrb[60].mxu0 %vm92_vm0, %v5900_v5 }
 0x2e1   :  { %12130 = vmatprep.mubr.msk.f32.mxu0 %vm92_vm0, %v5901_v41 }
 0x2e4   :  { %12131 = vmatmul.mubr.msk.f32.gmra.mrb[62].mxu0 %vm92_vm0, %v5902_v62 }
 0x33b   :  { %v12039_v35 = vpop.f32.mrb[0].mxu0 }
 0x33c   :  { %v14972_v22 = vadd.f32 %v12039_v35, %v14711_v4  ;;  %v6163_v9 = vpop.f32.mrb[1].mxu0 }
 0x33d   :  { %v14975_v54 = vadd.f32 %v6163_v9, %v14713_v53 }
 0x33e   :  { %17348 = vst [vmem:[#allocation22_spill] sm:$0xff] %v14972_v22  ;;  %v6681_v50 = vmul.f32 %v14972_v22, %v14972_v22  ;;  %v6548_v57 = vsel %vm17261_vm2, %v14972_v22, 0.0 }
 0x33f   :  { %17349 = vst [vmem:[#allocation23_spill] sm:$0xff] %v14975_v54  ;;  %v6547_v5 = vsel %vm17261_vm2, %v14975_v54, 0.0  ;;  %v6680_v41 = vmul.f32 %v14975_v54, %v14975_v54  ;;  %v12042_v62 = vpop.f32.mrb[2].mxu0 }
 0x340   :  { %v14986_v4 = vadd.f32 %v12042_v62, %v14717_v45  ;;  %v6173_v35 = vpop.f32.mrb[3].mxu0  ;;  %v6745_v53 = vsel %vm17261_vm2, %v6681_v50, 0.0  ;;  %v6549_v63 = vadd.f32 %v6548_v57, %v6547_v5 }
 0x341   :  { %v6744_v9 = vsel %vm17261_vm2, %v6680_v41, 0.0  ;;  %v14991_v39 = vadd.f32 %v6173_v35, %v14719_v52 }
 0x342   :  { %v6683_v22 = vmul.f32 %v14986_v4, %v14986_v4  ;;  %v6746_v62 = vadd.f32 %v6745_v53, %v6744_v9  ;;  %v6552_v52 = vsel %vm17261_vm2, %v14986_v4, 0.0 }
 0x343   :  { %v6550_v11 = vsel %vm17261_vm2, %v14991_v39, 0.0  ;;  %v6682_v54 = vmul.f32 %v14991_v39, %v14991_v39  ;;  %v12045_v45 = vpop.f32.mrb[4].mxu0 }
 0x344   :  { %v6551_v56 = vadd.f32 %v6550_v11, %v6549_v63  ;;  %v15000_v50 = vadd.f32 %v12045_v45, %v14724_v21  ;;  %v6183_v41 = vpop.f32.mrb[5].mxu0  ;;  %v6749_v6 = vsel %vm17261_vm2, %v6683_v22, 0.0 }
 0x345   :  { %v6747_v57 = vsel %vm17261_vm2, %v6682_v54, 0.0  ;;  %v15006_v5 = vadd.f32 %v6183_v41, %v14726_v31 }
 0x346   :  { %v6553_v35 = vadd.f32 %v6552_v52, %v6551_v56  ;;  %v6748_v44 = vadd.f32 %v6747_v57, %v6746_v62  ;;  %v6685_v53 = vmul.f32 %v15000_v50, %v15000_v50  ;;  %v6556_v56 = vsel %vm17261_vm2, %v15000_v50, 0.0 }
 0x347   :  { %v6554_v21 = vsel %vm17261_vm2, %v15006_v5, 0.0  ;;  %v6684_v11 = vmul.f32 %v15006_v5, %v15006_v5  ;;  %v12048_v63 = vpop.f32.mrb[6].mxu0 }
 0x348   :  { %v6750_v9 = vadd.f32 %v6749_v6, %v6748_v44  ;;  %v6555_v45 = vadd.f32 %v6554_v21, %v6553_v35  ;;  %v15016_v54 = vadd.f32 %v12048_v63, %v14730_v49  ;;  %v6193_v31 = vpop.f32.mrb[7].mxu0  ;;  %v6753_v57 = vsel %vm17261_vm2, %v6685_v53, 0.0 }
 0x349   :  { %v6751_v22 = vsel %vm17261_vm2, %v6684_v11, 0.0  ;;  %v15022_v62 = vadd.f32 %v6193_v31, %v14732_v0 }
 0x34a   :  { %v6752_v41 = vadd.f32 %v6751_v22, %v6750_v9  ;;  %v6557_v52 = vadd.f32 %v6556_v56, %v6555_v45  ;;  %v6687_v6 = vmul.f32 %v15016_v54, %v15016_v54  ;;  %v6560_v9 = vsel %vm17261_vm2, %v15016_v54, 0.0 }
 0x34b   :  { %v6558_v49 = vsel %vm17261_vm2, %v15022_v62, 0.0  ;;  %v6686_v44 = vmul.f32 %v15022_v62, %v15022_v62  ;;  %v12051_v35 = vpop.f32.mrb[8].mxu0 }
 0x34c   :  { %v6559_v21 = vadd.f32 %v6558_v49, %v6557_v52  ;;  %v6754_v63 = vadd.f32 %v6753_v57, %v6752_v41  ;;  %v15032_v11 = vadd.f32 %v12051_v35, %v14736_v14  ;;  %v6203_v0 = vpop.f32.mrb[9].mxu0  ;;  %v6757_v22 = vsel %vm17261_vm2, %v6687_v6, 0.0 }
 0x34d   :  { %v6755_v53 = vsel %vm17261_vm2, %v6686_v44, 0.0  ;;  %v15038_v45 = vadd.f32 %v6203_v0, %v14738_v26 }
 0x34e   :  { %v6756_v31 = vadd.f32 %v6755_v53, %v6754_v63  ;;  %v6561_v56 = vadd.f32 %v6560_v9, %v6559_v21  ;;  %v6689_v52 = vmul.f32 %v15032_v11, %v15032_v11  ;;  %v6564_v21 = vsel %vm17261_vm2, %v15032_v11, 0.0 }
 0x34f   :  { %v6562_v14 = vsel %vm17261_vm2, %v15038_v45, 0.0  ;;  %v6688_v41 = vmul.f32 %v15038_v45, %v15038_v45  ;;  %v12054_v57 = vpop.f32.mrb[10].mxu0 }
 0x350   :  { %v6563_v49 = vadd.f32 %v6562_v14, %v6561_v56  ;;  %v6758_v35 = vadd.f32 %v6757_v22, %v6756_v31  ;;  %v15048_v44 = vadd.f32 %v12054_v57, %v14742_v30  ;;  %v6213_v26 = vpop.f32.mrb[11].mxu0  ;;  %v6761_v53 = vsel %vm17261_vm2, %v6689_v52, 0.0 }
 0x351   :  { %v6759_v6 = vsel %vm17261_vm2, %v6688_v41, 0.0  ;;  %v15054_v63 = vadd.f32 %v6213_v26, %v14744_v33 }
 0x352   :  { %v6760_v0 = vadd.f32 %v6759_v6, %v6758_v35  ;;  %v6565_v9 = vadd.f32 %v6564_v21, %v6563_v49  ;;  %v6691_v56 = vmul.f32 %v15048_v44, %v15048_v44  ;;  %v6568_v49 = vsel %vm17261_vm2, %v15048_v44, 0.0 }
 0x353   :  { %v6566_v30 = vsel %vm17261_vm2, %v15054_v63, 0.0  ;;  %v6690_v31 = vmul.f32 %v15054_v63, %v15054_v63  ;;  %v12057_v22 = vpop.f32.mrb[12].mxu0 }
 0x354   :  { %v6567_v14 = vadd.f32 %v6566_v30, %v6565_v9  ;;  %v6762_v57 = vadd.f32 %v6761_v53, %v6760_v0  ;;  %v15064_v41 = vadd.f32 %v12057_v22, %v14748_v23  ;;  %v6223_v33 = vpop.f32.mrb[13].mxu0  ;;  %v6765_v6 = vsel %vm17261_vm2, %v6691_v56, 0.0 }
 0x355   :  { %v6763_v52 = vsel %vm17261_vm2, %v6690_v31, 0.0  ;;  %v15070_v35 = vadd.f32 %v6223_v33, %v14750_v47 }
 0x356   :  { %v6764_v26 = vadd.f32 %v6763_v52, %v6762_v57  ;;  %v6569_v21 = vadd.f32 %v6568_v49, %v6567_v14  ;;  %v6693_v9 = vmul.f32 %v15064_v41, %v15064_v41  ;;  %v6572_v14 = vsel %vm17261_vm2, %v15064_v41, 0.0 }
 0x357   :  { %v6570_v23 = vsel %vm17261_vm2, %v15070_v35, 0.0  ;;  %v6692_v0 = vmul.f32 %v15070_v35, %v15070_v35  ;;  %v12060_v53 = vpop.f32.mrb[14].mxu0 }
 0x358   :  { %v6571_v30 = vadd.f32 %v6570_v23, %v6569_v21  ;;  %v6766_v22 = vadd.f32 %v6765_v6, %v6764_v26  ;;  %v15080_v31 = vadd.f32 %v12060_v53, %v14754_v16  ;;  %v6233_v47 = vpop.f32.mrb[15].mxu0  ;;  %v6769_v52 = vsel %vm17261_vm2, %v6693_v9, 0.0 }
 0x359   :  { %v6767_v56 = vsel %vm17261_vm2, %v6692_v0, 0.0  ;;  %v15086_v57 = vadd.f32 %v6233_v47, %v14756_v32 }
 0x35a   :  { %v6768_v33 = vadd.f32 %v6767_v56, %v6766_v22  ;;  %v6573_v49 = vadd.f32 %v6572_v14, %v6571_v30  ;;  %v6695_v21 = vmul.f32 %v15080_v31, %v15080_v31  ;;  %v6576_v30 = vsel %vm17261_vm2, %v15080_v31, 0.0 }
 0x35b   :  { %v6574_v16 = vsel %vm17261_vm2, %v15086_v57, 0.0  ;;  %v6694_v26 = vmul.f32 %v15086_v57, %v15086_v57  ;;  %v12063_v6 = vpop.f32.mrb[16].mxu0 }
 0x35c   :  { %v6575_v23 = vadd.f32 %v6574_v16, %v6573_v49  ;;  %v6770_v53 = vadd.f32 %v6769_v52, %v6768_v33  ;;  %v15096_v0 = vadd.f32 %v12063_v6, %v14760_v46  ;;  %v6243_v32 = vpop.f32.mrb[17].mxu0  ;;  %v6773_v56 = vsel %vm17261_vm2, %v6695_v21, 0.0 }
 0x35d   :  { %v6771_v9 = vsel %vm17261_vm2, %v6694_v26, 0.0  ;;  %v15102_v22 = vadd.f32 %v6243_v32, %v14762_v38 }
 0x35e   :  { %v6772_v47 = vadd.f32 %v6771_v9, %v6770_v53  ;;  %v6577_v14 = vadd.f32 %v6576_v30, %v6575_v23  ;;  %v6697_v49 = vmul.f32 %v15096_v0, %v15096_v0  ;;  %v6580_v23 = vsel %vm17261_vm2, %v15096_v0, 0.0 }
 0x35f   :  { %v6578_v46 = vsel %vm17261_vm2, %v15102_v22, 0.0  ;;  %v6696_v33 = vmul.f32 %v15102_v22, %v15102_v22  ;;  %v12066_v52 = vpop.f32.mrb[18].mxu0 }
 0x360   :  { %v6579_v16 = vadd.f32 %v6578_v46, %v6577_v14  ;;  %v6774_v6 = vadd.f32 %v6773_v56, %v6772_v47  ;;  %v15112_v26 = vadd.f32 %v12066_v52, %v14766_v48  ;;  %v6253_v38 = vpop.f32.mrb[19].mxu0  ;;  %v6777_v9 = vsel %vm17261_vm2, %v6697_v49, 0.0 }
 0x361   :  { %v6775_v21 = vsel %vm17261_vm2, %v6696_v33, 0.0  ;;  %v15118_v53 = vadd.f32 %v6253_v38, %v14768_v58 }
 0x362   :  { %v6776_v32 = vadd.f32 %v6775_v21, %v6774_v6  ;;  %v6581_v30 = vadd.f32 %v6580_v23, %v6579_v16  ;;  %v6699_v14 = vmul.f32 %v15112_v26, %v15112_v26  ;;  %v6584_v16 = vsel %vm17261_vm2, %v15112_v26, 0.0 }
 0x363   :  { %v6582_v48 = vsel %vm17261_vm2, %v15118_v53, 0.0  ;;  %v6698_v47 = vmul.f32 %v15118_v53, %v15118_v53  ;;  %v12069_v56 = vpop.f32.mrb[20].mxu0 }
 0x364   :  { %v6583_v46 = vadd.f32 %v6582_v48, %v6581_v30  ;;  %v6778_v52 = vadd.f32 %v6777_v9, %v6776_v32  ;;  %v15128_v33 = vadd.f32 %v12069_v56, %v14772_v25  ;;  %v6263_v58 = vpop.f32.mrb[21].mxu0  ;;  %v6781_v21 = vsel %vm17261_vm2, %v6699_v14, 0.0 }
 0x365   :  { %v6779_v49 = vsel %vm17261_vm2, %v6698_v47, 0.0  ;;  %v15134_v6 = vadd.f32 %v6263_v58, %v14774_v42 }
 0x366   :  { %v6780_v38 = vadd.f32 %v6779_v49, %v6778_v52  ;;  %v6585_v23 = vadd.f32 %v6584_v16, %v6583_v46  ;;  %v6701_v30 = vmul.f32 %v15128_v33, %v15128_v33  ;;  %v6588_v46 = vsel %vm17261_vm2, %v15128_v33, 0.0 }
 0x367   :  { %v6586_v25 = vsel %vm17261_vm2, %v15134_v6, 0.0  ;;  %v6700_v32 = vmul.f32 %v15134_v6, %v15134_v6  ;;  %v12072_v9 = vpop.f32.mrb[22].mxu0 }
 0x368   :  { %v6587_v48 = vadd.f32 %v6586_v25, %v6585_v23  ;;  %v6782_v56 = vadd.f32 %v6781_v21, %v6780_v38  ;;  %v15144_v47 = vadd.f32 %v12072_v9, %v14778_v61  ;;  %v6273_v42 = vpop.f32.mrb[23].mxu0  ;;  %v6785_v49 = vsel %vm17261_vm2, %v6701_v30, 0.0 }
 0x369   :  { %v6783_v14 = vsel %vm17261_vm2, %v6700_v32, 0.0  ;;  %v15150_v52 = vadd.f32 %v6273_v42, %v14780_v12 }
 0x36a   :  { %v6784_v58 = vadd.f32 %v6783_v14, %v6782_v56  ;;  %v6589_v16 = vadd.f32 %v6588_v46, %v6587_v48  ;;  %v6703_v23 = vmul.f32 %v15144_v47, %v15144_v47  ;;  %v6592_v48 = vsel %vm17261_vm2, %v15144_v47, 0.0 }
 0x36b   :  { %v6590_v61 = vsel %vm17261_vm2, %v15150_v52, 0.0  ;;  %v6702_v38 = vmul.f32 %v15150_v52, %v15150_v52  ;;  %v12075_v21 = vpop.f32.mrb[24].mxu0 }
 0x36c   :  { %v6591_v25 = vadd.f32 %v6590_v61, %v6589_v16  ;;  %v6786_v9 = vadd.f32 %v6785_v49, %v6784_v58  ;;  %v15160_v32 = vadd.f32 %v12075_v21, %v14784_v59  ;;  %v6283_v12 = vpop.f32.mrb[25].mxu0  ;;  %v6789_v14 = vsel %vm17261_vm2, %v6703_v23, 0.0 }
 0x36d   :  { %v6787_v30 = vsel %vm17261_vm2, %v6702_v38, 0.0  ;;  %v15166_v56 = vadd.f32 %v6283_v12, %v14786_v1 }
 0x36e   :  { %v6788_v42 = vadd.f32 %v6787_v30, %v6786_v9  ;;  %v6593_v46 = vadd.f32 %v6592_v48, %v6591_v25  ;;  %v6705_v16 = vmul.f32 %v15160_v32, %v15160_v32  ;;  %v6596_v25 = vsel %vm17261_vm2, %v15160_v32, 0.0 }
 0x36f   :  { %v6594_v59 = vsel %vm17261_vm2, %v15166_v56, 0.0  ;;  %v6704_v58 = vmul.f32 %v15166_v56, %v15166_v56  ;;  %v12078_v49 = vpop.f32.mrb[26].mxu0 }
 0x370   :  { %v6595_v61 = vadd.f32 %v6594_v59, %v6593_v46  ;;  %v6790_v21 = vadd.f32 %v6789_v14, %v6788_v42  ;;  %v15176_v38 = vadd.f32 %v12078_v49, %v14790_v37  ;;  %v6293_v1 = vpop.f32.mrb[27].mxu0  ;;  %v6793_v30 = vsel %vm17261_vm2, %v6705_v16, 0.0 }
 0x371   :  { %v6791_v23 = vsel %vm17261_vm2, %v6704_v58, 0.0  ;;  %v15182_v9 = vadd.f32 %v6293_v1, %v14792_v55 }
 0x372   :  { %v6792_v12 = vadd.f32 %v6791_v23, %v6790_v21  ;;  %v6597_v48 = vadd.f32 %v6596_v25, %v6595_v61  ;;  %v6707_v46 = vmul.f32 %v15176_v38, %v15176_v38  ;;  %v6600_v61 = vsel %vm17261_vm2, %v15176_v38, 0.0 }
 0x373   :  { %v6598_v37 = vsel %vm17261_vm2, %v15182_v9, 0.0  ;;  %v6706_v42 = vmul.f32 %v15182_v9, %v15182_v9  ;;  %v12081_v14 = vpop.f32.mrb[28].mxu0 }
 0x374   :  { %v6599_v59 = vadd.f32 %v6598_v37, %v6597_v48  ;;  %v6794_v49 = vadd.f32 %v6793_v30, %v6792_v12  ;;  %v15192_v58 = vadd.f32 %v12081_v14, %v14796_v8  ;;  %v6303_v55 = vpop.f32.mrb[29].mxu0  ;;  %v6797_v23 = vsel %vm17261_vm2, %v6707_v46, 0.0 }
 0x375   :  { %v6795_v16 = vsel %vm17261_vm2, %v6706_v42, 0.0  ;;  %v15198_v21 = vadd.f32 %v6303_v55, %v14798_v29 }
 0x376   :  { %v6796_v1 = vadd.f32 %v6795_v16, %v6794_v49  ;;  %v6601_v25 = vadd.f32 %v6600_v61, %v6599_v59  ;;  %v6709_v48 = vmul.f32 %v15192_v58, %v15192_v58  ;;  %v6604_v59 = vsel %vm17261_vm2, %v15192_v58, 0.0 }
 0x377   :  { %v6602_v8 = vsel %vm17261_vm2, %v15198_v21, 0.0  ;;  %v6708_v12 = vmul.f32 %v15198_v21, %v15198_v21  ;;  %v12084_v30 = vpop.f32.mrb[30].mxu0 }
 0x378   :  { %v6603_v37 = vadd.f32 %v6602_v8, %v6601_v25  ;;  %v6798_v14 = vadd.f32 %v6797_v23, %v6796_v1  ;;  %v15208_v42 = vadd.f32 %v12084_v30, %v14803_v19  ;;  %v6313_v29 = vpop.f32.mrb[31].mxu0  ;;  %v6801_v16 = vsel %vm17261_vm2, %v6709_v48, 0.0 }
 0x379   :  { %v6799_v46 = vsel %vm17261_vm2, %v6708_v12, 0.0  ;;  %v15214_v49 = vadd.f32 %v6313_v29, %v14805_v27 }
 0x37a   :  { %v6800_v55 = vadd.f32 %v6799_v46, %v6798_v14  ;;  %v6605_v61 = vadd.f32 %v6604_v59, %v6603_v37  ;;  %v6711_v25 = vmul.f32 %v15208_v42, %v15208_v42  ;;  %v6608_v37 = vsel %vm17261_vm2, %v15208_v42, 0.0 }
 0x37b   :  { %v6606_v19 = vsel %vm17261_vm2, %v15214_v49, 0.0  ;;  %v6710_v1 = vmul.f32 %v15214_v49, %v15214_v49  ;;  %v12087_v23 = vpop.f32.mrb[32].mxu0 }
 0x37c   :  { %v6607_v8 = vadd.f32 %v6606_v19, %v6605_v61  ;;  %v6802_v30 = vadd.f32 %v6801_v16, %v6800_v55  ;;  %v15224_v12 = vadd.f32 %v12087_v23, %v14809_v40  ;;  %v6323_v27 = vpop.f32.mrb[33].mxu0  ;;  %v6805_v46 = vsel %vm17261_vm2, %v6711_v25, 0.0 }
 0x37d   :  { %v6803_v48 = vsel %vm17261_vm2, %v6710_v1, 0.0  ;;  %v15230_v14 = vadd.f32 %v6323_v27, %v14811_v3 }
 0x37e   :  { %v6804_v29 = vadd.f32 %v6803_v48, %v6802_v30  ;;  %v6609_v59 = vadd.f32 %v6608_v37, %v6607_v8  ;;  %v6713_v61 = vmul.f32 %v15224_v12, %v15224_v12  ;;  %v6612_v8 = vsel %vm17261_vm2, %v15224_v12, 0.0 }
 0x37f   :  { %v6610_v40 = vsel %vm17261_vm2, %v15230_v14, 0.0  ;;  %v6712_v55 = vmul.f32 %v15230_v14, %v15230_v14  ;;  %v12090_v16 = vpop.f32.mrb[34].mxu0 }
 0x380   :  { %v6611_v19 = vadd.f32 %v6610_v40, %v6609_v59  ;;  %v6806_v23 = vadd.f32 %v6805_v46, %v6804_v29  ;;  %v15240_v1 = vadd.f32 %v12090_v16, %v14815_v17  ;;  %v6333_v3 = vpop.f32.mrb[35].mxu0  ;;  %v6809_v48 = vsel %vm17261_vm2, %v6713_v61, 0.0 }
 0x381   :  { %v6807_v25 = vsel %vm17261_vm2, %v6712_v55, 0.0  ;;  %v15246_v30 = vadd.f32 %v6333_v3, %v14817_v2 }
 0x382   :  { %v6808_v27 = vadd.f32 %v6807_v25, %v6806_v23  ;;  %v6613_v37 = vadd.f32 %v6612_v8, %v6611_v19  ;;  %v6715_v59 = vmul.f32 %v15240_v1, %v15240_v1  ;;  %v6616_v19 = vsel %vm17261_vm2, %v15240_v1, 0.0 }
 0x383   :  { %v6614_v17 = vsel %vm17261_vm2, %v15246_v30, 0.0  ;;  %v6714_v29 = vmul.f32 %v15246_v30, %v15246_v30  ;;  %v12093_v46 = vpop.f32.mrb[36].mxu0 }
 0x384   :  { %v6615_v40 = vadd.f32 %v6614_v17, %v6613_v37  ;;  %v6810_v16 = vadd.f32 %v6809_v48, %v6808_v27  ;;  %v15256_v55 = vadd.f32 %v12093_v46, %v14821_v60  ;;  %v6343_v2 = vpop.f32.mrb[37].mxu0  ;;  %v6813_v25 = vsel %vm17261_vm2, %v6715_v59, 0.0 }
 0x385   :  { %v6811_v61 = vsel %vm17261_vm2, %v6714_v29, 0.0  ;;  %v15262_v23 = vadd.f32 %v6343_v2, %v14823_v36 }
 0x386   :  { %v6812_v3 = vadd.f32 %v6811_v61, %v6810_v16  ;;  %v6617_v8 = vadd.f32 %v6616_v19, %v6615_v40  ;;  %v6717_v37 = vmul.f32 %v15256_v55, %v15256_v55  ;;  %v6620_v40 = vsel %vm17261_vm2, %v15256_v55, 0.0 }
 0x387   :  { %v6618_v60 = vsel %vm17261_vm2, %v15262_v23, 0.0  ;;  %v6716_v27 = vmul.f32 %v15262_v23, %v15262_v23  ;;  %v12096_v48 = vpop.f32.mrb[38].mxu0 }
 0x388   :  { %v6619_v17 = vadd.f32 %v6618_v60, %v6617_v8  ;;  %v6814_v46 = vadd.f32 %v6813_v25, %v6812_v3  ;;  %v15272_v29 = vadd.f32 %v12096_v48, %v14827_v10  ;;  %v6353_v36 = vpop.f32.mrb[39].mxu0  ;;  %v6817_v61 = vsel %vm17261_vm2, %v6717_v37, 0.0 }
 0x389   :  { %v6815_v59 = vsel %vm17261_vm2, %v6716_v27, 0.0  ;;  %v15278_v16 = vadd.f32 %v6353_v36, %v14829_v28 }
 0x38a   :  { %v6816_v2 = vadd.f32 %v6815_v59, %v6814_v46  ;;  %v6621_v19 = vadd.f32 %v6620_v40, %v6619_v17  ;;  %v6719_v8 = vmul.f32 %v15272_v29, %v15272_v29  ;;  %v6624_v17 = vsel %vm17261_vm2, %v15272_v29, 0.0 }
 0x38b   :  { %v6622_v10 = vsel %vm17261_vm2, %v15278_v16, 0.0  ;;  %v6718_v3 = vmul.f32 %v15278_v16, %v15278_v16  ;;  %v12099_v25 = vpop.f32.mrb[40].mxu0 }
 0x38c   :  { %v6623_v60 = vadd.f32 %v6622_v10, %v6621_v19  ;;  %v6818_v48 = vadd.f32 %v6817_v61, %v6816_v2  ;;  %v15288_v27 = vadd.f32 %v12099_v25, %v14858_v43  ;;  %v6363_v28 = vpop.f32.mrb[41].mxu0  ;;  %v6821_v59 = vsel %vm17261_vm2, %v6719_v8, 0.0 }
 0x38d   :  { %v6819_v37 = vsel %vm17261_vm2, %v6718_v3, 0.0  ;;  %v15294_v46 = vadd.f32 %v6363_v28, %v14860_v18 }
 0x38e   :  { %v6820_v36 = vadd.f32 %v6819_v37, %v6818_v48  ;;  %v6625_v40 = vadd.f32 %v6624_v17, %v6623_v60  ;;  %v6721_v19 = vmul.f32 %v15288_v27, %v15288_v27  ;;  %v6628_v60 = vsel %vm17261_vm2, %v15288_v27, 0.0 }
 0x38f   :  { %v6626_v43 = vsel %vm17261_vm2, %v15294_v46, 0.0  ;;  %v6720_v2 = vmul.f32 %v15294_v46, %v15294_v46  ;;  %v12102_v61 = vpop.f32.mrb[42].mxu0 }
 0x390   :  { %v6627_v10 = vadd.f32 %v6626_v43, %v6625_v40  ;;  %v6822_v25 = vadd.f32 %v6821_v59, %v6820_v36  ;;  %v15304_v3 = vadd.f32 %v12102_v61, %v14864_v51  ;;  %v6373_v18 = vpop.f32.mrb[43].mxu0  ;;  %v6825_v37 = vsel %vm17261_vm2, %v6721_v19, 0.0 }
 0x391   :  { %v6823_v8 = vsel %vm17261_vm2, %v6720_v2, 0.0  ;;  %v15310_v48 = vadd.f32 %v6373_v18, %v14866_v24 }
 0x392   :  { %17350 = vst [vmem:[#allocation24_spill] sm:$0xff] %v15304_v3  ;;  %v6824_v28 = vadd.f32 %v6823_v8, %v6822_v25  ;;  %v6629_v17 = vadd.f32 %v6628_v60, %v6627_v10  ;;  %v6723_v40 = vmul.f32 %v15304_v3, %v15304_v3  ;;  %v6632_v10 = vsel %vm17261_vm2, %v15304_v3, 0.0 }
 0x393   :  { %v6630_v51 = vsel %vm17261_vm2, %v15310_v48, 0.0  ;;  %v6722_v36 = vmul.f32 %v15310_v48, %v15310_v48  ;;  %v12105_v59 = vpop.f32.mrb[44].mxu0 }
 0x394   :  { %v6631_v43 = vadd.f32 %v6630_v51, %v6629_v17  ;;  %v6826_v61 = vadd.f32 %v6825_v37, %v6824_v28  ;;  %v15320_v2 = vadd.f32 %v12105_v59, %v14870_v20  ;;  %v6383_v24 = vpop.f32.mrb[45].mxu0  ;;  %v6829_v8 = vsel %vm17261_vm2, %v6723_v40, 0.0 }
 0x395   :  { %v6827_v19 = vsel %vm17261_vm2, %v6722_v36, 0.0  ;;  %v15326_v25 = vadd.f32 %v6383_v24, %v14872_v7 }
 0x396   :  { %17351 = vst [vmem:[#allocation25_spill] sm:$0xff] %v15320_v2  ;;  %v6828_v18 = vadd.f32 %v6827_v19, %v6826_v61  ;;  %v6633_v60 = vadd.f32 %v6632_v10, %v6631_v43  ;;  %v6725_v17 = vmul.f32 %v15320_v2, %v15320_v2  ;;  %v6636_v43 = vsel %vm17261_vm2, %v15320_v2, 0.0 }
 0x397   :  { %17352 = vst [vmem:[#allocation27_spill] sm:$0xff] %v15326_v25  ;;  %v6634_v20 = vsel %vm17261_vm2, %v15326_v25, 0.0  ;;  %v6724_v28 = vmul.f32 %v15326_v25, %v15326_v25  ;;  %v12108_v37 = vpop.f32.mrb[46].mxu0 }
 0x398   :  { %v6635_v51 = vadd.f32 %v6634_v20, %v6633_v60  ;;  %v6830_v59 = vadd.f32 %v6829_v8, %v6828_v18  ;;  %v15336_v36 = vadd.f32 %v12108_v37, %v14876_v13  ;;  %v6393_v7 = vpop.f32.mrb[47].mxu0  ;;  %v6833_v19 = vsel %vm17261_vm2, %v6725_v17, 0.0 }
 0x399   :  { %v6831_v40 = vsel %vm17261_vm2, %v6724_v28, 0.0  ;;  %v15342_v61 = vadd.f32 %v6393_v7, %v14878_v34 }
 0x39a   :  { %17353 = vst [vmem:[#allocation29_spill] sm:$0xff] %v15336_v36  ;;  %v6832_v24 = vadd.f32 %v6831_v40, %v6830_v59  ;;  %v6637_v10 = vadd.f32 %v6636_v43, %v6635_v51  ;;  %v6727_v60 = vmul.f32 %v15336_v36, %v15336_v36  ;;  %v6640_v51 = vsel %vm17261_vm2, %v15336_v36, 0.0  ;;  %v17356_v59 = vld [vmem:[#allocation26_spill] sm:$0xff] }
 0x39b   :  { %17354 = vst [vmem:[#allocation30_spill] sm:$0xff] %v15342_v61  ;;  %v6638_v13 = vsel %vm17261_vm2, %v15342_v61, 0.0  ;;  %v6726_v18 = vmul.f32 %v15342_v61, %v15342_v61  ;;  %v12111_v8 = vpop.f32.mrb[48].mxu0 }
 0x39c   :  { %v6639_v20 = vadd.f32 %v6638_v13, %v6637_v10  ;;  %v6834_v37 = vadd.f32 %v6833_v19, %v6832_v24  ;;  %v15352_v28 = vadd.f32 %v12111_v8, %v14882_v15  ;;  %v6403_v34 = vpop.f32.mrb[49].mxu0  ;;  %v6837_v2 = vsel %vm17261_vm2, %v6727_v60, 0.0 }
 0x39d   :  { %v6835_v17 = vsel %vm17261_vm2, %v6726_v18, 0.0  ;;  %v15358_v7 = vadd.f32 %v6403_v34, %v17356_v59  ;;  %v17358_v18 = vld [vmem:[#allocation9_spill] sm:$0xff] }
 0x39e   :  { %17355 = vst [vmem:[#allocation31_spill] sm:$0xff] %v15352_v28  ;;  %v6836_v43 = vadd.f32 %v6835_v17, %v6834_v37  ;;  %v6641_v40 = vadd.f32 %v6640_v51, %v6639_v20  ;;  %v6729_v10 = vmul.f32 %v15352_v28, %v15352_v28  ;;  %v6644_v20 = vsel %vm17261_vm2, %v15352_v28, 0.0  ;;  %v17360_v37 = vld [vmem:[#allocation28_spill] sm:$0xff] }
 0x39f   :  { %17357 = vst [vmem:[#allocation26_spill] sm:$0xff] %v15358_v7  ;;  %v6642_v15 = vsel %vm17261_vm2, %v15358_v7, 0.0  ;;  %v6728_v24 = vmul.f32 %v15358_v7, %v15358_v7  ;;  %v12114_v19 = vpop.f32.mrb[50].mxu0 }
 0x3a0   :  { %v6643_v13 = vadd.f32 %v6642_v15, %v6641_v40  ;;  %v6838_v8 = vadd.f32 %v6837_v2, %v6836_v43  ;;  %v15368_v36 = vadd.f32 %v12114_v19, %v17358_v18  ;;  %v6413_v34 = vpop.f32.mrb[51].mxu0  ;;  %v6841_v61 = vsel %vm17261_vm2, %v6729_v10, 0.0 }
 0x3a1   :  { %v6839_v60 = vsel %vm17261_vm2, %v6728_v24, 0.0  ;;  %v15374_v51 = vadd.f32 %v6413_v34, %v17360_v37  ;;  %v17362_v24 = vld [vmem:[#allocation10_spill] sm:$0xff] }
 0x3a2   :  { %17359 = vst [vmem:[#allocation9_spill] sm:$0xff] %v15368_v36  ;;  %v6840_v17 = vadd.f32 %v6839_v60, %v6838_v8  ;;  %v6645_v59 = vadd.f32 %v6644_v20, %v6643_v13  ;;  %v6731_v40 = vmul.f32 %v15368_v36, %v15368_v36  ;;  %v6648_v13 = vsel %vm17261_vm2, %v15368_v36, 0.0  ;;  %v17364_v8 = vld [vmem:[#allocation11_spill] sm:$0xff] }
 0x3a3   :  { %17361 = vst [vmem:[#allocation28_spill] sm:$0xff] %v15374_v51  ;;  %v6646_v2 = vsel %vm17261_vm2, %v15374_v51, 0.0  ;;  %v6730_v43 = vmul.f32 %v15374_v51, %v15374_v51  ;;  %v12117_v15 = vpop.f32.mrb[52].mxu0 }
 0x3a4   :  { %v6647_v19 = vadd.f32 %v6646_v2, %v6645_v59  ;;  %v6842_v18 = vadd.f32 %v6841_v61, %v6840_v17  ;;  %v15384_v28 = vadd.f32 %v12117_v15, %v17362_v24  ;;  %v6423_v34 = vpop.f32.mrb[53].mxu0  ;;  %v6845_v7 = vsel %vm17261_vm2, %v6731_v40, 0.0 }
 0x3a5   :  { %v6843_v10 = vsel %vm17261_vm2, %v6730_v43, 0.0  ;;  %v15390_v20 = vadd.f32 %v6423_v34, %v17364_v8  ;;  %v17366_v43 = vld [vmem:[#allocation12_spill] sm:$0xff] }
 0x3a6   :  { %17363 = vst [vmem:[#allocation10_spill] sm:$0xff] %v15384_v28  ;;  %v6844_v60 = vadd.f32 %v6843_v10, %v6842_v18  ;;  %v6649_v37 = vadd.f32 %v6648_v13, %v6647_v19  ;;  %v6733_v59 = vmul.f32 %v15384_v28, %v15384_v28  ;;  %v6652_v19 = vsel %vm17261_vm2, %v15384_v28, 0.0  ;;  %v17368_v18 = vld [vmem:[#allocation13_spill] sm:$0xff] }
 0x3a7   :  { %17365 = vst [vmem:[#allocation11_spill] sm:$0xff] %v15390_v20  ;;  %v6650_v61 = vsel %vm17261_vm2, %v15390_v20, 0.0  ;;  %v6732_v17 = vmul.f32 %v15390_v20, %v15390_v20  ;;  %v12120_v2 = vpop.f32.mrb[54].mxu0 }
 0x3a8   :  { %v6651_v15 = vadd.f32 %v6650_v61, %v6649_v37  ;;  %v6846_v24 = vadd.f32 %v6845_v7, %v6844_v60  ;;  %v15400_v36 = vadd.f32 %v12120_v2, %v17366_v43  ;;  %v6433_v34 = vpop.f32.mrb[55].mxu0  ;;  %v6849_v51 = vsel %vm17261_vm2, %v6733_v59, 0.0 }
 0x3a9   :  { %v6847_v40 = vsel %vm17261_vm2, %v6732_v17, 0.0  ;;  %v15406_v13 = vadd.f32 %v6433_v34, %v17368_v18  ;;  %v17370_v17 = vld [vmem:[#allocation14_spill] sm:$0xff] }
 0x3aa   :  { %17367 = vst [vmem:[#allocation12_spill] sm:$0xff] %v15400_v36  ;;  %v6848_v10 = vadd.f32 %v6847_v40, %v6846_v24  ;;  %v6653_v8 = vadd.f32 %v6652_v19, %v6651_v15  ;;  %v6735_v37 = vmul.f32 %v15400_v36, %v15400_v36  ;;  %v6656_v15 = vsel %vm17261_vm2, %v15400_v36, 0.0  ;;  %v17372_v24 = vld [vmem:[#allocation15_spill] sm:$0xff] }
 0x3ab   :  { %17369 = vst [vmem:[#allocation13_spill] sm:$0xff] %v15406_v13  ;;  %v6654_v7 = vsel %vm17261_vm2, %v15406_v13, 0.0  ;;  %v6734_v60 = vmul.f32 %v15406_v13, %v15406_v13  ;;  %v12123_v61 = vpop.f32.mrb[56].mxu0 }
 0x3ac   :  { %v6655_v2 = vadd.f32 %v6654_v7, %v6653_v8  ;;  %v6850_v43 = vadd.f32 %v6849_v51, %v6848_v10  ;;  %v15416_v28 = vadd.f32 %v12123_v61, %v17370_v17  ;;  %v6443_v34 = vpop.f32.mrb[57].mxu0  ;;  %v6853_v20 = vsel %vm17261_vm2, %v6735_v37, 0.0 }
 0x3ad   :  { %v6851_v59 = vsel %vm17261_vm2, %v6734_v60, 0.0  ;;  %v15422_v19 = vadd.f32 %v6443_v34, %v17372_v24  ;;  %v17374_v60 = vld [vmem:[#allocation16_spill] sm:$0xff] }
 0x3ae   :  { %17371 = vst [vmem:[#allocation14_spill] sm:$0xff] %v15416_v28  ;;  %v6852_v40 = vadd.f32 %v6851_v59, %v6850_v43  ;;  %v6657_v18 = vadd.f32 %v6656_v15, %v6655_v2  ;;  %v6737_v8 = vmul.f32 %v15416_v28, %v15416_v28  ;;  %v6660_v2 = vsel %vm17261_vm2, %v15416_v28, 0.0  ;;  %v17376_v43 = vld [vmem:[#allocation17_spill] sm:$0xff] }
 0x3af   :  { %17373 = vst [vmem:[#allocation15_spill] sm:$0xff] %v15422_v19  ;;  %v6658_v51 = vsel %vm17261_vm2, %v15422_v19, 0.0  ;;  %v6736_v10 = vmul.f32 %v15422_v19, %v15422_v19  ;;  %v12126_v7 = vpop.f32.mrb[58].mxu0 }
 0x3b0   :  { %v6659_v61 = vadd.f32 %v6658_v51, %v6657_v18  ;;  %v6854_v17 = vadd.f32 %v6853_v20, %v6852_v40  ;;  %v15432_v36 = vadd.f32 %v12126_v7, %v17374_v60  ;;  %v6453_v34 = vpop.f32.mrb[59].mxu0  ;;  %v6857_v13 = vsel %vm17261_vm2, %v6737_v8, 0.0 }
 0x3b1   :  { %v6855_v37 = vsel %vm17261_vm2, %v6736_v10, 0.0  ;;  %v15438_v15 = vadd.f32 %v6453_v34, %v17376_v43  ;;  %v17378_v10 = vld [vmem:[#allocation18_spill] sm:$0xff] }
 0x3b2   :  { %17375 = vst [vmem:[#allocation16_spill] sm:$0xff] %v15432_v36  ;;  %v6856_v59 = vadd.f32 %v6855_v37, %v6854_v17  ;;  %v6661_v24 = vadd.f32 %v6660_v2, %v6659_v61  ;;  %v6739_v18 = vmul.f32 %v15432_v36, %v15432_v36  ;;  %v6664_v61 = vsel %vm17261_vm2, %v15432_v36, 0.0  ;;  %v17380_v17 = vld [vmem:[#allocation19_spill] sm:$0xff] }
 0x3b3   :  { %17377 = vst [vmem:[#allocation17_spill] sm:$0xff] %v15438_v15  ;;  %v6662_v20 = vsel %vm17261_vm2, %v15438_v15, 0.0  ;;  %v6738_v40 = vmul.f32 %v15438_v15, %v15438_v15  ;;  %v12129_v51 = vpop.f32.mrb[60].mxu0 }
 0x3b4   :  { %v6663_v7 = vadd.f32 %v6662_v20, %v6661_v24  ;;  %v6858_v60 = vadd.f32 %v6857_v13, %v6856_v59  ;;  %v15448_v28 = vadd.f32 %v12129_v51, %v17378_v10  ;;  %v6463_v34 = vpop.f32.mrb[61].mxu0  ;;  %v6861_v19 = vsel %vm17261_vm2, %v6739_v18, 0.0 }
 0x3b5   :  { %v6859_v8 = vsel %vm17261_vm2, %v6738_v40, 0.0  ;;  %v15454_v2 = vadd.f32 %v6463_v34, %v17380_v17  ;;  %v17381_v40 = vld [vmem:[#allocation20_spill] sm:$0xff] }
 0x3b6   :  { %17379 = vst [vmem:[#allocation18_spill] sm:$0xff] %v15448_v28  ;;  %v6860_v37 = vadd.f32 %v6859_v8, %v6858_v60  ;;  %v6665_v43 = vadd.f32 %v6664_v61, %v6663_v7  ;;  %v6741_v24 = vmul.f32 %v15448_v28, %v15448_v28  ;;  %v6668_v7 = vsel %vm17261_vm2, %v15448_v28, 0.0  ;;  %v17383_v60 = vld [vmem:[#allocation21_spill] sm:$0xff] }
 0x3b7   :  { %v6666_v13 = vsel %vm17261_vm2, %v15454_v2, 0.0  ;;  %v6740_v59 = vmul.f32 %v15454_v2, %v15454_v2  ;;  %v12132_v20 = vpop.f32.mrb[62].mxu0 }
 0x3b8   :  { %v6667_v51 = vadd.f32 %v6666_v13, %v6665_v43  ;;  %v6862_v10 = vadd.f32 %v6861_v19, %v6860_v37  ;;  %v15464_v36 = vadd.f32 %v12132_v20, %v17381_v40  ;;  %v6473_v34 = vpop.f32.mrb[63].mxu0  ;;  %v6865_v15 = vsel %vm17261_vm2, %v6741_v24, 0.0  ;;  %v10345_v24 = vld [vmem:[%s17195_s4 + $0x18] sm:$0xff] }
 0x3b9   :  { %v6863_v18 = vsel %vm17261_vm2, %v6740_v59, 0.0  ;;  %v12486_v61 = vadd.f32 %v6473_v34, %v17383_v60  ;;  %v10344_v59 = vld [vmem:[%s17195_s4 + $0x10] sm:$0xff] }
 0x3ba   :  { %17382 = vst [vmem:[#allocation19_spill] sm:$0xff] %v15464_v36  ;;  %v6864_v8 = vadd.f32 %v6863_v18, %v6862_v10  ;;  %v6669_v17 = vadd.f32 %v6668_v7, %v6667_v51  ;;  %v6743_v25 = vmul.f32 %v15464_v36, %v15464_v36  ;;  %v6672_v20 = vsel %vm17261_vm2, %v15464_v36, 0.0 }
 0x3bb   :  { %v6670_v19 = vsel %vm17261_vm2, %v12486_v61, 0.0  ;;  %v6742_v37 = vmul.f32 %v12486_v61, %v12486_v61  ;;  %v12385_v34 = vpack.c.bf16 %v10345_v24, %v10344_v59 }
 0x3bc   :  { %v6671_v43 = vadd.f32 %v6670_v19, %v6669_v17  ;;  %v6866_v13 = vadd.f32 %v6865_v15, %v6864_v8  ;;  %v6869_v7 = vsel %vm17261_vm2, %v6743_v25, 0.0  ;;  %v7483_v25 = vld [vmem:[%s17195_s4 + $0x8] sm:$0xff] }
 0x3bd   :  { %v6867_v40 = vsel %vm17261_vm2, %v6742_v37, 0.0  ;;  %12386 = vmatprep.subr.bf16.mxu1 %v12385_v34 }
 0x3be   :  { %v6673_v51 = vadd.f32 %v6672_v20, %v6671_v43  ;;  %v6868_v10 = vadd.f32 %v6867_v40, %v6866_v13  ;;  %12388 = vmatpush3.bf16.msra.mxu1 %v12385_v34  ;;  %v7482_v43 = vld [vmem:[%s17195_s4] sm:$0xff] }
 0x3bf   :  { %v15490_v13 = vpack.c.bf16 %v7483_v25, %v7482_v43 }
 0x3c0   :  { %v6674_v18 = vrot.slane %v6673_v51, 4  ;;  %v6870_v15 = vadd.f32 %v6869_v7, %v6868_v10  ;;  %v6889_v7 = vlaneseq }
 0x3c1   :  { %17384 = vst [vmem:[#allocation20_spill] sm:$0xff] %v15490_v13  ;;  %12390 = vmatprep.subr.bf16.mxu1 %v15490_v13 }
 0x3c2   :  { %v6675_v60 = vadd.f32 %v6674_v18, %v6673_v51  ;;  %v6871_v8 = vrot.slane %v6870_v15, 4  ;;  %v6890_v18 = vshrl.u32 %v6889_v7, 7 }
 0x3c4   :  { %v6676_v17 = vrot.slane %v6675_v60, 2  ;;  %v6872_v19 = vadd.f32 %v6871_v8, %v6870_v15  ;;  %v6881_v15 = vld [vmem:[%s17193_s2] sm:$0x1] }
 0x3c6   :  { %v6677_v37 = vadd.f32 %v6676_v17, %v6675_v60  ;;  %v6873_v36 = vrot.slane %v6872_v19, 2  ;;  %v15496_v60 = vsub.s32 0, %v6890_v18 }
 0x3c8   :  { %v6678_v28 = vrot.slane %v6677_v37, 1  ;;  %v6874_v3 = vadd.f32 %v6873_v36, %v6872_v19  ;;  %17385 = vst [vmem:[#allocation21_spill] sm:$0xff] %v15496_v60 }
 0x3ca   :  { %v6679_v20 = vadd.f32 %v6678_v28, %v6677_v37  ;;  %v6875_v40 = vrot.slane %v6874_v3, 1 }
 0x3cc   :  { %v6876_v59 = vadd.f32 %v6875_v40, %v6874_v3  ;;  %v6877_v24 = vmul.f32 0.001953125, %v6679_v20  ;;  %v6885_v3 = vld [vmem:[%s17194_s3] sm:$0x1]  ;;  %v17386_v20 = vld [vmem:[#allocation23_spill] sm:$0xff] }
 0x3ce   :  { %v6878_v51 = vmul.f32 0.001953125, %v6876_v59  ;;  %v6879_v10 = vmul.f32 %v6877_v24, %v6877_v24  ;;  %v17387_v59 = vld [vmem:[#allocation22_spill] sm:$0xff] }
 0x3d0   :  { %v6880_v34 = vsub.f32 %v6878_v51, %v6879_v10 }
 0x3d2   :  { %v6882_v36 = vadd.f32 1e-05, %v6880_v34 }
 0x3d4   :  { %13066 = vrsqrt.f32 %v6882_v36 }
 0x3de   :  { %v13067_v8 = vpop.eup %13066 }
 0x3df   :  { %v6884_v28 = vmul.f32 %v13067_v8, %v6881_v15 }
 0x3e1   :  { %v6886_v17 = vmul.f32 %v6884_v28, %v6877_v24  ;;  %v15502_v19 = vrot.slane %v6884_v28, %v15496_v60 }
 0x3e3   :  { %v6887_v37 = vsub.f32 %v6885_v3, %v6886_v17  ;;  %v6954_v43 = vmul.f32 %v15454_v2, %v15502_v19  ;;  %v6956_v25 = vmul.f32 %v12486_v61, %v15502_v19  ;;  %v15509_v40 = vmul.f32 %v17386_v20, %v15502_v19 }
 0x3e4   :  { %v15513_v51 = vmul.f32 %v17387_v59, %v15502_v19  ;;  %v15517_v24 = vmul.f32 %v14991_v39, %v15502_v19  ;;  %v15521_v10 = vmul.f32 %v14986_v4, %v15502_v19  ;;  %v15525_v2 = vmul.f32 %v15006_v5, %v15502_v19 }
 0x3e5   :  { %v15528_v61 = vrot.slane %v6887_v37, %v15496_v60  ;;  %v15532_v34 = vmul.f32 %v15000_v50, %v15502_v19  ;;  %v15536_v36 = vmul.f32 %v15022_v62, %v15502_v19  ;;  %v15540_v39 = vmul.f32 %v15016_v54, %v15502_v19 }
 0x3e6   :  { %v15544_v4 = vmul.f32 %v15038_v45, %v15502_v19  ;;  %v15548_v5 = vmul.f32 %v15032_v11, %v15502_v19  ;;  %v15552_v50 = vmul.f32 %v15054_v63, %v15502_v19  ;;  %v15556_v62 = vmul.f32 %v15048_v44, %v15502_v19 }
 0x3e7   :  { %v7024_v7 = vadd.f32 %v15528_v61, %v6954_v43  ;;  %v7026_v54 = vadd.f32 %v15528_v61, %v6956_v25  ;;  %v15562_v45 = vmul.f32 %v15070_v35, %v15502_v19  ;;  %v15566_v11 = vmul.f32 %v15064_v41, %v15502_v19 }
 0x3e8   :  { %v15570_v63 = vmul.f32 %v15086_v57, %v15502_v19  ;;  %v15574_v44 = vmul.f32 %v15080_v31, %v15502_v19  ;;  %v15578_v18 = vmul.f32 %v15102_v22, %v15502_v19  ;;  %v15582_v35 = vmul.f32 %v15096_v0, %v15502_v19 }
 0x3e9   :  { %vm7088_vm3 = vcmp.gt.f32.partialorder %v7024_v7, 0.0  ;;  %vm7090_vm4 = vcmp.gt.f32.partialorder %v7026_v54, 0.0  ;;  %v7152_v41 = vmul.f32 0.2, %v7024_v7  ;;  %v7154_v15 = vmul.f32 0.2, %v7026_v54 }
 0x3ea   :  { %v15586_v57 = vmul.f32 %v15118_v53, %v15502_v19  ;;  %v15590_v31 = vmul.f32 %v15112_v26, %v15502_v19  ;;  %v15594_v22 = vmul.f32 %v15134_v6, %v15502_v19  ;;  %v15598_v0 = vmul.f32 %v15128_v33, %v15502_v19 }
 0x3eb   :  { %v7216_v8 = vsel %vm7088_vm3, %v7024_v7, %v7152_v41  ;;  %v7218_v28 = vsel %vm7090_vm4, %v7026_v54, %v7154_v15  ;;  %v15602_v3 = vmul.f32 %v15150_v52, %v15502_v19  ;;  %v15606_v53 = vmul.f32 %v15144_v47, %v15502_v19 }
 0x3ec   :  { %v7250_v26 = vmax.f32 %v7216_v8, %v7218_v28  ;;  %v15610_v17 = vmul.f32 %v15166_v56, %v15502_v19  ;;  %v15614_v6 = vmul.f32 %v15160_v32, %v15502_v19  ;;  %v15618_v33 = vmul.f32 %v15182_v9, %v15502_v19  ;;  %v17402_v8 = vld [vmem:[#allocation28_spill] sm:$0xff] }
 0x3ed   :  { %v15622_v52 = vmul.f32 %v15176_v38, %v15502_v19  ;;  %v15626_v47 = vmul.f32 %v15198_v21, %v15502_v19  ;;  %v15630_v56 = vmul.f32 %v15192_v58, %v15502_v19  ;;  %v15634_v32 = vmul.f32 %v15214_v49, %v15502_v19 }
 0x3ee   :  { %17388 = vst [vmem:[#allocation23_spill] sm:$0xff] %v15610_v17  ;;  %17389 = vst [vmem:[#allocation22_spill] sm:$0xff] %v15614_v6  ;;  %v6925_v9 = vmul.f32 %v15208_v42, %v15502_v19  ;;  %v6926_v38 = vmul.f32 %v15230_v14, %v15502_v19  ;;  %v6927_v21 = vmul.f32 %v15224_v12, %v15502_v19 }
 0x3ef   :  { %17390 = vst [vmem:[#allocation32_spill] sm:$0xff] %v15618_v33  ;;  %17391 = vst [vmem:[#allocation33_spill] sm:$0xff] %v15622_v52  ;;  %v6928_v37 = vmul.f32 %v15246_v30, %v15502_v19  ;;  %v6929_v58 = vmul.f32 %v15240_v1, %v15502_v19  ;;  %v6930_v49 = vmul.f32 %v15262_v23, %v15502_v19  ;;  %v17395_v23 = vld [vmem:[#allocation24_spill] sm:$0xff] }
 0x3f0   :  { %17392 = vst [vmem:[#allocation34_spill] sm:$0xff] %v15626_v47  ;;  %17393 = vst [vmem:[#allocation35_spill] sm:$0xff] %v15630_v56  ;;  %v6931_v43 = vmul.f32 %v15256_v55, %v15502_v19  ;;  %v6932_v42 = vmul.f32 %v15278_v16, %v15502_v19  ;;  %v6933_v14 = vmul.f32 %v15272_v29, %v15502_v19  ;;  %v17396_v55 = vld [vmem:[#allocation27_spill] sm:$0xff]  ;;  %v17397_v16 = vld [vmem:[#allocation25_spill] sm:$0xff] }
 0x3f1   :  { %17394 = vst [vmem:[#allocation36_spill] sm:$0xff] %v15634_v32  ;;  %7282 = vst.msk [vmem:[#allocation3 + $0xf0] sm:$0xff] %vm17261_vm2, %v7250_v26  ;;  %v6934_v12 = vmul.f32 %v15294_v46, %v15502_v19  ;;  %v6935_v30 = vmul.f32 %v15288_v27, %v15502_v19  ;;  %v6936_v1 = vmul.f32 %v15310_v48, %v15502_v19  ;;  %v17398_v29 = vld [vmem:[#allocation30_spill] sm:$0xff]  ;;  %v17399_v46 = vld [vmem:[#allocation29_spill] sm:$0xff] }
 0x3f2   :  { %v6937_v25 = vmul.f32 %v17395_v23, %v15502_v19  ;;  %v6938_v20 = vmul.f32 %v17396_v55, %v15502_v19  ;;  %v6939_v59 = vmul.f32 %v17397_v16, %v15502_v19  ;;  %v6940_v7 = vmul.f32 %v17398_v29, %v15502_v19  ;;  %v17400_v27 = vld [vmem:[#allocation26_spill] sm:$0xff]  ;;  %v17401_v48 = vld [vmem:[#allocation31_spill] sm:$0xff]  ;;  %v17403_v26 = vld [vmem:[#allocation9_spill] sm:$0xff] }
 0x3f3   :  { %v6941_v54 = vmul.f32 %v17399_v46, %v15502_v19  ;;  %v6942_v41 = vmul.f32 %v17400_v27, %v15502_v19  ;;  %v6943_v15 = vmul.f32 %v17401_v48, %v15502_v19  ;;  %v6944_v28 = vmul.f32 %v17402_v8, %v15502_v19  ;;  %v17404_v55 = vld [vmem:[#allocation11_spill] sm:$0xff]  ;;  %v17405_v29 = vld [vmem:[#allocation10_spill] sm:$0xff]  ;;  %v17406_v46 = vld [vmem:[#allocation13_spill] sm:$0xff] }
 0x3f4   :  { %v6945_v23 = vmul.f32 %v17403_v26, %v15502_v19  ;;  %v6946_v16 = vmul.f32 %v17404_v55, %v15502_v19  ;;  %v6947_v60 = vmul.f32 %v17405_v29, %v15502_v19  ;;  %v6948_v13 = vmul.f32 %v17406_v46, %v15502_v19  ;;  %v17407_v27 = vld [vmem:[#allocation12_spill] sm:$0xff]  ;;  %v17408_v48 = vld [vmem:[#allocation15_spill] sm:$0xff]  ;;  %v17409_v8 = vld [vmem:[#allocation14_spill] sm:$0xff] }
 0x3f5   :  { %v6949_v32 = vmul.f32 %v17407_v27, %v15502_v19  ;;  %v6950_v56 = vmul.f32 %v17408_v48, %v15502_v19  ;;  %v6951_v47 = vmul.f32 %v17409_v8, %v15502_v19  ;;  %v17410_v26 = vld [vmem:[#allocation17_spill] sm:$0xff]  ;;  %v17411_v55 = vld [vmem:[#allocation16_spill] sm:$0xff]  ;;  %v17412_v29 = vld [vmem:[#allocation18_spill] sm:$0xff]  ;;  %v15701_v27 = vadd.f32 %v15528_v61, %v15509_v40 }
 0x3f6   :  { %v6952_v52 = vmul.f32 %v17410_v26, %v15502_v19  ;;  %v6953_v33 = vmul.f32 %v17411_v55, %v15502_v19  ;;  %v6955_v6 = vmul.f32 %v17412_v29, %v15502_v19  ;;  %v17413_v46 = vld [vmem:[#allocation19_spill] sm:$0xff]  ;;  %v15705_v48 = vadd.f32 %v15528_v61, %v15513_v51  ;;  %v17420_v29 = vld [vmem:[#allocation22_spill] sm:$0xff] }
 0x3f7   :  { %v6957_v17 = vmul.f32 %v17413_v46, %v15502_v19  ;;  %v15709_v8 = vadd.f32 %v15528_v61, %v15517_v24  ;;  %v15713_v26 = vadd.f32 %v15528_v61, %v15521_v10  ;;  %v15717_v55 = vadd.f32 %v15528_v61, %v15525_v2  ;;  %v17422_v46 = vld [vmem:[#allocation32_spill] sm:$0xff] }
 0x3f8   :  { %v15721_v19 = vadd.f32 %v15528_v61, %v15532_v34  ;;  %v15725_v40 = vadd.f32 %v15528_v61, %v15536_v36  ;;  %v15729_v51 = vadd.f32 %v15528_v61, %v15540_v39  ;;  %v15733_v24 = vadd.f32 %v15528_v61, %v15544_v4 }
 0x3f9   :  { %v15737_v10 = vadd.f32 %v15528_v61, %v15548_v5  ;;  %v15741_v2 = vadd.f32 %v15528_v61, %v15552_v50  ;;  %v15745_v34 = vadd.f32 %v15528_v61, %v15556_v62  ;;  %v15749_v36 = vadd.f32 %v15528_v61, %v15562_v45 }
 0x3fa   :  { %v15753_v39 = vadd.f32 %v15528_v61, %v15566_v11  ;;  %v15757_v4 = vadd.f32 %v15528_v61, %v15570_v63  ;;  %v15761_v5 = vadd.f32 %v15528_v61, %v15574_v44  ;;  %v15765_v50 = vadd.f32 %v15528_v61, %v15578_v18 }
 0x3fb   :  { %v15769_v62 = vadd.f32 %v15528_v61, %v15582_v35  ;;  %v15773_v45 = vadd.f32 %v15528_v61, %v15586_v57  ;;  %v15777_v11 = vadd.f32 %v15528_v61, %v15590_v31  ;;  %v15781_v63 = vadd.f32 %v15528_v61, %v15594_v22  ;;  %v17418_v57 = vld [vmem:[#allocation23_spill] sm:$0xff] }
 0x3fc   :  { %17414 = vst [vmem:[#allocation24_spill] sm:$0xff] %v15765_v50  ;;  %v15785_v44 = vadd.f32 %v15528_v61, %v15598_v0  ;;  %v15789_v18 = vadd.f32 %v15528_v61, %v15602_v3  ;;  %v15793_v35 = vadd.f32 %v15528_v61, %v15606_v53  ;;  %v15797_v31 = vadd.f32 %v15528_v61, %v17418_v57 }
 0x3fd   :  { %v15801_v22 = vadd.f32 %v15528_v61, %v17420_v29  ;;  %v15805_v0 = vadd.f32 %v15528_v61, %v17422_v46  ;;  %v15827_v46 = vadd.f32 %v15528_v61, %v6926_v38  ;;  %v15848_v38 = vadd.f32 %v15528_v61, %v6933_v14 }
 0x3fe   :  { %17415 = vst [vmem:[#allocation27_spill] sm:$0xff] %v15785_v44  ;;  %17416 = vst [vmem:[#allocation25_spill] sm:$0xff] %v15789_v18  ;;  %v17423_v44 = vld [vmem:[#allocation33_spill] sm:$0xff]  ;;  %v17424_v18 = vld [vmem:[#allocation34_spill] sm:$0xff]  ;;  %v15869_v14 = vadd.f32 %v15528_v61, %v6940_v7  ;;  %v15890_v7 = vadd.f32 %v15528_v61, %v6947_v60  ;;  %v15911_v60 = vadd.f32 %v15528_v61, %v6955_v6  ;;  %vm7028_vm5 = vcmp.gt.f32.partialorder %v15701_v27, 0.0 }
 0x3ff   :  { %17417 = vst [vmem:[#allocation30_spill] sm:$0xff] %v15793_v35  ;;  %17419 = vst [vmem:[#allocation29_spill] sm:$0xff] %v15797_v31  ;;  %v15809_v3 = vadd.f32 %v15528_v61, %v17423_v44  ;;  %v15813_v53 = vadd.f32 %v15528_v61, %v17424_v18  ;;  %v17426_v35 = vld [vmem:[#allocation35_spill] sm:$0xff]  ;;  %v17427_v31 = vld [vmem:[#allocation36_spill] sm:$0xff]  ;;  %v15830_v44 = vadd.f32 %v15528_v61, %v6927_v21  ;;  %vm7029_vm6 = vcmp.gt.f32.partialorder %v15705_v48, 0.0 }
 0x400   :  { %17421 = vst [vmem:[#allocation26_spill] sm:$0xff] %v15801_v22  ;;  %v15817_v57 = vadd.f32 %v15528_v61, %v17426_v35  ;;  %v15821_v29 = vadd.f32 %v15528_v61, %v17427_v31  ;;  %v15824_v22 = vadd.f32 %v15528_v61, %v6925_v9  ;;  %v15833_v18 = vadd.f32 %v15528_v61, %v6928_v37 }
 0x401   :  { %17425 = vst [vmem:[#allocation31_spill] sm:$0xff] %v15813_v53  ;;  %v15836_v53 = vadd.f32 %v15528_v61, %v6929_v58  ;;  %v15839_v35 = vadd.f32 %v15528_v61, %v6930_v49  ;;  %v15842_v31 = vadd.f32 %v15528_v61, %v6931_v43  ;;  %v15845_v9 = vadd.f32 %v15528_v61, %v6932_v42 }
 0x402   :  { %v15851_v21 = vadd.f32 %v15528_v61, %v6934_v12  ;;  %v15854_v37 = vadd.f32 %v15528_v61, %v6935_v30  ;;  %v15857_v58 = vadd.f32 %v15528_v61, %v6936_v1  ;;  %v15860_v49 = vadd.f32 %v15528_v61, %v6937_v25  ;;  %17429 = vst [vmem:[#allocation9_spill] sm:$0xff] %v15869_v14 }
 0x403   :  { %v15863_v43 = vadd.f32 %v15528_v61, %v6938_v20  ;;  %v15866_v42 = vadd.f32 %v15528_v61, %v6939_v59  ;;  %v15872_v12 = vadd.f32 %v15528_v61, %v6941_v54  ;;  %v15875_v30 = vadd.f32 %v15528_v61, %v6942_v41  ;;  %17436 = vst [vmem:[#allocation17_spill] sm:$0xff] %v15890_v7 }
 0x404   :  { %v15878_v1 = vadd.f32 %v15528_v61, %v6943_v15  ;;  %v15881_v25 = vadd.f32 %v15528_v61, %v6944_v28  ;;  %v15884_v20 = vadd.f32 %v15528_v61, %v6945_v23  ;;  %v15887_v59 = vadd.f32 %v15528_v61, %v6946_v16  ;;  %17443 = vst [vmem:[#allocation33_spill] sm:$0xff] %v15911_v60 }
 0x405   :  { %17428 = vst [vmem:[#allocation28_spill] sm:$0xff] %v15866_v42  ;;  %17430 = vst [vmem:[#allocation11_spill] sm:$0xff] %v15872_v12  ;;  %v15893_v54 = vadd.f32 %v15528_v61, %v6948_v13  ;;  %v15896_v41 = vadd.f32 %v15528_v61, %v6949_v32  ;;  %v15899_v15 = vadd.f32 %v15528_v61, %v6950_v56  ;;  %vm7030_vm7 = vcmp.gt.f32.partialorder %v15709_v8, 0.0 }
 0x406   :  { %17431 = vst [vmem:[#allocation10_spill] sm:$0xff] %v15875_v30  ;;  %17432 = vst [vmem:[#allocation13_spill] sm:$0xff] %v15878_v1  ;;  %v15902_v28 = vadd.f32 %v15528_v61, %v6951_v47  ;;  %v15905_v23 = vadd.f32 %v15528_v61, %v6952_v52  ;;  %v15908_v16 = vadd.f32 %v15528_v61, %v6953_v33  ;;  %vm7031_vm8 = vcmp.gt.f32.partialorder %v15713_v26, 0.0 }
 0x407   :  { %17433 = vst [vmem:[#allocation12_spill] sm:$0xff] %v15881_v25  ;;  %17434 = vst [vmem:[#allocation15_spill] sm:$0xff] %v15884_v20  ;;  %v15914_v13 = vadd.f32 %v15528_v61, %v6957_v17  ;;  %vm7032_vm9 = vcmp.gt.f32.partialorder %v15717_v55, 0.0  ;;  %vm7033_vm10 = vcmp.gt.f32.partialorder %v15721_v19, 0.0  ;;  %vm7034_vm11 = vcmp.gt.f32.partialorder %v15725_v40, 0.0 }
 0x408   :  { %17435 = vst [vmem:[#allocation14_spill] sm:$0xff] %v15887_v59  ;;  %17437 = vst [vmem:[#allocation16_spill] sm:$0xff] %v15893_v54  ;;  %vm7035_vm12 = vcmp.gt.f32.partialorder %v15729_v51, 0.0  ;;  %vm7036_vm13 = vcmp.gt.f32.partialorder %v15733_v24, 0.0  ;;  %vm7037_vm14 = vcmp.gt.f32.partialorder %v15737_v10, 0.0  ;;  %vm7038_vm15 = vcmp.gt.f32.partialorder %v15741_v2, 0.0 }
 0x409   :  { %17438 = vst [vmem:[#allocation18_spill] sm:$0xff] %v15896_v41  ;;  %17439 = vst [vmem:[#allocation19_spill] sm:$0xff] %v15899_v15  ;;  %v7092_v61 = vmul.f32 0.2, %v15701_v27  ;;  %v7093_v17 = vmul.f32 0.2, %v15705_v48 }
 0x40a   :  { %17440 = vst [vmem:[#allocation23_spill] sm:$0xff] %v15902_v28  ;;  %17441 = vst [vmem:[#allocation22_spill] sm:$0xff] %v15905_v23  ;;  %v7094_v6 = vmul.f32 0.2, %v15709_v8  ;;  %v7095_v33 = vmul.f32 0.2, %v15713_v26 }
 0x40b   :  { %17442 = vst [vmem:[#allocation32_spill] sm:$0xff] %v15908_v16  ;;  %17444 = vst [vmem:[#allocation34_spill] sm:$0xff] %v15914_v13  ;;  %vm7039_vm0 = vcmp.gt.f32.partialorder %v15745_v34, 0.0  ;;  %v7096_v52 = vmul.f32 0.2, %v15717_v55  ;;  %v15938_v32 = vsel %vm7028_vm5, %v15701_v27, %v7092_v61  ;;  %vm7040_vm1 = vcmp.gt.f32.partialorder %v15749_v36, 0.0 }
 0x40c   :  { %v7097_v47 = vmul.f32 0.2, %v15721_v19  ;;  %v7098_v56 = vmul.f32 0.2, %v15725_v40  ;;  %17445 = vst [vmem:[#allocation35_spill] sm:$0xff] %v15938_v32  ;;  %v15947_v23 = vsel %vm7029_vm6, %v15705_v48, %v7093_v17  ;;  %vm7041_vm3 = vcmp.gt.f32.partialorder %v15753_v39, 0.0 }
 0x40d   :  { %v7099_v13 = vmul.f32 0.2, %v15729_v51  ;;  %v7100_v60 = vmul.f32 0.2, %v15733_v24  ;;  %v7101_v16 = vmul.f32 0.2, %v15737_v10  ;;  %v15958_v32 = vsel %vm7030_vm7, %v15709_v8, %v7094_v6 }
 0x40e   :  { %17446 = vst [vmem:[#allocation36_spill] sm:$0xff] %v15947_v23  ;;  %v7102_v28 = vmul.f32 0.2, %v15741_v2  ;;  %v7103_v27 = vmul.f32 0.2, %v15745_v34  ;;  %17447 = vst [vmem:[#allocation37_spill] sm:$0xff] %v15958_v32  ;;  %v15973_v23 = vsel %vm7031_vm8, %v15713_v26, %v7095_v33  ;;  %v15988_v41 = vsel %vm7032_vm9, %v15717_v55, %v7096_v52 }
 0x40f   :  { %v15953_v61 = vmul.f32 0.2, %v15749_v36  ;;  %vm7042_vm4 = vcmp.gt.f32.partialorder %v15757_v4, 0.0  ;;  %v15962_v15 = vmul.f32 0.2, %v15753_v39  ;;  %17448 = vst [vmem:[#allocation38_spill] sm:$0xff] %v15973_v23 }
 0x410   :  { %v15965_v48 = vmul.f32 0.2, %v15757_v4  ;;  %v15968_v17 = vmul.f32 0.2, %v15761_v5  ;;  %vm7043_vm5 = vcmp.gt.f32.partialorder %v15761_v5, 0.0  ;;  %17452 = vst [vmem:[#allocation42_spill] sm:$0xff] %v15988_v41 }
 0x411   :  { %v15977_v8 = vmul.f32 0.2, %v15765_v50  ;;  %v15980_v6 = vmul.f32 0.2, %v15769_v62  ;;  %v15983_v32 = vmul.f32 0.2, %v15773_v45 }
 0x412   :  { %vm7044_vm6 = vcmp.gt.f32.partialorder %v15765_v50, 0.0  ;;  %v15992_v26 = vmul.f32 0.2, %v15777_v11  ;;  %v15995_v33 = vmul.f32 0.2, %v15781_v63  ;;  %v17454_v23 = vld [vmem:[#allocation27_spill] sm:$0xff] }
 0x413   :  { %17449 = vst [vmem:[#allocation39_spill] sm:$0xff] %v15977_v8  ;;  %17450 = vst [vmem:[#allocation40_spill] sm:$0xff] %v15980_v6  ;;  %v15998_v8 = vmul.f32 0.2, %v17454_v23  ;;  %vm7045_vm7 = vcmp.gt.f32.partialorder %v15769_v62, 0.0  ;;  %v17457_v55 = vld [vmem:[#allocation25_spill] sm:$0xff] }
 0x414   :  { %17451 = vst [vmem:[#allocation41_spill] sm:$0xff] %v15983_v32  ;;  %17453 = vst [vmem:[#allocation43_spill] sm:$0xff] %v15992_v26  ;;  %v16003_v32 = vsel %vm7033_vm10, %v15721_v19, %v7097_v47  ;;  %v16007_v52 = vmul.f32 0.2, %v17457_v55  ;;  %v17459_v41 = vld [vmem:[#allocation30_spill] sm:$0xff]  ;;  %v17460_v26 = vld [vmem:[#allocation29_spill] sm:$0xff] }
 0x415   :  { %17455 = vst [vmem:[#allocation27_spill] sm:$0xff] %v15998_v8  ;;  %17456 = vst [vmem:[#allocation44_spill] sm:$0xff] %v16003_v32  ;;  %v16010_v6 = vmul.f32 0.2, %v17459_v41  ;;  %v16013_v50 = vmul.f32 0.2, %v17460_v26  ;;  %v16018_v8 = vsel %vm7034_vm11, %v15725_v40, %v7098_v56 }
 0x416   :  { %17458 = vst [vmem:[#allocation25_spill] sm:$0xff] %v16007_v52  ;;  %17462 = vst [vmem:[#allocation29_spill] sm:$0xff] %v16018_v8  ;;  %vm7046_vm8 = vcmp.gt.f32.partialorder %v15773_v45, 0.0  ;;  %v17463_v19 = vld [vmem:[#allocation26_spill] sm:$0xff]  ;;  %v16025_v32 = vmul.f32 0.2, %v15805_v0 }
 0x417   :  { %17461 = vst [vmem:[#allocation30_spill] sm:$0xff] %v16013_v50  ;;  %v16022_v47 = vmul.f32 0.2, %v17463_v19  ;;  %v16028_v52 = vmul.f32 0.2, %v15809_v3  ;;  %v16033_v50 = vsel %vm7035_vm12, %v15729_v51, %v7099_v13  ;;  %vm7047_vm9 = vcmp.gt.f32.partialorder %v15777_v11, 0.0 }
 0x418   :  { %17464 = vst [vmem:[#allocation26_spill] sm:$0xff] %v16025_v32  ;;  %17465 = vst [vmem:[#allocation45_spill] sm:$0xff] %v16033_v50  ;;  %v17466_v40 = vld [vmem:[#allocation31_spill] sm:$0xff]  ;;  %v16042_v8 = vmul.f32 0.2, %v15817_v57  ;;  %v16050_v51 = vsel %vm7036_vm13, %v15733_v24, %v7100_v60  ;;  %vm7050_vm12 = vcmp.gt.f32.partialorder %v17457_v55, 0.0  ;;  %v16068_v24 = vsel %vm7037_vm14, %v15737_v10, %v7101_v16 }
 0x419   :  { %v16039_v56 = vmul.f32 0.2, %v17466_v40  ;;  %v16045_v32 = vmul.f32 0.2, %v15821_v29  ;;  %17468 = vst [vmem:[#allocation46_spill] sm:$0xff] %v16050_v51  ;;  %17470 = vst [vmem:[#allocation48_spill] sm:$0xff] %v16068_v24  ;;  %v16086_v10 = vsel %vm7038_vm15, %v15741_v2, %v7102_v28  ;;  %v16104_v2 = vsel %vm7039_vm0, %v15745_v34, %v7103_v27 }
 0x41a   :  { %v16057_v13 = vmul.f32 0.2, %v15824_v22  ;;  %v16060_v50 = vmul.f32 0.2, %v15827_v46  ;;  %vm7054_vm13 = vcmp.gt.f32.partialorder %v15805_v0, 0.0  ;;  %17472 = vst [vmem:[#allocation50_spill] sm:$0xff] %v16086_v10  ;;  %v16123_v34 = vsel %vm7040_vm1, %v15749_v36, %v15953_v61 }
 0x41b   :  { %17467 = vst [vmem:[#allocation31_spill] sm:$0xff] %v16045_v32  ;;  %v16063_v32 = vmul.f32 0.2, %v15830_v44  ;;  %v16075_v60 = vmul.f32 0.2, %v15833_v18  ;;  %vm7058_vm14 = vcmp.gt.f32.partialorder %v15821_v29, 0.0  ;;  %v16142_v36 = vsel %vm7041_vm3, %v15753_v39, %v15962_v15 }
 0x41c   :  { %v16078_v51 = vmul.f32 0.2, %v15836_v53  ;;  %v16093_v16 = vmul.f32 0.2, %v15842_v31  ;;  %v16096_v24 = vmul.f32 0.2, %v15845_v9  ;;  %v16161_v39 = vsel %vm7042_vm4, %v15757_v4, %v15965_v48 }
 0x41d   :  { %17469 = vst [vmem:[#allocation47_spill] sm:$0xff] %v16063_v32  ;;  %v16081_v32 = vmul.f32 0.2, %v15839_v35  ;;  %17474 = vst [vmem:[#allocation52_spill] sm:$0xff] %v16104_v2  ;;  %vm7062_vm15 = vcmp.gt.f32.partialorder %v15833_v18, 0.0  ;;  %vm7066_vm0 = vcmp.gt.f32.partialorder %v15845_v9, 0.0  ;;  %v16174_v4 = vsel %vm7043_vm5, %v15761_v5, %v15968_v17 }
 0x41e   :  { %v16111_v28 = vmul.f32 0.2, %v15851_v21  ;;  %v16114_v10 = vmul.f32 0.2, %v15854_v37  ;;  %17476 = vst [vmem:[#allocation54_spill] sm:$0xff] %v16123_v34  ;;  %17478 = vst [vmem:[#allocation56_spill] sm:$0xff] %v16142_v36 }
 0x41f   :  { %17471 = vst [vmem:[#allocation49_spill] sm:$0xff] %v16081_v32  ;;  %v16099_v32 = vmul.f32 0.2, %v15848_v38  ;;  %v16130_v27 = vmul.f32 0.2, %v15860_v49  ;;  %vm7070_vm1 = vcmp.gt.f32.partialorder %v15857_v58, 0.0 }
 0x420   :  { %v16133_v2 = vmul.f32 0.2, %v15863_v43  ;;  %v16149_v61 = vmul.f32 0.2, %v15869_v14  ;;  %v16152_v34 = vmul.f32 0.2, %v15872_v12 }
 0x421   :  { %17473 = vst [vmem:[#allocation51_spill] sm:$0xff] %v16099_v32  ;;  %v16117_v32 = vmul.f32 0.2, %v15857_v58  ;;  %17482 = vst [vmem:[#allocation60_spill] sm:$0xff] %v16161_v39  ;;  %vm7074_vm3 = vcmp.gt.f32.partialorder %v15869_v14, 0.0  ;;  %vm7078_vm4 = vcmp.gt.f32.partialorder %v15881_v25, 0.0 }
 0x422   :  { %17479 = vst [vmem:[#allocation57_spill] sm:$0xff] %v16149_v61  ;;  %17480 = vst [vmem:[#allocation58_spill] sm:$0xff] %v16152_v34  ;;  %v7141_v15 = vmul.f32 0.2, %v15878_v1  ;;  %v7142_v36 = vmul.f32 0.2, %v15881_v25 }
 0x423   :  { %17475 = vst [vmem:[#allocation53_spill] sm:$0xff] %v16117_v32  ;;  %v16136_v32 = vmul.f32 0.2, %v15866_v42  ;;  %17483 = vst [vmem:[#allocation61_spill] sm:$0xff] %v16174_v4  ;;  %v7144_v48 = vmul.f32 0.2, %v15887_v59 }
 0x424   :  { %v7145_v39 = vmul.f32 0.2, %v15890_v7  ;;  %v7146_v1 = vmul.f32 0.2, %v15893_v54  ;;  %v17485_v12 = vld [vmem:[#allocation24_spill] sm:$0xff]  ;;  %vm7082_vm5 = vcmp.gt.f32.partialorder %v15893_v54, 0.0 }
 0x425   :  { %17477 = vst [vmem:[#allocation55_spill] sm:$0xff] %v16136_v32  ;;  %v16155_v32 = vmul.f32 0.2, %v15875_v30  ;;  %v17484_v30 = vld [vmem:[#allocation39_spill] sm:$0xff]  ;;  %v17487_v17 = vld [vmem:[#allocation18_spill] sm:$0xff]  ;;  %v17490_v34 = vld [vmem:[#allocation40_spill] sm:$0xff] }
 0x426   :  { %v16187_v5 = vsel %vm7044_vm6, %v17485_v12, %v17484_v30  ;;  %v17488_v4 = vld [vmem:[#allocation19_spill] sm:$0xff]  ;;  %v7147_v59 = vmul.f32 0.2, %v17487_v17  ;;  %v16200_v12 = vsel %vm7045_vm7, %v15769_v62, %v17490_v34  ;;  %v17492_v30 = vld [vmem:[#allocation22_spill] sm:$0xff]  ;;  %v17494_v54 = vld [vmem:[#allocation33_spill] sm:$0xff]  ;;  %vm17499_vm7 = vcmp.gt.f32.partialorder %v15781_v63, 0.0 }
 0x427   :  { %17481 = vst [vmem:[#allocation59_spill] sm:$0xff] %v16155_v32  ;;  %v7143_v32 = vmul.f32 0.2, %v15884_v20  ;;  %17486 = vst [vmem:[#allocation39_spill] sm:$0xff] %v16187_v5  ;;  %v17489_v20 = vld [vmem:[#allocation23_spill] sm:$0xff]  ;;  %vm7086_vm6 = vcmp.gt.f32.partialorder %v17492_v30, 0.0 }
 0x428   :  { %v7148_v7 = vmul.f32 0.2, %v17488_v4  ;;  %v7149_v25 = vmul.f32 0.2, %v17489_v20  ;;  %17491 = vst [vmem:[#allocation24_spill] sm:$0xff] %v16200_v12  ;;  %v17493_v5 = vld [vmem:[#allocation32_spill] sm:$0xff] }
 0x429   :  { %vm7087_vm2 = vcmp.gt.f32.partialorder %v17493_v5, 0.0  ;;  %vm7089_vm11 = vcmp.gt.f32.partialorder %v17494_v54, 0.0  ;;  %v17495_v14 = vld [vmem:[#allocation34_spill] sm:$0xff]  ;;  %v7150_v17 = vmul.f32 0.2, %v17492_v30  ;;  %v17496_v61 = vld [vmem:[#allocation41_spill] sm:$0xff] }
 0x42a   :  { %v7151_v4 = vmul.f32 0.2, %v17493_v5  ;;  %v7153_v20 = vmul.f32 0.2, %v17494_v54  ;;  %v16213_v62 = vsel %vm7046_vm8, %v15773_v45, %v17496_v61  ;;  %v7155_v34 = vmul.f32 0.2, %v17495_v14 }
 0x42b   :  { %17497 = vst [vmem:[#allocation40_spill] sm:$0xff] %v16213_v62  ;;  %v17498_v12 = vld [vmem:[#allocation43_spill] sm:$0xff]  ;;  %v16226_v5 = vsel %vm17499_vm7, %v15781_v63, %v15995_v33  ;;  %vm17501_vm10 = vcmp.gt.f32.partialorder %v17454_v23, 0.0  ;;  %v17502_v61 = vld [vmem:[#allocation25_spill] sm:$0xff]  ;;  %vm17503_vm8 = vcmp.gt.f32.partialorder %v17459_v41, 0.0  ;;  %v17504_v63 = vld [vmem:[#allocation30_spill] sm:$0xff] }
 0x42c   :  { %v16220_v42 = vsel %vm7047_vm9, %v15777_v11, %v17498_v12  ;;  %v17500_v54 = vld [vmem:[#allocation27_spill] sm:$0xff]  ;;  %v16238_v62 = vsel %vm7050_vm12, %v17457_v55, %v17502_v61  ;;  %v16244_v11 = vsel %vm17503_vm8, %v17459_v41, %v16010_v6  ;;  %vm17505_vm9 = vcmp.gt.f32.partialorder %v17460_v26, 0.0  ;;  %v17540_v12 = vld [vmem:[#allocation12_spill] sm:$0xff] }
 0x42d   :  { %v16232_v45 = vsel %vm17501_vm10, %v17454_v23, %v17500_v54  ;;  %v16250_v33 = vsel %vm17505_vm9, %v17460_v26, %v17504_v63  ;;  %vm17506_vm10 = vcmp.gt.f32.partialorder %v17463_v19, 0.0  ;;  %v17507_v23 = vld [vmem:[#allocation26_spill] sm:$0xff]  ;;  %vm17508_vm12 = vcmp.gt.f32.partialorder %v15809_v3, 0.0  ;;  %v17541_v63 = vld [vmem:[#allocation15_spill] sm:$0xff] }
 0x42e   :  { %v16256_v54 = vsel %vm17506_vm10, %v17463_v19, %v16022_v47  ;;  %v16262_v55 = vsel %vm7054_vm13, %v15805_v0, %v17507_v23  ;;  %v16268_v41 = vsel %vm17508_vm12, %v15809_v3, %v16028_v52  ;;  %vm17509_vm7 = vcmp.gt.f32.partialorder %v17466_v40, 0.0  ;;  %v17511_v0 = vld [vmem:[#allocation31_spill] sm:$0xff] }
 0x42f   :  { %v16274_v6 = vsel %vm17509_vm7, %v17466_v40, %v16039_v56  ;;  %vm17510_vm8 = vcmp.gt.f32.partialorder %v15817_v57, 0.0  ;;  %v16286_v19 = vsel %vm7058_vm14, %v15821_v29, %v17511_v0  ;;  %vm17512_vm13 = vcmp.gt.f32.partialorder %v15824_v22, 0.0  ;;  %v17528_v56 = vld [vmem:[#allocation28_spill] sm:$0xff]  ;;  %v17543_v0 = vld [vmem:[#allocation14_spill] sm:$0xff] }
 0x430   :  { %v16280_v26 = vsel %vm17510_vm8, %v15817_v57, %v16042_v8  ;;  %v16292_v3 = vsel %vm17512_vm13, %v15824_v22, %v16057_v13  ;;  %vm17513_vm9 = vcmp.gt.f32.partialorder %v15827_v46, 0.0  ;;  %v17514_v57 = vld [vmem:[#allocation47_spill] sm:$0xff]  ;;  %vm17515_vm10 = vcmp.gt.f32.partialorder %v15830_v44, 0.0  ;;  %v17531_v13 = vld [vmem:[#allocation9_spill] sm:$0xff] }
 0x431   :  { %v16298_v52 = vsel %vm17513_vm9, %v15827_v46, %v16060_v50  ;;  %v16304_v8 = vsel %vm17515_vm10, %v15830_v44, %v17514_v57  ;;  %v16310_v29 = vsel %vm7062_vm15, %v15833_v18, %v16075_v60  ;;  %vm17516_vm14 = vcmp.gt.f32.partialorder %v15836_v53, 0.0  ;;  %v17517_v50 = vld [vmem:[#allocation49_spill] sm:$0xff]  ;;  %v17533_v60 = vld [vmem:[#allocation11_spill] sm:$0xff] }
 0x432   :  { %v16316_v22 = vsel %vm17516_vm14, %v15836_v53, %v16078_v51  ;;  %vm17518_vm12 = vcmp.gt.f32.partialorder %v15839_v35, 0.0  ;;  %vm17519_vm7 = vcmp.gt.f32.partialorder %v15842_v31, 0.0  ;;  %v16334_v18 = vsel %vm7066_vm0, %v15845_v9, %v16096_v24  ;;  %v17520_v53 = vld [vmem:[#allocation51_spill] sm:$0xff]  ;;  %v17524_v9 = vld [vmem:[#allocation53_spill] sm:$0xff] }
 0x433   :  { %v16322_v46 = vsel %vm17518_vm12, %v15839_v35, %v17517_v50  ;;  %v16328_v44 = vsel %vm17519_vm7, %v15842_v31, %v16093_v16  ;;  %vm17521_vm15 = vcmp.gt.f32.partialorder %v15848_v38, 0.0  ;;  %vm17522_vm8 = vcmp.gt.f32.partialorder %v15851_v21, 0.0  ;;  %v17536_v16 = vld [vmem:[#allocation10_spill] sm:$0xff]  ;;  %v17545_v50 = vld [vmem:[#allocation17_spill] sm:$0xff] }
 0x434   :  { %v16340_v47 = vsel %vm17521_vm15, %v15848_v38, %v17520_v53  ;;  %v16346_v35 = vsel %vm17522_vm8, %v15851_v21, %v16111_v28  ;;  %vm17523_vm13 = vcmp.gt.f32.partialorder %v15854_v37, 0.0  ;;  %v16358_v40 = vsel %vm7070_vm1, %v15857_v58, %v17524_v9  ;;  %v17530_v58 = vld [vmem:[#allocation57_spill] sm:$0xff]  ;;  %v17547_v53 = vld [vmem:[#allocation16_spill] sm:$0xff]  ;;  %v17548_v9 = vld [vmem:[#allocation18_spill] sm:$0xff] }
 0x435   :  { %v16352_v31 = vsel %vm17523_vm13, %v15854_v37, %v16114_v10  ;;  %vm17525_vm0 = vcmp.gt.f32.partialorder %v15860_v49, 0.0  ;;  %vm17526_vm9 = vcmp.gt.f32.partialorder %v15863_v43, 0.0  ;;  %v17527_v37 = vld [vmem:[#allocation55_spill] sm:$0xff]  ;;  %vm17529_vm10 = vcmp.gt.f32.partialorder %v17528_v56, 0.0  ;;  %v17538_v28 = vld [vmem:[#allocation13_spill] sm:$0xff] }
 0x436   :  { %v16364_v38 = vsel %vm17525_vm0, %v15860_v49, %v16130_v27  ;;  %v16370_v21 = vsel %vm17526_vm9, %v15863_v43, %v16133_v2  ;;  %v16376_v51 = vsel %vm17529_vm10, %v17528_v56, %v17527_v37  ;;  %v16382_v24 = vsel %vm7074_vm3, %v17531_v13, %v17530_v58  ;;  %v17532_v49 = vld [vmem:[#allocation58_spill] sm:$0xff]  ;;  %v17535_v43 = vld [vmem:[#allocation59_spill] sm:$0xff]  ;;  %v17554_v58 = vld [vmem:[#allocation32_spill] sm:$0xff] }
 0x437   :  { %vm17534_vm1 = vcmp.gt.f32.partialorder %v17533_v60, 0.0  ;;  %vm17537_vm14 = vcmp.gt.f32.partialorder %v17536_v16, 0.0  ;;  %vm17539_vm12 = vcmp.gt.f32.partialorder %v17538_v28, 0.0  ;;  %v16404_v61 = vsel %vm7078_vm4, %v17540_v12, %v7142_v36  ;;  %v17550_v37 = vld [vmem:[#allocation19_spill] sm:$0xff]  ;;  %v17555_v13 = vld [vmem:[#allocation33_spill] sm:$0xff]  ;;  %v17564_v12 = vld [vmem:[#allocation42_spill] sm:$0xff] }
 0x438   :  { %v16388_v10 = vsel %vm17534_vm1, %v17533_v60, %v17532_v49  ;;  %v16394_v2 = vsel %vm17537_vm14, %v17536_v16, %v17535_v43  ;;  %v16399_v27 = vsel %vm17539_vm12, %v17538_v28, %v7141_v15  ;;  %vm17542_vm3 = vcmp.gt.f32.partialorder %v17541_v63, 0.0  ;;  %v17552_v56 = vld [vmem:[#allocation23_spill] sm:$0xff]  ;;  %v17559_v49 = vld [vmem:[#allocation37_spill] sm:$0xff] }
 0x439   :  { %v16409_v23 = vsel %vm17542_vm3, %v17541_v63, %v7143_v32  ;;  %vm17544_vm7 = vcmp.gt.f32.partialorder %v17543_v0, 0.0  ;;  %vm17546_vm15 = vcmp.gt.f32.partialorder %v17545_v50, 0.0  ;;  %v16424_v36 = vsel %vm7082_vm5, %v17547_v53, %v7146_v1  ;;  %v17560_v60 = vld [vmem:[#allocation35_spill] sm:$0xff]  ;;  %v17563_v28 = vld [vmem:[#allocation29_spill] sm:$0xff]  ;;  %v17567_v53 = vld [vmem:[#allocation50_spill] sm:$0xff] }
 0x43a   :  { %v16414_v57 = vsel %vm17544_vm7, %v17543_v0, %v7144_v48  ;;  %v16419_v15 = vsel %vm17546_vm15, %v17545_v50, %v7145_v39  ;;  %vm17549_vm4 = vcmp.gt.f32.partialorder %v17548_v9, 0.0  ;;  %vm17551_vm8 = vcmp.gt.f32.partialorder %v17550_v37, 0.0  ;;  %v17565_v63 = vld [vmem:[#allocation45_spill] sm:$0xff]  ;;  %v17566_v0 = vld [vmem:[#allocation44_spill] sm:$0xff] }
 0x43b   :  { %v16429_v32 = vsel %vm17549_vm4, %v17548_v9, %v7147_v59  ;;  %v16434_v48 = vsel %vm17551_vm8, %v17550_v37, %v7148_v7  ;;  %vm17553_vm13 = vcmp.gt.f32.partialorder %v17552_v56, 0.0  ;;  %v16444_v1 = vsel %vm7086_vm6, %v17492_v30, %v7150_v17  ;;  %v17561_v17 = vld [vmem:[#allocation38_spill] sm:$0xff]  ;;  %v17562_v30 = vld [vmem:[#allocation36_spill] sm:$0xff] }
 0x43c   :  { %v16439_v39 = vsel %vm17553_vm13, %v17552_v56, %v7149_v25  ;;  %v16449_v59 = vsel %vm7087_vm2, %v17554_v58, %v7151_v4  ;;  %v16454_v7 = vsel %vm7089_vm11, %v17555_v13, %v7153_v20  ;;  %vm17557_vm5 = vcmp.gt.f32.partialorder %v17495_v14, 0.0  ;;  %v17568_v20 = vld [vmem:[#allocation46_spill] sm:$0xff]  ;;  %v17569_v37 = vld [vmem:[#allocation52_spill] sm:$0xff] }
 0x43d   :  { %17556 = vst [vmem:[#allocation22_spill] sm:$0xff] %v16454_v7  ;;  %v16459_v25 = vsel %vm17557_vm5, %v17495_v14, %v7155_v34  ;;  %v7220_v43 = vmax.f32 %v17560_v60, %v17559_v49  ;;  %v7221_v16 = vmax.f32 %v17562_v30, %v17561_v17  ;;  %v7222_v4 = vmax.f32 %v17564_v12, %v17563_v28  ;;  %v17570_v56 = vld [vmem:[#allocation48_spill] sm:$0xff]  ;;  %v17572_v34 = vld [vmem:[#allocation54_spill] sm:$0xff]  ;;  %v17573_v7 = vld [vmem:[#allocation61_spill] sm:$0xff] }
 0x43e   :  { %17558 = vst [vmem:[#allocation34_spill] sm:$0xff] %v16459_v25  ;;  %v7223_v50 = vmax.f32 %v17566_v0, %v17565_v63  ;;  %v7224_v9 = vmax.f32 %v17568_v20, %v17567_v53  ;;  %v7225_v58 = vmax.f32 %v17570_v56, %v17569_v37  ;;  %v17571_v14 = vld [vmem:[#allocation60_spill] sm:$0xff]  ;;  %v17576_v17 = vld [vmem:[#allocation39_spill] sm:$0xff]  ;;  %v7230_v63 = vmax.f32 %v16226_v5, %v16238_v62  ;;  %v10379_v53 = vld [vmem:[%s17195_s4 + $0x28] sm:$0xff] }
 0x43f   :  { %v7226_v13 = vmax.f32 %v17572_v34, %v17571_v14  ;;  %v17574_v49 = vld [vmem:[#allocation56_spill] sm:$0xff]  ;;  %v7231_v0 = vmax.f32 %v16232_v45, %v16244_v11  ;;  %vm17578_vm2 = vcmask 130048   ;;  %v7234_v5 = vmax.f32 %v16274_v6, %v16286_v19 }
 0x440   :  { %v7227_v60 = vmax.f32 %v17574_v49, %v17573_v7  ;;  %v17575_v25 = vld [vmem:[#allocation40_spill] sm:$0xff]  ;;  %7252 = vst.msk [vmem:[#allocation3] sm:$0xff] %vm17578_vm2, %v7220_v43  ;;  %vm17579_vm11 = vmmov %vm17578_vm2  ;;  %v7232_v7 = vmax.f32 %v16250_v33, %v16262_v55  ;;  %v7235_v62 = vmax.f32 %v16280_v26, %v16292_v3  ;;  %v7236_v45 = vmax.f32 %v16298_v52, %v16310_v29 }
 0x441   :  { %v7228_v30 = vmax.f32 %v17576_v17, %v17575_v25  ;;  %v17577_v28 = vld [vmem:[#allocation24_spill] sm:$0xff]  ;;  %7253 = vst.msk [vmem:[#allocation3 + $0x8] sm:$0xff] %vm17579_vm11, %v7221_v16  ;;  %vm17580_vm6 = vmmov %vm17578_vm2  ;;  %v7237_v11 = vmax.f32 %v16304_v8, %v16316_v22  ;;  %v7238_v33 = vmax.f32 %v16322_v46, %v16334_v18  ;;  %v7240_v55 = vmax.f32 %v16346_v35, %v16358_v40 }
 0x442   :  { %v7229_v12 = vmax.f32 %v17577_v28, %v16220_v42  ;;  %7254 = vst.msk [vmem:[#allocation3 + $0x10] sm:$0xff] %vm17580_vm6, %v7222_v4  ;;  %vm17581_vm0 = vmmov %vm17578_vm2  ;;  %v7233_v42 = vmax.f32 %v16256_v54, %v16268_v41  ;;  %v7239_v54 = vmax.f32 %v16328_v44, %v16340_v47  ;;  %v7241_v41 = vmax.f32 %v16352_v31, %v16364_v38 }
 0x443   :  { %7255 = vst.msk [vmem:[#allocation3 + $0x18] sm:$0xff] %vm17581_vm0, %v7223_v50  ;;  %vm17582_vm9 = vmmov %vm17581_vm0  ;;  %v7242_v6 = vmax.f32 %v16370_v21, %v16382_v24  ;;  %v7243_v26 = vmax.f32 %v16376_v51, %v16388_v10  ;;  %v7244_v19 = vmax.f32 %v16394_v2, %v16404_v61  ;;  %v7245_v3 = vmax.f32 %v16399_v27, %v16409_v23  ;;  %v10378_v50 = vld [vmem:[%s17195_s4 + $0x20] sm:$0xff] }
 0x444   :  { %7256 = vst.msk [vmem:[#allocation3 + $0x20] sm:$0xff] %vm17582_vm9, %v7224_v9  ;;  %vm17583_vm10 = vmmov %vm17581_vm0  ;;  %v7246_v52 = vmax.f32 %v16414_v57, %v16424_v36  ;;  %v7247_v8 = vmax.f32 %v16419_v15, %v16429_v32  ;;  %v7248_v29 = vmax.f32 %v16434_v48, %v16444_v1  ;;  %v7249_v22 = vmax.f32 %v16439_v39, %v16449_v59  ;;  %v17598_v44 = vld [vmem:[#allocation22_spill] sm:$0xff] }
 0x445   :  { %7257 = vst.msk [vmem:[#allocation3 + $0x28] sm:$0xff] %vm17583_vm10, %v7225_v58  ;;  %vm17584_vm1 = vmmov %vm17581_vm0  ;;  %v17597_v46 = vld [vmem:[#allocation34_spill] sm:$0xff] }
 0x446   :  { %7258 = vst.msk [vmem:[#allocation3 + $0x30] sm:$0xff] %vm17584_vm1, %v7226_v13  ;;  %vm17585_vm14 = vmmov %vm17581_vm0  ;;  %v7251_v18 = vmax.f32 %v17598_v44, %v17597_v46 }
 0x447   :  { %7259 = vst.msk [vmem:[#allocation3 + $0x38] sm:$0xff] %vm17585_vm14, %v7227_v60  ;;  %vm17586_vm12 = vmmov %vm17581_vm0 }
 0x448   :  { %7260 = vst.msk [vmem:[#allocation3 + $0x40] sm:$0xff] %vm17586_vm12, %v7228_v30  ;;  %vm17587_vm3 = vmmov %vm17581_vm0  ;;  %v7284_v31 = vld [vmem:[#allocation3] ss:$2 sm:$0xff]  ;;  %v7316_v38 = vld [vmem:[#allocation3 + $0x1] ss:$2 sm:$0xff] }
 0x449   :  { %7261 = vst.msk [vmem:[#allocation3 + $0x48] sm:$0xff] %vm17587_vm3, %v7229_v12  ;;  %vm17588_vm7 = vmmov %vm17581_vm0  ;;  %v7347_v24 = vmax.f32 %v7284_v31, %v7316_v38 }
 0x44a   :  { %7262 = vst.msk [vmem:[#allocation3 + $0x50] sm:$0xff] %vm17588_vm7, %v7230_v63  ;;  %vm17589_vm15 = vmmov %vm17581_vm0  ;;  %v7286_v47 = vld [vmem:[#allocation3 + $0x10] ss:$2 sm:$0xff]  ;;  %v7318_v35 = vld [vmem:[#allocation3 + $0x11] ss:$2 sm:$0xff] }
 0x44b   :  { %7263 = vst.msk [vmem:[#allocation3 + $0x58] sm:$0xff] %vm17589_vm15, %v7231_v0  ;;  %vm17590_vm4 = vmmov %vm17581_vm0  ;;  %v7348_v40 = vmax.f32 %v7286_v47, %v7318_v35 }
 0x44c   :  { %7264 = vst.msk [vmem:[#allocation3 + $0x60] sm:$0xff] %vm17590_vm4, %v7232_v7  ;;  %vm17591_vm8 = vmmov %vm17581_vm0  ;;  %v7288_v21 = vld [vmem:[#allocation3 + $0x20] ss:$2 sm:$0xff]  ;;  %v7320_v51 = vld [vmem:[#allocation3 + $0x21] ss:$2 sm:$0xff] }
 0x44d   :  { %7265 = vst.msk [vmem:[#allocation3 + $0x68] sm:$0xff] %vm17591_vm8, %v7233_v42  ;;  %vm17592_vm13 = vmmov %vm17581_vm0  ;;  %v7349_v10 = vmax.f32 %v7288_v21, %v7320_v51 }
 0x44e   :  { %7266 = vst.msk [vmem:[#allocation3 + $0x70] sm:$0xff] %vm17592_vm13, %v7234_v5  ;;  %vm17593_vm5 = vmmov %vm17581_vm0  ;;  %v7290_v2 = vld [vmem:[#allocation3 + $0x30] ss:$2 sm:$0xff]  ;;  %v7322_v27 = vld [vmem:[#allocation3 + $0x31] ss:$2 sm:$0xff] }
 0x44f   :  { %7267 = vst.msk [vmem:[#allocation3 + $0x78] sm:$0xff] %vm17593_vm5, %v7235_v62  ;;  %vm17594_vm2 = vmmov %vm17581_vm0  ;;  %vm7405_vm5 = vcmask 122880   ;;  %v7350_v23 = vmax.f32 %v7290_v2, %v7322_v27 }
 0x450   :  { %7268 = vst.msk [vmem:[#allocation3 + $0x80] sm:$0xff] %vm17594_vm2, %v7236_v45  ;;  %vm17595_vm11 = vmmov %vm17581_vm0  ;;  %v7292_v61 = vld [vmem:[#allocation3 + $0x40] ss:$2 sm:$0xff]  ;;  %v7324_v57 = vld [vmem:[#allocation3 + $0x41] ss:$2 sm:$0xff] }
 0x451   :  { %7269 = vst.msk [vmem:[#allocation3 + $0x88] sm:$0xff] %vm17595_vm11, %v7237_v11  ;;  %vm17596_vm6 = vmmov %vm17581_vm0  ;;  %v7351_v32 = vmax.f32 %v7292_v61, %v7324_v57  ;;  %v16575_v11 = vpack.c.bf16 %v10379_v53, %v10378_v50 }
 0x452   :  { %7270 = vst.msk [vmem:[#allocation3 + $0x90] sm:$0xff] %vm17596_vm6, %v7238_v33  ;;  %vm17599_vm9 = vmmov %vm17581_vm0  ;;  %v7294_v15 = vld [vmem:[#allocation3 + $0x50] ss:$2 sm:$0xff]  ;;  %v7326_v36 = vld [vmem:[#allocation3 + $0x51] ss:$2 sm:$0xff] }
 0x453   :  { %7271 = vst.msk [vmem:[#allocation3 + $0x98] sm:$0xff] %vm17581_vm0, %v7239_v54  ;;  %vm17600_vm10 = vmmov %vm17581_vm0  ;;  %v7352_v48 = vmax.f32 %v7294_v15, %v7326_v36 }
 0x454   :  { %7272 = vst.msk [vmem:[#allocation3 + $0xa0] sm:$0xff] %vm17599_vm9, %v7240_v55  ;;  %vm17601_vm1 = vmmov %vm17581_vm0  ;;  %v7296_v39 = vld [vmem:[#allocation3 + $0x60] ss:$2 sm:$0xff]  ;;  %v7328_v1 = vld [vmem:[#allocation3 + $0x61] ss:$2 sm:$0xff] }
 0x455   :  { %7273 = vst.msk [vmem:[#allocation3 + $0xa8] sm:$0xff] %vm17600_vm10, %v7241_v41  ;;  %vm17602_vm14 = vmmov %vm17581_vm0  ;;  %v7353_v25 = vmax.f32 %v7296_v39, %v7328_v1 }
 0x456   :  { %7274 = vst.msk [vmem:[#allocation3 + $0xb0] sm:$0xff] %vm17601_vm1, %v7242_v6  ;;  %vm17603_vm12 = vmmov %vm17581_vm0  ;;  %v7298_v7 = vld [vmem:[#allocation3 + $0x70] ss:$2 sm:$0xff]  ;;  %v7330_v42 = vld [vmem:[#allocation3 + $0x71] ss:$2 sm:$0xff] }
 0x457   :  { %7275 = vst.msk [vmem:[#allocation3 + $0xb8] sm:$0xff] %vm17602_vm14, %v7243_v26  ;;  %vm17604_vm3 = vmmov %vm17581_vm0  ;;  %v7354_v33 = vmax.f32 %v7298_v7, %v7330_v42 }
 0x458   :  { %7276 = vst.msk [vmem:[#allocation3 + $0xc0] sm:$0xff] %vm17603_vm12, %v7244_v19  ;;  %vm17605_vm7 = vmmov %vm17581_vm0  ;;  %v7300_v16 = vld [vmem:[#allocation3 + $0x80] ss:$2 sm:$0xff]  ;;  %v7332_v4 = vld [vmem:[#allocation3 + $0x81] ss:$2 sm:$0xff] }
 0x459   :  { %7277 = vst.msk [vmem:[#allocation3 + $0xc8] sm:$0xff] %vm17604_vm3, %v7245_v3  ;;  %vm17606_vm15 = vmmov %vm17581_vm0  ;;  %v7355_v9 = vmax.f32 %v7300_v16, %v7332_v4  ;;  %v17629_v19 = vld [vmem:[#allocation20_spill] sm:$0xff] }
 0x45a   :  { %7278 = vst.msk [vmem:[#allocation3 + $0xd0] sm:$0xff] %vm17605_vm7, %v7246_v52  ;;  %vm17607_vm4 = vmmov %vm17581_vm0  ;;  %v7302_v59 = vld [vmem:[#allocation3 + $0x90] ss:$2 sm:$0xff]  ;;  %v7334_v43 = vld [vmem:[#allocation3 + $0x91] ss:$2 sm:$0xff] }
 0x45b   :  { %7279 = vst.msk [vmem:[#allocation3 + $0xd8] sm:$0xff] %vm17606_vm15, %v7247_v8  ;;  %vm17608_vm8 = vmmov %vm17581_vm0  ;;  %v7356_v20 = vmax.f32 %v7302_v59, %v7334_v43 }
 0x45c   :  { %7280 = vst.msk [vmem:[#allocation3 + $0xe0] sm:$0xff] %vm17607_vm4, %v7248_v29  ;;  %vm17609_vm13 = vmmov %vm17581_vm0  ;;  %v7304_v37 = vld [vmem:[#allocation3 + $0xa0] ss:$2 sm:$0xff]  ;;  %v7336_v56 = vld [vmem:[#allocation3 + $0xa1] ss:$2 sm:$0xff] }
 0x45d   :  { %7281 = vst.msk [vmem:[#allocation3 + $0xe8] sm:$0xff] %vm17608_vm8, %v7249_v22  ;;  %vm17610_vm2 = vmmov %vm17581_vm0  ;;  %v7357_v14 = vmax.f32 %v7304_v37, %v7336_v56 }
 0x45e   :  { %7283 = vst.msk [vmem:[#allocation3 + $0xf8] sm:$0xff] %vm17609_vm13, %v7251_v18  ;;  %vm17611_vm11 = vmmov %vm17581_vm0  ;;  %v7306_v58 = vld [vmem:[#allocation3 + $0xb0] ss:$2 sm:$0xff]  ;;  %v7338_v34 = vld [vmem:[#allocation3 + $0xb1] ss:$2 sm:$0xff] }
 0x45f   :  { %7380 = vst.msk [vmem:[#allocation4 + $0x1] sm:$0xff] %vm17610_vm2, %v7348_v40  ;;  %vm17612_vm6 = vmmov %vm17581_vm0  ;;  %v7358_v60 = vmax.f32 %v7306_v58, %v7338_v34 }
 0x460   :  { %7365 = vst.msk [vmem:[#allocation4 + $0x21] sm:$0xff] %vm17611_vm11, %v7348_v40  ;;  %vm17613_vm9 = vmmov %vm17581_vm0  ;;  %v7308_v13 = vld [vmem:[#allocation3 + $0xc0] ss:$2 sm:$0xff]  ;;  %v7340_v49 = vld [vmem:[#allocation3 + $0xc1] ss:$2 sm:$0xff] }
 0x461   :  { %7364 = vst.msk [vmem:[#allocation4 + $0x11] sm:$0xff] %vm17612_vm6, %v7347_v24  ;;  %vm17614_vm10 = vmmov %vm17581_vm0  ;;  %v7359_v17 = vmax.f32 %v7308_v13, %v7340_v49 }
 0x462   :  { %7366 = vst.msk [vmem:[#allocation4 + $0x31] sm:$0xff] %vm17581_vm0, %v7349_v10  ;;  %vm17615_vm1 = vmmov %vm17581_vm0  ;;  %v7310_v30 = vld [vmem:[#allocation3 + $0xd0] ss:$2 sm:$0xff]  ;;  %v7342_v28 = vld [vmem:[#allocation3 + $0xd1] ss:$2 sm:$0xff] }
 0x463   :  { %7367 = vst.msk [vmem:[#allocation4 + $0x41] sm:$0xff] %vm17613_vm9, %v7350_v23  ;;  %vm17616_vm14 = vmmov %vm17581_vm0  ;;  %v7360_v63 = vmax.f32 %v7310_v30, %v7342_v28 }
 0x464   :  { %7368 = vst.msk [vmem:[#allocation4 + $0x51] sm:$0xff] %vm17614_vm10, %v7351_v32  ;;  %vm17617_vm12 = vmmov %vm17581_vm0  ;;  %v7312_v12 = vld [vmem:[#allocation3 + $0xe0] ss:$2 sm:$0xff]  ;;  %v7344_v0 = vld [vmem:[#allocation3 + $0xe1] ss:$2 sm:$0xff] }
 0x465   :  { %7369 = vst.msk [vmem:[#allocation4 + $0x61] sm:$0xff] %vm17615_vm1, %v7352_v48  ;;  %vm17618_vm3 = vmmov %vm17581_vm0  ;;  %v7361_v62 = vmax.f32 %v7312_v12, %v7344_v0  ;;  %v7314_v58 = vld [vmem:[#allocation3 + $0xf0] ss:$2 sm:$0xff] }
 0x466   :  { %7370 = vst.msk [vmem:[#allocation4 + $0x71] sm:$0xff] %vm17616_vm14, %v7353_v25  ;;  %vm17619_vm7 = vmmov %vm17581_vm0  ;;  %v7484_v5 = vld [vmem:[#allocation4 + $0x1] sm:$0xff]  ;;  %v10397_v12 = vld [vmem:[%s17195_s4 + $0x38] sm:$0xff] }
 0x467   :  { %7383 = vst.msk [vmem:[#allocation4 + $0x91] sm:$0xff] %vm17617_vm12, %v7353_v25  ;;  %vm17620_vm15 = vmmov %vm17581_vm0  ;;  %v7385_v45 = vld [vmem:[#allocation4 + $0x2] sm:$0x1]  ;;  %v7426_v2 = vld [vmem:[#allocation4 + $0x7] sm:$0x1] }
 0x468   :  { %7381 = vst.msk [vmem:[#allocation4 + $0xa1] sm:$0xff] %vm17618_vm3, %v7356_v20  ;;  %vm17621_vm4 = vmmov %vm17581_vm0  ;;  %v16578_v54 = vld [vmem:[#allocation4 + $0x11] sm:$0xff]  ;;  %v16584_v41 = vld [vmem:[#allocation4 + $0x21] sm:$0xff] }
 0x469   :  { %7373 = vst.msk [vmem:[#allocation4 + $0xc1] sm:$0xff] %vm17619_vm7, %v7356_v20  ;;  %vm17622_vm8 = vmmov %vm17581_vm0  ;;  %v7386_v55 = vld [vmem:[#allocation4 + $0x12] sm:$0x1]  ;;  %v7387_v6 = vld [vmem:[#allocation4 + $0x22] sm:$0x1] }
 0x46a   :  { %7372 = vst.msk [vmem:[#allocation4 + $0xb1] sm:$0xff] %vm17620_vm15, %v7355_v9  ;;  %vm17623_vm13 = vmmov %vm17581_vm0  ;;  %v7388_v26 = vld [vmem:[#allocation4 + $0x32] sm:$0x1]  ;;  %v7389_v3 = vld [vmem:[#allocation4 + $0x42] sm:$0x1] }
 0x46b   :  { %7374 = vst.msk [vmem:[#allocation4 + $0xd1] sm:$0xff] %vm17621_vm4, %v7357_v14  ;;  %vm17624_vm2 = vmmov %vm17581_vm0  ;;  %v7390_v52 = vld [vmem:[#allocation4 + $0x52] sm:$0x1]  ;;  %v16603_v22 = vld [vmem:[#allocation4 + $0x41] sm:$0xff] }
 0x46c   :  { %7375 = vst.msk [vmem:[#allocation4 + $0xe1] sm:$0xff] %vm17622_vm8, %v7358_v60  ;;  %12137 = vmatprep.mubr.msk.f32.mxu1 %vm17624_vm2, %v7484_v5  ;;  %vm17625_vm11 = vmmov %vm17581_vm0  ;;  %v7391_v8 = vld [vmem:[#allocation4 + $0x62] sm:$0x1]  ;;  %v16597_v29 = vld [vmem:[#allocation4 + $0x31] sm:$0xff] }
 0x46d   :  { %7376 = vst.msk [vmem:[#allocation4 + $0xf1] sm:$0xff] %vm17623_vm13, %v7359_v17  ;;  %vm17626_vm6 = vmmov %vm17581_vm0  ;;  %v7392_v46 = vld [vmem:[#allocation4 + $0x72] sm:$0x1]  ;;  %v16615_v40 = vld [vmem:[#allocation4 + $0x61] sm:$0xff] }
 0x46e   :  { %7377 = vst.msk [vmem:[#allocation4 + $0x101] sm:$0xff] %vm17625_vm11, %v7360_v63  ;;  %12138 = vmatmul.mubr.msk.f32.vlgmr.msra.gmra.mrb[64].mxu1 %vm17626_vm6, %v16578_v54  ;;  %vm17627_vm9 = vmmov %vm17581_vm0  ;;  %v16610_v35 = vld [vmem:[#allocation4 + $0x51] sm:$0xff]  ;;  %v7428_v61 = vld [vmem:[#allocation4 + $0x27] sm:$0x1] }
 0x46f   :  { %7406 = vst.msk [vmem:[#allocation4] sm:$0x1] %vm7405_vm5, %v7385_v45  ;;  %7407 = vst.msk [vmem:[#allocation4 + $0x10] sm:$0x1] %vm7405_vm5, %v7386_v55  ;;  %12392 = vmatpush3.bf16.msra.mxu1 %v17629_v19  ;;  %v7395_v44 = vld [vmem:[#allocation4 + $0xa2] sm:$0x1] }
 0x470   :  { %7378 = vst.msk [vmem:[#allocation4 + $0x111] sm:$0xff] %vm17581_vm0, %v7361_v62  ;;  %vm17628_vm10 = vmmov %vm17581_vm0  ;;  %12394 = vmatprep.subr.bf16.mxu1 %v16575_v11  ;;  %v7397_v47 = vld [vmem:[#allocation4 + $0xc2] sm:$0x1]  ;;  %v16621_v24 = vld [vmem:[#allocation4 + $0x71] sm:$0xff] }
 0x471   :  { %7384 = vst.msk [vmem:[#allocation4 + $0x131] sm:$0xff] %vm17627_vm9, %v7361_v62  ;;  %vm17630_vm1 = vmmov %vm17581_vm0  ;;  %v7396_v18 = vld [vmem:[#allocation4 + $0xb2] sm:$0x1]  ;;  %v7427_v27 = vld [vmem:[#allocation4 + $0x17] sm:$0x1] }
 0x472   :  { %7371 = vst.msk [vmem:[#allocation4 + $0x81] sm:$0xff] %vm17628_vm10, %v7354_v33  ;;  %12140 = vmatprep.mubr.msk.f32.mxu1 %vm17630_vm1, %v16584_v41  ;;  %vm17631_vm14 = vmmov %vm17581_vm0  ;;  %v7398_v31 = vld [vmem:[#allocation4 + $0xd2] sm:$0x1]  ;;  %v7492_v23 = vld [vmem:[#allocation4 + $0xa1] sm:$0xff] }
 0x473   :  { %7408 = vst.msk [vmem:[#allocation4 + $0x20] sm:$0x1] %vm7405_vm5, %v7387_v6  ;;  %7409 = vst.msk [vmem:[#allocation4 + $0x30] sm:$0x1] %vm7405_vm5, %v7388_v26  ;;  %12141 = vmatmul.mubr.msk.f32.gmra.mrb[66].mxu1 %vm17631_vm14, %v16597_v29  ;;  %v7399_v38 = vld [vmem:[#allocation4 + $0xe2] sm:$0x1] }
 0x474   :  { %7410 = vst.msk [vmem:[#allocation4 + $0x40] sm:$0x1] %vm7405_vm5, %v7389_v3  ;;  %7411 = vst.msk [vmem:[#allocation4 + $0x50] sm:$0x1] %vm7405_vm5, %v7390_v52  ;;  %v7400_v21 = vld [vmem:[#allocation4 + $0xf2] sm:$0x1] }
 0x475   :  { %7412 = vst.msk [vmem:[#allocation4 + $0x60] sm:$0x1] %vm7405_vm5, %v7391_v8  ;;  %vm17632_vm12 = vmmov %vm17581_vm0  ;;  %v7401_v51 = vld [vmem:[#allocation4 + $0x102] sm:$0x1]  ;;  %v7429_v57 = vld [vmem:[#allocation4 + $0x37] sm:$0x1] }
 0x476   :  { %12143 = vmatprep.mubr.msk.f32.mxu1 %vm17632_vm12, %v16603_v22  ;;  %7413 = vst.msk [vmem:[#allocation4 + $0x70] sm:$0x1] %vm7405_vm5, %v7392_v46  ;;  %7416 = vst.msk [vmem:[#allocation4 + $0xa0] sm:$0x1] %vm7405_vm5, %v7395_v44  ;;  %v7430_v15 = vld [vmem:[#allocation4 + $0x47] sm:$0x1] }
 0x477   :  { %7417 = vst.msk [vmem:[#allocation4 + $0xb0] sm:$0x1] %vm7405_vm5, %v7396_v18  ;;  %7418 = vst.msk [vmem:[#allocation4 + $0xc0] sm:$0x1] %vm7405_vm5, %v7397_v47  ;;  %v7402_v10 = vld [vmem:[#allocation4 + $0x112] sm:$0x1] }
 0x478   :  { %vm17633_vm3 = vmmov %vm17581_vm0  ;;  %7419 = vst.msk [vmem:[#allocation4 + $0xd0] sm:$0x1] %vm7405_vm5, %v7398_v31  ;;  %v7431_v36 = vld [vmem:[#allocation4 + $0x57] sm:$0x1]  ;;  %v7432_v32 = vld [vmem:[#allocation4 + $0x67] sm:$0x1] }
 0x479   :  { %12144 = vmatmul.mubr.msk.f32.gmra.mrb[68].mxu1 %vm17633_vm3, %v16610_v35  ;;  %vm17634_vm7 = vmmov %vm17581_vm0  ;;  %7420 = vst.msk [vmem:[#allocation4 + $0xe0] sm:$0x1] %vm7405_vm5, %v7399_v38  ;;  %v7433_v48 = vld [vmem:[#allocation4 + $0x77] sm:$0x1]  ;;  %v7436_v1 = vld [vmem:[#allocation4 + $0xa7] sm:$0x1] }
 0x47a   :  { %12146 = vmatprep.mubr.msk.f32.mxu1 %vm17634_vm7, %v16615_v40  ;;  %7421 = vst.msk [vmem:[#allocation4 + $0xf0] sm:$0x1] %vm7405_vm5, %v7400_v21  ;;  %7422 = vst.msk [vmem:[#allocation4 + $0x100] sm:$0x1] %vm7405_vm5, %v7401_v51  ;;  %v16635_v39 = vld [vmem:[#allocation4 + $0xb1] sm:$0xff]  ;;  %v16641_v25 = vld [vmem:[#allocation4 + $0xc1] sm:$0xff] }
 0x47b   :  { %7423 = vst.msk [vmem:[#allocation4 + $0x110] sm:$0x1] %vm7405_vm5, %v7402_v10  ;;  %vm17635_vm15 = vmmov %vm17581_vm0  ;;  %v7437_v59 = vld [vmem:[#allocation4 + $0xb7] sm:$0x1]  ;;  %v7438_v43 = vld [vmem:[#allocation4 + $0xc7] sm:$0x1] }
 0x47c   :  { %7446 = vst.msk [vmem:[#allocation4 + $0x9] sm:$0x1] %vm7405_vm5, %v7426_v2  ;;  %7447 = vst.msk [vmem:[#allocation4 + $0x19] sm:$0x1] %vm7405_vm5, %v7427_v27  ;;  %v7439_v16 = vld [vmem:[#allocation4 + $0xd7] sm:$0x1] }
 0x47d   :  { %12147 = vmatmul.mubr.msk.f32.gmra.mrb[70].mxu1 %vm17635_vm15, %v16621_v24  ;;  %7448 = vst.msk [vmem:[#allocation4 + $0x29] sm:$0x1] %vm7405_vm5, %v7428_v61  ;;  %vm17636_vm4 = vmmov %vm17581_vm0  ;;  %v7440_v4 = vld [vmem:[#allocation4 + $0xe7] sm:$0x1]  ;;  %v7441_v50 = vld [vmem:[#allocation4 + $0xf7] sm:$0x1] }
 0x47e   :  { %12149 = vmatprep.mubr.msk.f32.mxu1 %vm17636_vm4, %v7492_v23  ;;  %7449 = vst.msk [vmem:[#allocation4 + $0x39] sm:$0x1] %vm7405_vm5, %v7429_v57  ;;  %7450 = vst.msk [vmem:[#allocation4 + $0x49] sm:$0x1] %vm7405_vm5, %v7430_v15  ;;  %v7442_v53 = vld [vmem:[#allocation4 + $0x107] sm:$0x1] }
 0x47f   :  { %7451 = vst.msk [vmem:[#allocation4 + $0x59] sm:$0x1] %vm7405_vm5, %v7431_v36  ;;  %7452 = vst.msk [vmem:[#allocation4 + $0x69] sm:$0x1] %vm7405_vm5, %v7432_v32  ;;  %v16650_v20 = vld [vmem:[#allocation4 + $0xd1] sm:$0xff]  ;;  %v16656_v9 = vld [vmem:[#allocation4 + $0xe1] sm:$0xff] }
 0x480   :  { %7453 = vst.msk [vmem:[#allocation4 + $0x79] sm:$0x1] %vm7405_vm5, %v7433_v48  ;;  %vm17637_vm8 = vmmov %vm17581_vm0  ;;  %v7443_v37 = vld [vmem:[#allocation4 + $0x117] sm:$0x1]  ;;  %v7393_v56 = vld [vmem:[#allocation4 + $0x82] sm:$0x1] }
 0x481   :  { %12150 = vmatmul.mubr.msk.f32.gmra.mrb[72].mxu1 %vm17637_vm8, %v16635_v39  ;;  %7456 = vst.msk [vmem:[#allocation4 + $0xa9] sm:$0x1] %vm7405_vm5, %v7436_v1  ;;  %7457 = vst.msk [vmem:[#allocation4 + $0xb9] sm:$0x1] %vm7405_vm5, %v7437_v59  ;;  %v7346_v14 = vld [vmem:[#allocation3 + $0xf1] ss:$2 sm:$0xff] }
 0x482   :  { %vm17638_vm13 = vmmov %vm17581_vm0  ;;  %7458 = vst.msk [vmem:[#allocation4 + $0xc9] sm:$0x1] %vm7405_vm5, %v7438_v43  ;;  %v16662_v34 = vld [vmem:[#allocation4 + $0xf1] sm:$0xff]  ;;  %v7362_v13 = vmax.f32 %v7314_v58, %v7346_v14  ;;  %v16666_v49 = vld [vmem:[#allocation4 + $0x101] sm:$0xff] }
 0x483   :  { %12152 = vmatprep.mubr.msk.f32.mxu1 %vm17638_vm13, %v16641_v25  ;;  %7459 = vst.msk [vmem:[#allocation4 + $0xd9] sm:$0x1] %vm7405_vm5, %v7439_v16  ;;  %7460 = vst.msk [vmem:[#allocation4 + $0xe9] sm:$0x1] %vm7405_vm5, %v7440_v4  ;;  %v7434_v60 = vld [vmem:[#allocation4 + $0x87] sm:$0x1] }
 0x484   :  { %7461 = vst.msk [vmem:[#allocation4 + $0xf9] sm:$0x1] %vm7405_vm5, %v7441_v50  ;;  %7462 = vst.msk [vmem:[#allocation4 + $0x109] sm:$0x1] %vm7405_vm5, %v7442_v53  ;;  %v10396_v17 = vld [vmem:[%s17195_s4 + $0x30] sm:$0xff]  ;;  %v7466_v0 = vld [vmem:[#allocation4] sm:$0xff] }
 0x485   :  { %vm17639_vm2 = vmmov %vm17581_vm0  ;;  %7463 = vst.msk [vmem:[#allocation4 + $0x119] sm:$0x1] %vm7405_vm5, %v7443_v37  ;;  %v7394_v30 = vld [vmem:[#allocation4 + $0x92] sm:$0x1]  ;;  %v7435_v7 = vld [vmem:[#allocation4 + $0x97] sm:$0x1]  ;;  %v12397_v5 = vpack.c.bf16 %v10397_v12, %v10396_v17 }
 0x486   :  { %12153 = vmatmul.mubr.msk.f32.gmra.mrb[74].mxu1 %vm17639_vm2, %v16650_v20  ;;  %vm17640_vm11 = vmmov %vm17581_vm0  ;;  %7414 = vst.msk [vmem:[#allocation4 + $0x80] sm:$0x1] %vm7405_vm5, %v7393_v56  ;;  %v16675_v28 = vld [vmem:[#allocation4 + $0x111] sm:$0xff]  ;;  %v16691_v45 = vld [vmem:[#allocation4 + $0x20] sm:$0xff] }
 0x487   :  { %12155 = vmatprep.mubr.msk.f32.mxu1 %vm17640_vm11, %v16656_v9  ;;  %vm17641_vm6 = vmmov %vm17581_vm0  ;;  %7454 = vst.msk [vmem:[#allocation4 + $0x89] sm:$0x1] %vm7405_vm5, %v7434_v60  ;;  %v7404_v63 = vld [vmem:[#allocation4 + $0x132] sm:$0x1]  ;;  %v7445_v42 = vld [vmem:[#allocation4 + $0x137] sm:$0x1] }
 0x488   :  { %vm17642_vm9 = vmmov %vm17581_vm0  ;;  %7415 = vst.msk [vmem:[#allocation4 + $0x90] sm:$0x1] %vm7405_vm5, %v7394_v30  ;;  %v16687_v62 = vld [vmem:[#allocation4 + $0x10] sm:$0xff]  ;;  %v16702_v26 = vld [vmem:[#allocation4 + $0x40] sm:$0xff] }
 0x489   :  { %7379 = vst.msk [vmem:[#allocation4 + $0x121] sm:$0xff] %vm17642_vm9, %v7362_v13  ;;  %vm17643_vm10 = vmmov %vm17581_vm0  ;;  %v16698_v6 = vld [vmem:[#allocation4 + $0x30] sm:$0xff]  ;;  %v7474_v52 = vld [vmem:[#allocation4 + $0xa0] sm:$0xff] }
 0x48a   :  { %12156 = vmatmul.mubr.msk.f32.gmra.mrb[76].mxu1 %vm17641_vm6, %v16662_v34  ;;  %7425 = vst.msk [vmem:[#allocation4 + $0x130] sm:$0x1] %vm7405_vm5, %v7404_v63  ;;  %vm17644_vm1 = vmmov %vm17581_vm0  ;;  %v16706_v19 = vld [vmem:[#allocation4 + $0x50] sm:$0xff]  ;;  %v16723_v46 = vld [vmem:[#allocation4 + $0xc0] sm:$0xff] }
 0x48b   :  { %12158 = vmatprep.mubr.msk.f32.mxu1 %vm17581_vm0, %v16666_v49  ;;  %7455 = vst.msk [vmem:[#allocation4 + $0x99] sm:$0x1] %vm7405_vm5, %v7435_v7  ;;  %7465 = vst.msk [vmem:[#allocation4 + $0x139] sm:$0x1] %vm7405_vm5, %v7445_v42  ;;  %v16714_v3 = vld [vmem:[#allocation4 + $0x70] sm:$0xff]  ;;  %v16731_v18 = vld [vmem:[#allocation4 + $0xe0] sm:$0xff] }
 0x48c   :  { %vm17645_vm14 = vmmov %vm17581_vm0  ;;  %v16719_v8 = vld [vmem:[#allocation4 + $0xb0] sm:$0xff]  ;;  %v16739_v31 = vld [vmem:[#allocation4 + $0x100] sm:$0xff] }
 0x48d   :  { %vm17646_vm12 = vmmov %vm17581_vm0  ;;  %v16727_v44 = vld [vmem:[#allocation4 + $0xd0] sm:$0xff]  ;;  %v10414_v21 = vld [vmem:[%s17195_s4 + $0x40] sm:$0xff] }
 0x48e   :  { %12159 = vmatmul.mubr.msk.f32.gmra.mrb[78].mxu1 %vm17643_vm10, %v16675_v28  ;;  %vm17647_vm3 = vmmov %vm17581_vm0  ;;  %v16735_v47 = vld [vmem:[#allocation4 + $0xf0] sm:$0xff]  ;;  %v10415_v51 = vld [vmem:[%s17195_s4 + $0x48] sm:$0xff] }
 0x48f   :  { %12165 = vmatprep.mubr.msk.f32.mxu1 %vm17644_vm1, %v7466_v0  ;;  %vm17648_vm7 = vmmov %vm17581_vm0  ;;  %v16743_v38 = vld [vmem:[#allocation4 + $0x110] sm:$0xff]  ;;  %v7889_v10 = vld [vmem:[#allocation4 + $0x2] sm:$0xff]  ;;  %v12401_v2 = vpack.c.bf16 %v10415_v51, %v10414_v21 }
 0x490   :  { %v7403_v33 = vld [vmem:[#allocation4 + $0x122] sm:$0x1]  ;;  %v7444_v55 = vld [vmem:[#allocation4 + $0x127] sm:$0x1]  ;;  %vm17649_vm15 = vmmov %vm17581_vm0 }
 0x491   :  { %7424 = vst.msk [vmem:[#allocation4 + $0x120] sm:$0x1] %vm7405_vm5, %v7403_v33  ;;  %7464 = vst.msk [vmem:[#allocation4 + $0x129] sm:$0x1] %vm7405_vm5, %v7444_v55  ;;  %v16754_v27 = vld [vmem:[#allocation4 + $0x12] sm:$0xff]  ;;  %v16758_v61 = vld [vmem:[#allocation4 + $0x22] sm:$0xff] }
 0x492   :  { %12166 = vmatmul.mubr.msk.f32.vlgmr.msra.gmra.mrb[64].mxu1 %vm17645_vm14, %v16687_v62  ;;  %vm17650_vm5 = vmmov %vm17581_vm0  ;;  %v16762_v23 = vld [vmem:[#allocation4 + $0x32] sm:$0xff]  ;;  %v16766_v57 = vld [vmem:[#allocation4 + $0x42] sm:$0xff] }
 0x493   :  { %12396 = vmatpush3.bf16.msra.mxu1 %v16575_v11  ;;  %12168 = vmatprep.mubr.msk.f32.mxu1 %vm17646_vm12, %v16691_v45  ;;  %v16710_v11 = vld [vmem:[#allocation4 + $0x60] sm:$0xff]  ;;  %vm17651_vm4 = vmmov %vm17581_vm0  ;;  %v16770_v15 = vld [vmem:[#allocation4 + $0x52] sm:$0xff] }
 0x494   :  { %12398 = vmatprep.subr.bf16.mxu1 %v12397_v5  ;;  %vm17652_vm8 = vmmov %vm17581_vm0  ;;  %v16774_v36 = vld [vmem:[#allocation4 + $0x62] sm:$0xff]  ;;  %v16778_v32 = vld [vmem:[#allocation4 + $0x72] sm:$0xff] }
 0x495   :  { %vm17653_vm13 = vmmov %vm17581_vm0  ;;  %v7897_v48 = vld [vmem:[#allocation4 + $0xa2] sm:$0xff]  ;;  %v16783_v1 = vld [vmem:[#allocation4 + $0xb2] sm:$0xff] }
 0x496   :  { %12169 = vmatmul.mubr.msk.f32.gmra.mrb[66].mxu1 %vm17647_vm3, %v16698_v6  ;;  %vm17654_vm2 = vmmov %vm17581_vm0  ;;  %v16787_v59 = vld [vmem:[#allocation4 + $0xc2] sm:$0xff]  ;;  %v16791_v43 = vld [vmem:[#allocation4 + $0xd2] sm:$0xff] }
 0x497   :  { %12171 = vmatprep.mubr.msk.f32.mxu1 %vm17648_vm7, %v16702_v26  ;;  %vm17655_vm11 = vmmov %vm17581_vm0  ;;  %v16795_v16 = vld [vmem:[#allocation4 + $0xe2] sm:$0xff]  ;;  %v16799_v4 = vld [vmem:[#allocation4 + $0xf2] sm:$0xff] }
 0x498   :  { %vm17656_vm6 = vmmov %vm17581_vm0  ;;  %v16803_v50 = vld [vmem:[#allocation4 + $0x102] sm:$0xff]  ;;  %v16807_v53 = vld [vmem:[#allocation4 + $0x112] sm:$0xff] }
 0x499   :  { %vm17657_vm9 = vmmov %vm17581_vm0  ;;  %v10432_v37 = vld [vmem:[%s17195_s4 + $0x50] sm:$0xff]  ;;  %v10433_v56 = vld [vmem:[%s17195_s4 + $0x58] sm:$0xff] }
 0x49a   :  { %12172 = vmatmul.mubr.msk.f32.gmra.mrb[68].mxu1 %vm17649_vm15, %v16706_v19  ;;  %vm17658_vm10 = vmmov %vm17581_vm0  ;;  %v12405_v58 = vpack.c.bf16 %v10433_v56, %v10432_v37  ;;  %v16831_v14 = vld [vmem:[#allocation4 + $0x80] sm:$0xff]  ;;  %v10451_v17 = vld [vmem:[%s17195_s4 + $0x68] sm:$0xff] }
 0x49b   :  { %12174 = vmatprep.mubr.msk.f32.mxu1 %vm17650_vm5, %v16710_v11  ;;  %vm17659_vm1 = vmmov %vm17581_vm0  ;;  %v16849_v13 = vld [vmem:[#allocation4 + $0x120] sm:$0xff]  ;;  %v10469_v63 = vld [vmem:[%s17195_s4 + $0x78] sm:$0xff] }
 0x49c   :  { %vm17660_vm14 = vmmov %vm17581_vm0  ;;  %v10450_v60 = vld [vmem:[%s17195_s4 + $0x60] sm:$0xff]  ;;  %v8817_v55 = vld [vmem:[#allocation4 + $0x130] sm:$0xff] }
 0x49d   :  { %vm17661_vm12 = vmmov %vm17581_vm0  ;;  %v12409_v30 = vpack.c.bf16 %v10451_v17, %v10450_v60  ;;  %v16891_v12 = vld [vmem:[#allocation4 + $0x121] sm:$0xff] }
 0x49e   :  { %12175 = vmatmul.mubr.msk.f32.gmra.mrb[70].mxu1 %vm17651_vm4, %v16714_v3  ;;  %vm17662_vm3 = vmmov %vm17581_vm0  ;;  %v8580_v7 = vld [vmem:[#allocation4 + $0x82] sm:$0xff] }
 0x49f   :  { %12177 = vmatprep.mubr.msk.f32.mxu1 %vm17652_vm8, %v7474_v52  ;;  %vm17663_vm7 = vmmov %vm17581_vm0  ;;  %v8588_v42 = vld [vmem:[#allocation4 + $0x122] sm:$0xff] }
 0x4a0   :  { %vm17664_vm15 = vmmov %vm17581_vm0 }
 0x4a1   :  { %vm17665_vm5 = vmmov %vm17581_vm0 }
 0x4a2   :  { %12178 = vmatmul.mubr.msk.f32.gmra.mrb[72].mxu1 %vm17653_vm13, %v16719_v8  ;;  %vm17666_vm4 = vmmov %vm17581_vm0 }
 0x4a3   :  { %12180 = vmatprep.mubr.msk.f32.mxu1 %vm17654_vm2, %v16723_v46  ;;  %vm17667_vm8 = vmmov %vm17581_vm0 }
 0x4a4   :  { %vm17668_vm13 = vmmov %vm17581_vm0 }
 0x4a5   :  { %vm17669_vm2 = vmmov %vm17581_vm0 }
 0x4a6   :  { %12181 = vmatmul.mubr.msk.f32.gmra.mrb[74].mxu1 %vm17655_vm11, %v16727_v44  ;;  %vm17670_vm11 = vmmov %vm17581_vm0 }
 0x4a7   :  { %12183 = vmatprep.mubr.msk.f32.mxu1 %vm17656_vm6, %v16731_v18  ;;  %vm17671_vm6 = vmmov %vm17581_vm0 }
 0x4aa   :  { %12184 = vmatmul.mubr.msk.f32.gmra.mrb[76].mxu1 %vm17581_vm0, %v16735_v47 }
 0x4ab   :  { %12186 = vmatprep.mubr.msk.f32.mxu1 %vm17657_vm9, %v16739_v31  ;;  %vm17672_vm9 = vmmov %vm17581_vm0 }
 0x4ae   :  { %12187 = vmatmul.mubr.msk.f32.gmra.mrb[78].mxu1 %vm17658_vm10, %v16743_v38  ;;  %vm17673_vm10 = vmmov %vm17581_vm0 }
 0x4af   :  { %12193 = vmatprep.mubr.msk.f32.mxu1 %vm17659_vm1, %v7889_v10  ;;  %vm17674_vm1 = vmmov %vm17581_vm0 }
 0x4b2   :  { %12194 = vmatmul.mubr.msk.f32.vlgmr.msra.gmra.mrb[64].mxu1 %vm17660_vm14, %v16754_v27  ;;  %vm17675_vm14 = vmmov %vm17581_vm0 }
 0x4b3   :  { %12400 = vmatpush3.bf16.msra.mxu1 %v12397_v5  ;;  %12196 = vmatprep.mubr.msk.f32.mxu1 %vm17661_vm12, %v16758_v61  ;;  %vm17676_vm12 = vmmov %vm17581_vm0  ;;  %v10486_v5 = vld [vmem:[%s17195_s4 + $0x80] sm:$0xff] }
 0x4b4   :  { %12402 = vmatprep.subr.bf16.mxu1 %v12401_v2 }
 0x4b6   :  { %12197 = vmatmul.mubr.msk.f32.gmra.mrb[66].mxu1 %vm17662_vm3, %v16762_v23  ;;  %vm17677_vm3 = vmmov %vm17581_vm0 }
 0x4b7   :  { %12199 = vmatprep.mubr.msk.f32.mxu1 %vm17663_vm7, %v16766_v57  ;;  %vm17678_vm7 = vmmov %vm17581_vm0 }
 0x4ba   :  { %12200 = vmatmul.mubr.msk.f32.gmra.mrb[68].mxu1 %vm17664_vm15, %v16770_v15  ;;  %vm17679_vm15 = vmmov %vm17581_vm0 }
 0x4bb   :  { %12202 = vmatprep.mubr.msk.f32.mxu1 %vm17665_vm5, %v16774_v36  ;;  %vm17680_vm5 = vmmov %vm17581_vm0 }
 0x4be   :  { %12203 = vmatmul.mubr.msk.f32.gmra.mrb[70].mxu1 %vm17666_vm4, %v16778_v32  ;;  %vm17681_vm4 = vmmov %vm17581_vm0 }
 0x4bf   :  { %12205 = vmatprep.mubr.msk.f32.mxu1 %vm17667_vm8, %v7897_v48  ;;  %vm17682_vm8 = vmmov %vm17581_vm0 }
 0x4c2   :  { %12206 = vmatmul.mubr.msk.f32.gmra.mrb[72].mxu1 %vm17668_vm13, %v16783_v1  ;;  %vm17683_vm13 = vmmov %vm17581_vm0 }
 0x4c3   :  { %12208 = vmatprep.mubr.msk.f32.mxu1 %vm17669_vm2, %v16787_v59  ;;  %vm17684_vm2 = vmmov %vm17581_vm0 }
 0x4c6   :  { %12209 = vmatmul.mubr.msk.f32.gmra.mrb[74].mxu1 %vm17670_vm11, %v16791_v43  ;;  %vm17685_vm11 = vmmov %vm17581_vm0 }
 0x4c7   :  { %12211 = vmatprep.mubr.msk.f32.mxu1 %vm17671_vm6, %v16795_v16  ;;  %vm17686_vm6 = vmmov %vm17581_vm0 }
 0x4ca   :  { %12212 = vmatmul.mubr.msk.f32.gmra.mrb[76].mxu1 %vm17581_vm0, %v16799_v4 }
 0x4cb   :  { %12214 = vmatprep.mubr.msk.f32.mxu1 %vm17672_vm9, %v16803_v50  ;;  %vm17687_vm9 = vmmov %vm17581_vm0 }
 0x4ce   :  { %12215 = vmatmul.mubr.msk.f32.gmra.mrb[78].mxu1 %vm17673_vm10, %v16807_v53  ;;  %vm17688_vm10 = vmmov %vm17581_vm0 }
 0x4cf   :  { %12221 = vmatprep.mubr.msk.f32.mxu1 %vm17674_vm1, %v16687_v62  ;;  %vm17689_vm1 = vmmov %vm17581_vm0  ;;  %v10487_v62 = vld [vmem:[%s17195_s4 + $0x88] sm:$0xff] }
 0x4d0   :  { %v12417_v33 = vpack.c.bf16 %v10487_v62, %v10486_v5 }
 0x4d2   :  { %12222 = vmatmul.mubr.msk.f32.vlgmr.msra.gmra.mrb[64].mxu1 %vm17675_vm14, %v16691_v45  ;;  %vm17690_vm14 = vmmov %vm17581_vm0 }
 0x4d3   :  { %12404 = vmatpush3.bf16.msra.mxu1 %v12401_v2  ;;  %12224 = vmatprep.mubr.msk.f32.mxu1 %vm17676_vm12, %v16698_v6  ;;  %vm17691_vm12 = vmmov %vm17581_vm0 }
 0x4d4   :  { %12406 = vmatprep.subr.bf16.mxu1 %v12405_v58 }
 0x4d6   :  { %12225 = vmatmul.mubr.msk.f32.gmra.mrb[66].mxu1 %vm17677_vm3, %v16702_v26  ;;  %vm17692_vm3 = vmmov %vm17581_vm0 }
 0x4d7   :  { %12227 = vmatprep.mubr.msk.f32.mxu1 %vm17678_vm7, %v16706_v19  ;;  %vm17693_vm7 = vmmov %vm17581_vm0 }
 0x4da   :  { %12228 = vmatmul.mubr.msk.f32.gmra.mrb[68].mxu1 %vm17679_vm15, %v16710_v11  ;;  %vm17694_vm15 = vmmov %vm17581_vm0 }
 0x4db   :  { %12230 = vmatprep.mubr.msk.f32.mxu1 %vm17680_vm5, %v16714_v3  ;;  %vm17695_vm5 = vmmov %vm17581_vm0 }
 0x4de   :  { %12231 = vmatmul.mubr.msk.f32.gmra.mrb[70].mxu1 %vm17681_vm4, %v16831_v14  ;;  %vm17696_vm4 = vmmov %vm17581_vm0 }
 0x4df   :  { %12233 = vmatprep.mubr.msk.f32.mxu1 %vm17682_vm8, %v16719_v8  ;;  %vm17697_vm8 = vmmov %vm17581_vm0 }
 0x4e2   :  { %12234 = vmatmul.mubr.msk.f32.gmra.mrb[72].mxu1 %vm17683_vm13, %v16723_v46  ;;  %vm17698_vm13 = vmmov %vm17581_vm0 }
 0x4e3   :  { %12236 = vmatprep.mubr.msk.f32.mxu1 %vm17684_vm2, %v16727_v44  ;;  %vm17699_vm2 = vmmov %vm17581_vm0 }
 0x4e6   :  { %12237 = vmatmul.mubr.msk.f32.gmra.mrb[74].mxu1 %vm17685_vm11, %v16731_v18  ;;  %vm17700_vm11 = vmmov %vm17581_vm0 }
 0x4e7   :  { %12239 = vmatprep.mubr.msk.f32.mxu1 %vm17686_vm6, %v16735_v47  ;;  %vm17701_vm6 = vmmov %vm17581_vm0 }
 0x4ea   :  { %12240 = vmatmul.mubr.msk.f32.gmra.mrb[76].mxu1 %vm17581_vm0, %v16739_v31 }
 0x4eb   :  { %12242 = vmatprep.mubr.msk.f32.mxu1 %vm17687_vm9, %v16743_v38  ;;  %vm17702_vm9 = vmmov %vm17581_vm0 }
 0x4ee   :  { %12243 = vmatmul.mubr.msk.f32.gmra.mrb[78].mxu1 %vm17688_vm10, %v16849_v13  ;;  %vm17703_vm10 = vmmov %vm17581_vm0 }
 0x4ef   :  { %12249 = vmatprep.mubr.msk.f32.mxu1 %vm17689_vm1, %v16578_v54  ;;  %v16873_v54 = vld [vmem:[#allocation4 + $0x81] sm:$0xff]  ;;  %vm17704_vm1 = vmmov %vm17581_vm0 }
 0x4f2   :  { %12250 = vmatmul.mubr.msk.f32.vlgmr.msra.gmra.mrb[64].mxu1 %vm17690_vm14, %v16584_v41  ;;  %vm17705_vm14 = vmmov %vm17581_vm0 }
 0x4f3   :  { %12408 = vmatpush3.bf16.msra.mxu1 %v12405_v58  ;;  %12252 = vmatprep.mubr.msk.f32.mxu1 %vm17691_vm12, %v16597_v29  ;;  %vm17706_vm12 = vmmov %vm17581_vm0 }
 0x4f4   :  { %12410 = vmatprep.subr.bf16.mxu1 %v12409_v30 }
 0x4f6   :  { %12253 = vmatmul.mubr.msk.f32.gmra.mrb[66].mxu1 %vm17692_vm3, %v16603_v22  ;;  %vm17707_vm3 = vmmov %vm17581_vm0 }
 0x4f7   :  { %12255 = vmatprep.mubr.msk.f32.mxu1 %vm17693_vm7, %v16610_v35  ;;  %vm17708_vm7 = vmmov %vm17581_vm0 }
 0x4fa   :  { %12256 = vmatmul.mubr.msk.f32.gmra.mrb[68].mxu1 %vm17694_vm15, %v16615_v40  ;;  %vm17709_vm15 = vmmov %vm17581_vm0 }
 0x4fb   :  { %12258 = vmatprep.mubr.msk.f32.mxu1 %vm17695_vm5, %v16621_v24  ;;  %vm17710_vm5 = vmmov %vm17581_vm0 }
 0x4fe   :  { %12259 = vmatmul.mubr.msk.f32.gmra.mrb[70].mxu1 %vm17696_vm4, %v16873_v54  ;;  %vm17711_vm4 = vmmov %vm17581_vm0 }
 0x4ff   :  { %12261 = vmatprep.mubr.msk.f32.mxu1 %vm17697_vm8, %v16635_v39  ;;  %v10468_v39 = vld [vmem:[%s17195_s4 + $0x70] sm:$0xff]  ;;  %vm17712_vm8 = vmmov %vm17581_vm0 }
 0x500   :  { %v12413_v0 = vpack.c.bf16 %v10469_v63, %v10468_v39 }
 0x502   :  { %12262 = vmatmul.mubr.msk.f32.gmra.mrb[72].mxu1 %vm17698_vm13, %v16641_v25  ;;  %vm17713_vm13 = vmmov %vm17581_vm0 }
 0x503   :  { %12264 = vmatprep.mubr.msk.f32.mxu1 %vm17699_vm2, %v16650_v20  ;;  %vm17714_vm2 = vmmov %vm17581_vm0 }
 0x506   :  { %12265 = vmatmul.mubr.msk.f32.gmra.mrb[74].mxu1 %vm17700_vm11, %v16656_v9  ;;  %vm17715_vm11 = vmmov %vm17581_vm0 }
 0x507   :  { %12267 = vmatprep.mubr.msk.f32.mxu1 %vm17701_vm6, %v16662_v34  ;;  %vm17716_vm6 = vmmov %vm17581_vm0 }
 0x50a   :  { %12268 = vmatmul.mubr.msk.f32.gmra.mrb[76].mxu1 %vm17581_vm0, %v16666_v49 }
 0x50b   :  { %12270 = vmatprep.mubr.msk.f32.mxu1 %vm17702_vm9, %v16675_v28  ;;  %vm17717_vm9 = vmmov %vm17581_vm0 }
 0x50e   :  { %12271 = vmatmul.mubr.msk.f32.gmra.mrb[78].mxu1 %vm17703_vm10, %v16891_v12  ;;  %vm17718_vm10 = vmmov %vm17581_vm0 }
 0x50f   :  { %12277 = vmatprep.mubr.msk.f32.mxu1 %vm17704_vm1, %v16754_v27  ;;  %vm17719_vm1 = vmmov %vm17581_vm0 }
 0x512   :  { %12278 = vmatmul.mubr.msk.f32.vlgmr.msra.gmra.mrb[64].mxu1 %vm17705_vm14, %v16758_v61  ;;  %vm17720_vm14 = vmmov %vm17581_vm0 }
 0x513   :  { %12412 = vmatpush3.bf16.msra.mxu1 %v12409_v30  ;;  %12280 = vmatprep.mubr.msk.f32.mxu1 %vm17706_vm12, %v16762_v23  ;;  %vm17721_vm12 = vmmov %vm17581_vm0 }
 0x514   :  { %12414 = vmatprep.subr.bf16.mxu1 %v12413_v0 }
 0x516   :  { %12281 = vmatmul.mubr.msk.f32.gmra.mrb[66].mxu1 %vm17707_vm3, %v16766_v57  ;;  %vm17722_vm3 = vmmov %vm17581_vm0 }
 0x517   :  { %12283 = vmatprep.mubr.msk.f32.mxu1 %vm17708_vm7, %v16770_v15  ;;  %vm17723_vm7 = vmmov %vm17581_vm0 }
 0x51a   :  { %12284 = vmatmul.mubr.msk.f32.gmra.mrb[68].mxu1 %vm17709_vm15, %v16774_v36  ;;  %vm17724_vm15 = vmmov %vm17581_vm0 }
 0x51b   :  { %12286 = vmatprep.mubr.msk.f32.mxu1 %vm17710_vm5, %v16778_v32  ;;  %vm17725_vm5 = vmmov %vm17581_vm0 }
 0x51e   :  { %12287 = vmatmul.mubr.msk.f32.gmra.mrb[70].mxu1 %vm17711_vm4, %v8580_v7  ;;  %vm17726_vm4 = vmmov %vm17581_vm0 }
 0x51f   :  { %12289 = vmatprep.mubr.msk.f32.mxu1 %vm17712_vm8, %v16783_v1  ;;  %vm17727_vm8 = vmmov %vm17581_vm0 }
 0x522   :  { %12290 = vmatmul.mubr.msk.f32.gmra.mrb[72].mxu1 %vm17713_vm13, %v16787_v59  ;;  %vm17728_vm13 = vmmov %vm17581_vm0 }
 0x523   :  { %12292 = vmatprep.mubr.msk.f32.mxu1 %vm17714_vm2, %v16791_v43  ;;  %vm17729_vm2 = vmmov %vm17581_vm0 }
 0x526   :  { %12293 = vmatmul.mubr.msk.f32.gmra.mrb[74].mxu1 %vm17715_vm11, %v16795_v16  ;;  %vm17730_vm11 = vmmov %vm17581_vm0 }
 0x527   :  { %12295 = vmatprep.mubr.msk.f32.mxu1 %vm17716_vm6, %v16799_v4  ;;  %vm17731_vm6 = vmmov %vm17581_vm0 }
 0x52a   :  { %12296 = vmatmul.mubr.msk.f32.gmra.mrb[76].mxu1 %vm17581_vm0, %v16803_v50 }
 0x52b   :  { %12298 = vmatprep.mubr.msk.f32.mxu1 %vm17717_vm9, %v16807_v53  ;;  %vm17732_vm9 = vmmov %vm17581_vm0 }
 0x52e   :  { %12299 = vmatmul.mubr.msk.f32.gmra.mrb[78].mxu1 %vm17718_vm10, %v8588_v42  ;;  %vm17733_vm10 = vmmov %vm17581_vm0 }
 0x52f   :  { %12305 = vmatprep.mubr.msk.f32.mxu1 %vm17719_vm1, %v16691_v45  ;;  %v8809_v45 = vld [vmem:[#allocation4 + $0x90] sm:$0xff]  ;;  %vm17734_vm1 = vmmov %vm17581_vm0 }
 0x532   :  { %12306 = vmatmul.mubr.msk.f32.vlgmr.msra.gmra.mrb[64].mxu1 %vm17720_vm14, %v16698_v6  ;;  %vm17735_vm14 = vmmov %vm17581_vm0 }
 0x533   :  { %12416 = vmatpush3.bf16.msra.mxu1 %v12413_v0  ;;  %12308 = vmatprep.mubr.msk.f32.mxu1 %vm17721_vm12, %v16702_v26  ;;  %vm17736_vm12 = vmmov %vm17581_vm0 }
 0x534   :  { %12418 = vmatprep.subr.bf16.mxu1 %v12417_v33 }
 0x536   :  { %12309 = vmatmul.mubr.msk.f32.gmra.mrb[66].mxu1 %vm17722_vm3, %v16706_v19  ;;  %vm17737_vm3 = vmmov %vm17581_vm0 }
 0x537   :  { %12311 = vmatprep.mubr.msk.f32.mxu1 %vm17723_vm7, %v16710_v11  ;;  %vm17738_vm7 = vmmov %vm17581_vm0 }
 0x53a   :  { %12312 = vmatmul.mubr.msk.f32.gmra.mrb[68].mxu1 %vm17724_vm15, %v16714_v3  ;;  %vm17739_vm15 = vmmov %vm17581_vm0 }
 0x53b   :  { %12314 = vmatprep.mubr.msk.f32.mxu1 %vm17725_vm5, %v16831_v14  ;;  %vm17740_vm5 = vmmov %vm17581_vm0 }
 0x53e   :  { %12315 = vmatmul.mubr.msk.f32.gmra.mrb[70].mxu1 %vm17726_vm4, %v8809_v45  ;;  %vm17741_vm4 = vmmov %vm17581_vm0 }
 0x53f   :  { %12317 = vmatprep.mubr.msk.f32.mxu1 %vm17727_vm8, %v16723_v46  ;;  %vm17742_vm8 = vmmov %vm17581_vm0 }
 0x542   :  { %12318 = vmatmul.mubr.msk.f32.gmra.mrb[72].mxu1 %vm17728_vm13, %v16727_v44  ;;  %vm17743_vm13 = vmmov %vm17581_vm0 }
 0x543   :  { %12320 = vmatprep.mubr.msk.f32.mxu1 %vm17729_vm2, %v16731_v18  ;;  %vm17744_vm2 = vmmov %vm17581_vm0 }
 0x546   :  { %12321 = vmatmul.mubr.msk.f32.gmra.mrb[74].mxu1 %vm17730_vm11, %v16735_v47  ;;  %vm17745_vm11 = vmmov %vm17581_vm0 }
 0x547   :  { %12323 = vmatprep.mubr.msk.f32.mxu1 %vm17731_vm6, %v16739_v31  ;;  %vm17746_vm6 = vmmov %vm17581_vm0 }
 0x54a   :  { %12324 = vmatmul.mubr.msk.f32.gmra.mrb[76].mxu1 %vm17581_vm0, %v16743_v38 }
 0x54b   :  { %12326 = vmatprep.mubr.msk.f32.mxu1 %vm17732_vm9, %v16849_v13  ;;  %vm17747_vm9 = vmmov %vm17581_vm0 }
 0x54e   :  { %12327 = vmatmul.mubr.msk.f32.gmra.mrb[78].mxu1 %vm17733_vm10, %v8817_v55  ;;  %vm17748_vm10 = vmmov %vm17581_vm0 }
 0x54f   :  { %12333 = vmatprep.mubr.msk.f32.mxu1 %vm17734_vm1, %v16584_v41  ;;  %v9037_v41 = vld [vmem:[#allocation4 + $0x91] sm:$0xff]  ;;  %vm17749_vm1 = vmmov %vm17581_vm0 }
 0x552   :  { %12334 = vmatmul.mubr.msk.f32.vlgmr.msra.gmra.mrb[64].mxu1 %vm17735_vm14, %v16597_v29  ;;  %v9045_v29 = vld [vmem:[#allocation4 + $0x131] sm:$0xff]  ;;  %vm17750_vm14 = vmmov %vm17581_vm0 }
 0x553   :  { %12420 = vmatpush3.bf16.msra.mxu1 %v12417_v33  ;;  %12336 = vmatprep.mubr.msk.f32.mxu1 %vm17736_vm12, %v16603_v22  ;;  %vm17751_vm12 = vmmov %vm17581_vm0  ;;  %v9265_v22 = vld [vmem:[#allocation4 + $0x92] sm:$0xff] }
 0x556   :  { %12337 = vmatmul.mubr.msk.f32.gmra.mrb[66].mxu1 %vm17737_vm3, %v16610_v35  ;;  %vm17752_vm3 = vmmov %vm17581_vm0  ;;  %v9273_v35 = vld [vmem:[#allocation4 + $0x132] sm:$0xff] }
 0x557   :  { %12339 = vmatprep.mubr.msk.f32.mxu1 %vm17738_vm7, %v16615_v40  ;;  %vm17753_vm7 = vmmov %vm17581_vm0 }
 0x55a   :  { %12340 = vmatmul.mubr.msk.f32.gmra.mrb[68].mxu1 %vm17739_vm15, %v16621_v24  ;;  %vm17754_vm15 = vmmov %vm17581_vm0 }
 0x55b   :  { %12342 = vmatprep.mubr.msk.f32.mxu1 %vm17740_vm5, %v16873_v54  ;;  %vm17755_vm5 = vmmov %vm17581_vm0 }
 0x55e   :  { %12343 = vmatmul.mubr.msk.f32.gmra.mrb[70].mxu1 %vm17741_vm4, %v9037_v41  ;;  %vm17756_vm4 = vmmov %vm17581_vm0 }
 0x55f   :  { %12345 = vmatprep.mubr.msk.f32.mxu1 %vm17742_vm8, %v16641_v25  ;;  %vm17757_vm8 = vmmov %vm17581_vm0 }
 0x562   :  { %12346 = vmatmul.mubr.msk.f32.gmra.mrb[72].mxu1 %vm17743_vm13, %v16650_v20  ;;  %vm17758_vm13 = vmmov %vm17581_vm0 }
 0x563   :  { %12348 = vmatprep.mubr.msk.f32.mxu1 %vm17744_vm2, %v16656_v9  ;;  %vm17759_vm2 = vmmov %vm17581_vm0 }
 0x566   :  { %12349 = vmatmul.mubr.msk.f32.gmra.mrb[74].mxu1 %vm17745_vm11, %v16662_v34  ;;  %vm17760_vm11 = vmmov %vm17581_vm0 }
 0x567   :  { %12351 = vmatprep.mubr.msk.f32.mxu1 %vm17746_vm6, %v16666_v49  ;;  %vm17761_vm6 = vmmov %vm17581_vm0 }
 0x56a   :  { %12352 = vmatmul.mubr.msk.f32.gmra.mrb[76].mxu1 %vm17581_vm0, %v16675_v28 }
 0x56b   :  { %12354 = vmatprep.mubr.msk.f32.mxu1 %vm17747_vm9, %v16891_v12  ;;  %vm17762_vm9 = vmmov %vm17581_vm0 }
 0x56e   :  { %12355 = vmatmul.mubr.msk.f32.gmra.mrb[78].mxu1 %vm17748_vm10, %v9045_v29  ;;  %vm17763_vm10 = vmmov %vm17581_vm0 }
 0x56f   :  { %12361 = vmatprep.mubr.msk.f32.mxu1 %vm17749_vm1, %v16758_v61  ;;  %vm9486_vm1 = vcmask 261120  }
 0x572   :  { %12362 = vmatmul.mubr.msk.f32.vlgmr.msra.gmra.mrb[64].mxu1 %vm17750_vm14, %v16762_v23 }
 0x573   :  { %12364 = vmatprep.mubr.msk.f32.mxu1 %vm17751_vm12, %v16766_v57 }
 0x576   :  { %12365 = vmatmul.mubr.msk.f32.gmra.mrb[66].mxu1 %vm17752_vm3, %v16770_v15 }
 0x577   :  { %12367 = vmatprep.mubr.msk.f32.mxu1 %vm17753_vm7, %v16774_v36 }
 0x57a   :  { %12368 = vmatmul.mubr.msk.f32.gmra.mrb[68].mxu1 %vm17754_vm15, %v16778_v32 }
 0x57b   :  { %12370 = vmatprep.mubr.msk.f32.mxu1 %vm17755_vm5, %v8580_v7 }
 0x57e   :  { %12371 = vmatmul.mubr.msk.f32.gmra.mrb[70].mxu1 %vm17756_vm4, %v9265_v22 }
 0x57f   :  { %12373 = vmatprep.mubr.msk.f32.mxu1 %vm17757_vm8, %v16787_v59 }
 0x582   :  { %12374 = vmatmul.mubr.msk.f32.gmra.mrb[72].mxu1 %vm17758_vm13, %v16791_v43 }
 0x583   :  { %12376 = vmatprep.mubr.msk.f32.mxu1 %vm17759_vm2, %v16795_v16 }
 0x586   :  { %12377 = vmatmul.mubr.msk.f32.gmra.mrb[74].mxu1 %vm17760_vm11, %v16799_v4 }
 0x587   :  { %12379 = vmatprep.mubr.msk.f32.mxu1 %vm17761_vm6, %v16803_v50 }
 0x58a   :  { %12380 = vmatmul.mubr.msk.f32.gmra.mrb[76].mxu1 %vm17581_vm0, %v16807_v53 }
 0x58b   :  { %12382 = vmatprep.mubr.msk.f32.mxu1 %vm17762_vm9, %v8588_v42 }
 0x58e   :  { %12383 = vmatmul.mubr.msk.f32.gmra.mrb[78].mxu1 %vm17763_vm10, %v9273_v35 }
 0x645   :  { %v17025_v40 = vpop.f32.mrb[64].mxu1 }
 0x646   :  { %v9488_v24 = vsel %vm9486_vm1, %v17025_v40, 0.0  ;;  %v9525_v25 = vmul.f32 %v17025_v40, %v17025_v40  ;;  %v17031_v20 = vpop.f32.mrb[65].mxu1 }
 0x647   :  { %v9487_v9 = vsel %vm9486_vm1, %v17031_v20, 0.0  ;;  %v9524_v34 = vmul.f32 %v17031_v20, %v17031_v20 }
 0x648   :  { %v9541_v49 = vsel %vm9486_vm1, %v9525_v25, 0.0  ;;  %v9489_v28 = vadd.f32 %v9488_v24, %v9487_v9 }
 0x649   :  { %v9540_v6 = vsel %vm9486_vm1, %v9524_v34, 0.0  ;;  %v17039_v26 = vpop.f32.mrb[66].mxu1 }
 0x64a   :  { %v9542_v19 = vadd.f32 %v9541_v49, %v9540_v6  ;;  %v17041_v11 = vpop.f32.mrb[67].mxu1  ;;  %v9527_v3 = vmul.f32 %v17039_v26, %v17039_v26  ;;  %v9492_v44 = vsel %vm9486_vm1, %v17039_v26, 0.0 }
 0x64b   :  { %v9490_v52 = vsel %vm9486_vm1, %v17041_v11, 0.0  ;;  %v9526_v8 = vmul.f32 %v17041_v11, %v17041_v11 }
 0x64c   :  { %v9491_v46 = vadd.f32 %v9490_v52, %v9489_v28  ;;  %v9545_v51 = vsel %vm9486_vm1, %v9527_v3, 0.0 }
 0x64d   :  { %v9543_v18 = vsel %vm9486_vm1, %v9526_v8, 0.0  ;;  %v17052_v47 = vpop.f32.mrb[68].mxu1 }
 0x64e   :  { %v9544_v31 = vadd.f32 %v9543_v18, %v9542_v19  ;;  %v17054_v38 = vpop.f32.mrb[69].mxu1  ;;  %v9493_v21 = vadd.f32 %v9492_v44, %v9491_v46  ;;  %v9529_v10 = vmul.f32 %v17052_v47, %v17052_v47  ;;  %v9496_v57 = vsel %vm9486_vm1, %v17052_v47, 0.0 }
 0x64f   :  { %v9494_v2 = vsel %vm9486_vm1, %v17054_v38, 0.0  ;;  %v9528_v27 = vmul.f32 %v17054_v38, %v17054_v38 }
 0x650   :  { %v9495_v61 = vadd.f32 %v9494_v2, %v9493_v21  ;;  %v9546_v23 = vadd.f32 %v9545_v51, %v9544_v31  ;;  %v9549_v59 = vsel %vm9486_vm1, %v9529_v10, 0.0 }
 0x651   :  { %v9547_v15 = vsel %vm9486_vm1, %v9528_v27, 0.0  ;;  %v17066_v36 = vpop.f32.mrb[70].mxu1 }
 0x652   :  { %v9548_v32 = vadd.f32 %v9547_v15, %v9546_v23  ;;  %v17068_v48 = vpop.f32.mrb[71].mxu1  ;;  %v9497_v1 = vadd.f32 %v9496_v57, %v9495_v61  ;;  %v9531_v43 = vmul.f32 %v17066_v36, %v17066_v36  ;;  %v9500_v37 = vsel %vm9486_vm1, %v17066_v36, 0.0 }
 0x653   :  { %v9498_v16 = vsel %vm9486_vm1, %v17068_v48, 0.0  ;;  %v9530_v4 = vmul.f32 %v17068_v48, %v17068_v48 }
 0x654   :  { %v9499_v50 = vadd.f32 %v9498_v16, %v9497_v1  ;;  %v9550_v53 = vadd.f32 %v9549_v59, %v9548_v32  ;;  %v9553_v17 = vsel %vm9486_vm1, %v9531_v43, 0.0 }
 0x655   :  { %v9551_v56 = vsel %vm9486_vm1, %v9530_v4, 0.0  ;;  %v17080_v58 = vpop.f32.mrb[72].mxu1 }
 0x656   :  { %v9552_v14 = vadd.f32 %v9551_v56, %v9550_v53  ;;  %v17082_v13 = vpop.f32.mrb[73].mxu1  ;;  %v9501_v60 = vadd.f32 %v9500_v37, %v9499_v50  ;;  %v9533_v30 = vmul.f32 %v17080_v58, %v17080_v58  ;;  %v9504_v0 = vsel %vm9486_vm1, %v17080_v58, 0.0 }
 0x657   :  { %v9502_v54 = vsel %vm9486_vm1, %v17082_v13, 0.0  ;;  %v9532_v12 = vmul.f32 %v17082_v13, %v17082_v13 }
 0x658   :  { %v9503_v39 = vadd.f32 %v9502_v54, %v9501_v60  ;;  %v9554_v63 = vadd.f32 %v9553_v17, %v9552_v14  ;;  %v9557_v45 = vsel %vm9486_vm1, %v9533_v30, 0.0 }
 0x659   :  { %v9555_v7 = vsel %vm9486_vm1, %v9532_v12, 0.0  ;;  %v17094_v42 = vpop.f32.mrb[74].mxu1 }
 0x65a   :  { %v9556_v5 = vadd.f32 %v9555_v7, %v9554_v63  ;;  %v17096_v62 = vpop.f32.mrb[75].mxu1  ;;  %v9505_v33 = vadd.f32 %v9504_v0, %v9503_v39  ;;  %v9535_v55 = vmul.f32 %v17094_v42, %v17094_v42  ;;  %v9508_v24 = vsel %vm9486_vm1, %v17094_v42, 0.0 }
 0x65b   :  { %v9506_v41 = vsel %vm9486_vm1, %v17096_v62, 0.0  ;;  %v9534_v29 = vmul.f32 %v17096_v62, %v17096_v62 }
 0x65c   :  { %v9507_v22 = vadd.f32 %v9506_v41, %v9505_v33  ;;  %v9558_v35 = vadd.f32 %v9557_v45, %v9556_v5  ;;  %v9561_v6 = vsel %vm9486_vm1, %v9535_v55, 0.0  ;;  %v9581_v55 = vld [vmem:[%s17196_s5] sm:$0x1]  ;;  %s13095_s5 = smov [#allocation6]  }
 0x65d   :  { %v9559_v25 = vsel %vm9486_vm1, %v9534_v29, 0.0  ;;  %v17108_v9 = vpop.f32.mrb[76].mxu1 }
 0x65e   :  { %v9560_v34 = vadd.f32 %v9559_v25, %v9558_v35  ;;  %v17110_v49 = vpop.f32.mrb[77].mxu1  ;;  %v9509_v28 = vadd.f32 %v9508_v24, %v9507_v22  ;;  %v9537_v19 = vmul.f32 %v17108_v9, %v17108_v9  ;;  %v9512_v44 = vsel %vm9486_vm1, %v17108_v9, 0.0  ;;  %v9585_v22 = vld [vmem:[%s17197_s6] sm:$0x1]  ;;  %s9749_s6 = sshll.u32 %s13095_s5, 4  ;;  %s9750_s6 = int_to_ptr.vmem [resolvable:$true] %s9749_s6 }
 0x65f   :  { %v9510_v3 = vsel %vm9486_vm1, %v17110_v49, 0.0  ;;  %v9536_v52 = vmul.f32 %v17110_v49, %v17110_v49  ;;  %v17764_v24 = vld [vmem:[#allocation21_spill] sm:$0xff]  ;;  %s13071_s23 = scalar_lea.vmem %s9750_s6, 512  ;;  %p13076_p1 = scmp.lt.s32.totalorder %s9750_s6, %s9750_s6 }
 0x660   :  { %v9511_v8 = vadd.f32 %v9510_v3, %v9509_v28  ;;  %v9562_v46 = vadd.f32 %v9561_v6, %v9560_v34  ;;  %v9565_v2 = vsel %vm9486_vm1, %v9537_v19, 0.0  ;;  %p13072_p0 = scmp.ne.s32.totalorder %s9750_s6, %s13071_s23  ;;  %p13077_p2 = scmp.lt.s32.totalorder %s13071_s23, %s13071_s23 }
 0x661   :  { %v9563_v18 = vsel %vm9486_vm1, %v9536_v52, 0.0  ;;  %v12384_v31 = vpop.f32.mrb[78].mxu1 }
 0x662   :  { %v9564_v21 = vadd.f32 %v9563_v18, %v9562_v46  ;;  %v9461_v51 = vpop.f32.mrb[79].mxu1  ;;  %v9513_v10 = vadd.f32 %v9512_v44, %v9511_v8  ;;  %v9539_v27 = vmul.f32 %v12384_v31, %v12384_v31  ;;  %v9516_v32 = vsel %vm9486_vm1, %v12384_v31, 0.0  ;;  %p13078_p3 = por %p13077_p2, %p13076_p1 }
 0x663   :  { %v9514_v61 = vsel %vm9486_vm1, %v9461_v51, 0.0  ;;  %v9538_v23 = vmul.f32 %v9461_v51, %v9461_v51 }
 0x664   :  { %v9515_v57 = vadd.f32 %v9514_v61, %v9513_v10  ;;  %v9566_v15 = vadd.f32 %v9565_v2, %v9564_v21  ;;  %v9569_v16 = vsel %vm9486_vm1, %v9539_v27, 0.0  ;;  %p13079_p4 = pnand %p13078_p3, %p13072_p0 }
 0x665   :  { %v9567_v1 = vsel %vm9486_vm1, %v9538_v23, 0.0 }
 0x666   :  { %v9517_v59 = vadd.f32 %v9516_v32, %v9515_v57  ;;  %v9568_v43 = vadd.f32 %v9567_v1, %v9566_v15 }
 0x668   :  { %v9518_v4 = vrot.slane %v9517_v59, 4  ;;  %v9570_v50 = vadd.f32 %v9569_v16, %v9568_v43 }
 0x66a   :  { %v9519_v53 = vadd.f32 %v9518_v4, %v9517_v59  ;;  %v9571_v37 = vrot.slane %v9570_v50, 4 }
 0x66c   :  { %v9520_v56 = vrot.slane %v9519_v53, 2  ;;  %v9572_v14 = vadd.f32 %v9571_v37, %v9570_v50 }
 0x66e   :  { %v9521_v60 = vadd.f32 %v9520_v56, %v9519_v53  ;;  %v9573_v17 = vrot.slane %v9572_v14, 2 }
 0x670   :  { %v9522_v30 = vrot.slane %v9521_v60, 1  ;;  %v9574_v54 = vadd.f32 %v9573_v17, %v9572_v14 }
 0x672   :  { %v9523_v12 = vadd.f32 %v9522_v30, %v9521_v60  ;;  %v9575_v39 = vrot.slane %v9574_v54, 1 }
 0x674   :  { %v9576_v63 = vadd.f32 %v9575_v39, %v9574_v54  ;;  %v9577_v0 = vmul.f32 0.0078125, %v9523_v12 }
 0x676   :  { %v9578_v7 = vmul.f32 0.0078125, %v9576_v63  ;;  %v9579_v5 = vmul.f32 %v9577_v0, %v9577_v0 }
 0x678   :  { %v9580_v33 = vsub.f32 %v9578_v7, %v9579_v5 }
 0x67a   :  { %v9582_v45 = vadd.f32 1e-05, %v9580_v33 }
 0x67c   :  { %13068 = vrsqrt.f32 %v9582_v45 }
 0x686   :  { %v13069_v41 = vpop.eup %13068 }
 0x687   :  { %v9584_v29 = vmul.f32 %v13069_v41, %v9581_v55 }
 0x689   :  { %v9586_v35 = vmul.f32 %v9584_v29, %v9577_v0  ;;  %v9592_v25 = vrot.slane %v9584_v29, %v17764_v24 }
 0x68b   :  { %v9587_v34 = vsub.f32 %v9585_v22, %v9586_v35  ;;  %v9608_v28 = vmul.f32 %v9592_v25, %v9461_v51  ;;  %v9609_v6 = vmul.f32 %v12384_v31, %v9592_v25  ;;  %v9594_v19 = vmul.f32 %v9592_v25, %v17031_v20 }
 0x68c   :  { %v9595_v3 = vmul.f32 %v17025_v40, %v9592_v25  ;;  %v9596_v52 = vmul.f32 %v9592_v25, %v17041_v11  ;;  %v9597_v8 = vmul.f32 %v17039_v26, %v9592_v25  ;;  %v9598_v46 = vmul.f32 %v9592_v25, %v17054_v38 }
 0x68d   :  { %v9614_v44 = vrot.slane %v9587_v34, %v17764_v24  ;;  %v9599_v18 = vmul.f32 %v17052_v47, %v9592_v25  ;;  %v9600_v21 = vmul.f32 %v9592_v25, %v17068_v48  ;;  %v9601_v10 = vmul.f32 %v17066_v36, %v9592_v25 }
 0x68e   :  { %v9602_v31 = vmul.f32 %v9592_v25, %v17082_v13  ;;  %v9603_v20 = vmul.f32 %v17080_v58, %v9592_v25  ;;  %v9604_v40 = vmul.f32 %v9592_v25, %v17096_v62  ;;  %v9605_v11 = vmul.f32 %v17094_v42, %v9592_v25 }
 0x68f   :  { %v9630_v51 = vadd.f32 %v9614_v44, %v9608_v28  ;;  %v9631_v26 = vadd.f32 %v9614_v44, %v9609_v6  ;;  %v9606_v38 = vmul.f32 %v9592_v25, %v17110_v49  ;;  %v9607_v2 = vmul.f32 %v17108_v9, %v9592_v25 }
 0x690   :  { %v9616_v27 = vadd.f32 %v9614_v44, %v9594_v19  ;;  %v9617_v47 = vadd.f32 %v9614_v44, %v9595_v3  ;;  %v9618_v61 = vadd.f32 %v9614_v44, %v9596_v52  ;;  %v9619_v48 = vadd.f32 %v9614_v44, %v9597_v8 }
 0x691   :  { %vm9646_vm14 = vcmp.gt.f32.partialorder %v9630_v51, 0.0  ;;  %vm9647_vm12 = vcmp.gt.f32.partialorder %v9631_v26, 0.0  ;;  %v9662_v36 = vmul.f32 0.2, %v9630_v51  ;;  %v9663_v13 = vmul.f32 0.2, %v9631_v26 }
 0x692   :  { %v9620_v23 = vadd.f32 %v9614_v44, %v9598_v46  ;;  %v9621_v58 = vadd.f32 %v9614_v44, %v9599_v18  ;;  %v9622_v57 = vadd.f32 %v9614_v44, %v9600_v21  ;;  %v9623_v62 = vadd.f32 %v9614_v44, %v9601_v10 }
 0x693   :  { %v9678_v15 = vsel %vm9646_vm14, %v9630_v51, %v9662_v36  ;;  %v9679_v42 = vsel %vm9647_vm12, %v9631_v26, %v9663_v13  ;;  %v9624_v32 = vadd.f32 %v9614_v44, %v9602_v31  ;;  %v9625_v1 = vadd.f32 %v9614_v44, %v9603_v20 }
 0x694   :  { %v9687_v59 = vmax.f32 %v9678_v15, %v9679_v42  ;;  %v9626_v49 = vadd.f32 %v9614_v44, %v9604_v40  ;;  %v9627_v43 = vadd.f32 %v9614_v44, %v9605_v11  ;;  %v9628_v9 = vadd.f32 %v9614_v44, %v9606_v38 }
 0x695   :  { %v9629_v16 = vadd.f32 %v9614_v44, %v9607_v2  ;;  %vm9632_vm3 = vcmp.gt.f32.partialorder %v9616_v27, 0.0  ;;  %vm9633_vm7 = vcmp.gt.f32.partialorder %v9617_v47, 0.0  ;;  %vm9634_vm15 = vcmp.gt.f32.partialorder %v9618_v61, 0.0 }
 0x696   :  { %9695 = vst.msk [vmem:[#allocation5 + $0x38] sm:$0xff] %vm9486_vm1, %v9687_v59  ;;  %vm9635_vm5 = vcmp.gt.f32.partialorder %v9619_v48, 0.0  ;;  %vm9636_vm4 = vcmp.gt.f32.partialorder %v9620_v23, 0.0  ;;  %vm9637_vm8 = vcmp.gt.f32.partialorder %v9621_v58, 0.0  ;;  %vm9638_vm13 = vcmp.gt.f32.partialorder %v9622_v57, 0.0 }
 0x697   :  { %vm9639_vm2 = vcmp.gt.f32.partialorder %v9623_v62, 0.0  ;;  %vm9640_vm11 = vcmp.gt.f32.partialorder %v9624_v32, 0.0  ;;  %vm9641_vm6 = vcmp.gt.f32.partialorder %v9625_v1, 0.0  ;;  %vm9642_vm0 = vcmp.gt.f32.partialorder %v9626_v49, 0.0 }
 0x698   :  { %vm9643_vm9 = vcmp.gt.f32.partialorder %v9627_v43, 0.0  ;;  %vm9644_vm10 = vcmp.gt.f32.partialorder %v9628_v9, 0.0  ;;  %vm9645_vm14 = vcmp.gt.f32.partialorder %v9629_v16, 0.0  ;;  %v9648_v4 = vmul.f32 0.2, %v9616_v27 }
 0x699   :  { %vm9735_vm12 = vcmask 257024   ;;  %v9649_v50 = vmul.f32 0.2, %v9617_v47  ;;  %v9650_v53 = vmul.f32 0.2, %v9618_v61 }
 0x69a   :  { %v9651_v37 = vmul.f32 0.2, %v9619_v48  ;;  %v9652_v56 = vmul.f32 0.2, %v9620_v23  ;;  %v9653_v14 = vmul.f32 0.2, %v9621_v58  ;;  %v9664_v17 = vsel %vm9632_vm3, %v9616_v27, %v9648_v4 }
 0x69b   :  { %v9654_v60 = vmul.f32 0.2, %v9622_v57  ;;  %v9655_v30 = vmul.f32 0.2, %v9623_v62  ;;  %v9656_v54 = vmul.f32 0.2, %v9624_v32  ;;  %v9665_v39 = vsel %vm9633_vm7, %v9617_v47, %v9649_v50 }
 0x69c   :  { %v9657_v12 = vmul.f32 0.2, %v9625_v1  ;;  %v9658_v63 = vmul.f32 0.2, %v9626_v49  ;;  %v9659_v0 = vmul.f32 0.2, %v9627_v43  ;;  %v9666_v5 = vsel %vm9634_vm15, %v9618_v61, %v9650_v53 }
 0x69d   :  { %v9660_v7 = vmul.f32 0.2, %v9628_v9  ;;  %v9661_v33 = vmul.f32 0.2, %v9629_v16  ;;  %v9667_v45 = vsel %vm9635_vm5, %v9619_v48, %v9651_v37  ;;  %v9668_v55 = vsel %vm9636_vm4, %v9620_v23, %v9652_v56 }
 0x69e   :  { %v9669_v41 = vsel %vm9637_vm8, %v9621_v58, %v9653_v14  ;;  %v9670_v29 = vsel %vm9638_vm13, %v9622_v57, %v9654_v60  ;;  %v9671_v22 = vsel %vm9639_vm2, %v9623_v62, %v9655_v30  ;;  %v9672_v35 = vsel %vm9640_vm11, %v9624_v32, %v9656_v54  ;;  %v9710_v25 = vld [vmem:[#allocation5 + $0x38] ss:$2 sm:$0xf]  ;;  %v9726_v34 = vld [vmem:[#allocation5 + $0x39] ss:$2 sm:$0xf] }
 0x69f   :  { %v9673_v24 = vsel %vm9641_vm6, %v9625_v1, %v9657_v12  ;;  %v9674_v28 = vsel %vm9642_vm0, %v9626_v49, %v9658_v63  ;;  %v9675_v6 = vsel %vm9643_vm9, %v9627_v43, %v9659_v0  ;;  %v9676_v19 = vsel %vm9644_vm10, %v9628_v9, %v9660_v7 }
 0x6a0   :  { %v9677_v3 = vsel %vm9645_vm14, %v9629_v16, %v9661_v33  ;;  %v9680_v52 = vmax.f32 %v9664_v17, %v9665_v39  ;;  %v9681_v8 = vmax.f32 %v9666_v5, %v9667_v45  ;;  %v9682_v46 = vmax.f32 %v9668_v55, %v9669_v41 }
 0x6a1   :  { %v9683_v44 = vmax.f32 %v9670_v29, %v9671_v22  ;;  %v9684_v18 = vmax.f32 %v9672_v35, %v9673_v24  ;;  %v9685_v21 = vmax.f32 %v9674_v28, %v9675_v6  ;;  %v9686_v10 = vmax.f32 %v9676_v19, %v9677_v3 }
 0x6a2   :  { %v9734_v31 = vmax.f32 %v9710_v25, %v9726_v34  ;;  %9688 = vst.msk [vmem:[#allocation5] sm:$0xff] %vm9486_vm1, %v9680_v52  ;;  %9689 = vst.msk [vmem:[#allocation5 + $0x8] sm:$0xff] %vm9486_vm1, %v9681_v8 }
 0x6a3   :  { %9690 = vst.msk [vmem:[#allocation5 + $0x10] sm:$0xff] %vm9486_vm1, %v9682_v46  ;;  %9691 = vst.msk [vmem:[#allocation5 + $0x18] sm:$0xff] %vm9486_vm1, %v9683_v44 }
 0x6a4   :  { %9692 = vst.msk [vmem:[#allocation5 + $0x20] sm:$0xff] %vm9486_vm1, %v9684_v18  ;;  %9693 = vst.msk [vmem:[#allocation5 + $0x28] sm:$0xff] %vm9486_vm1, %v9685_v21 }
 0x6a5   :  { %9694 = vst.msk [vmem:[#allocation5 + $0x30] sm:$0xff] %vm9486_vm1, %v9686_v10 }
 0x6a6   :  { %9743 = vst.msk [vmem:[#allocation6 + $0x1c] sm:$0xf] %vm9735_vm12, %v9734_v31 }
 0x6a9   :  { %v9696_v20 = vld [vmem:[#allocation5] ss:$2 sm:$0xf]  ;;  %v9698_v40 = vld [vmem:[#allocation5 + $0x8] ss:$2 sm:$0xf] }
 0x6aa   :  { %v9700_v11 = vld [vmem:[#allocation5 + $0x10] ss:$2 sm:$0xf]  ;;  %v9702_v51 = vld [vmem:[#allocation5 + $0x18] ss:$2 sm:$0xf] }
 0x6ab   :  { %v9704_v26 = vld [vmem:[#allocation5 + $0x20] ss:$2 sm:$0xf]  ;;  %v9706_v38 = vld [vmem:[#allocation5 + $0x28] ss:$2 sm:$0xf] }
 0x6ac   :  { %v9708_v2 = vld [vmem:[#allocation5 + $0x30] ss:$2 sm:$0xf]  ;;  %v9712_v27 = vld [vmem:[#allocation5 + $0x1] ss:$2 sm:$0xf] }
 0x6ad   :  { %v9714_v47 = vld [vmem:[#allocation5 + $0x9] ss:$2 sm:$0xf]  ;;  %v9716_v61 = vld [vmem:[#allocation5 + $0x11] ss:$2 sm:$0xf]  ;;  %v9727_v48 = vmax.f32 %v9696_v20, %v9712_v27 }
 0x6ae   :  { %v9718_v36 = vld [vmem:[#allocation5 + $0x19] ss:$2 sm:$0xf]  ;;  %v9720_v13 = vld [vmem:[#allocation5 + $0x21] ss:$2 sm:$0xf]  ;;  %v9728_v23 = vmax.f32 %v9698_v40, %v9714_v47  ;;  %v9729_v58 = vmax.f32 %v9700_v11, %v9716_v61 }
 0x6af   :  { %v9722_v57 = vld [vmem:[#allocation5 + $0x29] ss:$2 sm:$0xf]  ;;  %v9724_v62 = vld [vmem:[#allocation5 + $0x31] ss:$2 sm:$0xf]  ;;  %v9730_v15 = vmax.f32 %v9702_v51, %v9718_v36  ;;  %v9731_v42 = vmax.f32 %v9704_v26, %v9720_v13 }
 0x6b0   :  { %9736 = vst.msk [vmem:[#allocation6] sm:$0xf] %vm9735_vm12, %v9727_v48  ;;  %v9732_v32 = vmax.f32 %v9706_v38, %v9722_v57  ;;  %v9733_v1 = vmax.f32 %v9708_v2, %v9724_v62  ;;  %9737 = vst.msk [vmem:[#allocation6 + $0x4] sm:$0xf] %vm9735_vm12, %v9728_v23 }
 0x6b1   :  { %9738 = vst.msk [vmem:[#allocation6 + $0x8] sm:$0xf] %vm9735_vm12, %v9729_v58  ;;  %9739 = vst.msk [vmem:[#allocation6 + $0xc] sm:$0xf] %vm9735_vm12, %v9730_v15 }
 0x6b2   :  { %9740 = vst.msk [vmem:[#allocation6 + $0x10] sm:$0xf] %vm9735_vm12, %v9731_v42  ;;  %9741 = vst.msk [vmem:[#allocation6 + $0x14] sm:$0xf] %vm9735_vm12, %v9732_v32 }
 0x6b3   :  { %9742 = vst.msk [vmem:[#allocation6 + $0x18] sm:$0xf] %vm9735_vm12, %v9733_v1 }
 0x6b4   :  { %13082 = shalt.err (!%p13079_p4)
}
 0x6b5   :  { %s13083_s25 = scalar_lea.hbm %s17198_s7, 512 }
 0x6b6   :  { %p13084_p5 = scmp.ne.s32.totalorder %s17198_s7, %s13083_s25  ;;  %p13087_p6 = scmp.lt.u32.totalorder %s13083_s25, %s17198_s7 }
 0x6b8   :  { %p13089_p7 = pnand %p13087_p6, %p13084_p5 }
 0x6ba   :  { %13092 = shalt.err (!%p13089_p7)
}
 0x6bb   :  { %s13096_s30 = smov 64   ;;  %s13097_s8 = smov 4  }
 0x6bc   :  { %9755 = dma.vmem_to_hbm [thread:$0]  %s9750_s6, 512, %s17198_s7, [#allocation7], %s13096_s30, %s13096_s30, %s13097_s8  }
 0x6bd   :  { %13093 = dma.done.wait [#allocation7], 512  }
 0x6be   :  { %13094 = vsyncadd [#allocation7], 4294966784 }
 0x6bf   :  { %9759 = vsyncpa [#allocation7], 1 }

</bundles_post_ra>
